<compile_context>
chip_gen: v6e
topology: v6e:2x2x1
jax: 0.10.0
libtpu: 0.0.40
codegen_flags: <defaults>
</compile_context>

<pallas_src>
import functools
import math

import jax
import jax.numpy as jnp
from jax import lax
from jax.experimental import pallas as pl
from jax.experimental.pallas import tpu as pltpu


# ----------------------------------------------------------------------------
# Small helpers (run inside kernels, f32)
# ----------------------------------------------------------------------------

def _ln(x, g, b, eps):
    mu = jnp.mean(x, axis=-1, keepdims=True)
    var = jnp.mean((x - mu) ** 2, axis=-1, keepdims=True)
    return (x - mu) * lax.rsqrt(var + eps) * g + b


# ----------------------------------------------------------------------------
# Patch-embedding kernel (one small matmul)
# ----------------------------------------------------------------------------

def _patch_embed_kernel(x_ref, w_ref, b_ref, o_ref):
    acc = jnp.dot(x_ref[...].astype(jnp.bfloat16), w_ref[...],
                  preferred_element_type=jnp.float32)
    o_ref[...] = acc + b_ref[...]


def patch_embed(xp, w_bf16, b):
    M, K = xp.shape
    _, N = w_bf16.shape
    return pl.pallas_call(
        _patch_embed_kernel,
        out_shape=jax.ShapeDtypeStruct((M, N), jnp.float32),
        grid=(1,),
        in_specs=[
            pl.BlockSpec((M, K), lambda i: (0, 0)),
            pl.BlockSpec((K, N), lambda i: (0, 0)),
            pl.BlockSpec((1, N), lambda i: (0, 0)),
        ],
        out_specs=pl.BlockSpec((M, N), lambda i: (0, 0)),
    )(xp, w_bf16, b.reshape(1, N))


# ----------------------------------------------------------------------------
# Fused transformer-stack kernel: grid=(depth,), residual stream in VMEM
# ----------------------------------------------------------------------------

def _fused_blocks_kernel(x_ref, nrm_g_ref, nrm_b_ref,
                         ln1g_ref, ln1b_ref, qkvw_ref, qkvb_ref,
                         projw_ref, projb_ref,
                         ln2g_ref, ln2b_ref, fc1w_ref, fc1b_ref,
                         fc2w_ref, fc2b_ref,
                         out_ref, x_res,
                         *, B, S_pad, S, heads, eps):
    d = pl.program_id(0)
    D = x_ref.shape[-1]
    hd = D // heads
    scale = 1.0 / math.sqrt(hd)

    # Load the token embeddings into the resident VMEM residual stream once.
    @pl.when(d == 0)
    def _():
        x_res[...] = x_ref[...]

    x = x_res[...]                                          # (M, D) f32

    # ---- attention sub-block: LN1 -> QKV -> per-head SDPA -> proj (+res) ----
    xn = _ln(x, ln1g_ref[0], ln1b_ref[0], eps)
    qkv = jnp.dot(xn.astype(jnp.bfloat16), qkvw_ref[0],
                  preferred_element_type=jnp.float32) + qkvb_ref[0]   # (M, 3D)

    # mask padded key tokens (token index >= S is zero padding)
    key_ok = lax.broadcasted_iota(jnp.int32, (S_pad, S_pad), 1) < S

    attn_rows = []
    for b in range(B):                                      # static, tiny B
        qkv_b = qkv[b * S_pad:(b + 1) * S_pad, :]           # (S_pad, 3D)
        head_outs = []
        for h in range(heads):                              # static head split
            q_h = qkv_b[:, h * hd:(h + 1) * hd]
            k_h = qkv_b[:, D + h * hd:D + (h + 1) * hd]
            v_h = qkv_b[:, 2 * D + h * hd:2 * D + (h + 1) * hd]
            s = lax.dot_general(q_h.astype(jnp.bfloat16), k_h.astype(jnp.bfloat16),
                                (((1,), (1,)), ((), ())),
                                preferred_element_type=jnp.float32) * scale
            s = jnp.where(key_ok, s, -1e30)
            s = s - jnp.max(s, axis=-1, keepdims=True)
            p = jnp.exp(s)
            p = p * pl.reciprocal(jnp.sum(p, axis=-1, keepdims=True), approx=True)
            head_outs.append(
                jnp.dot(p.astype(jnp.bfloat16), v_h.astype(jnp.bfloat16),
                        preferred_element_type=jnp.float32))
        attn_rows.append(jnp.concatenate(head_outs, axis=-1))   # (S_pad, D)
    ao = jnp.concatenate(attn_rows, axis=0)                     # (M, D) lane-dense

    proj = jnp.dot(ao.astype(jnp.bfloat16), projw_ref[0],
                   preferred_element_type=jnp.float32) + projb_ref[0]
    x = x + proj                                            # fused residual add

    # ---- MLP sub-block: LN2 -> FC1 -> GELU -> FC2 (+res) ----
    xn2 = _ln(x, ln2g_ref[0], ln2b_ref[0], eps)
    h1 = jnp.dot(xn2.astype(jnp.bfloat16), fc1w_ref[0],
                 preferred_element_type=jnp.float32) + fc1b_ref[0]
    h1 = 0.5 * h1 * (1.0 + lax.erf(h1 * (1.0 / math.sqrt(2.0))))   # exact GELU
    h2 = jnp.dot(h1.astype(jnp.bfloat16), fc2w_ref[0],
                 preferred_element_type=jnp.float32) + fc2b_ref[0]
    x = x + h2                                              # fused residual add

    x_res[...] = x

    # ---- final LayerNorm fused into the last depth step ----
    @pl.when(d == pl.num_programs(0) - 1)
    def _():
        out_ref[...] = _ln(x, nrm_g_ref[...], nrm_b_ref[...], eps)


def fused_blocks(x_emb, blk, norm_g, norm_b, *, B, S_pad, S, heads, depth,
                 eps=1e-6):
    # NOTE: timm ViT uses LayerNorm eps=1e-6 (partial), not the nn.LayerNorm
    # default of 1e-5.
    M, D = x_emb.shape
    Hm = blk["fc1_w"].shape[-1]
    d3 = 3 * D

    def stacked(shape):  # depth-stacked param: stream block d per grid step
        ndim = len(shape)
        return pl.BlockSpec(shape, lambda d, _n=ndim: (d,) + (0,) * (_n - 1))

    const2 = lambda shape: pl.BlockSpec(shape, lambda d: (0, 0))

    kernel = functools.partial(_fused_blocks_kernel, B=B, S_pad=S_pad, S=S,
                               heads=heads, eps=eps)
    return pl.pallas_call(
        kernel,
        out_shape=jax.ShapeDtypeStruct((M, D), jnp.float32),
        grid=(depth,),
        in_specs=[
            const2((M, D)),            # token embeddings (resident)
            const2((1, D)),            # final norm gamma
            const2((1, D)),            # final norm beta
            stacked((1, 1, D)),        # ln1_g
            stacked((1, 1, D)),        # ln1_b
            stacked((1, D, d3)),       # qkv_w  (bf16)
            stacked((1, 1, d3)),       # qkv_b
            stacked((1, D, D)),        # proj_w (bf16)
            stacked((1, 1, D)),        # proj_b
            stacked((1, 1, D)),        # ln2_g
            stacked((1, 1, D)),        # ln2_b
            stacked((1, D, Hm)),       # fc1_w  (bf16)
            stacked((1, 1, Hm)),       # fc1_b
            stacked((1, Hm, D)),       # fc2_w  (bf16)
            stacked((1, 1, D)),        # fc2_b
        ],
        out_specs=pl.BlockSpec((M, D), lambda d: (0, 0)),
        scratch_shapes=[pltpu.VMEM((M, D), jnp.float32)],   # residual stream
        compiler_params=pltpu.CompilerParams(
            dimension_semantics=("arbitrary",),             # sequential carry
            vmem_limit_bytes=32 * 1024 * 1024),
    )(x_emb, norm_g.reshape(1, D), norm_b.reshape(1, D),
      blk["ln1_g"], blk["ln1_b"], blk["qkv_w"], blk["qkv_b"],
      blk["proj_w"], blk["proj_b"],
      blk["ln2_g"], blk["ln2_b"], blk["fc1_w"], blk["fc1_b"],
      blk["fc2_w"], blk["fc2_b"])


# ----------------------------------------------------------------------------
# Parameter initialization (deterministic, synthetic — no checkpoint loading)
# ----------------------------------------------------------------------------

def init_params(key, *, C, patch, D, depth, mlp_hidden, seq):
    keys = jax.random.split(key, 3 + 4 * depth)

    def rnd(k, shape):
        return jax.random.normal(k, shape, jnp.float32) * 0.02

    params = {
        "patch_w": rnd(keys[0], (C * patch * patch, D)).astype(jnp.bfloat16),
        "patch_b": jnp.zeros((D,), jnp.float32),
        "cls": rnd(keys[1], (1, 1, D)),
        "pos": rnd(keys[2], (1, seq, D)),
        "norm_g": jnp.ones((D,), jnp.float32),
        "norm_b": jnp.zeros((D,), jnp.float32),
    }

    ki = 3
    qkv_w, proj_w, fc1_w, fc2_w = [], [], [], []
    for _ in range(depth):
        qkv_w.append(rnd(keys[ki], (D, 3 * D))); ki += 1
        proj_w.append(rnd(keys[ki], (D, D))); ki += 1
        fc1_w.append(rnd(keys[ki], (D, mlp_hidden))); ki += 1
        fc2_w.append(rnd(keys[ki], (mlp_hidden, D))); ki += 1

    params["blocks"] = {
        "ln1_g": jnp.ones((depth, 1, D), jnp.float32),
        "ln1_b": jnp.zeros((depth, 1, D), jnp.float32),
        "qkv_w": jnp.stack(qkv_w).astype(jnp.bfloat16),
        "qkv_b": jnp.zeros((depth, 1, 3 * D), jnp.float32),
        "proj_w": jnp.stack(proj_w).astype(jnp.bfloat16),
        "proj_b": jnp.zeros((depth, 1, D), jnp.float32),
        "ln2_g": jnp.ones((depth, 1, D), jnp.float32),
        "ln2_b": jnp.zeros((depth, 1, D), jnp.float32),
        "fc1_w": jnp.stack(fc1_w).astype(jnp.bfloat16),
        "fc1_b": jnp.zeros((depth, 1, mlp_hidden), jnp.float32),
        "fc2_w": jnp.stack(fc2_w).astype(jnp.bfloat16),
        "fc2_b": jnp.zeros((depth, 1, D), jnp.float32),
    }
    return params


# ----------------------------------------------------------------------------
# Forward pass (thin JAX glue; all math inside 2 pallas_calls)
# ----------------------------------------------------------------------------

def vit_forward(x, params, *, patch, D, heads, depth):
    B, C, H, W = x.shape
    ph, pw = H // patch, W // patch
    num_patches = ph * pw
    S = num_patches + 1
    S_pad = max(8, ((S + 7) // 8) * 8)       # sublane-aligned tokens per image

    # Patch embedding: Conv2d(C, D, k=patch, s=patch) == matmul over flattened
    # (C, patch, patch) patch vectors (channel-major, matching PyTorch's
    # weight.reshape(D, C*p*p)).
    xp = x.reshape(B, C, ph, patch, pw, patch)
    xp = xp.transpose(0, 2, 4, 1, 3, 5).reshape(B * num_patches, C * patch * patch)
    tok = patch_embed(xp, params["patch_w"], params["patch_b"])
    tok = tok.reshape(B, num_patches, D)

    cls = jnp.broadcast_to(params["cls"], (B, 1, D))
    xseq = jnp.concatenate([cls, tok], axis=1) + params["pos"]          # (B, S, D)
    # TODO(synk): dropout (pos_drop / attn_drop / proj_drop) omitted — eval-mode no-op.
    xseq = jnp.pad(xseq, ((0, 0), (0, S_pad - S), (0, 0)))              # pad tokens
    x_emb = xseq.reshape(B * S_pad, D)

    out = fused_blocks(x_emb, params["blocks"], params["norm_g"], params["norm_b"],
                       B=B, S_pad=S_pad, S=S, heads=heads, depth=depth)
    return out.reshape(B, S_pad, D)[:, 0]    # cls-token features; head = Identity


# ----------------------------------------------------------------------------
# Main
# ----------------------------------------------------------------------------

if __name__ == "__main__":
    # Same ViT-small architecture (D=384, 12 heads, 12 blocks, patch 16),
    # shrunk image 32x32 -> 4 patches + cls = 5 tokens (padded to 8).
    B, C, H, W = 2, 3, 32, 32
    PATCH, DIM, DEPTH, HEADS = 16, 384, 12, 12
    MLP_HIDDEN = 4 * DIM
    SEQ = (H // PATCH) * (W // PATCH) + 1

    key = jax.random.PRNGKey(0)
    kx, kp = jax.random.split(key)
    x = jax.random.normal(kx, (B, C, H, W), jnp.float32)
    params = init_params(kp, C=C, patch=PATCH, D=DIM, depth=DEPTH,
                         mlp_hidden=MLP_HIDDEN, seq=SEQ)

    fwd = jax.jit(functools.partial(vit_forward, patch=PATCH, D=DIM,
                                    heads=HEADS, depth=DEPTH))
    out = fwd(x, params)
    out = jax.block_until_ready(out)

    assert out.shape == (B, DIM), out.shape
    assert out.dtype == jnp.float32
    print("KERNEL_OK")
</pallas_src>

<mosaic_0001>
module attributes {stable_mosaic.version = 11 : i64} {
  func.func @_patch_embed_kernel(%arg0: i32, %arg1: memref<8x768xf32, #tpu.memory_space<vmem>>, %arg2: memref<768x384xbf16, #tpu.memory_space<vmem>>, %arg3: memref<1x384xf32, #tpu.memory_space<vmem>>, %arg4: memref<8x384xf32, #tpu.memory_space<vmem>>) attributes {dimension_semantics = [#tpu.dimension_semantics<arbitrary>], iteration_bounds = array<i64: 1>, scalar_prefetch = 0 : i64, scratch_operands = 0 : i64, tpu.core_type = #tpu.core_type<tc>, window_params = [{pipeline_mode = #tpu.pipeline_mode<synchronous>, transform_indices = @transform_0, window_bounds = array<i64: 8, 768>}, {pipeline_mode = #tpu.pipeline_mode<synchronous>, transform_indices = @transform_1, window_bounds = array<i64: 768, 384>}, {pipeline_mode = #tpu.pipeline_mode<synchronous>, transform_indices = @transform_2, window_bounds = array<i64: 1, 384>}, {pipeline_mode = #tpu.pipeline_mode<synchronous>, transform_indices = @transform_3, window_bounds = array<i64: 8, 384>}]} {
    %c0 = arith.constant 0 : index
    %c0_0 = arith.constant 0 : index
    %0 = vector.load %arg1[%c0, %c0_0] : memref<8x768xf32, #tpu.memory_space<vmem>>, vector<8x768xf32>
    %1 = arith.truncf %0 : vector<8x768xf32> to vector<8x768xbf16>
    %c0_1 = arith.constant 0 : index
    %c0_2 = arith.constant 0 : index
    %2 = vector.load %arg2[%c0_1, %c0_2] : memref<768x384xbf16, #tpu.memory_space<vmem>>, vector<768x384xbf16>
    %cst = arith.constant dense<0.000000e+00> : vector<8x384xf32>
    %3 = tpu.matmul %1, %2, %cst {dimension_numbers = #tpu.dot_dimension_numbers<[1], [0], [0], [1], [0, 0, 1, 1], [], []>} : vector<8x768xbf16>, vector<768x384xbf16>, vector<8x384xf32> -> vector<8x384xf32>
    %c0_3 = arith.constant 0 : index
    %c0_4 = arith.constant 0 : index
    %4 = vector.load %arg3[%c0_3, %c0_4] : memref<1x384xf32, #tpu.memory_space<vmem>>, vector<1x384xf32>
    %5 = vector.broadcast %4 : vector<1x384xf32> to vector<8x384xf32>
    %6 = arith.addf %3, %5 : vector<8x384xf32>
    %c0_5 = arith.constant 0 : index
    %c0_6 = arith.constant 0 : index
    %7 = vector.load %arg4[%c0_5, %c0_6] : memref<8x384xf32, #tpu.memory_space<vmem>>, vector<8x384xf32>
    tpu.vector_store %arg4[%c0_5, %c0_6], %6 {strides = array<i32>} : memref<8x384xf32, #tpu.memory_space<vmem>>, vector<8x384xf32>,
    return
  }
  func.func @transform_0(%arg0: i32) -> (i32, i32) {
    %c0_i32 = arith.constant 0 : i32
    %c0_i32_0 = arith.constant 0 : i32
    %c0_i32_1 = arith.constant 0 : i32
    return %c0_i32, %c0_i32_0 : i32, i32
  }
  func.func @transform_1(%arg0: i32) -> (i32, i32) {
    %c0_i32 = arith.constant 0 : i32
    %c0_i32_0 = arith.constant 0 : i32
    %c0_i32_1 = arith.constant 0 : i32
    return %c0_i32, %c0_i32_0 : i32, i32
  }
  func.func @transform_2(%arg0: i32) -> (i32, i32) {
    %c0_i32 = arith.constant 0 : i32
    %c0_i32_0 = arith.constant 0 : i32
    %c0_i32_1 = arith.constant 0 : i32
    return %c0_i32, %c0_i32_0 : i32, i32
  }
  func.func @transform_3(%arg0: i32) -> (i32, i32) {
    %c0_i32 = arith.constant 0 : i32
    %c0_i32_0 = arith.constant 0 : i32
    %c0_i32_1 = arith.constant 0 : i32
    return %c0_i32, %c0_i32_0 : i32, i32
  }
}

module attributes {stable_mosaic.version = 11 : i64} {
  func.func @_fused_blocks_kernel(%arg0: i32, %arg1: memref<16x384xf32, #tpu.memory_space<vmem>>, %arg2: memref<1x384xf32, #tpu.memory_space<vmem>>, %arg3: memref<1x384xf32, #tpu.memory_space<vmem>>, %arg4: memref<1x1x384xf32, #tpu.memory_space<vmem>>, %arg5: memref<1x1x384xf32, #tpu.memory_space<vmem>>, %arg6: memref<1x384x1152xbf16, #tpu.memory_space<vmem>>, %arg7: memref<1x1x1152xf32, #tpu.memory_space<vmem>>, %arg8: memref<1x384x384xbf16, #tpu.memory_space<vmem>>, %arg9: memref<1x1x384xf32, #tpu.memory_space<vmem>>, %arg10: memref<1x1x384xf32, #tpu.memory_space<vmem>>, %arg11: memref<1x1x384xf32, #tpu.memory_space<vmem>>, %arg12: memref<1x384x1536xbf16, #tpu.memory_space<vmem>>, %arg13: memref<1x1x1536xf32, #tpu.memory_space<vmem>>, %arg14: memref<1x1536x384xbf16, #tpu.memory_space<vmem>>, %arg15: memref<1x1x384xf32, #tpu.memory_space<vmem>>, %arg16: memref<16x384xf32, #tpu.memory_space<vmem>>, %arg17: memref<16x384xf32, #tpu.memory_space<vmem>>) attributes {dimension_semantics = [#tpu.dimension_semantics<arbitrary>], iteration_bounds = array<i64: 12>, scalar_prefetch = 0 : i64, scratch_operands = 1 : i64, tpu.core_type = #tpu.core_type<tc>, window_params = [{pipeline_mode = #tpu.pipeline_mode<synchronous>, transform_indices = @transform_0, window_bounds = array<i64: 16, 384>}, {pipeline_mode = #tpu.pipeline_mode<synchronous>, transform_indices = @transform_1, window_bounds = array<i64: 1, 384>}, {pipeline_mode = #tpu.pipeline_mode<synchronous>, transform_indices = @transform_2, window_bounds = array<i64: 1, 384>}, {transform_indices = @transform_3, window_bounds = array<i64: 1, 1, 384>}, {transform_indices = @transform_4, window_bounds = array<i64: 1, 1, 384>}, {transform_indices = @transform_5, window_bounds = array<i64: 1, 384, 1152>}, {transform_indices = @transform_6, window_bounds = array<i64: 1, 1, 1152>}, {transform_indices = @transform_7, window_bounds = array<i64: 1, 384, 384>}, {transform_indices = @transform_8, window_bounds = array<i64: 1, 1, 384>}, {transform_indices = @transform_9, window_bounds = array<i64: 1, 1, 384>}, {transform_indices = @transform_10, window_bounds = array<i64: 1, 1, 384>}, {transform_indices = @transform_11, window_bounds = array<i64: 1, 384, 1536>}, {transform_indices = @transform_12, window_bounds = array<i64: 1, 1, 1536>}, {transform_indices = @transform_13, window_bounds = array<i64: 1, 1536, 384>}, {transform_indices = @transform_14, window_bounds = array<i64: 1, 1, 384>}, {pipeline_mode = #tpu.pipeline_mode<synchronous>, transform_indices = @transform_15, window_bounds = array<i64: 16, 384>}]} {
    %c0_i32 = arith.constant 0 : i32
    %0 = arith.cmpi eq, %arg0, %c0_i32 : i32
    %1 = arith.extui %0 : i1 to i32
    %c0_i32_0 = arith.constant 0 : i32
    %2 = arith.cmpi ne, %1, %c0_i32_0 : i32
    scf.if %2 {
      %c0_201 = arith.constant 0 : index
      %c0_202 = arith.constant 0 : index
      %662 = vector.load %arg1[%c0_201, %c0_202] : memref<16x384xf32, #tpu.memory_space<vmem>>, vector<16x384xf32>
      %c0_203 = arith.constant 0 : index
      %c0_204 = arith.constant 0 : index
      %663 = vector.load %arg17[%c0_203, %c0_204] : memref<16x384xf32, #tpu.memory_space<vmem>>, vector<16x384xf32>
      tpu.vector_store %arg17[%c0_203, %c0_204], %662 {strides = array<i32>} : memref<16x384xf32, #tpu.memory_space<vmem>>, vector<16x384xf32>,
    } else {
    }
    %c0 = arith.constant 0 : index
    %c0_1 = arith.constant 0 : index
    %3 = vector.load %arg17[%c0, %c0_1] : memref<16x384xf32, #tpu.memory_space<vmem>>, vector<16x384xf32>
    %c0_2 = arith.constant 0 : index
    %c0_3 = arith.constant 0 : index
    %c0_4 = arith.constant 0 : index
    %4 = vector.load %arg4[%c0_2, %c0_3, %c0_4] : memref<1x1x384xf32, #tpu.memory_space<vmem>>, vector<1x1x384xf32>
    %5 = vector.shape_cast %4 : vector<1x1x384xf32> to vector<1x384xf32>
    %c0_5 = arith.constant 0 : index
    %c0_6 = arith.constant 0 : index
    %c0_7 = arith.constant 0 : index
    %6 = vector.load %arg5[%c0_5, %c0_6, %c0_7] : memref<1x1x384xf32, #tpu.memory_space<vmem>>, vector<1x1x384xf32>
    %7 = vector.shape_cast %6 : vector<1x1x384xf32> to vector<1x384xf32>
    %cst = arith.constant dense<0.000000e+00> : vector<16xf32>
    %8 = vector.multi_reduction <add>, %3, %cst [1] : vector<16x384xf32> to vector<16xf32>
    %9 = vector.shape_cast %8 : vector<16xf32> to vector<16x1xf32>
    %cst_8 = arith.constant 3.840000e+02 : f32
    %10 = vector.broadcast %cst_8 : f32 to vector<16x1xf32>
    %11 = arith.divf %9, %10 : vector<16x1xf32>
    %12 = vector.broadcast %11 : vector<16x1xf32> to vector<16x384xf32>
    %13 = arith.subf %3, %12 : vector<16x384xf32>
    %14 = arith.mulf %13, %13 : vector<16x384xf32>
    %cst_9 = arith.constant dense<0.000000e+00> : vector<16xf32>
    %15 = vector.multi_reduction <add>, %14, %cst_9 [1] : vector<16x384xf32> to vector<16xf32>
    %16 = vector.shape_cast %15 : vector<16xf32> to vector<16x1xf32>
    %cst_10 = arith.constant 3.840000e+02 : f32
    %17 = vector.broadcast %cst_10 : f32 to vector<16x1xf32>
    %18 = arith.divf %16, %17 : vector<16x1xf32>
    %19 = vector.broadcast %11 : vector<16x1xf32> to vector<16x384xf32>
    %20 = arith.subf %3, %19 : vector<16x384xf32>
    %cst_11 = arith.constant 9.99999997E-7 : f32
    %21 = vector.broadcast %cst_11 : f32 to vector<16x1xf32>
    %22 = arith.addf %18, %21 : vector<16x1xf32>
    %23 = math.rsqrt %22 : vector<16x1xf32>
    %24 = vector.broadcast %23 : vector<16x1xf32> to vector<16x384xf32>
    %25 = arith.mulf %20, %24 : vector<16x384xf32>
    %26 = vector.broadcast %5 : vector<1x384xf32> to vector<16x384xf32>
    %27 = arith.mulf %25, %26 : vector<16x384xf32>
    %28 = vector.broadcast %7 : vector<1x384xf32> to vector<16x384xf32>
    %29 = arith.addf %27, %28 : vector<16x384xf32>
    %30 = arith.truncf %29 : vector<16x384xf32> to vector<16x384xbf16>
    %c0_12 = arith.constant 0 : index
    %c0_13 = arith.constant 0 : index
    %c0_14 = arith.constant 0 : index
    %31 = vector.load %arg6[%c0_12, %c0_13, %c0_14] : memref<1x384x1152xbf16, #tpu.memory_space<vmem>>, vector<1x384x1152xbf16>
    %32 = vector.shape_cast %31 : vector<1x384x1152xbf16> to vector<384x1152xbf16>
    %cst_15 = arith.constant dense<0.000000e+00> : vector<16x1152xf32>
    %33 = tpu.matmul %30, %32, %cst_15 {dimension_numbers = #tpu.dot_dimension_numbers<[1], [0], [0], [1], [0, 0, 1, 1], [], []>} : vector<16x384xbf16>, vector<384x1152xbf16>, vector<16x1152xf32> -> vector<16x1152xf32>
    %c0_16 = arith.constant 0 : index
    %c0_17 = arith.constant 0 : index
    %c0_18 = arith.constant 0 : index
    %34 = vector.load %arg7[%c0_16, %c0_17, %c0_18] : memref<1x1x1152xf32, #tpu.memory_space<vmem>>, vector<1x1x1152xf32>
    %35 = vector.shape_cast %34 : vector<1x1x1152xf32> to vector<1x1152xf32>
    %36 = vector.broadcast %35 : vector<1x1152xf32> to vector<16x1152xf32>
    %37 = arith.addf %33, %36 : vector<16x1152xf32>
    %38 = tpu.iota {dimensions = array<i32: 1>} : vector<8x8xi32>
    %c5_i32 = arith.constant 5 : i32
    %39 = vector.broadcast %c5_i32 : i32 to vector<8x8xi32>
    %40 = arith.cmpi slt, %38, %39 : vector<8x8xi32>
    %41 = vector.extract_strided_slice %37 {offsets = [0, 0], sizes = [8, 1152], strides = [1, 1]} : vector<16x1152xf32> to vector<8x1152xf32>
    %42 = vector.extract_strided_slice %41 {offsets = [0, 0], sizes = [8, 32], strides = [1, 1]} : vector<8x1152xf32> to vector<8x32xf32>
    %43 = vector.extract_strided_slice %41 {offsets = [0, 384], sizes = [8, 32], strides = [1, 1]} : vector<8x1152xf32> to vector<8x32xf32>
    %44 = vector.extract_strided_slice %41 {offsets = [0, 768], sizes = [8, 32], strides = [1, 1]} : vector<8x1152xf32> to vector<8x32xf32>
    %45 = arith.truncf %42 : vector<8x32xf32> to vector<8x32xbf16>
    %46 = arith.truncf %43 : vector<8x32xf32> to vector<8x32xbf16>
    %cst_19 = arith.constant dense<0.000000e+00> : vector<8x8xf32>
    %47 = tpu.matmul %45, %46, %cst_19 {dimension_numbers = #tpu.dot_dimension_numbers<[1], [1], [0], [0], [0, 0, 1, 0], [], []>} : vector<8x32xbf16>, vector<8x32xbf16>, vector<8x8xf32> -> vector<8x8xf32>
    %cst_20 = arith.constant 0.176776692 : f32
    %48 = vector.broadcast %cst_20 : f32 to vector<8x8xf32>
    %49 = arith.mulf %47, %48 : vector<8x8xf32>
    %cst_21 = arith.constant -1.000000e+30 : f32
    %50 = vector.broadcast %cst_21 : f32 to vector<8x8xf32>
    %51 = arith.select %40, %49, %50 : vector<8x8xi1>, vector<8x8xf32>
    %cst_22 = arith.constant dense<0xFF800000> : vector<8xf32>
    %52 = vector.multi_reduction <maximumf>, %51, %cst_22 [1] : vector<8x8xf32> to vector<8xf32>
    %53 = vector.shape_cast %52 : vector<8xf32> to vector<8x1xf32>
    %54 = vector.broadcast %53 : vector<8x1xf32> to vector<8x8xf32>
    %55 = arith.subf %51, %54 : vector<8x8xf32>
    %56 = math.exp %55 : vector<8x8xf32>
    %cst_23 = arith.constant dense<0.000000e+00> : vector<8xf32>
    %57 = vector.multi_reduction <add>, %56, %cst_23 [1] : vector<8x8xf32> to vector<8xf32>
    %58 = vector.shape_cast %57 : vector<8xf32> to vector<8x1xf32>
    %59 = tpu.reciprocal %58 {approx = true} : vector<8x1xf32> -> vector<8x1xf32>
    %60 = vector.broadcast %59 : vector<8x1xf32> to vector<8x8xf32>
    %61 = arith.mulf %56, %60 : vector<8x8xf32>
    %62 = arith.truncf %61 : vector<8x8xf32> to vector<8x8xbf16>
    %63 = arith.truncf %44 : vector<8x32xf32> to vector<8x32xbf16>
    %cst_24 = arith.constant dense<0.000000e+00> : vector<8x32xf32>
    %64 = tpu.matmul %62, %63, %cst_24 {dimension_numbers = #tpu.dot_dimension_numbers<[1], [0], [0], [1], [0, 0, 1, 1], [], []>} : vector<8x8xbf16>, vector<8x32xbf16>, vector<8x32xf32> -> vector<8x32xf32>
    %65 = vector.extract_strided_slice %41 {offsets = [0, 32], sizes = [8, 32], strides = [1, 1]} : vector<8x1152xf32> to vector<8x32xf32>
    %66 = vector.extract_strided_slice %41 {offsets = [0, 416], sizes = [8, 32], strides = [1, 1]} : vector<8x1152xf32> to vector<8x32xf32>
    %67 = vector.extract_strided_slice %41 {offsets = [0, 800], sizes = [8, 32], strides = [1, 1]} : vector<8x1152xf32> to vector<8x32xf32>
    %68 = arith.truncf %65 : vector<8x32xf32> to vector<8x32xbf16>
    %69 = arith.truncf %66 : vector<8x32xf32> to vector<8x32xbf16>
    %cst_25 = arith.constant dense<0.000000e+00> : vector<8x8xf32>
    %70 = tpu.matmul %68, %69, %cst_25 {dimension_numbers = #tpu.dot_dimension_numbers<[1], [1], [0], [0], [0, 0, 1, 0], [], []>} : vector<8x32xbf16>, vector<8x32xbf16>, vector<8x8xf32> -> vector<8x8xf32>
    %cst_26 = arith.constant 0.176776692 : f32
    %71 = vector.broadcast %cst_26 : f32 to vector<8x8xf32>
    %72 = arith.mulf %70, %71 : vector<8x8xf32>
    %cst_27 = arith.constant -1.000000e+30 : f32
    %73 = vector.broadcast %cst_27 : f32 to vector<8x8xf32>
    %74 = arith.select %40, %72, %73 : vector<8x8xi1>, vector<8x8xf32>
    %cst_28 = arith.constant dense<0xFF800000> : vector<8xf32>
    %75 = vector.multi_reduction <maximumf>, %74, %cst_28 [1] : vector<8x8xf32> to vector<8xf32>
    %76 = vector.shape_cast %75 : vector<8xf32> to vector<8x1xf32>
    %77 = vector.broadcast %76 : vector<8x1xf32> to vector<8x8xf32>
    %78 = arith.subf %74, %77 : vector<8x8xf32>
    %79 = math.exp %78 : vector<8x8xf32>
    %cst_29 = arith.constant dense<0.000000e+00> : vector<8xf32>
    %80 = vector.multi_reduction <add>, %79, %cst_29 [1] : vector<8x8xf32> to vector<8xf32>
    %81 = vector.shape_cast %80 : vector<8xf32> to vector<8x1xf32>
    %82 = tpu.reciprocal %81 {approx = true} : vector<8x1xf32> -> vector<8x1xf32>
    %83 = vector.broadcast %82 : vector<8x1xf32> to vector<8x8xf32>
    %84 = arith.mulf %79, %83 : vector<8x8xf32>
    %85 = arith.truncf %84 : vector<8x8xf32> to vector<8x8xbf16>
    %86 = arith.truncf %67 : vector<8x32xf32> to vector<8x32xbf16>
    %cst_30 = arith.constant dense<0.000000e+00> : vector<8x32xf32>
    %87 = tpu.matmul %85, %86, %cst_30 {dimension_numbers = #tpu.dot_dimension_numbers<[1], [0], [0], [1], [0, 0, 1, 1], [], []>} : vector<8x8xbf16>, vector<8x32xbf16>, vector<8x32xf32> -> vector<8x32xf32>
    %88 = vector.extract_strided_slice %41 {offsets = [0, 64], sizes = [8, 32], strides = [1, 1]} : vector<8x1152xf32> to vector<8x32xf32>
    %89 = vector.extract_strided_slice %41 {offsets = [0, 448], sizes = [8, 32], strides = [1, 1]} : vector<8x1152xf32> to vector<8x32xf32>
    %90 = vector.extract_strided_slice %41 {offsets = [0, 832], sizes = [8, 32], strides = [1, 1]} : vector<8x1152xf32> to vector<8x32xf32>
    %91 = arith.truncf %88 : vector<8x32xf32> to vector<8x32xbf16>
    %92 = arith.truncf %89 : vector<8x32xf32> to vector<8x32xbf16>
    %cst_31 = arith.constant dense<0.000000e+00> : vector<8x8xf32>
    %93 = tpu.matmul %91, %92, %cst_31 {dimension_numbers = #tpu.dot_dimension_numbers<[1], [1], [0], [0], [0, 0, 1, 0], [], []>} : vector<8x32xbf16>, vector<8x32xbf16>, vector<8x8xf32> -> vector<8x8xf32>
    %cst_32 = arith.constant 0.176776692 : f32
    %94 = vector.broadcast %cst_32 : f32 to vector<8x8xf32>
    %95 = arith.mulf %93, %94 : vector<8x8xf32>
    %cst_33 = arith.constant -1.000000e+30 : f32
    %96 = vector.broadcast %cst_33 : f32 to vector<8x8xf32>
    %97 = arith.select %40, %95, %96 : vector<8x8xi1>, vector<8x8xf32>
    %cst_34 = arith.constant dense<0xFF800000> : vector<8xf32>
    %98 = vector.multi_reduction <maximumf>, %97, %cst_34 [1] : vector<8x8xf32> to vector<8xf32>
    %99 = vector.shape_cast %98 : vector<8xf32> to vector<8x1xf32>
    %100 = vector.broadcast %99 : vector<8x1xf32> to vector<8x8xf32>
    %101 = arith.subf %97, %100 : vector<8x8xf32>
    %102 = math.exp %101 : vector<8x8xf32>
    %cst_35 = arith.constant dense<0.000000e+00> : vector<8xf32>
    %103 = vector.multi_reduction <add>, %102, %cst_35 [1] : vector<8x8xf32> to vector<8xf32>
    %104 = vector.shape_cast %103 : vector<8xf32> to vector<8x1xf32>
    %105 = tpu.reciprocal %104 {approx = true} : vector<8x1xf32> -> vector<8x1xf32>
    %106 = vector.broadcast %105 : vector<8x1xf32> to vector<8x8xf32>
    %107 = arith.mulf %102, %106 : vector<8x8xf32>
    %108 = arith.truncf %107 : vector<8x8xf32> to vector<8x8xbf16>
    %109 = arith.truncf %90 : vector<8x32xf32> to vector<8x32xbf16>
    %cst_36 = arith.constant dense<0.000000e+00> : vector<8x32xf32>
    %110 = tpu.matmul %108, %109, %cst_36 {dimension_numbers = #tpu.dot_dimension_numbers<[1], [0], [0], [1], [0, 0, 1, 1], [], []>} : vector<8x8xbf16>, vector<8x32xbf16>, vector<8x32xf32> -> vector<8x32xf32>
    %111 = vector.extract_strided_slice %41 {offsets = [0, 96], sizes = [8, 32], strides = [1, 1]} : vector<8x1152xf32> to vector<8x32xf32>
    %112 = vector.extract_strided_slice %41 {offsets = [0, 480], sizes = [8, 32], strides = [1, 1]} : vector<8x1152xf32> to vector<8x32xf32>
    %113 = vector.extract_strided_slice %41 {offsets = [0, 864], sizes = [8, 32], strides = [1, 1]} : vector<8x1152xf32> to vector<8x32xf32>
    %114 = arith.truncf %111 : vector<8x32xf32> to vector<8x32xbf16>
    %115 = arith.truncf %112 : vector<8x32xf32> to vector<8x32xbf16>
    %cst_37 = arith.constant dense<0.000000e+00> : vector<8x8xf32>
    %116 = tpu.matmul %114, %115, %cst_37 {dimension_numbers = #tpu.dot_dimension_numbers<[1], [1], [0], [0], [0, 0, 1, 0], [], []>} : vector<8x32xbf16>, vector<8x32xbf16>, vector<8x8xf32> -> vector<8x8xf32>
    %cst_38 = arith.constant 0.176776692 : f32
    %117 = vector.broadcast %cst_38 : f32 to vector<8x8xf32>
    %118 = arith.mulf %116, %117 : vector<8x8xf32>
    %cst_39 = arith.constant -1.000000e+30 : f32
    %119 = vector.broadcast %cst_39 : f32 to vector<8x8xf32>
    %120 = arith.select %40, %118, %119 : vector<8x8xi1>, vector<8x8xf32>
    %cst_40 = arith.constant dense<0xFF800000> : vector<8xf32>
    %121 = vector.multi_reduction <maximumf>, %120, %cst_40 [1] : vector<8x8xf32> to vector<8xf32>
    %122 = vector.shape_cast %121 : vector<8xf32> to vector<8x1xf32>
    %123 = vector.broadcast %122 : vector<8x1xf32> to vector<8x8xf32>
    %124 = arith.subf %120, %123 : vector<8x8xf32>
    %125 = math.exp %124 : vector<8x8xf32>
    %cst_41 = arith.constant dense<0.000000e+00> : vector<8xf32>
    %126 = vector.multi_reduction <add>, %125, %cst_41 [1] : vector<8x8xf32> to vector<8xf32>
    %127 = vector.shape_cast %126 : vector<8xf32> to vector<8x1xf32>
    %128 = tpu.reciprocal %127 {approx = true} : vector<8x1xf32> -> vector<8x1xf32>
    %129 = vector.broadcast %128 : vector<8x1xf32> to vector<8x8xf32>
    %130 = arith.mulf %125, %129 : vector<8x8xf32>
    %131 = arith.truncf %130 : vector<8x8xf32> to vector<8x8xbf16>
    %132 = arith.truncf %113 : vector<8x32xf32> to vector<8x32xbf16>
    %cst_42 = arith.constant dense<0.000000e+00> : vector<8x32xf32>
    %133 = tpu.matmul %131, %132, %cst_42 {dimension_numbers = #tpu.dot_dimension_numbers<[1], [0], [0], [1], [0, 0, 1, 1], [], []>} : vector<8x8xbf16>, vector<8x32xbf16>, vector<8x32xf32> -> vector<8x32xf32>
    %134 = vector.extract_strided_slice %41 {offsets = [0, 128], sizes = [8, 32], strides = [1, 1]} : vector<8x1152xf32> to vector<8x32xf32>
    %135 = vector.extract_strided_slice %41 {offsets = [0, 512], sizes = [8, 32], strides = [1, 1]} : vector<8x1152xf32> to vector<8x32xf32>
    %136 = vector.extract_strided_slice %41 {offsets = [0, 896], sizes = [8, 32], strides = [1, 1]} : vector<8x1152xf32> to vector<8x32xf32>
    %137 = arith.truncf %134 : vector<8x32xf32> to vector<8x32xbf16>
    %138 = arith.truncf %135 : vector<8x32xf32> to vector<8x32xbf16>
    %cst_43 = arith.constant dense<0.000000e+00> : vector<8x8xf32>
    %139 = tpu.matmul %137, %138, %cst_43 {dimension_numbers = #tpu.dot_dimension_numbers<[1], [1], [0], [0], [0, 0, 1, 0], [], []>} : vector<8x32xbf16>, vector<8x32xbf16>, vector<8x8xf32> -> vector<8x8xf32>
    %cst_44 = arith.constant 0.176776692 : f32
    %140 = vector.broadcast %cst_44 : f32 to vector<8x8xf32>
    %141 = arith.mulf %139, %140 : vector<8x8xf32>
    %cst_45 = arith.constant -1.000000e+30 : f32
    %142 = vector.broadcast %cst_45 : f32 to vector<8x8xf32>
    %143 = arith.select %40, %141, %142 : vector<8x8xi1>, vector<8x8xf32>
    %cst_46 = arith.constant dense<0xFF800000> : vector<8xf32>
    %144 = vector.multi_reduction <maximumf>, %143, %cst_46 [1] : vector<8x8xf32> to vector<8xf32>
    %145 = vector.shape_cast %144 : vector<8xf32> to vector<8x1xf32>
    %146 = vector.broadcast %145 : vector<8x1xf32> to vector<8x8xf32>
    %147 = arith.subf %143, %146 : vector<8x8xf32>
    %148 = math.exp %147 : vector<8x8xf32>
    %cst_47 = arith.constant dense<0.000000e+00> : vector<8xf32>
    %149 = vector.multi_reduction <add>, %148, %cst_47 [1] : vector<8x8xf32> to vector<8xf32>
    %150 = vector.shape_cast %149 : vector<8xf32> to vector<8x1xf32>
    %151 = tpu.reciprocal %150 {approx = true} : vector<8x1xf32> -> vector<8x1xf32>
    %152 = vector.broadcast %151 : vector<8x1xf32> to vector<8x8xf32>
    %153 = arith.mulf %148, %152 : vector<8x8xf32>
    %154 = arith.truncf %153 : vector<8x8xf32> to vector<8x8xbf16>
    %155 = arith.truncf %136 : vector<8x32xf32> to vector<8x32xbf16>
    %cst_48 = arith.constant dense<0.000000e+00> : vector<8x32xf32>
    %156 = tpu.matmul %154, %155, %cst_48 {dimension_numbers = #tpu.dot_dimension_numbers<[1], [0], [0], [1], [0, 0, 1, 1], [], []>} : vector<8x8xbf16>, vector<8x32xbf16>, vector<8x32xf32> -> vector<8x32xf32>
    %157 = vector.extract_strided_slice %41 {offsets = [0, 160], sizes = [8, 32], strides = [1, 1]} : vector<8x1152xf32> to vector<8x32xf32>
    %158 = vector.extract_strided_slice %41 {offsets = [0, 544], sizes = [8, 32], strides = [1, 1]} : vector<8x1152xf32> to vector<8x32xf32>
    %159 = vector.extract_strided_slice %41 {offsets = [0, 928], sizes = [8, 32], strides = [1, 1]} : vector<8x1152xf32> to vector<8x32xf32>
    %160 = arith.truncf %157 : vector<8x32xf32> to vector<8x32xbf16>
    %161 = arith.truncf %158 : vector<8x32xf32> to vector<8x32xbf16>
    %cst_49 = arith.constant dense<0.000000e+00> : vector<8x8xf32>
    %162 = tpu.matmul %160, %161, %cst_49 {dimension_numbers = #tpu.dot_dimension_numbers<[1], [1], [0], [0], [0, 0, 1, 0], [], []>} : vector<8x32xbf16>, vector<8x32xbf16>, vector<8x8xf32> -> vector<8x8xf32>
    %cst_50 = arith.constant 0.176776692 : f32
    %163 = vector.broadcast %cst_50 : f32 to vector<8x8xf32>
    %164 = arith.mulf %162, %163 : vector<8x8xf32>
    %cst_51 = arith.constant -1.000000e+30 : f32
    %165 = vector.broadcast %cst_51 : f32 to vector<8x8xf32>
    %166 = arith.select %40, %164, %165 : vector<8x8xi1>, vector<8x8xf32>
    %cst_52 = arith.constant dense<0xFF800000> : vector<8xf32>
    %167 = vector.multi_reduction <maximumf>, %166, %cst_52 [1] : vector<8x8xf32> to vector<8xf32>
    %168 = vector.shape_cast %167 : vector<8xf32> to vector<8x1xf32>
    %169 = vector.broadcast %168 : vector<8x1xf32> to vector<8x8xf32>
    %170 = arith.subf %166, %169 : vector<8x8xf32>
    %171 = math.exp %170 : vector<8x8xf32>
    %cst_53 = arith.constant dense<0.000000e+00> : vector<8xf32>
    %172 = vector.multi_reduction <add>, %171, %cst_53 [1] : vector<8x8xf32> to vector<8xf32>
    %173 = vector.shape_cast %172 : vector<8xf32> to vector<8x1xf32>
    %174 = tpu.reciprocal %173 {approx = true} : vector<8x1xf32> -> vector<8x1xf32>
    %175 = vector.broadcast %174 : vector<8x1xf32> to vector<8x8xf32>
    %176 = arith.mulf %171, %175 : vector<8x8xf32>
    %177 = arith.truncf %176 : vector<8x8xf32> to vector<8x8xbf16>
    %178 = arith.truncf %159 : vector<8x32xf32> to vector<8x32xbf16>
    %cst_54 = arith.constant dense<0.000000e+00> : vector<8x32xf32>
    %179 = tpu.matmul %177, %178, %cst_54 {dimension_numbers = #tpu.dot_dimension_numbers<[1], [0], [0], [1], [0, 0, 1, 1], [], []>} : vector<8x8xbf16>, vector<8x32xbf16>, vector<8x32xf32> -> vector<8x32xf32>
    %180 = vector.extract_strided_slice %41 {offsets = [0, 192], sizes = [8, 32], strides = [1, 1]} : vector<8x1152xf32> to vector<8x32xf32>
    %181 = vector.extract_strided_slice %41 {offsets = [0, 576], sizes = [8, 32], strides = [1, 1]} : vector<8x1152xf32> to vector<8x32xf32>
    %182 = vector.extract_strided_slice %41 {offsets = [0, 960], sizes = [8, 32], strides = [1, 1]} : vector<8x1152xf32> to vector<8x32xf32>
    %183 = arith.truncf %180 : vector<8x32xf32> to vector<8x32xbf16>
    %184 = arith.truncf %181 : vector<8x32xf32> to vector<8x32xbf16>
    %cst_55 = arith.constant dense<0.000000e+00> : vector<8x8xf32>
    %185 = tpu.matmul %183, %184, %cst_55 {dimension_numbers = #tpu.dot_dimension_numbers<[1], [1], [0], [0], [0, 0, 1, 0], [], []>} : vector<8x32xbf16>, vector<8x32xbf16>, vector<8x8xf32> -> vector<8x8xf32>
    %cst_56 = arith.constant 0.176776692 : f32
    %186 = vector.broadcast %cst_56 : f32 to vector<8x8xf32>
    %187 = arith.mulf %185, %186 : vector<8x8xf32>
    %cst_57 = arith.constant -1.000000e+30 : f32
    %188 = vector.broadcast %cst_57 : f32 to vector<8x8xf32>
    %189 = arith.select %40, %187, %188 : vector<8x8xi1>, vector<8x8xf32>
    %cst_58 = arith.constant dense<0xFF800000> : vector<8xf32>
    %190 = vector.multi_reduction <maximumf>, %189, %cst_58 [1] : vector<8x8xf32> to vector<8xf32>
    %191 = vector.shape_cast %190 : vector<8xf32> to vector<8x1xf32>
    %192 = vector.broadcast %191 : vector<8x1xf32> to vector<8x8xf32>
    %193 = arith.subf %189, %192 : vector<8x8xf32>
    %194 = math.exp %193 : vector<8x8xf32>
    %cst_59 = arith.constant dense<0.000000e+00> : vector<8xf32>
    %195 = vector.multi_reduction <add>, %194, %cst_59 [1] : vector<8x8xf32> to vector<8xf32>
    %196 = vector.shape_cast %195 : vector<8xf32> to vector<8x1xf32>
    %197 = tpu.reciprocal %196 {approx = true} : vector<8x1xf32> -> vector<8x1xf32>
    %198 = vector.broadcast %197 : vector<8x1xf32> to vector<8x8xf32>
    %199 = arith.mulf %194, %198 : vector<8x8xf32>
    %200 = arith.truncf %199 : vector<8x8xf32> to vector<8x8xbf16>
    %201 = arith.truncf %182 : vector<8x32xf32> to vector<8x32xbf16>
    %cst_60 = arith.constant dense<0.000000e+00> : vector<8x32xf32>
    %202 = tpu.matmul %200, %201, %cst_60 {dimension_numbers = #tpu.dot_dimension_numbers<[1], [0], [0], [1], [0, 0, 1, 1], [], []>} : vector<8x8xbf16>, vector<8x32xbf16>, vector<8x32xf32> -> vector<8x32xf32>
    %203 = vector.extract_strided_slice %41 {offsets = [0, 224], sizes = [8, 32], strides = [1, 1]} : vector<8x1152xf32> to vector<8x32xf32>
    %204 = vector.extract_strided_slice %41 {offsets = [0, 608], sizes = [8, 32], strides = [1, 1]} : vector<8x1152xf32> to vector<8x32xf32>
    %205 = vector.extract_strided_slice %41 {offsets = [0, 992], sizes = [8, 32], strides = [1, 1]} : vector<8x1152xf32> to vector<8x32xf32>
    %206 = arith.truncf %203 : vector<8x32xf32> to vector<8x32xbf16>
    %207 = arith.truncf %204 : vector<8x32xf32> to vector<8x32xbf16>
    %cst_61 = arith.constant dense<0.000000e+00> : vector<8x8xf32>
    %208 = tpu.matmul %206, %207, %cst_61 {dimension_numbers = #tpu.dot_dimension_numbers<[1], [1], [0], [0], [0, 0, 1, 0], [], []>} : vector<8x32xbf16>, vector<8x32xbf16>, vector<8x8xf32> -> vector<8x8xf32>
    %cst_62 = arith.constant 0.176776692 : f32
    %209 = vector.broadcast %cst_62 : f32 to vector<8x8xf32>
    %210 = arith.mulf %208, %209 : vector<8x8xf32>
    %cst_63 = arith.constant -1.000000e+30 : f32
    %211 = vector.broadcast %cst_63 : f32 to vector<8x8xf32>
    %212 = arith.select %40, %210, %211 : vector<8x8xi1>, vector<8x8xf32>
    %cst_64 = arith.constant dense<0xFF800000> : vector<8xf32>
    %213 = vector.multi_reduction <maximumf>, %212, %cst_64 [1] : vector<8x8xf32> to vector<8xf32>
    %214 = vector.shape_cast %213 : vector<8xf32> to vector<8x1xf32>
    %215 = vector.broadcast %214 : vector<8x1xf32> to vector<8x8xf32>
    %216 = arith.subf %212, %215 : vector<8x8xf32>
    %217 = math.exp %216 : vector<8x8xf32>
    %cst_65 = arith.constant dense<0.000000e+00> : vector<8xf32>
    %218 = vector.multi_reduction <add>, %217, %cst_65 [1] : vector<8x8xf32> to vector<8xf32>
    %219 = vector.shape_cast %218 : vector<8xf32> to vector<8x1xf32>
    %220 = tpu.reciprocal %219 {approx = true} : vector<8x1xf32> -> vector<8x1xf32>
    %221 = vector.broadcast %220 : vector<8x1xf32> to vector<8x8xf32>
    %222 = arith.mulf %217, %221 : vector<8x8xf32>
    %223 = arith.truncf %222 : vector<8x8xf32> to vector<8x8xbf16>
    %224 = arith.truncf %205 : vector<8x32xf32> to vector<8x32xbf16>
    %cst_66 = arith.constant dense<0.000000e+00> : vector<8x32xf32>
    %225 = tpu.matmul %223, %224, %cst_66 {dimension_numbers = #tpu.dot_dimension_numbers<[1], [0], [0], [1], [0, 0, 1, 1], [], []>} : vector<8x8xbf16>, vector<8x32xbf16>, vector<8x32xf32> -> vector<8x32xf32>
    %226 = vector.extract_strided_slice %41 {offsets = [0, 256], sizes = [8, 32], strides = [1, 1]} : vector<8x1152xf32> to vector<8x32xf32>
    %227 = vector.extract_strided_slice %41 {offsets = [0, 640], sizes = [8, 32], strides = [1, 1]} : vector<8x1152xf32> to vector<8x32xf32>
    %228 = vector.extract_strided_slice %41 {offsets = [0, 1024], sizes = [8, 32], strides = [1, 1]} : vector<8x1152xf32> to vector<8x32xf32>
    %229 = arith.truncf %226 : vector<8x32xf32> to vector<8x32xbf16>
    %230 = arith.truncf %227 : vector<8x32xf32> to vector<8x32xbf16>
    %cst_67 = arith.constant dense<0.000000e+00> : vector<8x8xf32>
    %231 = tpu.matmul %229, %230, %cst_67 {dimension_numbers = #tpu.dot_dimension_numbers<[1], [1], [0], [0], [0, 0, 1, 0], [], []>} : vector<8x32xbf16>, vector<8x32xbf16>, vector<8x8xf32> -> vector<8x8xf32>
    %cst_68 = arith.constant 0.176776692 : f32
    %232 = vector.broadcast %cst_68 : f32 to vector<8x8xf32>
    %233 = arith.mulf %231, %232 : vector<8x8xf32>
    %cst_69 = arith.constant -1.000000e+30 : f32
    %234 = vector.broadcast %cst_69 : f32 to vector<8x8xf32>
    %235 = arith.select %40, %233, %234 : vector<8x8xi1>, vector<8x8xf32>
    %cst_70 = arith.constant dense<0xFF800000> : vector<8xf32>
    %236 = vector.multi_reduction <maximumf>, %235, %cst_70 [1] : vector<8x8xf32> to vector<8xf32>
    %237 = vector.shape_cast %236 : vector<8xf32> to vector<8x1xf32>
    %238 = vector.broadcast %237 : vector<8x1xf32> to vector<8x8xf32>
    %239 = arith.subf %235, %238 : vector<8x8xf32>
    %240 = math.exp %239 : vector<8x8xf32>
    %cst_71 = arith.constant dense<0.000000e+00> : vector<8xf32>
    %241 = vector.multi_reduction <add>, %240, %cst_71 [1] : vector<8x8xf32> to vector<8xf32>
    %242 = vector.shape_cast %241 : vector<8xf32> to vector<8x1xf32>
    %243 = tpu.reciprocal %242 {approx = true} : vector<8x1xf32> -> vector<8x1xf32>
    %244 = vector.broadcast %243 : vector<8x1xf32> to vector<8x8xf32>
    %245 = arith.mulf %240, %244 : vector<8x8xf32>
    %246 = arith.truncf %245 : vector<8x8xf32> to vector<8x8xbf16>
    %247 = arith.truncf %228 : vector<8x32xf32> to vector<8x32xbf16>
    %cst_72 = arith.constant dense<0.000000e+00> : vector<8x32xf32>
    %248 = tpu.matmul %246, %247, %cst_72 {dimension_numbers = #tpu.dot_dimension_numbers<[1], [0], [0], [1], [0, 0, 1, 1], [], []>} : vector<8x8xbf16>, vector<8x32xbf16>, vector<8x32xf32> -> vector<8x32xf32>
    %249 = vector.extract_strided_slice %41 {offsets = [0, 288], sizes = [8, 32], strides = [1, 1]} : vector<8x1152xf32> to vector<8x32xf32>
    %250 = vector.extract_strided_slice %41 {offsets = [0, 672], sizes = [8, 32], strides = [1, 1]} : vector<8x1152xf32> to vector<8x32xf32>
    %251 = vector.extract_strided_slice %41 {offsets = [0, 1056], sizes = [8, 32], strides = [1, 1]} : vector<8x1152xf32> to vector<8x32xf32>
    %252 = arith.truncf %249 : vector<8x32xf32> to vector<8x32xbf16>
    %253 = arith.truncf %250 : vector<8x32xf32> to vector<8x32xbf16>
    %cst_73 = arith.constant dense<0.000000e+00> : vector<8x8xf32>
    %254 = tpu.matmul %252, %253, %cst_73 {dimension_numbers = #tpu.dot_dimension_numbers<[1], [1], [0], [0], [0, 0, 1, 0], [], []>} : vector<8x32xbf16>, vector<8x32xbf16>, vector<8x8xf32> -> vector<8x8xf32>
    %cst_74 = arith.constant 0.176776692 : f32
    %255 = vector.broadcast %cst_74 : f32 to vector<8x8xf32>
    %256 = arith.mulf %254, %255 : vector<8x8xf32>
    %cst_75 = arith.constant -1.000000e+30 : f32
    %257 = vector.broadcast %cst_75 : f32 to vector<8x8xf32>
    %258 = arith.select %40, %256, %257 : vector<8x8xi1>, vector<8x8xf32>
    %cst_76 = arith.constant dense<0xFF800000> : vector<8xf32>
    %259 = vector.multi_reduction <maximumf>, %258, %cst_76 [1] : vector<8x8xf32> to vector<8xf32>
    %260 = vector.shape_cast %259 : vector<8xf32> to vector<8x1xf32>
    %261 = vector.broadcast %260 : vector<8x1xf32> to vector<8x8xf32>
    %262 = arith.subf %258, %261 : vector<8x8xf32>
    %263 = math.exp %262 : vector<8x8xf32>
    %cst_77 = arith.constant dense<0.000000e+00> : vector<8xf32>
    %264 = vector.multi_reduction <add>, %263, %cst_77 [1] : vector<8x8xf32> to vector<8xf32>
    %265 = vector.shape_cast %264 : vector<8xf32> to vector<8x1xf32>
    %266 = tpu.reciprocal %265 {approx = true} : vector<8x1xf32> -> vector<8x1xf32>
    %267 = vector.broadcast %266 : vector<8x1xf32> to vector<8x8xf32>
    %268 = arith.mulf %263, %267 : vector<8x8xf32>
    %269 = arith.truncf %268 : vector<8x8xf32> to vector<8x8xbf16>
    %270 = arith.truncf %251 : vector<8x32xf32> to vector<8x32xbf16>
    %cst_78 = arith.constant dense<0.000000e+00> : vector<8x32xf32>
    %271 = tpu.matmul %269, %270, %cst_78 {dimension_numbers = #tpu.dot_dimension_numbers<[1], [0], [0], [1], [0, 0, 1, 1], [], []>} : vector<8x8xbf16>, vector<8x32xbf16>, vector<8x32xf32> -> vector<8x32xf32>
    %272 = vector.extract_strided_slice %41 {offsets = [0, 320], sizes = [8, 32], strides = [1, 1]} : vector<8x1152xf32> to vector<8x32xf32>
    %273 = vector.extract_strided_slice %41 {offsets = [0, 704], sizes = [8, 32], strides = [1, 1]} : vector<8x1152xf32> to vector<8x32xf32>
    %274 = vector.extract_strided_slice %41 {offsets = [0, 1088], sizes = [8, 32], strides = [1, 1]} : vector<8x1152xf32> to vector<8x32xf32>
    %275 = arith.truncf %272 : vector<8x32xf32> to vector<8x32xbf16>
    %276 = arith.truncf %273 : vector<8x32xf32> to vector<8x32xbf16>
    %cst_79 = arith.constant dense<0.000000e+00> : vector<8x8xf32>
    %277 = tpu.matmul %275, %276, %cst_79 {dimension_numbers = #tpu.dot_dimension_numbers<[1], [1], [0], [0], [0, 0, 1, 0], [], []>} : vector<8x32xbf16>, vector<8x32xbf16>, vector<8x8xf32> -> vector<8x8xf32>
    %cst_80 = arith.constant 0.176776692 : f32
    %278 = vector.broadcast %cst_80 : f32 to vector<8x8xf32>
    %279 = arith.mulf %277, %278 : vector<8x8xf32>
    %cst_81 = arith.constant -1.000000e+30 : f32
    %280 = vector.broadcast %cst_81 : f32 to vector<8x8xf32>
    %281 = arith.select %40, %279, %280 : vector<8x8xi1>, vector<8x8xf32>
    %cst_82 = arith.constant dense<0xFF800000> : vector<8xf32>
    %282 = vector.multi_reduction <maximumf>, %281, %cst_82 [1] : vector<8x8xf32> to vector<8xf32>
    %283 = vector.shape_cast %282 : vector<8xf32> to vector<8x1xf32>
    %284 = vector.broadcast %283 : vector<8x1xf32> to vector<8x8xf32>
    %285 = arith.subf %281, %284 : vector<8x8xf32>
    %286 = math.exp %285 : vector<8x8xf32>
    %cst_83 = arith.constant dense<0.000000e+00> : vector<8xf32>
    %287 = vector.multi_reduction <add>, %286, %cst_83 [1] : vector<8x8xf32> to vector<8xf32>
    %288 = vector.shape_cast %287 : vector<8xf32> to vector<8x1xf32>
    %289 = tpu.reciprocal %288 {approx = true} : vector<8x1xf32> -> vector<8x1xf32>
    %290 = vector.broadcast %289 : vector<8x1xf32> to vector<8x8xf32>
    %291 = arith.mulf %286, %290 : vector<8x8xf32>
    %292 = arith.truncf %291 : vector<8x8xf32> to vector<8x8xbf16>
    %293 = arith.truncf %274 : vector<8x32xf32> to vector<8x32xbf16>
    %cst_84 = arith.constant dense<0.000000e+00> : vector<8x32xf32>
    %294 = tpu.matmul %292, %293, %cst_84 {dimension_numbers = #tpu.dot_dimension_numbers<[1], [0], [0], [1], [0, 0, 1, 1], [], []>} : vector<8x8xbf16>, vector<8x32xbf16>, vector<8x32xf32> -> vector<8x32xf32>
    %295 = vector.extract_strided_slice %41 {offsets = [0, 352], sizes = [8, 32], strides = [1, 1]} : vector<8x1152xf32> to vector<8x32xf32>
    %296 = vector.extract_strided_slice %41 {offsets = [0, 736], sizes = [8, 32], strides = [1, 1]} : vector<8x1152xf32> to vector<8x32xf32>
    %297 = vector.extract_strided_slice %41 {offsets = [0, 1120], sizes = [8, 32], strides = [1, 1]} : vector<8x1152xf32> to vector<8x32xf32>
    %298 = arith.truncf %295 : vector<8x32xf32> to vector<8x32xbf16>
    %299 = arith.truncf %296 : vector<8x32xf32> to vector<8x32xbf16>
    %cst_85 = arith.constant dense<0.000000e+00> : vector<8x8xf32>
    %300 = tpu.matmul %298, %299, %cst_85 {dimension_numbers = #tpu.dot_dimension_numbers<[1], [1], [0], [0], [0, 0, 1, 0], [], []>} : vector<8x32xbf16>, vector<8x32xbf16>, vector<8x8xf32> -> vector<8x8xf32>
    %cst_86 = arith.constant 0.176776692 : f32
    %301 = vector.broadcast %cst_86 : f32 to vector<8x8xf32>
    %302 = arith.mulf %300, %301 : vector<8x8xf32>
    %cst_87 = arith.constant -1.000000e+30 : f32
    %303 = vector.broadcast %cst_87 : f32 to vector<8x8xf32>
    %304 = arith.select %40, %302, %303 : vector<8x8xi1>, vector<8x8xf32>
    %cst_88 = arith.constant dense<0xFF800000> : vector<8xf32>
    %305 = vector.multi_reduction <maximumf>, %304, %cst_88 [1] : vector<8x8xf32> to vector<8xf32>
    %306 = vector.shape_cast %305 : vector<8xf32> to vector<8x1xf32>
    %307 = vector.broadcast %306 : vector<8x1xf32> to vector<8x8xf32>
    %308 = arith.subf %304, %307 : vector<8x8xf32>
    %309 = math.exp %308 : vector<8x8xf32>
    %cst_89 = arith.constant dense<0.000000e+00> : vector<8xf32>
    %310 = vector.multi_reduction <add>, %309, %cst_89 [1] : vector<8x8xf32> to vector<8xf32>
    %311 = vector.shape_cast %310 : vector<8xf32> to vector<8x1xf32>
    %312 = tpu.reciprocal %311 {approx = true} : vector<8x1xf32> -> vector<8x1xf32>
    %313 = vector.broadcast %312 : vector<8x1xf32> to vector<8x8xf32>
    %314 = arith.mulf %309, %313 : vector<8x8xf32>
    %315 = arith.truncf %314 : vector<8x8xf32> to vector<8x8xbf16>
    %316 = arith.truncf %297 : vector<8x32xf32> to vector<8x32xbf16>
    %cst_90 = arith.constant dense<0.000000e+00> : vector<8x32xf32>
    %317 = tpu.matmul %315, %316, %cst_90 {dimension_numbers = #tpu.dot_dimension_numbers<[1], [0], [0], [1], [0, 0, 1, 1], [], []>} : vector<8x8xbf16>, vector<8x32xbf16>, vector<8x32xf32> -> vector<8x32xf32>
    %318 = tpu.concatenate %64, %87, %110, %133, %156, %179, %202, %225, %248, %271, %294, %317 in 1 : vector<8x32xf32>, vector<8x32xf32>, vector<8x32xf32>, vector<8x32xf32>, vector<8x32xf32>, vector<8x32xf32>, vector<8x32xf32>, vector<8x32xf32>, vector<8x32xf32>, vector<8x32xf32>, vector<8x32xf32>, vector<8x32xf32> -> vector<8x384xf32>
    %319 = vector.extract_strided_slice %37 {offsets = [8, 0], sizes = [8, 1152], strides = [1, 1]} : vector<16x1152xf32> to vector<8x1152xf32>
    %320 = vector.extract_strided_slice %319 {offsets = [0, 0], sizes = [8, 32], strides = [1, 1]} : vector<8x1152xf32> to vector<8x32xf32>
    %321 = vector.extract_strided_slice %319 {offsets = [0, 384], sizes = [8, 32], strides = [1, 1]} : vector<8x1152xf32> to vector<8x32xf32>
    %322 = vector.extract_strided_slice %319 {offsets = [0, 768], sizes = [8, 32], strides = [1, 1]} : vector<8x1152xf32> to vector<8x32xf32>
    %323 = arith.truncf %320 : vector<8x32xf32> to vector<8x32xbf16>
    %324 = arith.truncf %321 : vector<8x32xf32> to vector<8x32xbf16>
    %cst_91 = arith.constant dense<0.000000e+00> : vector<8x8xf32>
    %325 = tpu.matmul %323, %324, %cst_91 {dimension_numbers = #tpu.dot_dimension_numbers<[1], [1], [0], [0], [0, 0, 1, 0], [], []>} : vector<8x32xbf16>, vector<8x32xbf16>, vector<8x8xf32> -> vector<8x8xf32>
    %cst_92 = arith.constant 0.176776692 : f32
    %326 = vector.broadcast %cst_92 : f32 to vector<8x8xf32>
    %327 = arith.mulf %325, %326 : vector<8x8xf32>
    %cst_93 = arith.constant -1.000000e+30 : f32
    %328 = vector.broadcast %cst_93 : f32 to vector<8x8xf32>
    %329 = arith.select %40, %327, %328 : vector<8x8xi1>, vector<8x8xf32>
    %cst_94 = arith.constant dense<0xFF800000> : vector<8xf32>
    %330 = vector.multi_reduction <maximumf>, %329, %cst_94 [1] : vector<8x8xf32> to vector<8xf32>
    %331 = vector.shape_cast %330 : vector<8xf32> to vector<8x1xf32>
    %332 = vector.broadcast %331 : vector<8x1xf32> to vector<8x8xf32>
    %333 = arith.subf %329, %332 : vector<8x8xf32>
    %334 = math.exp %333 : vector<8x8xf32>
    %cst_95 = arith.constant dense<0.000000e+00> : vector<8xf32>
    %335 = vector.multi_reduction <add>, %334, %cst_95 [1] : vector<8x8xf32> to vector<8xf32>
    %336 = vector.shape_cast %335 : vector<8xf32> to vector<8x1xf32>
    %337 = tpu.reciprocal %336 {approx = true} : vector<8x1xf32> -> vector<8x1xf32>
    %338 = vector.broadcast %337 : vector<8x1xf32> to vector<8x8xf32>
    %339 = arith.mulf %334, %338 : vector<8x8xf32>
    %340 = arith.truncf %339 : vector<8x8xf32> to vector<8x8xbf16>
    %341 = arith.truncf %322 : vector<8x32xf32> to vector<8x32xbf16>
    %cst_96 = arith.constant dense<0.000000e+00> : vector<8x32xf32>
    %342 = tpu.matmul %340, %341, %cst_96 {dimension_numbers = #tpu.dot_dimension_numbers<[1], [0], [0], [1], [0, 0, 1, 1], [], []>} : vector<8x8xbf16>, vector<8x32xbf16>, vector<8x32xf32> -> vector<8x32xf32>
    %343 = vector.extract_strided_slice %319 {offsets = [0, 32], sizes = [8, 32], strides = [1, 1]} : vector<8x1152xf32> to vector<8x32xf32>
    %344 = vector.extract_strided_slice %319 {offsets = [0, 416], sizes = [8, 32], strides = [1, 1]} : vector<8x1152xf32> to vector<8x32xf32>
    %345 = vector.extract_strided_slice %319 {offsets = [0, 800], sizes = [8, 32], strides = [1, 1]} : vector<8x1152xf32> to vector<8x32xf32>
    %346 = arith.truncf %343 : vector<8x32xf32> to vector<8x32xbf16>
    %347 = arith.truncf %344 : vector<8x32xf32> to vector<8x32xbf16>
    %cst_97 = arith.constant dense<0.000000e+00> : vector<8x8xf32>
    %348 = tpu.matmul %346, %347, %cst_97 {dimension_numbers = #tpu.dot_dimension_numbers<[1], [1], [0], [0], [0, 0, 1, 0], [], []>} : vector<8x32xbf16>, vector<8x32xbf16>, vector<8x8xf32> -> vector<8x8xf32>
    %cst_98 = arith.constant 0.176776692 : f32
    %349 = vector.broadcast %cst_98 : f32 to vector<8x8xf32>
    %350 = arith.mulf %348, %349 : vector<8x8xf32>
    %cst_99 = arith.constant -1.000000e+30 : f32
    %351 = vector.broadcast %cst_99 : f32 to vector<8x8xf32>
    %352 = arith.select %40, %350, %351 : vector<8x8xi1>, vector<8x8xf32>
    %cst_100 = arith.constant dense<0xFF800000> : vector<8xf32>
    %353 = vector.multi_reduction <maximumf>, %352, %cst_100 [1] : vector<8x8xf32> to vector<8xf32>
    %354 = vector.shape_cast %353 : vector<8xf32> to vector<8x1xf32>
    %355 = vector.broadcast %354 : vector<8x1xf32> to vector<8x8xf32>
    %356 = arith.subf %352, %355 : vector<8x8xf32>
    %357 = math.exp %356 : vector<8x8xf32>
    %cst_101 = arith.constant dense<0.000000e+00> : vector<8xf32>
    %358 = vector.multi_reduction <add>, %357, %cst_101 [1] : vector<8x8xf32> to vector<8xf32>
    %359 = vector.shape_cast %358 : vector<8xf32> to vector<8x1xf32>
    %360 = tpu.reciprocal %359 {approx = true} : vector<8x1xf32> -> vector<8x1xf32>
    %361 = vector.broadcast %360 : vector<8x1xf32> to vector<8x8xf32>
    %362 = arith.mulf %357, %361 : vector<8x8xf32>
    %363 = arith.truncf %362 : vector<8x8xf32> to vector<8x8xbf16>
    %364 = arith.truncf %345 : vector<8x32xf32> to vector<8x32xbf16>
    %cst_102 = arith.constant dense<0.000000e+00> : vector<8x32xf32>
    %365 = tpu.matmul %363, %364, %cst_102 {dimension_numbers = #tpu.dot_dimension_numbers<[1], [0], [0], [1], [0, 0, 1, 1], [], []>} : vector<8x8xbf16>, vector<8x32xbf16>, vector<8x32xf32> -> vector<8x32xf32>
    %366 = vector.extract_strided_slice %319 {offsets = [0, 64], sizes = [8, 32], strides = [1, 1]} : vector<8x1152xf32> to vector<8x32xf32>
    %367 = vector.extract_strided_slice %319 {offsets = [0, 448], sizes = [8, 32], strides = [1, 1]} : vector<8x1152xf32> to vector<8x32xf32>
    %368 = vector.extract_strided_slice %319 {offsets = [0, 832], sizes = [8, 32], strides = [1, 1]} : vector<8x1152xf32> to vector<8x32xf32>
    %369 = arith.truncf %366 : vector<8x32xf32> to vector<8x32xbf16>
    %370 = arith.truncf %367 : vector<8x32xf32> to vector<8x32xbf16>
    %cst_103 = arith.constant dense<0.000000e+00> : vector<8x8xf32>
    %371 = tpu.matmul %369, %370, %cst_103 {dimension_numbers = #tpu.dot_dimension_numbers<[1], [1], [0], [0], [0, 0, 1, 0], [], []>} : vector<8x32xbf16>, vector<8x32xbf16>, vector<8x8xf32> -> vector<8x8xf32>
    %cst_104 = arith.constant 0.176776692 : f32
    %372 = vector.broadcast %cst_104 : f32 to vector<8x8xf32>
    %373 = arith.mulf %371, %372 : vector<8x8xf32>
    %cst_105 = arith.constant -1.000000e+30 : f32
    %374 = vector.broadcast %cst_105 : f32 to vector<8x8xf32>
    %375 = arith.select %40, %373, %374 : vector<8x8xi1>, vector<8x8xf32>
    %cst_106 = arith.constant dense<0xFF800000> : vector<8xf32>
    %376 = vector.multi_reduction <maximumf>, %375, %cst_106 [1] : vector<8x8xf32> to vector<8xf32>
    %377 = vector.shape_cast %376 : vector<8xf32> to vector<8x1xf32>
    %378 = vector.broadcast %377 : vector<8x1xf32> to vector<8x8xf32>
    %379 = arith.subf %375, %378 : vector<8x8xf32>
    %380 = math.exp %379 : vector<8x8xf32>
    %cst_107 = arith.constant dense<0.000000e+00> : vector<8xf32>
    %381 = vector.multi_reduction <add>, %380, %cst_107 [1] : vector<8x8xf32> to vector<8xf32>
    %382 = vector.shape_cast %381 : vector<8xf32> to vector<8x1xf32>
    %383 = tpu.reciprocal %382 {approx = true} : vector<8x1xf32> -> vector<8x1xf32>
    %384 = vector.broadcast %383 : vector<8x1xf32> to vector<8x8xf32>
    %385 = arith.mulf %380, %384 : vector<8x8xf32>
    %386 = arith.truncf %385 : vector<8x8xf32> to vector<8x8xbf16>
    %387 = arith.truncf %368 : vector<8x32xf32> to vector<8x32xbf16>
    %cst_108 = arith.constant dense<0.000000e+00> : vector<8x32xf32>
    %388 = tpu.matmul %386, %387, %cst_108 {dimension_numbers = #tpu.dot_dimension_numbers<[1], [0], [0], [1], [0, 0, 1, 1], [], []>} : vector<8x8xbf16>, vector<8x32xbf16>, vector<8x32xf32> -> vector<8x32xf32>
    %389 = vector.extract_strided_slice %319 {offsets = [0, 96], sizes = [8, 32], strides = [1, 1]} : vector<8x1152xf32> to vector<8x32xf32>
    %390 = vector.extract_strided_slice %319 {offsets = [0, 480], sizes = [8, 32], strides = [1, 1]} : vector<8x1152xf32> to vector<8x32xf32>
    %391 = vector.extract_strided_slice %319 {offsets = [0, 864], sizes = [8, 32], strides = [1, 1]} : vector<8x1152xf32> to vector<8x32xf32>
    %392 = arith.truncf %389 : vector<8x32xf32> to vector<8x32xbf16>
    %393 = arith.truncf %390 : vector<8x32xf32> to vector<8x32xbf16>
    %cst_109 = arith.constant dense<0.000000e+00> : vector<8x8xf32>
    %394 = tpu.matmul %392, %393, %cst_109 {dimension_numbers = #tpu.dot_dimension_numbers<[1], [1], [0], [0], [0, 0, 1, 0], [], []>} : vector<8x32xbf16>, vector<8x32xbf16>, vector<8x8xf32> -> vector<8x8xf32>
    %cst_110 = arith.constant 0.176776692 : f32
    %395 = vector.broadcast %cst_110 : f32 to vector<8x8xf32>
    %396 = arith.mulf %394, %395 : vector<8x8xf32>
    %cst_111 = arith.constant -1.000000e+30 : f32
    %397 = vector.broadcast %cst_111 : f32 to vector<8x8xf32>
    %398 = arith.select %40, %396, %397 : vector<8x8xi1>, vector<8x8xf32>
    %cst_112 = arith.constant dense<0xFF800000> : vector<8xf32>
    %399 = vector.multi_reduction <maximumf>, %398, %cst_112 [1] : vector<8x8xf32> to vector<8xf32>
    %400 = vector.shape_cast %399 : vector<8xf32> to vector<8x1xf32>
    %401 = vector.broadcast %400 : vector<8x1xf32> to vector<8x8xf32>
    %402 = arith.subf %398, %401 : vector<8x8xf32>
    %403 = math.exp %402 : vector<8x8xf32>
    %cst_113 = arith.constant dense<0.000000e+00> : vector<8xf32>
    %404 = vector.multi_reduction <add>, %403, %cst_113 [1] : vector<8x8xf32> to vector<8xf32>
    %405 = vector.shape_cast %404 : vector<8xf32> to vector<8x1xf32>
    %406 = tpu.reciprocal %405 {approx = true} : vector<8x1xf32> -> vector<8x1xf32>
    %407 = vector.broadcast %406 : vector<8x1xf32> to vector<8x8xf32>
    %408 = arith.mulf %403, %407 : vector<8x8xf32>
    %409 = arith.truncf %408 : vector<8x8xf32> to vector<8x8xbf16>
    %410 = arith.truncf %391 : vector<8x32xf32> to vector<8x32xbf16>
    %cst_114 = arith.constant dense<0.000000e+00> : vector<8x32xf32>
    %411 = tpu.matmul %409, %410, %cst_114 {dimension_numbers = #tpu.dot_dimension_numbers<[1], [0], [0], [1], [0, 0, 1, 1], [], []>} : vector<8x8xbf16>, vector<8x32xbf16>, vector<8x32xf32> -> vector<8x32xf32>
    %412 = vector.extract_strided_slice %319 {offsets = [0, 128], sizes = [8, 32], strides = [1, 1]} : vector<8x1152xf32> to vector<8x32xf32>
    %413 = vector.extract_strided_slice %319 {offsets = [0, 512], sizes = [8, 32], strides = [1, 1]} : vector<8x1152xf32> to vector<8x32xf32>
    %414 = vector.extract_strided_slice %319 {offsets = [0, 896], sizes = [8, 32], strides = [1, 1]} : vector<8x1152xf32> to vector<8x32xf32>
    %415 = arith.truncf %412 : vector<8x32xf32> to vector<8x32xbf16>
    %416 = arith.truncf %413 : vector<8x32xf32> to vector<8x32xbf16>
    %cst_115 = arith.constant dense<0.000000e+00> : vector<8x8xf32>
    %417 = tpu.matmul %415, %416, %cst_115 {dimension_numbers = #tpu.dot_dimension_numbers<[1], [1], [0], [0], [0, 0, 1, 0], [], []>} : vector<8x32xbf16>, vector<8x32xbf16>, vector<8x8xf32> -> vector<8x8xf32>
    %cst_116 = arith.constant 0.176776692 : f32
    %418 = vector.broadcast %cst_116 : f32 to vector<8x8xf32>
    %419 = arith.mulf %417, %418 : vector<8x8xf32>
    %cst_117 = arith.constant -1.000000e+30 : f32
    %420 = vector.broadcast %cst_117 : f32 to vector<8x8xf32>
    %421 = arith.select %40, %419, %420 : vector<8x8xi1>, vector<8x8xf32>
    %cst_118 = arith.constant dense<0xFF800000> : vector<8xf32>
    %422 = vector.multi_reduction <maximumf>, %421, %cst_118 [1] : vector<8x8xf32> to vector<8xf32>
    %423 = vector.shape_cast %422 : vector<8xf32> to vector<8x1xf32>
    %424 = vector.broadcast %423 : vector<8x1xf32> to vector<8x8xf32>
    %425 = arith.subf %421, %424 : vector<8x8xf32>
    %426 = math.exp %425 : vector<8x8xf32>
    %cst_119 = arith.constant dense<0.000000e+00> : vector<8xf32>
    %427 = vector.multi_reduction <add>, %426, %cst_119 [1] : vector<8x8xf32> to vector<8xf32>
    %428 = vector.shape_cast %427 : vector<8xf32> to vector<8x1xf32>
    %429 = tpu.reciprocal %428 {approx = true} : vector<8x1xf32> -> vector<8x1xf32>
    %430 = vector.broadcast %429 : vector<8x1xf32> to vector<8x8xf32>
    %431 = arith.mulf %426, %430 : vector<8x8xf32>
    %432 = arith.truncf %431 : vector<8x8xf32> to vector<8x8xbf16>
    %433 = arith.truncf %414 : vector<8x32xf32> to vector<8x32xbf16>
    %cst_120 = arith.constant dense<0.000000e+00> : vector<8x32xf32>
    %434 = tpu.matmul %432, %433, %cst_120 {dimension_numbers = #tpu.dot_dimension_numbers<[1], [0], [0], [1], [0, 0, 1, 1], [], []>} : vector<8x8xbf16>, vector<8x32xbf16>, vector<8x32xf32> -> vector<8x32xf32>
    %435 = vector.extract_strided_slice %319 {offsets = [0, 160], sizes = [8, 32], strides = [1, 1]} : vector<8x1152xf32> to vector<8x32xf32>
    %436 = vector.extract_strided_slice %319 {offsets = [0, 544], sizes = [8, 32], strides = [1, 1]} : vector<8x1152xf32> to vector<8x32xf32>
    %437 = vector.extract_strided_slice %319 {offsets = [0, 928], sizes = [8, 32], strides = [1, 1]} : vector<8x1152xf32> to vector<8x32xf32>
    %438 = arith.truncf %435 : vector<8x32xf32> to vector<8x32xbf16>
    %439 = arith.truncf %436 : vector<8x32xf32> to vector<8x32xbf16>
    %cst_121 = arith.constant dense<0.000000e+00> : vector<8x8xf32>
    %440 = tpu.matmul %438, %439, %cst_121 {dimension_numbers = #tpu.dot_dimension_numbers<[1], [1], [0], [0], [0, 0, 1, 0], [], []>} : vector<8x32xbf16>, vector<8x32xbf16>, vector<8x8xf32> -> vector<8x8xf32>
    %cst_122 = arith.constant 0.176776692 : f32
    %441 = vector.broadcast %cst_122 : f32 to vector<8x8xf32>
    %442 = arith.mulf %440, %441 : vector<8x8xf32>
    %cst_123 = arith.constant -1.000000e+30 : f32
    %443 = vector.broadcast %cst_123 : f32 to vector<8x8xf32>
    %444 = arith.select %40, %442, %443 : vector<8x8xi1>, vector<8x8xf32>
    %cst_124 = arith.constant dense<0xFF800000> : vector<8xf32>
    %445 = vector.multi_reduction <maximumf>, %444, %cst_124 [1] : vector<8x8xf32> to vector<8xf32>
    %446 = vector.shape_cast %445 : vector<8xf32> to vector<8x1xf32>
    %447 = vector.broadcast %446 : vector<8x1xf32> to vector<8x8xf32>
    %448 = arith.subf %444, %447 : vector<8x8xf32>
    %449 = math.exp %448 : vector<8x8xf32>
    %cst_125 = arith.constant dense<0.000000e+00> : vector<8xf32>
    %450 = vector.multi_reduction <add>, %449, %cst_125 [1] : vector<8x8xf32> to vector<8xf32>
    %451 = vector.shape_cast %450 : vector<8xf32> to vector<8x1xf32>
    %452 = tpu.reciprocal %451 {approx = true} : vector<8x1xf32> -> vector<8x1xf32>
    %453 = vector.broadcast %452 : vector<8x1xf32> to vector<8x8xf32>
    %454 = arith.mulf %449, %453 : vector<8x8xf32>
    %455 = arith.truncf %454 : vector<8x8xf32> to vector<8x8xbf16>
    %456 = arith.truncf %437 : vector<8x32xf32> to vector<8x32xbf16>
    %cst_126 = arith.constant dense<0.000000e+00> : vector<8x32xf32>
    %457 = tpu.matmul %455, %456, %cst_126 {dimension_numbers = #tpu.dot_dimension_numbers<[1], [0], [0], [1], [0, 0, 1, 1], [], []>} : vector<8x8xbf16>, vector<8x32xbf16>, vector<8x32xf32> -> vector<8x32xf32>
    %458 = vector.extract_strided_slice %319 {offsets = [0, 192], sizes = [8, 32], strides = [1, 1]} : vector<8x1152xf32> to vector<8x32xf32>
    %459 = vector.extract_strided_slice %319 {offsets = [0, 576], sizes = [8, 32], strides = [1, 1]} : vector<8x1152xf32> to vector<8x32xf32>
    %460 = vector.extract_strided_slice %319 {offsets = [0, 960], sizes = [8, 32], strides = [1, 1]} : vector<8x1152xf32> to vector<8x32xf32>
    %461 = arith.truncf %458 : vector<8x32xf32> to vector<8x32xbf16>
    %462 = arith.truncf %459 : vector<8x32xf32> to vector<8x32xbf16>
    %cst_127 = arith.constant dense<0.000000e+00> : vector<8x8xf32>
    %463 = tpu.matmul %461, %462, %cst_127 {dimension_numbers = #tpu.dot_dimension_numbers<[1], [1], [0], [0], [0, 0, 1, 0], [], []>} : vector<8x32xbf16>, vector<8x32xbf16>, vector<8x8xf32> -> vector<8x8xf32>
    %cst_128 = arith.constant 0.176776692 : f32
    %464 = vector.broadcast %cst_128 : f32 to vector<8x8xf32>
    %465 = arith.mulf %463, %464 : vector<8x8xf32>
    %cst_129 = arith.constant -1.000000e+30 : f32
    %466 = vector.broadcast %cst_129 : f32 to vector<8x8xf32>
    %467 = arith.select %40, %465, %466 : vector<8x8xi1>, vector<8x8xf32>
    %cst_130 = arith.constant dense<0xFF800000> : vector<8xf32>
    %468 = vector.multi_reduction <maximumf>, %467, %cst_130 [1] : vector<8x8xf32> to vector<8xf32>
    %469 = vector.shape_cast %468 : vector<8xf32> to vector<8x1xf32>
    %470 = vector.broadcast %469 : vector<8x1xf32> to vector<8x8xf32>
    %471 = arith.subf %467, %470 : vector<8x8xf32>
    %472 = math.exp %471 : vector<8x8xf32>
    %cst_131 = arith.constant dense<0.000000e+00> : vector<8xf32>
    %473 = vector.multi_reduction <add>, %472, %cst_131 [1] : vector<8x8xf32> to vector<8xf32>
    %474 = vector.shape_cast %473 : vector<8xf32> to vector<8x1xf32>
    %475 = tpu.reciprocal %474 {approx = true} : vector<8x1xf32> -> vector<8x1xf32>
    %476 = vector.broadcast %475 : vector<8x1xf32> to vector<8x8xf32>
    %477 = arith.mulf %472, %476 : vector<8x8xf32>
    %478 = arith.truncf %477 : vector<8x8xf32> to vector<8x8xbf16>
    %479 = arith.truncf %460 : vector<8x32xf32> to vector<8x32xbf16>
    %cst_132 = arith.constant dense<0.000000e+00> : vector<8x32xf32>
    %480 = tpu.matmul %478, %479, %cst_132 {dimension_numbers = #tpu.dot_dimension_numbers<[1], [0], [0], [1], [0, 0, 1, 1], [], []>} : vector<8x8xbf16>, vector<8x32xbf16>, vector<8x32xf32> -> vector<8x32xf32>
    %481 = vector.extract_strided_slice %319 {offsets = [0, 224], sizes = [8, 32], strides = [1, 1]} : vector<8x1152xf32> to vector<8x32xf32>
    %482 = vector.extract_strided_slice %319 {offsets = [0, 608], sizes = [8, 32], strides = [1, 1]} : vector<8x1152xf32> to vector<8x32xf32>
    %483 = vector.extract_strided_slice %319 {offsets = [0, 992], sizes = [8, 32], strides = [1, 1]} : vector<8x1152xf32> to vector<8x32xf32>
    %484 = arith.truncf %481 : vector<8x32xf32> to vector<8x32xbf16>
    %485 = arith.truncf %482 : vector<8x32xf32> to vector<8x32xbf16>
    %cst_133 = arith.constant dense<0.000000e+00> : vector<8x8xf32>
    %486 = tpu.matmul %484, %485, %cst_133 {dimension_numbers = #tpu.dot_dimension_numbers<[1], [1], [0], [0], [0, 0, 1, 0], [], []>} : vector<8x32xbf16>, vector<8x32xbf16>, vector<8x8xf32> -> vector<8x8xf32>
    %cst_134 = arith.constant 0.176776692 : f32
    %487 = vector.broadcast %cst_134 : f32 to vector<8x8xf32>
    %488 = arith.mulf %486, %487 : vector<8x8xf32>
    %cst_135 = arith.constant -1.000000e+30 : f32
    %489 = vector.broadcast %cst_135 : f32 to vector<8x8xf32>
    %490 = arith.select %40, %488, %489 : vector<8x8xi1>, vector<8x8xf32>
    %cst_136 = arith.constant dense<0xFF800000> : vector<8xf32>
    %491 = vector.multi_reduction <maximumf>, %490, %cst_136 [1] : vector<8x8xf32> to vector<8xf32>
    %492 = vector.shape_cast %491 : vector<8xf32> to vector<8x1xf32>
    %493 = vector.broadcast %492 : vector<8x1xf32> to vector<8x8xf32>
    %494 = arith.subf %490, %493 : vector<8x8xf32>
    %495 = math.exp %494 : vector<8x8xf32>
    %cst_137 = arith.constant dense<0.000000e+00> : vector<8xf32>
    %496 = vector.multi_reduction <add>, %495, %cst_137 [1] : vector<8x8xf32> to vector<8xf32>
    %497 = vector.shape_cast %496 : vector<8xf32> to vector<8x1xf32>
    %498 = tpu.reciprocal %497 {approx = true} : vector<8x1xf32> -> vector<8x1xf32>
    %499 = vector.broadcast %498 : vector<8x1xf32> to vector<8x8xf32>
    %500 = arith.mulf %495, %499 : vector<8x8xf32>
    %501 = arith.truncf %500 : vector<8x8xf32> to vector<8x8xbf16>
    %502 = arith.truncf %483 : vector<8x32xf32> to vector<8x32xbf16>
    %cst_138 = arith.constant dense<0.000000e+00> : vector<8x32xf32>
    %503 = tpu.matmul %501, %502, %cst_138 {dimension_numbers = #tpu.dot_dimension_numbers<[1], [0], [0], [1], [0, 0, 1, 1], [], []>} : vector<8x8xbf16>, vector<8x32xbf16>, vector<8x32xf32> -> vector<8x32xf32>
    %504 = vector.extract_strided_slice %319 {offsets = [0, 256], sizes = [8, 32], strides = [1, 1]} : vector<8x1152xf32> to vector<8x32xf32>
    %505 = vector.extract_strided_slice %319 {offsets = [0, 640], sizes = [8, 32], strides = [1, 1]} : vector<8x1152xf32> to vector<8x32xf32>
    %506 = vector.extract_strided_slice %319 {offsets = [0, 1024], sizes = [8, 32], strides = [1, 1]} : vector<8x1152xf32> to vector<8x32xf32>
    %507 = arith.truncf %504 : vector<8x32xf32> to vector<8x32xbf16>
    %508 = arith.truncf %505 : vector<8x32xf32> to vector<8x32xbf16>
    %cst_139 = arith.constant dense<0.000000e+00> : vector<8x8xf32>
    %509 = tpu.matmul %507, %508, %cst_139 {dimension_numbers = #tpu.dot_dimension_numbers<[1], [1], [0], [0], [0, 0, 1, 0], [], []>} : vector<8x32xbf16>, vector<8x32xbf16>, vector<8x8xf32> -> vector<8x8xf32>
    %cst_140 = arith.constant 0.176776692 : f32
    %510 = vector.broadcast %cst_140 : f32 to vector<8x8xf32>
    %511 = arith.mulf %509, %510 : vector<8x8xf32>
    %cst_141 = arith.constant -1.000000e+30 : f32
    %512 = vector.broadcast %cst_141 : f32 to vector<8x8xf32>
    %513 = arith.select %40, %511, %512 : vector<8x8xi1>, vector<8x8xf32>
    %cst_142 = arith.constant dense<0xFF800000> : vector<8xf32>
    %514 = vector.multi_reduction <maximumf>, %513, %cst_142 [1] : vector<8x8xf32> to vector<8xf32>
    %515 = vector.shape_cast %514 : vector<8xf32> to vector<8x1xf32>
    %516 = vector.broadcast %515 : vector<8x1xf32> to vector<8x8xf32>
    %517 = arith.subf %513, %516 : vector<8x8xf32>
    %518 = math.exp %517 : vector<8x8xf32>
    %cst_143 = arith.constant dense<0.000000e+00> : vector<8xf32>
    %519 = vector.multi_reduction <add>, %518, %cst_143 [1] : vector<8x8xf32> to vector<8xf32>
    %520 = vector.shape_cast %519 : vector<8xf32> to vector<8x1xf32>
    %521 = tpu.reciprocal %520 {approx = true} : vector<8x1xf32> -> vector<8x1xf32>
    %522 = vector.broadcast %521 : vector<8x1xf32> to vector<8x8xf32>
    %523 = arith.mulf %518, %522 : vector<8x8xf32>
    %524 = arith.truncf %523 : vector<8x8xf32> to vector<8x8xbf16>
    %525 = arith.truncf %506 : vector<8x32xf32> to vector<8x32xbf16>
    %cst_144 = arith.constant dense<0.000000e+00> : vector<8x32xf32>
    %526 = tpu.matmul %524, %525, %cst_144 {dimension_numbers = #tpu.dot_dimension_numbers<[1], [0], [0], [1], [0, 0, 1, 1], [], []>} : vector<8x8xbf16>, vector<8x32xbf16>, vector<8x32xf32> -> vector<8x32xf32>
    %527 = vector.extract_strided_slice %319 {offsets = [0, 288], sizes = [8, 32], strides = [1, 1]} : vector<8x1152xf32> to vector<8x32xf32>
    %528 = vector.extract_strided_slice %319 {offsets = [0, 672], sizes = [8, 32], strides = [1, 1]} : vector<8x1152xf32> to vector<8x32xf32>
    %529 = vector.extract_strided_slice %319 {offsets = [0, 1056], sizes = [8, 32], strides = [1, 1]} : vector<8x1152xf32> to vector<8x32xf32>
    %530 = arith.truncf %527 : vector<8x32xf32> to vector<8x32xbf16>
    %531 = arith.truncf %528 : vector<8x32xf32> to vector<8x32xbf16>
    %cst_145 = arith.constant dense<0.000000e+00> : vector<8x8xf32>
    %532 = tpu.matmul %530, %531, %cst_145 {dimension_numbers = #tpu.dot_dimension_numbers<[1], [1], [0], [0], [0, 0, 1, 0], [], []>} : vector<8x32xbf16>, vector<8x32xbf16>, vector<8x8xf32> -> vector<8x8xf32>
    %cst_146 = arith.constant 0.176776692 : f32
    %533 = vector.broadcast %cst_146 : f32 to vector<8x8xf32>
    %534 = arith.mulf %532, %533 : vector<8x8xf32>
    %cst_147 = arith.constant -1.000000e+30 : f32
    %535 = vector.broadcast %cst_147 : f32 to vector<8x8xf32>
    %536 = arith.select %40, %534, %535 : vector<8x8xi1>, vector<8x8xf32>
    %cst_148 = arith.constant dense<0xFF800000> : vector<8xf32>
    %537 = vector.multi_reduction <maximumf>, %536, %cst_148 [1] : vector<8x8xf32> to vector<8xf32>
    %538 = vector.shape_cast %537 : vector<8xf32> to vector<8x1xf32>
    %539 = vector.broadcast %538 : vector<8x1xf32> to vector<8x8xf32>
    %540 = arith.subf %536, %539 : vector<8x8xf32>
    %541 = math.exp %540 : vector<8x8xf32>
    %cst_149 = arith.constant dense<0.000000e+00> : vector<8xf32>
    %542 = vector.multi_reduction <add>, %541, %cst_149 [1] : vector<8x8xf32> to vector<8xf32>
    %543 = vector.shape_cast %542 : vector<8xf32> to vector<8x1xf32>
    %544 = tpu.reciprocal %543 {approx = true} : vector<8x1xf32> -> vector<8x1xf32>
    %545 = vector.broadcast %544 : vector<8x1xf32> to vector<8x8xf32>
    %546 = arith.mulf %541, %545 : vector<8x8xf32>
    %547 = arith.truncf %546 : vector<8x8xf32> to vector<8x8xbf16>
    %548 = arith.truncf %529 : vector<8x32xf32> to vector<8x32xbf16>
    %cst_150 = arith.constant dense<0.000000e+00> : vector<8x32xf32>
    %549 = tpu.matmul %547, %548, %cst_150 {dimension_numbers = #tpu.dot_dimension_numbers<[1], [0], [0], [1], [0, 0, 1, 1], [], []>} : vector<8x8xbf16>, vector<8x32xbf16>, vector<8x32xf32> -> vector<8x32xf32>
    %550 = vector.extract_strided_slice %319 {offsets = [0, 320], sizes = [8, 32], strides = [1, 1]} : vector<8x1152xf32> to vector<8x32xf32>
    %551 = vector.extract_strided_slice %319 {offsets = [0, 704], sizes = [8, 32], strides = [1, 1]} : vector<8x1152xf32> to vector<8x32xf32>
    %552 = vector.extract_strided_slice %319 {offsets = [0, 1088], sizes = [8, 32], strides = [1, 1]} : vector<8x1152xf32> to vector<8x32xf32>
    %553 = arith.truncf %550 : vector<8x32xf32> to vector<8x32xbf16>
    %554 = arith.truncf %551 : vector<8x32xf32> to vector<8x32xbf16>
    %cst_151 = arith.constant dense<0.000000e+00> : vector<8x8xf32>
    %555 = tpu.matmul %553, %554, %cst_151 {dimension_numbers = #tpu.dot_dimension_numbers<[1], [1], [0], [0], [0, 0, 1, 0], [], []>} : vector<8x32xbf16>, vector<8x32xbf16>, vector<8x8xf32> -> vector<8x8xf32>
    %cst_152 = arith.constant 0.176776692 : f32
    %556 = vector.broadcast %cst_152 : f32 to vector<8x8xf32>
    %557 = arith.mulf %555, %556 : vector<8x8xf32>
    %cst_153 = arith.constant -1.000000e+30 : f32
    %558 = vector.broadcast %cst_153 : f32 to vector<8x8xf32>
    %559 = arith.select %40, %557, %558 : vector<8x8xi1>, vector<8x8xf32>
    %cst_154 = arith.constant dense<0xFF800000> : vector<8xf32>
    %560 = vector.multi_reduction <maximumf>, %559, %cst_154 [1] : vector<8x8xf32> to vector<8xf32>
    %561 = vector.shape_cast %560 : vector<8xf32> to vector<8x1xf32>
    %562 = vector.broadcast %561 : vector<8x1xf32> to vector<8x8xf32>
    %563 = arith.subf %559, %562 : vector<8x8xf32>
    %564 = math.exp %563 : vector<8x8xf32>
    %cst_155 = arith.constant dense<0.000000e+00> : vector<8xf32>
    %565 = vector.multi_reduction <add>, %564, %cst_155 [1] : vector<8x8xf32> to vector<8xf32>
    %566 = vector.shape_cast %565 : vector<8xf32> to vector<8x1xf32>
    %567 = tpu.reciprocal %566 {approx = true} : vector<8x1xf32> -> vector<8x1xf32>
    %568 = vector.broadcast %567 : vector<8x1xf32> to vector<8x8xf32>
    %569 = arith.mulf %564, %568 : vector<8x8xf32>
    %570 = arith.truncf %569 : vector<8x8xf32> to vector<8x8xbf16>
    %571 = arith.truncf %552 : vector<8x32xf32> to vector<8x32xbf16>
    %cst_156 = arith.constant dense<0.000000e+00> : vector<8x32xf32>
    %572 = tpu.matmul %570, %571, %cst_156 {dimension_numbers = #tpu.dot_dimension_numbers<[1], [0], [0], [1], [0, 0, 1, 1], [], []>} : vector<8x8xbf16>, vector<8x32xbf16>, vector<8x32xf32> -> vector<8x32xf32>
    %573 = vector.extract_strided_slice %319 {offsets = [0, 352], sizes = [8, 32], strides = [1, 1]} : vector<8x1152xf32> to vector<8x32xf32>
    %574 = vector.extract_strided_slice %319 {offsets = [0, 736], sizes = [8, 32], strides = [1, 1]} : vector<8x1152xf32> to vector<8x32xf32>
    %575 = vector.extract_strided_slice %319 {offsets = [0, 1120], sizes = [8, 32], strides = [1, 1]} : vector<8x1152xf32> to vector<8x32xf32>
    %576 = arith.truncf %573 : vector<8x32xf32> to vector<8x32xbf16>
    %577 = arith.truncf %574 : vector<8x32xf32> to vector<8x32xbf16>
    %cst_157 = arith.constant dense<0.000000e+00> : vector<8x8xf32>
    %578 = tpu.matmul %576, %577, %cst_157 {dimension_numbers = #tpu.dot_dimension_numbers<[1], [1], [0], [0], [0, 0, 1, 0], [], []>} : vector<8x32xbf16>, vector<8x32xbf16>, vector<8x8xf32> -> vector<8x8xf32>
    %cst_158 = arith.constant 0.176776692 : f32
    %579 = vector.broadcast %cst_158 : f32 to vector<8x8xf32>
    %580 = arith.mulf %578, %579 : vector<8x8xf32>
    %cst_159 = arith.constant -1.000000e+30 : f32
    %581 = vector.broadcast %cst_159 : f32 to vector<8x8xf32>
    %582 = arith.select %40, %580, %581 : vector<8x8xi1>, vector<8x8xf32>
    %cst_160 = arith.constant dense<0xFF800000> : vector<8xf32>
    %583 = vector.multi_reduction <maximumf>, %582, %cst_160 [1] : vector<8x8xf32> to vector<8xf32>
    %584 = vector.shape_cast %583 : vector<8xf32> to vector<8x1xf32>
    %585 = vector.broadcast %584 : vector<8x1xf32> to vector<8x8xf32>
    %586 = arith.subf %582, %585 : vector<8x8xf32>
    %587 = math.exp %586 : vector<8x8xf32>
    %cst_161 = arith.constant dense<0.000000e+00> : vector<8xf32>
    %588 = vector.multi_reduction <add>, %587, %cst_161 [1] : vector<8x8xf32> to vector<8xf32>
    %589 = vector.shape_cast %588 : vector<8xf32> to vector<8x1xf32>
    %590 = tpu.reciprocal %589 {approx = true} : vector<8x1xf32> -> vector<8x1xf32>
    %591 = vector.broadcast %590 : vector<8x1xf32> to vector<8x8xf32>
    %592 = arith.mulf %587, %591 : vector<8x8xf32>
    %593 = arith.truncf %592 : vector<8x8xf32> to vector<8x8xbf16>
    %594 = arith.truncf %575 : vector<8x32xf32> to vector<8x32xbf16>
    %cst_162 = arith.constant dense<0.000000e+00> : vector<8x32xf32>
    %595 = tpu.matmul %593, %594, %cst_162 {dimension_numbers = #tpu.dot_dimension_numbers<[1], [0], [0], [1], [0, 0, 1, 1], [], []>} : vector<8x8xbf16>, vector<8x32xbf16>, vector<8x32xf32> -> vector<8x32xf32>
    %596 = tpu.concatenate %342, %365, %388, %411, %434, %457, %480, %503, %526, %549, %572, %595 in 1 : vector<8x32xf32>, vector<8x32xf32>, vector<8x32xf32>, vector<8x32xf32>, vector<8x32xf32>, vector<8x32xf32>, vector<8x32xf32>, vector<8x32xf32>, vector<8x32xf32>, vector<8x32xf32>, vector<8x32xf32>, vector<8x32xf32> -> vector<8x384xf32>
    %597 = tpu.concatenate %318, %596 in 0 : vector<8x384xf32>, vector<8x384xf32> -> vector<16x384xf32>
    %598 = arith.truncf %597 : vector<16x384xf32> to vector<16x384xbf16>
    %c0_163 = arith.constant 0 : index
    %c0_164 = arith.constant 0 : index
    %c0_165 = arith.constant 0 : index
    %599 = vector.load %arg8[%c0_163, %c0_164, %c0_165] : memref<1x384x384xbf16, #tpu.memory_space<vmem>>, vector<1x384x384xbf16>
    %600 = vector.shape_cast %599 : vector<1x384x384xbf16> to vector<384x384xbf16>
    %cst_166 = arith.constant dense<0.000000e+00> : vector<16x384xf32>
    %601 = tpu.matmul %598, %600, %cst_166 {dimension_numbers = #tpu.dot_dimension_numbers<[1], [0], [0], [1], [0, 0, 1, 1], [], []>} : vector<16x384xbf16>, vector<384x384xbf16>, vector<16x384xf32> -> vector<16x384xf32>
    %c0_167 = arith.constant 0 : index
    %c0_168 = arith.constant 0 : index
    %c0_169 = arith.constant 0 : index
    %602 = vector.load %arg9[%c0_167, %c0_168, %c0_169] : memref<1x1x384xf32, #tpu.memory_space<vmem>>, vector<1x1x384xf32>
    %603 = vector.shape_cast %602 : vector<1x1x384xf32> to vector<1x384xf32>
    %604 = vector.broadcast %603 : vector<1x384xf32> to vector<16x384xf32>
    %605 = arith.addf %601, %604 : vector<16x384xf32>
    %606 = arith.addf %3, %605 : vector<16x384xf32>
    %c0_170 = arith.constant 0 : index
    %c0_171 = arith.constant 0 : index
    %c0_172 = arith.constant 0 : index
    %607 = vector.load %arg10[%c0_170, %c0_171, %c0_172] : memref<1x1x384xf32, #tpu.memory_space<vmem>>, vector<1x1x384xf32>
    %608 = vector.shape_cast %607 : vector<1x1x384xf32> to vector<1x384xf32>
    %c0_173 = arith.constant 0 : index
    %c0_174 = arith.constant 0 : index
    %c0_175 = arith.constant 0 : index
    %609 = vector.load %arg11[%c0_173, %c0_174, %c0_175] : memref<1x1x384xf32, #tpu.memory_space<vmem>>, vector<1x1x384xf32>
    %610 = vector.shape_cast %609 : vector<1x1x384xf32> to vector<1x384xf32>
    %cst_176 = arith.constant dense<0.000000e+00> : vector<16xf32>
    %611 = vector.multi_reduction <add>, %606, %cst_176 [1] : vector<16x384xf32> to vector<16xf32>
    %612 = vector.shape_cast %611 : vector<16xf32> to vector<16x1xf32>
    %cst_177 = arith.constant 3.840000e+02 : f32
    %613 = vector.broadcast %cst_177 : f32 to vector<16x1xf32>
    %614 = arith.divf %612, %613 : vector<16x1xf32>
    %615 = vector.broadcast %614 : vector<16x1xf32> to vector<16x384xf32>
    %616 = arith.subf %606, %615 : vector<16x384xf32>
    %617 = arith.mulf %616, %616 : vector<16x384xf32>
    %cst_178 = arith.constant dense<0.000000e+00> : vector<16xf32>
    %618 = vector.multi_reduction <add>, %617, %cst_178 [1] : vector<16x384xf32> to vector<16xf32>
    %619 = vector.shape_cast %618 : vector<16xf32> to vector<16x1xf32>
    %cst_179 = arith.constant 3.840000e+02 : f32
    %620 = vector.broadcast %cst_179 : f32 to vector<16x1xf32>
    %621 = arith.divf %619, %620 : vector<16x1xf32>
    %622 = vector.broadcast %614 : vector<16x1xf32> to vector<16x384xf32>
    %623 = arith.subf %606, %622 : vector<16x384xf32>
    %cst_180 = arith.constant 9.99999997E-7 : f32
    %624 = vector.broadcast %cst_180 : f32 to vector<16x1xf32>
    %625 = arith.addf %621, %624 : vector<16x1xf32>
    %626 = math.rsqrt %625 : vector<16x1xf32>
    %627 = vector.broadcast %626 : vector<16x1xf32> to vector<16x384xf32>
    %628 = arith.mulf %623, %627 : vector<16x384xf32>
    %629 = vector.broadcast %608 : vector<1x384xf32> to vector<16x384xf32>
    %630 = arith.mulf %628, %629 : vector<16x384xf32>
    %631 = vector.broadcast %610 : vector<1x384xf32> to vector<16x384xf32>
    %632 = arith.addf %630, %631 : vector<16x384xf32>
    %633 = arith.truncf %632 : vector<16x384xf32> to vector<16x384xbf16>
    %c0_181 = arith.constant 0 : index
    %c0_182 = arith.constant 0 : index
    %c0_183 = arith.constant 0 : index
    %634 = vector.load %arg12[%c0_181, %c0_182, %c0_183] : memref<1x384x1536xbf16, #tpu.memory_space<vmem>>, vector<1x384x1536xbf16>
    %635 = vector.shape_cast %634 : vector<1x384x1536xbf16> to vector<384x1536xbf16>
    %cst_184 = arith.constant dense<0.000000e+00> : vector<16x1536xf32>
    %636 = tpu.matmul %633, %635, %cst_184 {dimension_numbers = #tpu.dot_dimension_numbers<[1], [0], [0], [1], [0, 0, 1, 1], [], []>} : vector<16x384xbf16>, vector<384x1536xbf16>, vector<16x1536xf32> -> vector<16x1536xf32>
    %c0_185 = arith.constant 0 : index
    %c0_186 = arith.constant 0 : index
    %c0_187 = arith.constant 0 : index
    %637 = vector.load %arg13[%c0_185, %c0_186, %c0_187] : memref<1x1x1536xf32, #tpu.memory_space<vmem>>, vector<1x1x1536xf32>
    %638 = vector.shape_cast %637 : vector<1x1x1536xf32> to vector<1x1536xf32>
    %639 = vector.broadcast %638 : vector<1x1536xf32> to vector<16x1536xf32>
    %640 = arith.addf %636, %639 : vector<16x1536xf32>
    %cst_188 = arith.constant 5.000000e-01 : f32
    %641 = vector.broadcast %cst_188 : f32 to vector<16x1536xf32>
    %642 = arith.mulf %641, %640 : vector<16x1536xf32>
    %cst_189 = arith.constant 0.707106769 : f32
    %643 = vector.broadcast %cst_189 : f32 to vector<16x1536xf32>
    %644 = arith.mulf %640, %643 : vector<16x1536xf32>
    %645 = math.erf %644 : vector<16x1536xf32>
    %cst_190 = arith.constant 1.000000e+00 : f32
    %646 = vector.broadcast %cst_190 : f32 to vector<16x1536xf32>
    %647 = arith.addf %646, %645 : vector<16x1536xf32>
    %648 = arith.mulf %642, %647 : vector<16x1536xf32>
    %649 = arith.truncf %648 : vector<16x1536xf32> to vector<16x1536xbf16>
    %c0_191 = arith.constant 0 : index
    %c0_192 = arith.constant 0 : index
    %c0_193 = arith.constant 0 : index
    %650 = vector.load %arg14[%c0_191, %c0_192, %c0_193] : memref<1x1536x384xbf16, #tpu.memory_space<vmem>>, vector<1x1536x384xbf16>
    %651 = vector.shape_cast %650 : vector<1x1536x384xbf16> to vector<1536x384xbf16>
    %cst_194 = arith.constant dense<0.000000e+00> : vector<16x384xf32>
    %652 = tpu.matmul %649, %651, %cst_194 {dimension_numbers = #tpu.dot_dimension_numbers<[1], [0], [0], [1], [0, 0, 1, 1], [], []>} : vector<16x1536xbf16>, vector<1536x384xbf16>, vector<16x384xf32> -> vector<16x384xf32>
    %c0_195 = arith.constant 0 : index
    %c0_196 = arith.constant 0 : index
    %c0_197 = arith.constant 0 : index
    %653 = vector.load %arg15[%c0_195, %c0_196, %c0_197] : memref<1x1x384xf32, #tpu.memory_space<vmem>>, vector<1x1x384xf32>
    %654 = vector.shape_cast %653 : vector<1x1x384xf32> to vector<1x384xf32>
    %655 = vector.broadcast %654 : vector<1x384xf32> to vector<16x384xf32>
    %656 = arith.addf %652, %655 : vector<16x384xf32>
    %657 = arith.addf %606, %656 : vector<16x384xf32>
    %c0_198 = arith.constant 0 : index
    %c0_199 = arith.constant 0 : index
    %658 = vector.load %arg17[%c0_198, %c0_199] : memref<16x384xf32, #tpu.memory_space<vmem>>, vector<16x384xf32>
    tpu.vector_store %arg17[%c0_198, %c0_199], %657 {strides = array<i32>} : memref<16x384xf32, #tpu.memory_space<vmem>>, vector<16x384xf32>,
    %c11_i32 = arith.constant 11 : i32
    %659 = arith.cmpi eq, %arg0, %c11_i32 : i32
    %660 = arith.extui %659 : i1 to i32
    %c0_i32_200 = arith.constant 0 : i32
    %661 = arith.cmpi ne, %660, %c0_i32_200 : i32
    scf.if %661 {
      %c0_201 = arith.constant 0 : index
      %c0_202 = arith.constant 0 : index
      %662 = vector.load %arg2[%c0_201, %c0_202] : memref<1x384xf32, #tpu.memory_space<vmem>>, vector<1x384xf32>
      %c0_203 = arith.constant 0 : index
      %c0_204 = arith.constant 0 : index
      %663 = vector.load %arg3[%c0_203, %c0_204] : memref<1x384xf32, #tpu.memory_space<vmem>>, vector<1x384xf32>
      %cst_205 = arith.constant dense<0.000000e+00> : vector<16xf32>
      %664 = vector.multi_reduction <add>, %657, %cst_205 [1] : vector<16x384xf32> to vector<16xf32>
      %665 = vector.shape_cast %664 : vector<16xf32> to vector<16x1xf32>
      %cst_206 = arith.constant 3.840000e+02 : f32
      %666 = vector.broadcast %cst_206 : f32 to vector<16x1xf32>
      %667 = arith.divf %665, %666 : vector<16x1xf32>
      %668 = vector.broadcast %667 : vector<16x1xf32> to vector<16x384xf32>
      %669 = arith.subf %657, %668 : vector<16x384xf32>
      %670 = arith.mulf %669, %669 : vector<16x384xf32>
      %cst_207 = arith.constant dense<0.000000e+00> : vector<16xf32>
      %671 = vector.multi_reduction <add>, %670, %cst_207 [1] : vector<16x384xf32> to vector<16xf32>
      %672 = vector.shape_cast %671 : vector<16xf32> to vector<16x1xf32>
      %cst_208 = arith.constant 3.840000e+02 : f32
      %673 = vector.broadcast %cst_208 : f32 to vector<16x1xf32>
      %674 = arith.divf %672, %673 : vector<16x1xf32>
      %675 = vector.broadcast %667 : vector<16x1xf32> to vector<16x384xf32>
      %676 = arith.subf %657, %675 : vector<16x384xf32>
      %cst_209 = arith.constant 9.99999997E-7 : f32
      %677 = vector.broadcast %cst_209 : f32 to vector<16x1xf32>
      %678 = arith.addf %674, %677 : vector<16x1xf32>
      %679 = math.rsqrt %678 : vector<16x1xf32>
      %680 = vector.broadcast %679 : vector<16x1xf32> to vector<16x384xf32>
      %681 = arith.mulf %676, %680 : vector<16x384xf32>
      %682 = vector.broadcast %662 : vector<1x384xf32> to vector<16x384xf32>
      %683 = arith.mulf %681, %682 : vector<16x384xf32>
      %684 = vector.broadcast %663 : vector<1x384xf32> to vector<16x384xf32>
      %685 = arith.addf %683, %684 : vector<16x384xf32>
      %c0_210 = arith.constant 0 : index
      %c0_211 = arith.constant 0 : index
      %686 = vector.load %arg16[%c0_210, %c0_211] : memref<16x384xf32, #tpu.memory_space<vmem>>, vector<16x384xf32>
      tpu.vector_store %arg16[%c0_210, %c0_211], %685 {strides = array<i32>} : memref<16x384xf32, #tpu.memory_space<vmem>>, vector<16x384xf32>,
    } else {
    }
    return
  }
  func.func @transform_0(%arg0: i32) -> (i32, i32) {
    %c0_i32 = arith.constant 0 : i32
    %c0_i32_0 = arith.constant 0 : i32
    %c0_i32_1 = arith.constant 0 : i32
    return %c0_i32, %c0_i32_0 : i32, i32
  }
  func.func @transform_1(%arg0: i32) -> (i32, i32) {
    %c0_i32 = arith.constant 0 : i32
    %c0_i32_0 = arith.constant 0 : i32
    %c0_i32_1 = arith.constant 0 : i32
    return %c0_i32, %c0_i32_0 : i32, i32
  }
  func.func @transform_2(%arg0: i32) -> (i32, i32) {
    %c0_i32 = arith.constant 0 : i32
    %c0_i32_0 = arith.constant 0 : i32
    %c0_i32_1 = arith.constant 0 : i32
    return %c0_i32, %c0_i32_0 : i32, i32
  }
  func.func @transform_3(%arg0: i32) -> (i32, i32, i32) {
    %c0_i32 = arith.constant 0 : i32
    %c0_i32_0 = arith.constant 0 : i32
    %c0_i32_1 = arith.constant 0 : i32
    return %arg0, %c0_i32, %c0_i32_0 : i32, i32, i32
  }
  func.func @transform_4(%arg0: i32) -> (i32, i32, i32) {
    %c0_i32 = arith.constant 0 : i32
    %c0_i32_0 = arith.constant 0 : i32
    %c0_i32_1 = arith.constant 0 : i32
    return %arg0, %c0_i32, %c0_i32_0 : i32, i32, i32
  }
  func.func @transform_5(%arg0: i32) -> (i32, i32, i32) {
    %c0_i32 = arith.constant 0 : i32
    %c0_i32_0 = arith.constant 0 : i32
    %c0_i32_1 = arith.constant 0 : i32
    return %arg0, %c0_i32, %c0_i32_0 : i32, i32, i32
  }
  func.func @transform_6(%arg0: i32) -> (i32, i32, i32) {
    %c0_i32 = arith.constant 0 : i32
    %c0_i32_0 = arith.constant 0 : i32
    %c0_i32_1 = arith.constant 0 : i32
    return %arg0, %c0_i32, %c0_i32_0 : i32, i32, i32
  }
  func.func @transform_7(%arg0: i32) -> (i32, i32, i32) {
    %c0_i32 = arith.constant 0 : i32
    %c0_i32_0 = arith.constant 0 : i32
    %c0_i32_1 = arith.constant 0 : i32
    return %arg0, %c0_i32, %c0_i32_0 : i32, i32, i32
  }
  func.func @transform_8(%arg0: i32) -> (i32, i32, i32) {
    %c0_i32 = arith.constant 0 : i32
    %c0_i32_0 = arith.constant 0 : i32
    %c0_i32_1 = arith.constant 0 : i32
    return %arg0, %c0_i32, %c0_i32_0 : i32, i32, i32
  }
  func.func @transform_9(%arg0: i32) -> (i32, i32, i32) {
    %c0_i32 = arith.constant 0 : i32
    %c0_i32_0 = arith.constant 0 : i32
    %c0_i32_1 = arith.constant 0 : i32
    return %arg0, %c0_i32, %c0_i32_0 : i32, i32, i32
  }
  func.func @transform_10(%arg0: i32) -> (i32, i32, i32) {
    %c0_i32 = arith.constant 0 : i32
    %c0_i32_0 = arith.constant 0 : i32
    %c0_i32_1 = arith.constant 0 : i32
    return %arg0, %c0_i32, %c0_i32_0 : i32, i32, i32
  }
  func.func @transform_11(%arg0: i32) -> (i32, i32, i32) {
    %c0_i32 = arith.constant 0 : i32
    %c0_i32_0 = arith.constant 0 : i32
    %c0_i32_1 = arith.constant 0 : i32
    return %arg0, %c0_i32, %c0_i32_0 : i32, i32, i32
  }
  func.func @transform_12(%arg0: i32) -> (i32, i32, i32) {
    %c0_i32 = arith.constant 0 : i32
    %c0_i32_0 = arith.constant 0 : i32
    %c0_i32_1 = arith.constant 0 : i32
    return %arg0, %c0_i32, %c0_i32_0 : i32, i32, i32
  }
  func.func @transform_13(%arg0: i32) -> (i32, i32, i32) {
    %c0_i32 = arith.constant 0 : i32
    %c0_i32_0 = arith.constant 0 : i32
    %c0_i32_1 = arith.constant 0 : i32
    return %arg0, %c0_i32, %c0_i32_0 : i32, i32, i32
  }
  func.func @transform_14(%arg0: i32) -> (i32, i32, i32) {
    %c0_i32 = arith.constant 0 : i32
    %c0_i32_0 = arith.constant 0 : i32
    %c0_i32_1 = arith.constant 0 : i32
    return %arg0, %c0_i32, %c0_i32_0 : i32, i32, i32
  }
  func.func @transform_15(%arg0: i32) -> (i32, i32) {
    %c0_i32 = arith.constant 0 : i32
    %c0_i32_0 = arith.constant 0 : i32
    %c0_i32_1 = arith.constant 0 : i32
    return %c0_i32, %c0_i32_0 : i32, i32
  }
}

</mosaic_0001>

<bundles_post_ra>
// kernel: vit_forward.2
= control target key start
LH: loop header
LB: loop body
LE: loop exit
PB: predicated region body
PF: predicated region fallthrough
CT: control target
= control target key end

     0   :  { %8 = vsyncpa [#allocation3], 0  ;;  %s1696_s12 = smov [#allocation2]   ;;  %s1772_s0 = inlined_call_operand.vmem [shape: f32[8,768], index: 0, kind: input, shape index: {}]   ;;  %s1773_s1 = inlined_call_operand.hbm [shape: bf16[768,384], index: 1, kind: input, shape index: {}]   ;;  %s1774_s2 = inlined_call_operand.vmem [shape: f32[1,384], index: 2, kind: input, shape index: {}]   ;;  %s1775_s3 = inlined_call_operand.vmem [shape: f32[8,384], index: 3, kind: output, shape index: {}]  }
   0x1   :  { %s16_s13 = sshll.u32 %s1696_s12, 4  ;;  %s17_s13 = int_to_ptr.vmem [resolvable:$true] %s16_s13 }
   0x2   :  { %s1682_s14 = scalar_lea.vmem %s17_s13, 18432  ;;  %p1687_p1 = scmp.lt.s32.totalorder %s17_s13, %s17_s13 }
   0x3   :  { %p1683_p0 = scmp.ne.s32.totalorder %s17_s13, %s1682_s14  ;;  %p1688_p2 = scmp.lt.s32.totalorder %s1682_s14, %s1682_s14 }
   0x5   :  { %p1689_p3 = por %p1688_p2, %p1687_p1 }
   0x7   :  { %p1690_p4 = pnand %p1689_p3, %p1683_p0 }
   0x9   :  { %1693 = shalt.err (!%p1690_p4)
}
   0xa   :  { %s1697_s15 = smov 192   ;;  %s1698_s16 = smov 12  }
   0xb   :  { %22 = dma.hbm_to_vmem [thread:$0]  %s1773_s1, 18432, %s17_s13, [#allocation3], %s1697_s15, %s1697_s15, %s1698_s16  }
   0xc   :  { %1694 = dma.done.wait [#allocation3], 18432  }
   0xd   :  { %1695 = vsyncadd [#allocation3], 4294948864  ;;  %v1482_v0 = vld [vmem:[#allocation2 + $0xac] ss:$12 sps:$4 sm:$0xff]   ;;  %v1486_v2 = vld [vmem:[#allocation2 + $0xa8] ss:$12 sps:$4 sm:$0xff]  }
   0xe   :  { %v1484_v1 = vld [vmem:[#allocation2 + $0x22c] ss:$12 sps:$4 sm:$0xff]   ;;  %1018 = vmatprep.subr.bf16.mxu0 %v1482_v0  ;;  %v1487_v3 = vld [vmem:[#allocation2 + $0x228] ss:$12 sps:$4 sm:$0xff]   ;;  %v1492_v6 = vld [vmem:[#allocation2 + $0x90] ss:$12 sps:$4 sm:$0xff]  }
   0xf   :  { %1059 = vmatprep.subr.bf16.mxu1 %v1484_v1  ;;  %v1488_v4 = vld [vmem:[#allocation2 + $0x94] ss:$12 sps:$4 sm:$0xff]   ;;  %1019 = vmatpush1.bf16.msra.mxu0 %v1486_v2  ;;  %v1493_v7 = vld [vmem:[#allocation2 + $0x210] ss:$12 sps:$4 sm:$0xff]   ;;  %v1498_v10 = vld [vmem:[#allocation2 + $0x78] ss:$12 sps:$4 sm:$0xff]  }
  0x10   :  { %1060 = vmatpush1.bf16.msra.mxu1 %v1487_v3  ;;  %v1490_v5 = vld [vmem:[#allocation2 + $0x214] ss:$12 sps:$4 sm:$0xff]   ;;  %1020 = vmatprep.subr.bf16.mxu0 %v1488_v4  ;;  %v1494_v8 = vld [vmem:[#allocation2 + $0x7c] ss:$12 sps:$4 sm:$0xff]   ;;  %v1499_v11 = vld [vmem:[#allocation2 + $0x1f8] ss:$12 sps:$4 sm:$0xff]  }
  0x11   :  { %1061 = vmatprep.subr.bf16.mxu1 %v1490_v5  ;;  %v1496_v9 = vld [vmem:[#allocation2 + $0x1fc] ss:$12 sps:$4 sm:$0xff]   ;;  %v1500_v12 = vld [vmem:[#allocation2 + $0x64] ss:$12 sps:$4 sm:$0xff]   ;;  %v1504_v14 = vld [vmem:[#allocation2 + $0x60] ss:$12 sps:$4 sm:$0xff]  }
  0x12   :  { %v1502_v13 = vld [vmem:[#allocation2 + $0x1e4] ss:$12 sps:$4 sm:$0xff]   ;;  %v1505_v15 = vld [vmem:[#allocation2 + $0x1e0] ss:$12 sps:$4 sm:$0xff]   ;;  %v1510_v18 = vld [vmem:[#allocation2 + $0x48] ss:$12 sps:$4 sm:$0xff]  }
  0x13   :  { %1021 = vmatpush1.bf16.msra.mxu0 %v1492_v6  ;;  %v1506_v16 = vld [vmem:[#allocation2 + $0x4c] ss:$12 sps:$4 sm:$0xff]   ;;  %v1511_v19 = vld [vmem:[#allocation2 + $0x1c8] ss:$12 sps:$4 sm:$0xff]   ;;  %v1516_v22 = vld [vmem:[#allocation2 + $0x30] ss:$12 sps:$4 sm:$0xff]  }
  0x14   :  { %1062 = vmatpush1.bf16.msra.mxu1 %v1493_v7  ;;  %1022 = vmatprep.subr.bf16.mxu0 %v1494_v8  ;;  %v1508_v17 = vld [vmem:[#allocation2 + $0x1cc] ss:$12 sps:$4 sm:$0xff]   ;;  %v1512_v20 = vld [vmem:[#allocation2 + $0x34] ss:$12 sps:$4 sm:$0xff]   ;;  %v1517_v23 = vld [vmem:[#allocation2 + $0x1b0] ss:$12 sps:$4 sm:$0xff]  }
  0x15   :  { %1063 = vmatprep.subr.bf16.mxu1 %v1496_v9  ;;  %v1514_v21 = vld [vmem:[#allocation2 + $0x1b4] ss:$12 sps:$4 sm:$0xff]   ;;  %v1518_v24 = vld [vmem:[#allocation2 + $0x1c] ss:$12 sps:$4 sm:$0xff]   ;;  %v1522_v26 = vld [vmem:[#allocation2 + $0x18] ss:$12 sps:$4 sm:$0xff]  }
  0x16   :  { %v1520_v25 = vld [vmem:[#allocation2 + $0x19c] ss:$12 sps:$4 sm:$0xff]   ;;  %v1523_v27 = vld [vmem:[#allocation2 + $0x198] ss:$12 sps:$4 sm:$0xff]   ;;  %v1528_v30 = vld [vmem:[#allocation2] ss:$12 sps:$4 sm:$0xff]  }
  0x17   :  { %1023 = vmatpush1.bf16.msra.mxu0 %v1498_v10  ;;  %v1524_v28 = vld [vmem:[#allocation2 + $0x4] ss:$12 sps:$4 sm:$0xff]   ;;  %v1529_v31 = vld [vmem:[#allocation2 + $0x180] ss:$12 sps:$4 sm:$0xff]   ;;  %v1534_v34 = vld [vmem:[#allocation2 + $0x168] ss:$12 sps:$4 sm:$0xff]  }
  0x18   :  { %1064 = vmatpush1.bf16.msra.mxu1 %v1499_v11  ;;  %1024 = vmatprep.subr.bf16.mxu0 %v1500_v12  ;;  %v1526_v29 = vld [vmem:[#allocation2 + $0x184] ss:$12 sps:$4 sm:$0xff]   ;;  %v1530_v32 = vld [vmem:[#allocation2 + $0x16c] ss:$12 sps:$4 sm:$0xff]   ;;  %v1535_v35 = vld [vmem:[#allocation2 + $0x2e8] ss:$12 sps:$4 sm:$0xff]  }
  0x19   :  { %1065 = vmatprep.subr.bf16.mxu1 %v1502_v13  ;;  %v1532_v33 = vld [vmem:[#allocation2 + $0x2ec] ss:$12 sps:$4 sm:$0xff]   ;;  %v1536_v36 = vld [vmem:[#allocation2 + $0x154] ss:$12 sps:$4 sm:$0xff]   ;;  %v1540_v38 = vld [vmem:[#allocation2 + $0x150] ss:$12 sps:$4 sm:$0xff]  }
  0x1a   :  { %v1538_v37 = vld [vmem:[#allocation2 + $0x2d4] ss:$12 sps:$4 sm:$0xff]   ;;  %v1541_v39 = vld [vmem:[#allocation2 + $0x2d0] ss:$12 sps:$4 sm:$0xff]   ;;  %v1546_v42 = vld [vmem:[#allocation2 + $0x138] ss:$12 sps:$4 sm:$0xff]  }
  0x1b   :  { %1025 = vmatpush1.bf16.msra.mxu0 %v1504_v14  ;;  %v1542_v40 = vld [vmem:[#allocation2 + $0x13c] ss:$12 sps:$4 sm:$0xff]   ;;  %v1547_v43 = vld [vmem:[#allocation2 + $0x2b8] ss:$12 sps:$4 sm:$0xff]   ;;  %v1552_v47 = vld [vmem:[#allocation2 + $0x120] ss:$12 sps:$4 sm:$0xff]  }
  0x1c   :  { %1066 = vmatpush1.bf16.msra.mxu1 %v1505_v15  ;;  %1026 = vmatprep.subr.bf16.mxu0 %v1506_v16  ;;  %v1544_v41 = vld [vmem:[#allocation2 + $0x2bc] ss:$12 sps:$4 sm:$0xff]   ;;  %v1548_v44 = vld [vmem:[#allocation2 + $0x124] ss:$12 sps:$4 sm:$0xff]   ;;  %v1553_v50 = vld [vmem:[#allocation2 + $0x2a0] ss:$12 sps:$4 sm:$0xff]  }
  0x1d   :  { %1067 = vmatprep.subr.bf16.mxu1 %v1508_v17  ;;  %v1550_v45 = vld [vmem:[#allocation2 + $0x2a4] ss:$12 sps:$4 sm:$0xff]   ;;  %v30_v46 = vld [vmem:[%s1772_s0 + $0x8] sm:$0xff]  ;;  %v32_v49 = vld [vmem:[%s1772_s0 + $0x18] sm:$0xff] }
  0x1e   :  { %v1725_v48 = vpack.c.bf16 %v30_v46, %v30_v46  ;;  %v1554_v51 = vld [vmem:[#allocation2 + $0x10c] ss:$12 sps:$4 sm:$0xff]   ;;  %v1730_v52 = vpack.c.bf16 %v32_v49, %v32_v49  ;;  %v1558_v54 = vld [vmem:[#allocation2 + $0x108] ss:$12 sps:$4 sm:$0xff]   ;;  %v1564_v58 = vld [vmem:[#allocation2 + $0xf0] ss:$12 sps:$4 sm:$0xff]  }
  0x1f   :  { %1027 = vmatpush1.bf16.msra.mxu0 %v1510_v18  ;;  %v1556_v53 = vld [vmem:[#allocation2 + $0x28c] ss:$12 sps:$4 sm:$0xff]   ;;  %v1559_v55 = vld [vmem:[#allocation2 + $0x288] ss:$12 sps:$4 sm:$0xff]   ;;  %v1565_v59 = vld [vmem:[#allocation2 + $0x270] ss:$12 sps:$4 sm:$0xff]  }
  0x20   :  { %1068 = vmatpush1.bf16.msra.mxu1 %v1511_v19  ;;  %1028 = vmatprep.subr.bf16.mxu0 %v1512_v20  ;;  %v1560_v56 = vld [vmem:[#allocation2 + $0xf4] ss:$12 sps:$4 sm:$0xff]   ;;  %v1566_v60 = vld [vmem:[#allocation2 + $0xdc] ss:$12 sps:$4 sm:$0xff]   ;;  %v1570_v62 = vld [vmem:[#allocation2 + $0xd8] ss:$12 sps:$4 sm:$0xff]  }
  0x21   :  { %1069 = vmatprep.subr.bf16.mxu1 %v1514_v21  ;;  %1050 = vmatprep.mubr.bf16.mxu0 %v1725_v48  ;;  %v1562_v57 = vld [vmem:[#allocation2 + $0x274] ss:$12 sps:$4 sm:$0xff]   ;;  %v1568_v61 = vld [vmem:[#allocation2 + $0x25c] ss:$12 sps:$4 sm:$0xff]   ;;  %v1571_v63 = vld [vmem:[#allocation2 + $0x258] ss:$12 sps:$4 sm:$0xff]  }
  0x22   :  { %1091 = vmatprep.mubr.bf16.mxu1 %v1730_v52  ;;  %v1572_v0 = vld [vmem:[#allocation2 + $0xc4] ss:$12 sps:$4 sm:$0xff]   ;;  %v1576_v2 = vld [vmem:[#allocation2 + $0xc0] ss:$12 sps:$4 sm:$0xff]   ;;  %v1578_v8 = vld [vmem:[#allocation2 + $0x3a8] ss:$12 sps:$4 sm:$0xff]  }
  0x23   :  { %1029 = vmatpush1.bf16.msra.mxu0 %v1516_v22  ;;  %v1574_v1 = vld [vmem:[#allocation2 + $0x244] ss:$12 sps:$4 sm:$0xff]   ;;  %v1577_v3 = vld [vmem:[#allocation2 + $0x240] ss:$12 sps:$4 sm:$0xff]   ;;  %v1590_v16 = vld [vmem:[#allocation2 + $0x37c] ss:$12 sps:$4 sm:$0xff]  }
  0x24   :  { %1070 = vmatpush1.bf16.msra.mxu1 %v1517_v23  ;;  %1030 = vmatprep.subr.bf16.mxu0 %v1518_v24  ;;  %v29_v4 = vld [vmem:[%s1772_s0] sm:$0xff]  ;;  %v31_v5 = vld [vmem:[%s1772_s0 + $0x10] sm:$0xff]  ;;  %v1580_v6 = vld [vmem:[#allocation2 + $0x3ac] ss:$12 sps:$4 sm:$0xff]  }
  0x25   :  { %1071 = vmatprep.subr.bf16.mxu1 %v1520_v25  ;;  %v1581_v7 = vld [vmem:[#allocation2 + $0x170] ss:$12 sps:$4 sm:$0xff]   ;;  %v1740_v9 = vpack.c.bf16 %v29_v4, %v29_v4  ;;  %v1742_v10 = vpack.c.bf16 %v31_v5, %v31_v5  ;;  %v1585_v12 = vld [vmem:[#allocation2 + $0x394] ss:$12 sps:$4 sm:$0xff]   ;;  %v1586_v13 = vld [vmem:[#allocation2 + $0x158] ss:$12 sps:$4 sm:$0xff]  }
  0x26   :  { %v1582_v11 = vld [vmem:[#allocation2 + $0xb0] ss:$12 sps:$4 sm:$0xff]   ;;  %v1587_v15 = vld [vmem:[#allocation2 + $0x98] ss:$12 sps:$4 sm:$0xff]   ;;  %v1591_v17 = vld [vmem:[#allocation2 + $0x140] ss:$12 sps:$4 sm:$0xff]  }
  0x27   :  { %1031 = vmatpush1.bf16.msra.mxu0 %v1522_v26  ;;  %v1583_v14 = vld [vmem:[#allocation2 + $0x390] ss:$12 sps:$4 sm:$0xff]   ;;  %v1588_v18 = vld [vmem:[#allocation2 + $0x378] ss:$12 sps:$4 sm:$0xff]   ;;  %v1592_v19 = vld [vmem:[#allocation2 + $0x80] ss:$12 sps:$4 sm:$0xff]  }
  0x28   :  { %1072 = vmatpush1.bf16.msra.mxu1 %v1523_v27  ;;  %1032 = vmatprep.subr.bf16.mxu0 %v1524_v28  ;;  %v1595_v20 = vld [vmem:[#allocation2 + $0x364] ss:$12 sps:$4 sm:$0xff]   ;;  %v1596_v21 = vld [vmem:[#allocation2 + $0x128] ss:$12 sps:$4 sm:$0xff]   ;;  %v1593_v22 = vld [vmem:[#allocation2 + $0x360] ss:$12 sps:$4 sm:$0xff]  }
  0x29   :  { %1073 = vmatprep.subr.bf16.mxu1 %v1526_v29  ;;  %v1597_v23 = vld [vmem:[#allocation2 + $0x68] ss:$12 sps:$4 sm:$0xff]   ;;  %v1600_v24 = vld [vmem:[#allocation2 + $0x34c] ss:$12 sps:$4 sm:$0xff]   ;;  %v1601_v25 = vld [vmem:[#allocation2 + $0x110] ss:$12 sps:$4 sm:$0xff]  }
  0x2a   :  { %v1598_v26 = vld [vmem:[#allocation2 + $0x348] ss:$12 sps:$4 sm:$0xff]   ;;  %v1602_v27 = vld [vmem:[#allocation2 + $0x50] ss:$12 sps:$4 sm:$0xff]   ;;  %v1606_v29 = vld [vmem:[#allocation2 + $0xf8] ss:$12 sps:$4 sm:$0xff]  }
  0x2b   :  { %1033 = vmatpush1.bf16.msra.mxu0 %v1528_v30  ;;  %v1605_v28 = vld [vmem:[#allocation2 + $0x334] ss:$12 sps:$4 sm:$0xff]   ;;  %v1603_v30 = vld [vmem:[#allocation2 + $0x330] ss:$12 sps:$4 sm:$0xff]   ;;  %v34_v46 = vld [vmem:[%s1772_s0 + $0x28] sm:$0xff] }
  0x2c   :  { %1074 = vmatpush1.bf16.msra.mxu1 %v1529_v31  ;;  %1034 = vmatprep.subr.bf16.mxu0 %v1530_v32  ;;  %v1607_v31 = vld [vmem:[#allocation2 + $0x38] ss:$12 sps:$4 sm:$0xff]   ;;  %v1610_v32 = vld [vmem:[#allocation2 + $0x31c] ss:$12 sps:$4 sm:$0xff]   ;;  %v1652_v5 = vld [vmem:[#allocation2 + $0x1a0] ss:$12 sps:$4 sm:$0xff]  }
  0x2d   :  { %1075 = vmatprep.subr.bf16.mxu1 %v1532_v33  ;;  %v1611_v33 = vld [vmem:[#allocation2 + $0xe0] ss:$12 sps:$4 sm:$0xff]   ;;  %v1627_v49 = vld [vmem:[#allocation2 + $0x218] ss:$12 sps:$4 sm:$0xff]  }
  0x2e   :  { %v1648_v4 = vld [vmem:[#allocation2 + $0x3d8] ss:$12 sps:$4 sm:$0xff]  }
  0x2f   :  { %1035 = vmatpush2.bf16.msra.mxu0 %v1534_v34  ;;  %v1608_v34 = vld [vmem:[#allocation2 + $0x318] ss:$12 sps:$4 sm:$0xff]  }
  0x30   :  { %1076 = vmatpush2.bf16.msra.mxu1 %v1535_v35  ;;  %1036 = vmatprep.subr.bf16.mxu0 %v1536_v36  ;;  %v1612_v35 = vld [vmem:[#allocation2 + $0x20] ss:$12 sps:$4 sm:$0xff]   ;;  %v1615_v36 = vld [vmem:[#allocation2 + $0x304] ss:$12 sps:$4 sm:$0xff]  }
  0x31   :  { %1077 = vmatprep.subr.bf16.mxu1 %v1538_v37  ;;  %v1616_v37 = vld [vmem:[#allocation2 + $0xc8] ss:$12 sps:$4 sm:$0xff]  }
  0x33   :  { %1037 = vmatpush2.bf16.msra.mxu0 %v1540_v38  ;;  %v1613_v38 = vld [vmem:[#allocation2 + $0x300] ss:$12 sps:$4 sm:$0xff]  }
  0x34   :  { %1078 = vmatpush2.bf16.msra.mxu1 %v1541_v39  ;;  %1038 = vmatprep.subr.bf16.mxu0 %v1542_v40  ;;  %v1617_v39 = vld [vmem:[#allocation2 + $0x8] ss:$12 sps:$4 sm:$0xff]   ;;  %v1620_v40 = vld [vmem:[#allocation2 + $0x46c] ss:$12 sps:$4 sm:$0xff]  }
  0x35   :  { %1079 = vmatprep.subr.bf16.mxu1 %v1544_v41  ;;  %v1621_v41 = vld [vmem:[#allocation2 + $0x2f0] ss:$12 sps:$4 sm:$0xff]  }
  0x37   :  { %1039 = vmatpush2.bf16.msra.mxu0 %v1546_v42  ;;  %v1618_v42 = vld [vmem:[#allocation2 + $0x468] ss:$12 sps:$4 sm:$0xff]  }
  0x38   :  { %1080 = vmatpush2.bf16.msra.mxu1 %v1547_v43  ;;  %1040 = vmatprep.subr.bf16.mxu0 %v1548_v44  ;;  %v1622_v43 = vld [vmem:[#allocation2 + $0x230] ss:$12 sps:$4 sm:$0xff]   ;;  %v1625_v44 = vld [vmem:[#allocation2 + $0x454] ss:$12 sps:$4 sm:$0xff]  }
  0x39   :  { %1081 = vmatprep.subr.bf16.mxu1 %v1550_v45  ;;  %v1626_v45 = vld [vmem:[#allocation2 + $0x2d8] ss:$12 sps:$4 sm:$0xff]  }
  0x3b   :  { %1041 = vmatpush2.bf16.msra.mxu0 %v1552_v47  ;;  %v1623_v47 = vld [vmem:[#allocation2 + $0x450] ss:$12 sps:$4 sm:$0xff]  }
  0x3c   :  { %1082 = vmatpush2.bf16.msra.mxu1 %v1553_v50  ;;  %1042 = vmatprep.subr.bf16.mxu0 %v1554_v51  ;;  %v1630_v50 = vld [vmem:[#allocation2 + $0x43c] ss:$12 sps:$4 sm:$0xff]   ;;  %v1631_v51 = vld [vmem:[#allocation2 + $0x2c0] ss:$12 sps:$4 sm:$0xff]  }
  0x3d   :  { %1083 = vmatprep.subr.bf16.mxu1 %v1556_v53  ;;  %v1628_v53 = vld [vmem:[#allocation2 + $0x438] ss:$12 sps:$4 sm:$0xff]  }
  0x3f   :  { %1043 = vmatpush2.bf16.msra.mxu0 %v1558_v54  ;;  %v1632_v54 = vld [vmem:[#allocation2 + $0x200] ss:$12 sps:$4 sm:$0xff]  }
  0x40   :  { %1084 = vmatpush2.bf16.msra.mxu1 %v1559_v55  ;;  %1044 = vmatprep.subr.bf16.mxu0 %v1560_v56  ;;  %v1635_v55 = vld [vmem:[#allocation2 + $0x424] ss:$12 sps:$4 sm:$0xff]   ;;  %v1636_v56 = vld [vmem:[#allocation2 + $0x2a8] ss:$12 sps:$4 sm:$0xff]  }
  0x41   :  { %1085 = vmatprep.subr.bf16.mxu1 %v1562_v57  ;;  %v1633_v57 = vld [vmem:[#allocation2 + $0x420] ss:$12 sps:$4 sm:$0xff]  }
  0x43   :  { %1045 = vmatpush2.bf16.msra.mxu0 %v1564_v58  ;;  %v1637_v58 = vld [vmem:[#allocation2 + $0x1e8] ss:$12 sps:$4 sm:$0xff]  }
  0x44   :  { %1086 = vmatpush2.bf16.msra.mxu1 %v1565_v59  ;;  %1046 = vmatprep.subr.bf16.mxu0 %v1566_v60  ;;  %v1640_v59 = vld [vmem:[#allocation2 + $0x40c] ss:$12 sps:$4 sm:$0xff]   ;;  %v1641_v60 = vld [vmem:[#allocation2 + $0x290] ss:$12 sps:$4 sm:$0xff]  }
  0x45   :  { %1087 = vmatprep.subr.bf16.mxu1 %v1568_v61  ;;  %v1638_v61 = vld [vmem:[#allocation2 + $0x408] ss:$12 sps:$4 sm:$0xff]  }
  0x47   :  { %1047 = vmatpush2.bf16.msra.mxu0 %v1570_v62  ;;  %v1642_v62 = vld [vmem:[#allocation2 + $0x1d0] ss:$12 sps:$4 sm:$0xff]  }
  0x48   :  { %1088 = vmatpush2.bf16.msra.mxu1 %v1571_v63  ;;  %1048 = vmatprep.subr.bf16.mxu0 %v1572_v0  ;;  %v1646_v63 = vld [vmem:[#allocation2 + $0x278] ss:$12 sps:$4 sm:$0xff]   ;;  %v1643_v0 = vld [vmem:[#allocation2 + $0x3f0] ss:$12 sps:$4 sm:$0xff]  }
  0x49   :  { %1089 = vmatprep.subr.bf16.mxu1 %v1574_v1  ;;  %v1647_v1 = vld [vmem:[#allocation2 + $0x1b8] ss:$12 sps:$4 sm:$0xff]  }
  0x4b   :  { %1049 = vmatpush2.bf16.msra.mxu0 %v1576_v2  ;;  %v1650_v2 = vld [vmem:[#allocation2 + $0x3dc] ss:$12 sps:$4 sm:$0xff]  }
  0x4c   :  { %1090 = vmatpush2.bf16.msra.mxu1 %v1577_v3  ;;  %1100 = vmatprep.subr.bf16.mxu0 %v1580_v6  ;;  %v1651_v3 = vld [vmem:[#allocation2 + $0x260] ss:$12 sps:$4 sm:$0xff]   ;;  %v1655_v6 = vld [vmem:[#allocation2 + $0x3c4] ss:$12 sps:$4 sm:$0xff]  }
  0x4d   :  { %1413 = vmatprep.subr.bf16.mxu1 %v1581_v7  ;;  %v1656_v7 = vld [vmem:[#allocation2 + $0x248] ss:$12 sps:$4 sm:$0xff]  }
  0x4e   :  { %1051 = vmatmul.mubr.bf16.vlgmr.msra.gmra.mxu0 %v1740_v9 }
  0x4f   :  { %1092 = vmatmul.mubr.bf16.vlgmr.msra.gmra.mxu1 %v1742_v10  ;;  %1101 = vmatpush1.bf16.msra.mxu0 %v1578_v8  ;;  %v1653_v8 = vld [vmem:[#allocation2 + $0x3c0] ss:$12 sps:$4 sm:$0xff]  }
  0x50   :  { %1414 = vmatpush3.bf16.msra.mxu1 %v1582_v11  ;;  %1102 = vmatprep.subr.bf16.mxu0 %v1585_v12  ;;  %v33_v11 = vld [vmem:[%s1772_s0 + $0x20] sm:$0xff]  ;;  %v1658_v12 = vld [vmem:[#allocation2 + $0x470] ss:$12 sps:$4 sm:$0xff]  }
  0x51   :  { %1415 = vmatprep.subr.bf16.mxu1 %v1586_v13  ;;  %1173 = vmatprep.mubr.bf16.mxu1 %v1725_v48  ;;  %v1750_v48 = vpack.c.bf16 %v34_v46, %v34_v46  ;;  %v39_v13 = vpack.c.bf16 %v33_v11, %v33_v11 }
  0x53   :  { %1103 = vmatpush1.bf16.msra.mxu0 %v1583_v14  ;;  %1132 = vmatprep.mubr.bf16.mxu0 %v1750_v48  ;;  %v1659_v14 = vld [vmem:[#allocation2 + $0x3b0] ss:$12 sps:$4 sm:$0xff]  }
  0x54   :  { %1416 = vmatpush3.bf16.msra.mxu1 %v1587_v15  ;;  %1104 = vmatprep.subr.bf16.mxu0 %v1590_v16  ;;  %v1660_v15 = vld [vmem:[#allocation2 + $0x458] ss:$12 sps:$4 sm:$0xff]  }
  0x55   :  { %1417 = vmatprep.subr.bf16.mxu1 %v1591_v17  ;;  %v1661_v16 = vld [vmem:[#allocation2 + $0x398] ss:$12 sps:$4 sm:$0xff]   ;;  %v1662_v17 = vld [vmem:[#allocation2 + $0x440] ss:$12 sps:$4 sm:$0xff]  }
  0x57   :  { %1105 = vmatpush1.bf16.msra.mxu0 %v1588_v18  ;;  %v1663_v18 = vld [vmem:[#allocation2 + $0x380] ss:$12 sps:$4 sm:$0xff]  }
  0x58   :  { %1418 = vmatpush3.bf16.msra.mxu1 %v1592_v19  ;;  %1106 = vmatprep.subr.bf16.mxu0 %v1595_v20  ;;  %v1664_v19 = vld [vmem:[#allocation2 + $0x428] ss:$12 sps:$4 sm:$0xff]  }
  0x59   :  { %1419 = vmatprep.subr.bf16.mxu1 %v1596_v21  ;;  %v1665_v20 = vld [vmem:[#allocation2 + $0x368] ss:$12 sps:$4 sm:$0xff]   ;;  %v1666_v21 = vld [vmem:[#allocation2 + $0x410] ss:$12 sps:$4 sm:$0xff]  }
  0x5b   :  { %1107 = vmatpush1.bf16.msra.mxu0 %v1593_v22  ;;  %v1667_v22 = vld [vmem:[#allocation2 + $0x350] ss:$12 sps:$4 sm:$0xff]  }
  0x5c   :  { %1420 = vmatpush3.bf16.msra.mxu1 %v1597_v23  ;;  %1108 = vmatprep.subr.bf16.mxu0 %v1600_v24  ;;  %v1668_v23 = vld [vmem:[#allocation2 + $0x3f8] ss:$12 sps:$4 sm:$0xff]   ;;  %v1670_v24 = vld [vmem:[#allocation2 + $0x3e0] ss:$12 sps:$4 sm:$0xff]  }
  0x5d   :  { %1421 = vmatprep.subr.bf16.mxu1 %v1601_v25  ;;  %v1671_v25 = vld [vmem:[#allocation2 + $0x320] ss:$12 sps:$4 sm:$0xff]  }
  0x5f   :  { %1109 = vmatpush1.bf16.msra.mxu0 %v1598_v26  ;;  %v1672_v26 = vld [vmem:[#allocation2 + $0x3c8] ss:$12 sps:$4 sm:$0xff]  }
  0x60   :  { %1422 = vmatpush3.bf16.msra.mxu1 %v1602_v27  ;;  %1110 = vmatprep.subr.bf16.mxu0 %v1605_v28  ;;  %v1673_v27 = vld [vmem:[#allocation2 + $0x308] ss:$12 sps:$4 sm:$0xff]  }
  0x61   :  { %1423 = vmatprep.subr.bf16.mxu1 %v1606_v29 }
  0x63   :  { %1111 = vmatpush1.bf16.msra.mxu0 %v1603_v30 }
  0x64   :  { %1424 = vmatpush3.bf16.msra.mxu1 %v1607_v31  ;;  %1112 = vmatprep.subr.bf16.mxu0 %v1610_v32 }
  0x65   :  { %1425 = vmatprep.subr.bf16.mxu1 %v1611_v33 }
  0x67   :  { %1113 = vmatpush1.bf16.msra.mxu0 %v1608_v34 }
  0x68   :  { %1426 = vmatpush3.bf16.msra.mxu1 %v1612_v35  ;;  %1114 = vmatprep.subr.bf16.mxu0 %v1615_v36 }
  0x69   :  { %1427 = vmatprep.subr.bf16.mxu1 %v1616_v37 }
  0x6b   :  { %1115 = vmatpush1.bf16.msra.mxu0 %v1613_v38 }
  0x6c   :  { %1428 = vmatpush3.bf16.msra.mxu1 %v1617_v39  ;;  %1116 = vmatprep.subr.bf16.mxu0 %v1620_v40  ;;  %v235_v40 = vlaneseq }
  0x6d   :  { %1435 = vmatprep.subr.bf16.mxu1 %v1621_v41 }
  0x6e   :  { %v236_v41 = vshrl.u32 %v235_v40, 7 }
  0x6f   :  { %1174 = vmatmul.mubr.bf16.vlgmr.msra.gmra.mxu1 %v1740_v9  ;;  %1117 = vmatpush2.bf16.msra.mxu0 %v1618_v42  ;;  %v1657_v9 = vld [vmem:[#allocation2 + $0x188] ss:$12 sps:$4 sm:$0xff]  }
  0x70   :  { %1436 = vmatpush3.bf16.msra.mxu1 %v1622_v43  ;;  %1118 = vmatprep.subr.bf16.mxu0 %v1625_v44  ;;  %v237_v42 = vsub.s32 0, %v236_v41  ;;  %v233_v43 = vld [vmem:[%s1774_s2] sm:$0x7]  ;;  %v241_v44 = vsub.s32 1, %v236_v41 }
  0x71   :  { %1437 = vmatprep.subr.bf16.mxu1 %v1626_v45  ;;  %1213 = vmatprep.mubr.bf16.mxu1 %v1730_v52  ;;  %v1645_v52 = vld [vmem:[#allocation2 + $0x3f4] ss:$12 sps:$4 sm:$0xff]  }
  0x72   :  { %v238_v45 = vrot.slane %v233_v43, %v237_v42  ;;  %v242_v46 = vrot.slane %v233_v43, %v241_v44 }
  0x73   :  { %1119 = vmatpush2.bf16.msra.mxu0 %v1623_v47 }
  0x74   :  { %1438 = vmatpush3.bf16.msra.mxu1 %v1627_v49  ;;  %1120 = vmatprep.subr.bf16.mxu0 %v1630_v50 }
  0x75   :  { %1439 = vmatprep.subr.bf16.mxu1 %v1631_v51 }
  0x77   :  { %1121 = vmatpush2.bf16.msra.mxu0 %v1628_v53 }
  0x78   :  { %1440 = vmatpush3.bf16.msra.mxu1 %v1632_v54  ;;  %1122 = vmatprep.subr.bf16.mxu0 %v1635_v55 }
  0x79   :  { %1441 = vmatprep.subr.bf16.mxu1 %v1636_v56 }
  0x7b   :  { %1123 = vmatpush2.bf16.msra.mxu0 %v1633_v57 }
  0x7c   :  { %1442 = vmatpush3.bf16.msra.mxu1 %v1637_v58  ;;  %1124 = vmatprep.subr.bf16.mxu0 %v1640_v59 }
  0x7d   :  { %1443 = vmatprep.subr.bf16.mxu1 %v1641_v60 }
  0x7f   :  { %1125 = vmatpush2.bf16.msra.mxu0 %v1638_v61 }
  0x80   :  { %1444 = vmatpush3.bf16.msra.mxu1 %v1642_v62  ;;  %1126 = vmatprep.subr.bf16.mxu0 %v1645_v52  ;;  %v245_v62 = vsub.s32 2, %v236_v41 }
  0x81   :  { %1445 = vmatprep.subr.bf16.mxu1 %v1646_v63 }
  0x82   :  { %v246_v52 = vrot.slane %v233_v43, %v245_v62 }
  0x83   :  { %1127 = vmatpush2.bf16.msra.mxu0 %v1643_v0 }
  0x84   :  { %1446 = vmatpush3.bf16.msra.mxu1 %v1647_v1  ;;  %1128 = vmatprep.subr.bf16.mxu0 %v1650_v2 }
  0x85   :  { %1447 = vmatprep.subr.bf16.mxu1 %v1651_v3 }
  0x87   :  { %1129 = vmatpush2.bf16.msra.mxu0 %v1648_v4 }
  0x88   :  { %1448 = vmatpush3.bf16.msra.mxu1 %v1652_v5  ;;  %1130 = vmatprep.subr.bf16.mxu0 %v1655_v6 }
  0x89   :  { %1449 = vmatprep.subr.bf16.mxu1 %v1656_v7 }
  0x8b   :  { %1131 = vmatpush2.bf16.msra.mxu0 %v1653_v8 }
  0x8c   :  { %1450 = vmatpush3.bf16.msra.mxu1 %v1657_v9  ;;  %1457 = vmatprep.subr.bf16.mxu0 %v1658_v12 }
  0x8e   :  { %1133 = vmatmul.mubr.bf16.vlgmr.msra.gmra.mxu0 %v39_v13 }
  0x8f   :  { %1214 = vmatmul.mubr.bf16.vlgmr.msra.gmra.mxu1 %v1742_v10  ;;  %1458 = vmatpush3.bf16.msra.mxu0 %v1659_v14  ;;  %v1669_v10 = vld [vmem:[#allocation2 + $0x338] ss:$12 sps:$4 sm:$0xff]  }
  0x90   :  { %1253 = vmatprep.mubr.bf16.mxu0 %v1750_v48  ;;  %1459 = vmatprep.subr.bf16.mxu0 %v1660_v15 }
  0x93   :  { %1460 = vmatpush3.bf16.msra.mxu0 %v1661_v16 }
  0x94   :  { %1461 = vmatprep.subr.bf16.mxu0 %v1662_v17 }
  0x97   :  { %1462 = vmatpush3.bf16.msra.mxu0 %v1663_v18 }
  0x98   :  { %1463 = vmatprep.subr.bf16.mxu0 %v1664_v19 }
  0x9b   :  { %1464 = vmatpush3.bf16.msra.mxu0 %v1665_v20 }
  0x9c   :  { %1465 = vmatprep.subr.bf16.mxu0 %v1666_v21 }
  0x9f   :  { %1466 = vmatpush3.bf16.msra.mxu0 %v1667_v22 }
  0xa0   :  { %1467 = vmatprep.subr.bf16.mxu0 %v1668_v23 }
  0xa3   :  { %1468 = vmatpush3.bf16.msra.mxu0 %v1669_v10 }
  0xa4   :  { %1469 = vmatprep.subr.bf16.mxu0 %v1670_v24 }
  0xa7   :  { %1470 = vmatpush3.bf16.msra.mxu0 %v1671_v25 }
  0xa8   :  { %1471 = vmatprep.subr.bf16.mxu0 %v1672_v26 }
  0xab   :  { %1472 = vmatpush3.bf16.msra.mxu0 %v1673_v27 }
  0xae   :  { %1254 = vmatmul.mubr.bf16.vlgmr.msra.gmra.mxu0 %v39_v13 }
 0x10e   :  { %v1052_v28 = vpop.f32.mrf.mxu0 }
 0x10f   :  { %v1093_v29 = vpop.f32.mrf.mxu1  ;;  %v1053_v47 = vadd.f32 %v1052_v28, %v238_v45 }
 0x110   :  { %v1054_v30 = vpop.f32.mrf.mxu0 }
 0x111   :  { %v1095_v31 = vpop.f32.mrf.mxu1  ;;  %v1055_v48 = vadd.f32 %v1054_v30, %v242_v46  ;;  %v1094_v49 = vadd.f32 %v1093_v29, %v1053_v47 }
 0x112   :  { %v1056_v32 = vpop.f32.mrf.mxu0 }
 0x113   :  { %v1097_v33 = vpop.f32.mrf.mxu1  ;;  %v1096_v53 = vadd.f32 %v1095_v31, %v1055_v48 }
 0x114   :  { %v1057_v34 = vpop.f32.mrf.mxu0 }
 0x115   :  { %v1098_v35 = vpop.f32.mrf.mxu1 }
 0x12f   :  { %v1429_v36 = vpop.f32.mrf.mxu1 }
 0x131   :  { %v1430_v37 = vpop.f32.mrf.mxu1 }
 0x132   :  { %v1431_v63 = vadd.f32 %v1430_v37, %v1429_v36 }
 0x133   :  { %v1432_v38 = vpop.f32.mrf.mxu1 }
 0x134   :  { %v1176_v0 = vadd.f32 %v1431_v63, %v246_v52 }
 0x135   :  { %v1433_v39 = vpop.f32.mrf.mxu1 }
 0x14e   :  { %v1134_v50 = vpop.f32.mrf.mxu0 }
 0x14f   :  { %v1451_v51 = vpop.f32.mrf.mxu1  ;;  %v1135_v54 = vadd.f32 %v1134_v50, %v1094_v49 }
 0x150   :  { %v1136_v55 = vpop.f32.mrf.mxu0 }
 0x151   :  { %v1452_v56 = vpop.f32.mrf.mxu1  ;;  %1261 = vst [vmem:[%s1775_s3] sm:$0xff] %v1135_v54  ;;  %v1137_v57 = vadd.f32 %v1136_v55, %v1096_v53 }
 0x152   :  { %v1138_v58 = vpop.f32.mrf.mxu0  ;;  %v1453_v1 = vadd.f32 %v1452_v56, %v1451_v51 }
 0x153   :  { %v1454_v59 = vpop.f32.mrf.mxu1  ;;  %1262 = vst [vmem:[%s1775_s3 + $0x8] sm:$0xff] %v1137_v57 }
 0x154   :  { %v1139_v60 = vpop.f32.mrf.mxu0  ;;  %v1216_v4 = vadd.f32 %v1453_v1, %v1176_v0 }
 0x155   :  { %v1455_v61 = vpop.f32.mrf.mxu1 }
 0x16e   :  { %v1473_v2 = vpop.f32.mrf.mxu0 }
 0x170   :  { %v1474_v3 = vpop.f32.mrf.mxu0 }
 0x171   :  { %v1475_v5 = vadd.f32 %v1474_v3, %v1473_v2 }
 0x172   :  { %v1476_v6 = vpop.f32.mrf.mxu0 }
 0x173   :  { %v1256_v7 = vadd.f32 %v1475_v5, %v1216_v4 }
 0x174   :  { %v1477_v8 = vpop.f32.mrf.mxu0 }
 0x175   :  { %1263 = vst [vmem:[%s1775_s3 + $0x10] sm:$0xff] %v1256_v7 }
 0x176   :  { %1268 = vsyncpa [#allocation3], 1 }

// kernel: vit_forward.3
= control target key start
LH: loop header
LB: loop body
LE: loop exit
PB: predicated region body
PF: predicated region fallthrough
CT: control target
= control target key end

     0   :  { %s17969_s0 = inlined_call_operand.vmem [shape: f32[16,384], index: 0, kind: input, shape index: {}]   ;;  %s17970_s1 = inlined_call_operand.vmem [shape: f32[1,384], index: 1, kind: input, shape index: {}]   ;;  %s17971_s2 = inlined_call_operand.vmem [shape: f32[1,384], index: 2, kind: input, shape index: {}]   ;;  %s17972_s3 = inlined_call_operand.hbm [shape: f32[12,1,384], index: 3, kind: input, shape index: {}]   ;;  %s17973_s4 = inlined_call_operand.hbm [shape: f32[12,1,384], index: 4, kind: input, shape index: {}]   ;;  %s17974_s5 = inlined_call_operand.hbm [shape: bf16[12,384,1152], index: 5, kind: input, shape index: {}]   ;;  %s17975_s6 = inlined_call_operand.hbm [shape: f32[12,1,1152], index: 6, kind: input, shape index: {}]   ;;  %s17976_s7 = inlined_call_operand.hbm [shape: bf16[12,384,384], index: 7, kind: input, shape index: {}]   ;;  %s17977_s8 = inlined_call_operand.hbm [shape: f32[12,1,384], index: 8, kind: input, shape index: {}]   ;;  %s17978_s9 = inlined_call_operand.hbm [shape: f32[12,1,384], index: 9, kind: input, shape index: {}]   ;;  %s17979_s10 = inlined_call_operand.hbm [shape: f32[12,1,384], index: 10, kind: input, shape index: {}]   ;;  %s17980_s11 = inlined_call_operand.hbm [shape: bf16[12,384,1536], index: 11, kind: input, shape index: {}]   ;;  %s17981_s12 = inlined_call_operand.hbm [shape: f32[12,1,1536], index: 12, kind: input, shape index: {}]   ;;  %s17982_s13 = inlined_call_operand.hbm [shape: bf16[12,1536,384], index: 13, kind: input, shape index: {}]   ;;  %s17983_s14 = inlined_call_operand.hbm [shape: f32[12,1,384], index: 14, kind: input, shape index: {}]   ;;  %s17984_s15 = inlined_call_operand.vmem [shape: f32[16,384], index: 15, kind: output, shape index: {}]  }
   0x1   :  { %18004 = sst [smem:[#allocation36_spill]] %s17969_s0 }
   0x2   :  { %18005 = sst [smem:[#allocation37_spill]] %s17970_s1 }
   0x3   :  { %18006 = sst [smem:[#allocation38_spill]] %s17971_s2 }
   0x4   :  { %18007 = sst [smem:[#allocation39_spill]] %s17973_s4 }
   0x5   :  { %18008 = sst [smem:[#allocation40_spill]] %s17975_s6 }
   0x6   :  { %18009 = sst [smem:[#allocation41_spill]] %s17977_s8 }
   0x7   :  { %18010 = sst [smem:[#allocation42_spill]] %s17983_s14 }
   0x8   :  { %18011 = sst [smem:[#allocation43_spill]] %s17984_s15 }
   0x9   :  { %20 = vsyncpa [#allocation4], 0 }
   0xa   :  { %22 = vsyncpa [#allocation4 + $0x1], 0 }
   0xb   :  { %23 = vsyncpa [#allocation6], 0 }
   0xc   :  { %25 = vsyncpa [#allocation6 + $0x1], 0 }
   0xd   :  { %26 = vsyncpa [#allocation9], 0 }
   0xe   :  { %28 = vsyncpa [#allocation9 + $0x1], 0 }
   0xf   :  { %29 = vsyncpa [#allocation12], 0 }
  0x10   :  { %31 = vsyncpa [#allocation12 + $0x1], 0 }
  0x11   :  { %32 = vsyncpa [#allocation15], 0 }
  0x12   :  { %34 = vsyncpa [#allocation15 + $0x1], 0 }
  0x13   :  { %35 = vsyncpa [#allocation18], 0 }
  0x14   :  { %37 = vsyncpa [#allocation18 + $0x1], 0 }
  0x15   :  { %38 = vsyncpa [#allocation21], 0 }
  0x16   :  { %40 = vsyncpa [#allocation21 + $0x1], 0  ;;  %s15280_s18 = smov 0   ;;  %s15282_s19 = smov 0  }
  0x17   :  { %s15284_s20 = smov 0   ;;  %s15286_s21 = smov 0  }
  0x18 LB: > { %18012 = sst [smem:[#allocation29_spill]] %s15166_s19  ;;  %s15299_s22 = sadd.s32 4294967295, %s15174_s21   ;;  %s15174_s21 = sphi %s15286_s21, %s18053_s21   ;;  %s15170_s20 = sphi %s15284_s20, %s18056_s20   ;;  %s15166_s19 = sphi %s15282_s19, %s18055_s19   ;;  %s15162_s18 = sphi %s15280_s18, %s18054_s18  }
  0x19   : > { %18013 = sst [smem:[#allocation30_spill]] %s15170_s20  ;;  %s15302_s23 = sadd.s32 1, %s15174_s21  }
  0x1a   : > { %18014 = sst [smem:[#allocation31_spill]] %s15299_s22  ;;  %s113_s24 = ssub.s32 %s15174_s21, %s15302_s23 }
  0x1b   : > { %18015 = sst [smem:[#allocation32_spill]] %s15302_s23  ;;  %s116_s25 = sadd.s32 1, %s15170_s20 }
  0x1c   : > { %p114_p0 = scmp.eq.s32.totalorder %s113_s24, 0  ;;  %p123_p1 = scmp.ne.s32.totalorder %s15170_s20, %s15166_s19 }
  0x1d   : > { %p124_p2 = scmp.eq.s32.totalorder %s15174_s21, 0  ;;  %p129_p3 = scmp.ne.s32.totalorder %s15166_s19, %s15162_s18 }
  0x1e   : > { %s15312_s26 = scalar_select %p114_p0, %s15170_s20, %s116_s25  }
  0x1f   : > { %p125_p4 = por %p124_p2, %p123_p1  ;;  %p130_p5 = scmp.eq.s32.totalorder %s15299_s22, 0 }
  0x20   : > { %18016 = sst [smem:[#allocation33_spill]] %s15312_s26  ;;  %p13304_p6 = scmp.lt.s32.totalorder %s15174_s21, 12 }
  0x21   : > { %p15316_p7 = por %p130_p5, %p129_p3  ;;  %s15321_s28 = sand.u32 1, %s15170_s20  }
  0x22   : > { %s15324_s29 = smul.u32 3, %s15321_s28  ;;  %p15326_p8 = pnand %p13304_p6, %p125_p4 }
  0x23   : > { %s18017_s27 = scalar_select %p15316_p7, 1, 0 }
  0x24   : > { %s15331_s16 = smul.u32 48, %s15174_s21  ;;  %s15334_s17 = sand.u32 1, %s15174_s21  }
  0x25   : > { %18018 = sst [smem:[#allocation34_spill]] %s18017_s27  ;;  %s492_s26 = scalar_lea.vmem [#allocation5], %s15324_s29 }
  0x26   : > { %s18020_s4 = sld [smem:[#allocation39_spill]]  ;;  %s500_s20 = sshll.u32 %s492_s26, 4  ;;  %s501_s20 = int_to_ptr.vmem [resolvable:$true] %s500_s20 }
  0x27   : > { %p15350_p12 = pneg %p15326_p8 }
  0x2c   : > { %s15340_s25 = scalar_lea.hbm %s18020_s4, %s15331_s16  ;;  %s14785_s1 = scalar_lea.hbm %s18020_s4, 576 }
  0x2d   : > { %s14780_s15 = scalar_lea.hbm %s15340_s25, 48  ;;  %p14786_p1 = scmp.lt.s32.totalorder %s15340_s25, %s18020_s4 }
  0x2e   : > { %p14781_p11 = scmp.ne.s32.totalorder %s15340_s25, %s14780_s15  ;;  %p14787_p2 = scmp.lt.s32.totalorder %s14785_s1, %s14780_s15 }
  0x30   : > { %p14783_p13 = pnand %p15350_p12, %p14781_p11  ;;  %p14788_p3 = por %p14787_p2, %p14786_p1 }
  0x32   : > { %p14784_p0 = pneg %p14783_p13 }
  0x34   : > { %p14789_p4 = pnand %p14788_p3, %p14784_p0 }
  0x36   : > { %14792 = shalt.err (!%p14789_p4)
}
  0x37   : > { %s14793_s23 = scalar_lea.vmem %s501_s20, 48  ;;  %s15176_s22 = smov [#allocation5]  }
  0x38   : > { %p14794_p5 = scmp.ne.s32.totalorder %s501_s20, %s14793_s23  ;;  %s14798_s27 = sshll.u32 %s15176_s22, 4  ;;  %s14799_s27 = int_to_ptr.vmem [resolvable:$false] %s14798_s27 }
  0x39   : > { %s14800_s19 = scalar_lea.vmem %s14799_s27, 96  ;;  %p14801_p11 = scmp.lt.s32.totalorder %s501_s20, %s14799_s27 }
  0x3a   : > { %p14796_p6 = pnand %p14794_p5, %p15350_p12  ;;  %p14802_p13 = scmp.lt.s32.totalorder %s14800_s19, %s14793_s23 }
  0x3c   : > { %p14797_p9 = pneg %p14796_p6  ;;  %p14803_p10 = por %p14802_p13, %p14801_p11 }
  0x3e   : > { %p14804_p7 = pnand %p14803_p10, %p14797_p9 }
  0x40   : > { %14807 = shalt.err (!%p14804_p7)
}
  0x41   : > { %s18022_s0 = scalar_lea.sflag [#allocation6], %s15334_s17  ;;  %p18023_p0 = scmp.lt.s32.totalorder %s15174_s21, 13 }
  0x42   : > { %13273 = dma.hbm_to_vmem [thread:$0]  (!%p15326_p8), %s15340_s25, 48, %s501_s20, %s18022_s0  }
  0x43   : > { %p18024_p1 = scmp.ge.s32.totalorder %s15174_s21, 1  ;;  %s13219_s15 = smul.u32 9, %s15321_s28 }
  0x44   : > { %s13220_s19 = smul.u32 144, %s15174_s21  ;;  %s18027_s8 = sld [smem:[#allocation41_spill]] }
  0x45   : > { %p15374_p2 = pnand %p18024_p1, %p18023_p0  ;;  %s18028_s6 = sld [smem:[#allocation40_spill]] }
  0x46   : > { %s532_s20 = scalar_lea.vmem [#allocation8], %s13219_s15  ;;  %s572_s0 = scalar_lea.vmem [#allocation11], %s15324_s29 }
  0x47   : > { %s18025_s1 = scalar_select %p15374_p2, 1, 0 }
  0x48   : > { %s540_s25 = sshll.u32 %s532_s20, 4  ;;  %s580_s4 = sshll.u32 %s572_s0, 4  ;;  %s541_s25 = int_to_ptr.vmem [resolvable:$true] %s540_s25  ;;  %s581_s4 = int_to_ptr.vmem [resolvable:$true] %s580_s4 }
  0x49   : > { %18026 = sst [smem:[#allocation35_spill]] %s18025_s1 }
  0x4a   : > { %s15384_s27 = scalar_lea.hbm %s18027_s8, %s15331_s16 }
  0x4b   : > { %s15389_s26 = scalar_lea.hbm %s18028_s6, %s13220_s19  ;;  %s14813_s18 = scalar_lea.hbm %s18028_s6, 1728 }
  0x4c   : > { %s14808_s14 = scalar_lea.hbm %s15389_s26, 144  ;;  %p14814_p3 = scmp.lt.s32.totalorder %s15389_s26, %s18028_s6 }
  0x4d   : > { %p14809_p7 = scmp.ne.s32.totalorder %s15389_s26, %s14808_s14  ;;  %p14815_p4 = scmp.lt.s32.totalorder %s14813_s18, %s14808_s14 }
  0x4f   : > { %p14811_p9 = pnand %p14809_p7, %p15350_p12  ;;  %p14816_p5 = por %p14815_p4, %p14814_p3 }
  0x51   : > { %p14812_p10 = pneg %p14811_p9 }
  0x53   : > { %p14817_p6 = pnand %p14816_p5, %p14812_p10 }
  0x55   : > { %14820 = shalt.err (!%p14817_p6)
}
  0x56   : > { %s14821_s15 = scalar_lea.vmem %s541_s25, 144  ;;  %s15177_s20 = smov [#allocation8]  }
  0x57   : > { %p14822_p11 = scmp.ne.s32.totalorder %s541_s25, %s14821_s15  ;;  %s14826_s0 = sshll.u32 %s15177_s20, 4  ;;  %s14827_s0 = int_to_ptr.vmem [resolvable:$false] %s14826_s0 }
  0x58   : > { %s14828_s1 = scalar_lea.vmem %s14827_s0, 288  ;;  %p14829_p1 = scmp.lt.s32.totalorder %s541_s25, %s14827_s0 }
  0x59   : > { %p14824_p13 = pnand %p14822_p11, %p15350_p12  ;;  %p14830_p7 = scmp.lt.s32.totalorder %s14828_s1, %s14821_s15 }
  0x5b   : > { %p14825_p0 = pneg %p14824_p13  ;;  %p14831_p9 = por %p14830_p7, %p14829_p1 }
  0x5d   : > { %p14832_p2 = pnand %p14831_p9, %p14825_p0 }
  0x5f   : > { %14835 = shalt.err (!%p14832_p2)
}
  0x60   : > { %s18029_s14 = scalar_lea.sflag [#allocation9], %s15334_s17  ;;  %s17998_s22 = scalar_lea.sflag [#allocation12], %s15334_s17 }
  0x61   : > { %13279 = dma.hbm_to_vmem [thread:$0]  (!%p15326_p8), %s15389_s26, 144, %s541_s25, %s18029_s14  }
  0x62   : > { %s14836_s23 = scalar_lea.hbm %s15384_s27, 48  ;;  %s14841_s19 = scalar_lea.hbm %s18027_s8, 576 }
  0x63   : > { %p14837_p10 = scmp.ne.s32.totalorder %s15384_s27, %s14836_s23  ;;  %p14842_p2 = scmp.lt.s32.totalorder %s15384_s27, %s18027_s8 }
  0x64   : > { %p14843_p5 = scmp.lt.s32.totalorder %s14841_s19, %s14836_s23 }
  0x65   : > { %p14839_p3 = pnand %p14837_p10, %p15350_p12 }
  0x66   : > { %p14844_p6 = por %p14843_p5, %p14842_p2 }
  0x67   : > { %p14840_p4 = pneg %p14839_p3 }
  0x69   : > { %p14845_p11 = pnand %p14844_p6, %p14840_p4 }
  0x6b   : > { %14848 = shalt.err (!%p14845_p11)
}
  0x6c   : > { %s14849_s26 = scalar_lea.vmem %s581_s4, 48  ;;  %s15178_s25 = smov [#allocation11]  }
  0x6d   : > { %p14850_p13 = scmp.ne.s32.totalorder %s581_s4, %s14849_s26  ;;  %s14854_s20 = sshll.u32 %s15178_s25, 4  ;;  %s14855_s20 = int_to_ptr.vmem [resolvable:$false] %s14854_s20 }
  0x6e   : > { %s14856_s0 = scalar_lea.vmem %s14855_s20, 96  ;;  %p14857_p7 = scmp.lt.s32.totalorder %s581_s4, %s14855_s20 }
  0x6f   : > { %p14852_p0 = pnand %p14850_p13, %p15350_p12  ;;  %p14858_p9 = scmp.lt.s32.totalorder %s14856_s0, %s14849_s26 }
  0x71   : > { %p14853_p1 = pneg %p14852_p0  ;;  %p14859_p10 = por %p14858_p9, %p14857_p7 }
  0x73   : > { %p14860_p3 = pnand %p14859_p10, %p14853_p1 }
  0x75   : > { %14863 = shalt.err (!%p14860_p3)
}
  0x76   : > { %13285 = dma.hbm_to_vmem [thread:$0]  (!%p15326_p8), %s15384_s27, 48, %s581_s4, %s17998_s22  }
  0x77   : > { %s15434_s1 = scalar_lea.hbm %s17979_s10, %s15331_s16  ;;  %s610_s18 = scalar_lea.vmem [#allocation14], %s15324_s29 }
  0x78   : > { %s618_s19 = sshll.u32 %s610_s18, 4  ;;  %s13231_s24 = smul.u32 12, %s15321_s28  ;;  %s619_s19 = int_to_ptr.vmem [resolvable:$true] %s618_s19 }
  0x79   : > { %s18000_s15 = scalar_lea.sflag [#allocation15], %s15334_s17  ;;  %s14864_s26 = scalar_lea.hbm %s15434_s1, 48 }
  0x7a   : > { %p14865_p4 = scmp.ne.s32.totalorder %s15434_s1, %s14864_s26  ;;  %s14869_s27 = scalar_lea.hbm %s17979_s10, 576 }
  0x7b   : > { %p14870_p6 = scmp.lt.s32.totalorder %s15434_s1, %s17979_s10  ;;  %p14871_p11 = scmp.lt.s32.totalorder %s14869_s27, %s14864_s26 }
  0x7c   : > { %p14867_p2 = pnand %p14865_p4, %p15350_p12 }
  0x7d   : > { %p14872_p13 = por %p14871_p11, %p14870_p6 }
  0x7e   : > { %p14868_p5 = pneg %p14867_p2 }
  0x80   : > { %p14873_p0 = pnand %p14872_p13, %p14868_p5 }
  0x82   : > { %14876 = shalt.err (!%p14873_p0)
}
  0x83   : > { %s14877_s14 = scalar_lea.vmem %s619_s19, 48  ;;  %s15179_s23 = smov [#allocation14]  }
  0x84   : > { %p14878_p1 = scmp.ne.s32.totalorder %s619_s19, %s14877_s14  ;;  %s14882_s18 = sshll.u32 %s15179_s23, 4  ;;  %s14883_s18 = int_to_ptr.vmem [resolvable:$false] %s14882_s18 }
  0x85   : > { %s14884_s22 = scalar_lea.vmem %s14883_s18, 96  ;;  %p14885_p10 = scmp.lt.s32.totalorder %s619_s19, %s14883_s18 }
  0x86   : > { %p14880_p7 = pnand %p14878_p1, %p15350_p12  ;;  %p14886_p3 = scmp.lt.s32.totalorder %s14884_s22, %s14877_s14 }
  0x88   : > { %p14881_p9 = pneg %p14880_p7  ;;  %p14887_p4 = por %p14886_p3, %p14885_p10 }
  0x8a   : > { %p14888_p2 = pnand %p14887_p4, %p14881_p9 }
  0x8c   : > { %14891 = shalt.err (!%p14888_p2)
}
  0x8d   : > { %13291 = dma.hbm_to_vmem [thread:$0]  (!%p15326_p8), %s15434_s1, 48, %s619_s19, %s18000_s15  }
  0x8e   : > { %s13232_s26 = smul.u32 192, %s15174_s21  ;;  %s650_s25 = scalar_lea.vmem [#allocation17], %s13231_s24 }
  0x8f   : > { %s658_s4 = sshll.u32 %s650_s25, 4  ;;  %s17999_s22 = scalar_lea.sflag [#allocation18], %s15334_s17  ;;  %s659_s4 = int_to_ptr.vmem [resolvable:$true] %s658_s4 }
  0x90   : > { %s656_s0 = scalar_lea.hbm %s17981_s12, %s13232_s26  ;;  %s14897_s6 = scalar_lea.hbm %s17981_s12, 2304 }
  0x91   : > { %s14892_s14 = scalar_lea.hbm %s656_s0, 192  ;;  %p14898_p13 = scmp.lt.s32.totalorder %s656_s0, %s17981_s12 }
  0x92   : > { %p14893_p5 = scmp.ne.s32.totalorder %s656_s0, %s14892_s14  ;;  %p14899_p0 = scmp.lt.s32.totalorder %s14897_s6, %s14892_s14 }
  0x94   : > { %p14895_p6 = pnand %p14893_p5, %p15350_p12  ;;  %p14900_p1 = por %p14899_p0, %p14898_p13 }
  0x96   : > { %p14896_p11 = pneg %p14895_p6 }
  0x98   : > { %p14901_p7 = pnand %p14900_p1, %p14896_p11 }
  0x9a   : > { %14904 = shalt.err (!%p14901_p7)
}
  0x9b   : > { %s14905_s19 = scalar_lea.vmem %s659_s4, 192  ;;  %s15180_s24 = smov [#allocation17]  }
  0x9c   : > { %p14906_p9 = scmp.ne.s32.totalorder %s659_s4, %s14905_s19  ;;  %s14910_s26 = sshll.u32 %s15180_s24, 4  ;;  %s14911_s26 = int_to_ptr.vmem [resolvable:$false] %s14910_s26 }
  0x9d   : > { %s14912_s25 = scalar_lea.vmem %s14911_s26, 384  ;;  %p14913_p4 = scmp.lt.s32.totalorder %s659_s4, %s14911_s26 }
  0x9e   : > { %p14908_p10 = pnand %p14906_p9, %p15350_p12  ;;  %p14914_p2 = scmp.lt.s32.totalorder %s14912_s25, %s14905_s19 }
  0xa0   : > { %p14909_p3 = pneg %p14908_p10  ;;  %p14915_p5 = por %p14914_p2, %p14913_p4 }
  0xa2   : > { %p14916_p6 = pnand %p14915_p5, %p14909_p3 }
  0xa4   : > { %14919 = shalt.err (!%p14916_p6)
}
  0xa5   : > { %13297 = dma.hbm_to_vmem [thread:$0]  (!%p15326_p8), %s656_s0, 192, %s659_s4, %s17999_s22  }
  0xa6   : > { %s15480_s27 = scalar_lea.hbm %s17972_s3, %s15331_s16  ;;  %s473_s20 = scalar_lea.vmem [#allocation3], %s15324_s29 }
  0xa7   : > { %s481_s14 = sshll.u32 %s473_s20, 4  ;;  %s13217_s23 = smul.u32 1728, %s15321_s28  ;;  %s482_s14 = int_to_ptr.vmem [resolvable:$true] %s481_s14 }
  0xa8   : > { %s13218_s18 = smul.u32 27648, %s15174_s21  ;;  %s470_s1 = scalar_lea.sflag [#allocation4], %s15321_s28 }
  0xa9   : > { %s14920_s19 = scalar_lea.hbm %s15480_s27, 48  ;;  %s14925_s24 = scalar_lea.hbm %s17972_s3, 576 }
  0xaa   : > { %p14921_p11 = scmp.ne.s32.totalorder %s15480_s27, %s14920_s19  ;;  %p14926_p1 = scmp.lt.s32.totalorder %s15480_s27, %s17972_s3 }
  0xab   : > { %p14927_p7 = scmp.lt.s32.totalorder %s14925_s24, %s14920_s19 }
  0xac   : > { %p14923_p13 = pnand %p14921_p11, %p15350_p12 }
  0xad   : > { %p14928_p9 = por %p14927_p7, %p14926_p1 }
  0xae   : > { %p14924_p0 = pneg %p14923_p13 }
  0xb0   : > { %p14929_p10 = pnand %p14928_p9, %p14924_p0 }
  0xb2   : > { %14932 = shalt.err (!%p14929_p10)
}
  0xb3   : > { %s14933_s6 = scalar_lea.vmem %s482_s14, 48  ;;  %s15181_s8 = smov [#allocation3]  }
  0xb4   : > { %p14934_p3 = scmp.ne.s32.totalorder %s482_s14, %s14933_s6  ;;  %s14938_s20 = sshll.u32 %s15181_s8, 4  ;;  %s14939_s20 = int_to_ptr.vmem [resolvable:$false] %s14938_s20 }
  0xb5   : > { %s14940_s22 = scalar_lea.vmem %s14939_s20, 96  ;;  %p14941_p5 = scmp.lt.s32.totalorder %s482_s14, %s14939_s20 }
  0xb6   : > { %p14936_p4 = pnand %p14934_p3, %p15350_p12  ;;  %p14942_p6 = scmp.lt.s32.totalorder %s14940_s22, %s14933_s6 }
  0xb8   : > { %p14937_p2 = pneg %p14936_p4  ;;  %p14943_p11 = por %p14942_p6, %p14941_p5 }
  0xba   : > { %p14944_p13 = pnand %p14943_p11, %p14937_p2 }
  0xbc   : > { %14947 = shalt.err (!%p14944_p13)
}
  0xbd   : > { %13270 = dma.hbm_to_vmem [thread:$0]  (!%p15326_p8), %s15480_s27, 48, %s482_s14, %s470_s1  }
  0xbe   : > { %s15505_s0 = scalar_lea.hbm %s17974_s5, %s13218_s18  ;;  %s511_s24 = scalar_lea.vmem [#allocation7], %s13217_s23 }
  0xbf   : > { %s518_s22 = sshll.u32 %s511_s24, 4  ;;  %s14948_s26 = scalar_lea.hbm %s15505_s0, 27648  ;;  %s15509_s22 = int_to_ptr.vmem [resolvable:$true] %s518_s22 }
  0xc0   : > { %p14949_p0 = scmp.ne.s32.totalorder %s15505_s0, %s14948_s26  ;;  %s14953_s14 = scalar_lea.hbm %s17974_s5, 331776 }
  0xc1   : > { %p14954_p9 = scmp.lt.s32.totalorder %s15505_s0, %s17974_s5  ;;  %p14955_p10 = scmp.lt.s32.totalorder %s14953_s14, %s14948_s26 }
  0xc2   : > { %p14951_p1 = pnand %p14949_p0, %p15350_p12 }
  0xc3   : > { %p14956_p3 = por %p14955_p10, %p14954_p9 }
  0xc4   : > { %p14952_p7 = pneg %p14951_p1 }
  0xc6   : > { %p14957_p4 = pnand %p14956_p3, %p14952_p7 }
  0xc8   : > { %14960 = shalt.err (!%p14957_p4)
}
  0xc9   : > { %s14961_s23 = scalar_lea.vmem %s15509_s22, 27648  ;;  %s15182_s6 = smov [#allocation7]  }
  0xca   : > { %p14962_p2 = scmp.ne.s32.totalorder %s15509_s22, %s14961_s23  ;;  %s14966_s8 = sshll.u32 %s15182_s6, 4  ;;  %s14967_s8 = int_to_ptr.vmem [resolvable:$false] %s14966_s8 }
  0xcb   : > { %s14968_s20 = scalar_lea.vmem %s14967_s8, 55296  ;;  %p14969_p11 = scmp.lt.s32.totalorder %s15509_s22, %s14967_s8 }
  0xcc   : > { %p14964_p5 = pnand %p14962_p2, %p15350_p12  ;;  %p14970_p13 = scmp.lt.s32.totalorder %s14968_s20, %s14961_s23 }
  0xce   : > { %p14965_p6 = pneg %p14964_p5  ;;  %p14971_p0 = por %p14970_p13, %p14969_p11 }
  0xd0   : > { %p14972_p1 = pnand %p14971_p0, %p14965_p6 }
  0xd2   : > { %14975 = shalt.err (!%p14972_p1)
}
  0xd3   : > { %s15183_s19 = smov 576   ;;  %s15184_s4 = smov 36  }
  0xd4   : > { %s18030_s24 = scalar_lea.sflag [#allocation6], %s15334_s17  ;;  %s13221_s26 = smul.u32 576, %s15321_s28 }
  0xd5   : > { %13276 = dma.hbm_to_vmem [thread:$0]  (!%p15326_p8), %s15505_s0, 27648, %s15509_s22, %s18030_s24, %s15183_s19, %s15183_s19, %s15184_s4  }
  0xd6   : > { %s13222_s25 = smul.u32 9216, %s15174_s21  ;;  %s551_s18 = scalar_lea.vmem [#allocation10], %s13221_s26 }
  0xd7   : > { %s558_s23 = sshll.u32 %s551_s18, 4  ;;  %s15546_s20 = scalar_lea.hbm %s17978_s9, %s15331_s16  ;;  %s15540_s23 = int_to_ptr.vmem [resolvable:$true] %s558_s23 }
  0xd8   : > { %s15538_s1 = scalar_lea.hbm %s17976_s7, %s13222_s25  ;;  %s14981_s4 = scalar_lea.hbm %s17976_s7, 110592 }
  0xd9   : > { %s14976_s0 = scalar_lea.hbm %s15538_s1, 9216  ;;  %p14982_p3 = scmp.lt.s32.totalorder %s15538_s1, %s17976_s7 }
  0xda   : > { %p14977_p7 = scmp.ne.s32.totalorder %s15538_s1, %s14976_s0  ;;  %p14983_p4 = scmp.lt.s32.totalorder %s14981_s4, %s14976_s0 }
  0xdc   : > { %p14979_p9 = pnand %p14977_p7, %p15350_p12  ;;  %p14984_p2 = por %p14983_p4, %p14982_p3 }
  0xde   : > { %p14980_p10 = pneg %p14979_p9 }
  0xe0   : > { %p14985_p5 = pnand %p14984_p2, %p14980_p10 }
  0xe2   : > { %14988 = shalt.err (!%p14985_p5)
}
  0xe3   : > { %s14989_s26 = scalar_lea.vmem %s15540_s23, 9216  ;;  %s15185_s27 = smov [#allocation10]  }
  0xe4   : > { %p14990_p6 = scmp.ne.s32.totalorder %s15540_s23, %s14989_s26  ;;  %s14994_s14 = sshll.u32 %s15185_s27, 4  ;;  %s14995_s14 = int_to_ptr.vmem [resolvable:$false] %s14994_s14 }
  0xe5   : > { %s14996_s18 = scalar_lea.vmem %s14995_s14, 18432  ;;  %p14997_p0 = scmp.lt.s32.totalorder %s15540_s23, %s14995_s14 }
  0xe6   : > { %p14992_p11 = pnand %p14990_p6, %p15350_p12  ;;  %p14998_p1 = scmp.lt.s32.totalorder %s14996_s18, %s14989_s26 }
  0xe8   : > { %p14993_p13 = pneg %p14992_p11  ;;  %p14999_p7 = por %p14998_p1, %p14997_p0 }
  0xea   : > { %p15000_p9 = pnand %p14999_p7, %p14993_p13 }
  0xec   : > { %15003 = shalt.err (!%p15000_p9)
}
  0xed   : > { %s15186_s6 = smov 192   ;;  %s15187_s8 = smov 12  }
  0xee   : > { %s18031_s0 = scalar_lea.sflag [#allocation9], %s15334_s17  ;;  %s591_s22 = scalar_lea.vmem [#allocation13], %s15324_s29 }
  0xef   : > { %13282 = dma.hbm_to_vmem [thread:$0]  (!%p15326_p8), %s15538_s1, 9216, %s15540_s23, %s18031_s0, %s15186_s6, %s15186_s6, %s15187_s8  }
  0xf0   : > { %s599_s19 = sshll.u32 %s591_s22, 4  ;;  %s13229_s4 = smul.u32 2304, %s15321_s28  ;;  %s600_s19 = int_to_ptr.vmem [resolvable:$true] %s599_s19 }
  0xf1   : > { %s13230_s24 = smul.u32 36864, %s15174_s21  ;;  %s15004_s25 = scalar_lea.hbm %s15546_s20, 48 }
  0xf2   : > { %p15005_p10 = scmp.ne.s32.totalorder %s15546_s20, %s15004_s25  ;;  %s15009_s14 = scalar_lea.hbm %s17978_s9, 576 }
  0xf3   : > { %p15010_p2 = scmp.lt.s32.totalorder %s15546_s20, %s17978_s9  ;;  %p15011_p5 = scmp.lt.s32.totalorder %s15009_s14, %s15004_s25 }
  0xf4   : > { %p15007_p3 = pnand %p15005_p10, %p15350_p12 }
  0xf5   : > { %p15012_p6 = por %p15011_p5, %p15010_p2 }
  0xf6   : > { %p15008_p4 = pneg %p15007_p3 }
  0xf8   : > { %p15013_p11 = pnand %p15012_p6, %p15008_p4 }
  0xfa   : > { %15016 = shalt.err (!%p15013_p11)
}
  0xfb   : > { %s15017_s1 = scalar_lea.vmem %s600_s19, 48  ;;  %s15188_s23 = smov [#allocation13]  }
  0xfc   : > { %p15018_p13 = scmp.ne.s32.totalorder %s600_s19, %s15017_s1  ;;  %s15022_s0 = sshll.u32 %s15188_s23, 4  ;;  %s15023_s0 = int_to_ptr.vmem [resolvable:$false] %s15022_s0 }
  0xfd   : > { %s15024_s22 = scalar_lea.vmem %s15023_s0, 96  ;;  %p15025_p7 = scmp.lt.s32.totalorder %s600_s19, %s15023_s0 }
  0xfe   : > { %p15020_p0 = pnand %p15018_p13, %p15350_p12  ;;  %p15026_p9 = scmp.lt.s32.totalorder %s15024_s22, %s15017_s1 }
 0x100   : > { %p15021_p1 = pneg %p15020_p0  ;;  %p15027_p10 = por %p15026_p9, %p15025_p7 }
 0x102   : > { %p15028_p3 = pnand %p15027_p10, %p15021_p1 }
 0x104   : > { %15031 = shalt.err (!%p15028_p3)
}
 0x105   : > { %s18032_s15 = scalar_lea.sflag [#allocation12], %s15334_s17  ;;  %s15599_s27 = scalar_lea.hbm %s17980_s11, %s13230_s24 }
 0x106   : > { %13288 = dma.hbm_to_vmem [thread:$0]  (!%p15326_p8), %s15546_s20, 48, %s600_s19, %s18032_s15  }
 0x107   : > { %s629_s14 = scalar_lea.vmem [#allocation16], %s13229_s4  ;;  %s15032_s1 = scalar_lea.hbm %s15599_s27, 36864 }
 0x108   : > { %s636_s18 = sshll.u32 %s629_s14, 4  ;;  %p15033_p4 = scmp.ne.s32.totalorder %s15599_s27, %s15032_s1  ;;  %s15603_s18 = int_to_ptr.vmem [resolvable:$true] %s636_s18 }
 0x109   : > { %s15037_s23 = scalar_lea.hbm %s17980_s11, 442368  ;;  %p15038_p6 = scmp.lt.s32.totalorder %s15599_s27, %s17980_s11 }
 0x10a   : > { %p15035_p2 = pnand %p15033_p4, %p15350_p12  ;;  %p15039_p11 = scmp.lt.s32.totalorder %s15037_s23, %s15032_s1 }
 0x10c   : > { %p15036_p5 = pneg %p15035_p2  ;;  %p15040_p13 = por %p15039_p11, %p15038_p6 }
 0x10e   : > { %p15041_p0 = pnand %p15040_p13, %p15036_p5 }
 0x110   : > { %15044 = shalt.err (!%p15041_p0)
}
 0x111   : > { %s15045_s15 = scalar_lea.vmem %s15603_s18, 36864  ;;  %s15189_s25 = smov [#allocation16]  }
 0x112   : > { %p15046_p1 = scmp.ne.s32.totalorder %s15603_s18, %s15045_s15  ;;  %s15050_s26 = sshll.u32 %s15189_s25, 4  ;;  %s15051_s26 = int_to_ptr.vmem [resolvable:$false] %s15050_s26 }
 0x113   : > { %s15052_s14 = scalar_lea.vmem %s15051_s26, 73728  ;;  %p15053_p10 = scmp.lt.s32.totalorder %s15603_s18, %s15051_s26 }
 0x114   : > { %p15048_p7 = pnand %p15046_p1, %p15350_p12  ;;  %p15054_p3 = scmp.lt.s32.totalorder %s15052_s14, %s15045_s15 }
 0x116   : > { %p15049_p9 = pneg %p15048_p7  ;;  %p15055_p4 = por %p15054_p3, %p15053_p10 }
 0x118   : > { %p15056_p2 = pnand %p15055_p4, %p15049_p9 }
 0x11a   : > { %15059 = shalt.err (!%p15056_p2)
}
 0x11b   : > { %s15190_s1 = smov 768   ;;  %s15191_s20 = smov 48  }
 0x11c   : > { %s18033_s19 = scalar_lea.sflag [#allocation15], %s15334_s17  ;;  %s15632_s22 = scalar_lea.hbm %s17982_s13, %s13230_s24 }
 0x11d   : > { %13294 = dma.hbm_to_vmem [thread:$0]  (!%p15326_p8), %s15599_s27, 36864, %s15603_s18, %s18033_s19, %s15190_s1, %s15190_s1, %s15191_s20  }
 0x11e   : > { %s669_s15 = scalar_lea.vmem [#allocation19], %s13229_s4  ;;  %s15060_s26 = scalar_lea.hbm %s15632_s22, 36864 }
 0x11f   : > { %s676_s25 = sshll.u32 %s669_s15, 4  ;;  %p15061_p5 = scmp.ne.s32.totalorder %s15632_s22, %s15060_s26  ;;  %s677_s25 = int_to_ptr.vmem [resolvable:$true] %s676_s25 }
 0x120   : > { %s15065_s21 = scalar_lea.hbm %s17982_s13, 442368  ;;  %p15066_p13 = scmp.lt.s32.totalorder %s15632_s22, %s17982_s13 }
 0x121   : > { %p15063_p6 = pnand %p15061_p5, %p15350_p12  ;;  %p15067_p0 = scmp.lt.s32.totalorder %s15065_s21, %s15060_s26 }
 0x123   : > { %p15064_p11 = pneg %p15063_p6  ;;  %p15068_p1 = por %p15067_p0, %p15066_p13 }
 0x125   : > { %p15069_p7 = pnand %p15068_p1, %p15064_p11 }
 0x127   : > { %15072 = shalt.err (!%p15069_p7)
}
 0x128   : > { %s15073_s4 = scalar_lea.vmem %s677_s25, 36864  ;;  %s15192_s24 = smov [#allocation19]  }
 0x129   : > { %p15074_p9 = scmp.ne.s32.totalorder %s677_s25, %s15073_s4  ;;  %s15078_s20 = sshll.u32 %s15192_s24, 4  ;;  %s15079_s20 = int_to_ptr.vmem [resolvable:$false] %s15078_s20 }
 0x12a   : > { %s15080_s19 = scalar_lea.vmem %s15079_s20, 73728  ;;  %p15081_p4 = scmp.lt.s32.totalorder %s677_s25, %s15079_s20 }
 0x12b   : > { %p15076_p10 = pnand %p15074_p9, %p15350_p12  ;;  %p15082_p2 = scmp.lt.s32.totalorder %s15080_s19, %s15073_s4 }
 0x12d   : > { %p15077_p3 = pneg %p15076_p10  ;;  %p15083_p5 = por %p15082_p2, %p15081_p4 }
 0x12f   : > { %p15084_p6 = pnand %p15083_p5, %p15077_p3 }
 0x131   : > { %15087 = shalt.err (!%p15084_p6)
}
 0x132   : > { %s18034_s23 = scalar_lea.sflag [#allocation18], %s15334_s17  ;;  %s18035_s26 = sld [smem:[#allocation42_spill]] }
 0x133   : > { %13300 = dma.hbm_to_vmem [thread:$0]  (!%p15326_p8), %s15632_s22, 36864, %s677_s25, %s18034_s23, %s15186_s6, %s15186_s6, %s15187_s8  }
 0x134   : > { %s690_s27 = scalar_lea.vmem [#allocation20], %s15324_s29  ;;  %s687_s18 = scalar_lea.sflag [#allocation21], %s15321_s28 }
 0x135   : > { %s698_s21 = sshll.u32 %s690_s27, 4  ;;  %s699_s21 = int_to_ptr.vmem [resolvable:$true] %s698_s21 }
 0x138   : > { %s15661_s14 = scalar_lea.hbm %s18035_s26, %s15331_s16  ;;  %s15093_s6 = scalar_lea.hbm %s18035_s26, 576 }
 0x139   : > { %s15088_s1 = scalar_lea.hbm %s15661_s14, 48  ;;  %p15094_p1 = scmp.lt.s32.totalorder %s15661_s14, %s18035_s26 }
 0x13a   : > { %p15089_p11 = scmp.ne.s32.totalorder %s15661_s14, %s15088_s1  ;;  %p15095_p7 = scmp.lt.s32.totalorder %s15093_s6, %s15088_s1 }
 0x13c   : > { %p15091_p13 = pnand %p15089_p11, %p15350_p12  ;;  %p15096_p9 = por %p15095_p7, %p15094_p1 }
 0x13e   : > { %p15092_p0 = pneg %p15091_p13 }
 0x140   : > { %p15097_p10 = pnand %p15096_p9, %p15092_p0 }
 0x142   : > { %15100 = shalt.err (!%p15097_p10)
}
 0x143   : > { %s15101_s29 = scalar_lea.vmem %s699_s21, 48  ;;  %s15193_s28 = smov [#allocation20]  }
 0x144   : > { %p15102_p3 = scmp.ne.s32.totalorder %s699_s21, %s15101_s29  ;;  %s15106_s16 = sshll.u32 %s15193_s28, 4  ;;  %s15107_s16 = int_to_ptr.vmem [resolvable:$false] %s15106_s16 }
 0x145   : > { %s15108_s25 = scalar_lea.vmem %s15107_s16, 96  ;;  %p15109_p5 = scmp.lt.s32.totalorder %s699_s21, %s15107_s16 }
 0x146   : > { %p15104_p4 = pnand %p15102_p3, %p15350_p12  ;;  %p15110_p6 = scmp.lt.s32.totalorder %s15108_s25, %s15101_s29 }
 0x148   : > { %p15105_p2 = pneg %p15104_p4  ;;  %p15111_p11 = por %p15110_p6, %p15109_p5 }
 0x14a   : > { %p15112_p13 = pnand %p15111_p11, %p15105_p2 }
 0x14c   : > { %15115 = shalt.err (!%p15112_p13)
}
 0x14d   : > { %13303 = dma.hbm_to_vmem [thread:$0]  (!%p15326_p8), %s15661_s14, 48, %s699_s21, %s687_s18  }
 0x14e   : > { %s18036_s24 = sld [smem:[#allocation35_spill]] }
 0x154   : > { %p18037_p0 = scmp.ne.s32.totalorder %s18036_s24, 0 }
 0x155   : > { %s18038_s20 = sld [smem:[#allocation29_spill]] (!%p18037_p0) }
 0x156   : > { %707 = sbr.rel (%p18037_p0) target bundleno = 4416 (0x1140), region = 80  ;;  %s18039_s2 = sld [smem:[#allocation34_spill]] (!%p18037_p0) }
 0x15b   : > { %s15684_s19 = sand.u32 1, %s18038_s20  }
 0x15c   : > { %s15687_s23 = smul.u32 3, %s15684_s19  ;;  %s710_s0 = scalar_lea.sflag [#allocation4], %s15684_s19 }
 0x15d   : > { %p18040_p12 = scmp.ne.s32.totalorder %s18039_s2, 0 }
 0x15e   : > { %s713_s15 = scalar_lea.vmem [#allocation3], %s15687_s23 }
 0x15f   : > { %15133 = dma.done.wait (%p18040_p12), %s710_s0, 48  }
 0x160   : > { %15135 = vsyncadd (%p18040_p12), %s710_s0, 4294967248  ;;  %s18041_s30 = sld [smem:[#allocation31_spill]]  ;;  %s722_s21 = scalar_lea.vmem [#allocation5], %s15687_s23 }
 0x166   : > { %s15696_s14 = sand.u32 1, %s18041_s30  }
 0x167   : > { %s719_s27 = scalar_lea.sflag [#allocation6], %s15696_s14 }
 0x168   : > { %15137 = dma.done.wait (%p18040_p12), %s719_s27, 27696  }
 0x169   : > { %15139 = vsyncadd (%p18040_p12), %s719_s27, 4294939600  ;;  %s13238_s18 = smul.u32 1728, %s15684_s19  ;;  %s737_s4 = scalar_lea.sflag [#allocation9], %s15696_s14 }
 0x16a   : > { %s13239_s1 = smul.u32 9, %s15684_s19 }
 0x16b   : > { %s15706_s17 = scalar_lea.vmem [#allocation7], %s13238_s18 }
 0x16c   : > { %s15709_s6 = scalar_lea.vmem [#allocation8], %s13239_s1 }
 0x16d   : > { %15141 = dma.done.wait (%p18040_p12), %s737_s4, 9360  }
 0x16e   : > { %15143 = vsyncadd (%p18040_p12), %s737_s4, 4294957936  ;;  %s13240_s8 = smul.u32 576, %s15684_s19  ;;  %s755_s29 = scalar_lea.sflag [#allocation12], %s15696_s14 }
 0x16f   : > { %s758_s28 = scalar_lea.vmem [#allocation11], %s15687_s23 }
 0x170   : > { %s15716_s22 = scalar_lea.vmem [#allocation10], %s13240_s8 }
 0x171   : > { %15145 = dma.done.wait (%p18040_p12), %s755_s29, 96  }
 0x172   : > { %15147 = vsyncadd (%p18040_p12), %s755_s29, 4294967200  ;;  %s773_s25 = scalar_lea.sflag [#allocation15], %s15696_s14 }
 0x173   : > { %15149 = dma.done.wait (%p18040_p12), %s773_s25, 36912  }
 0x174   : > { %15151 = vsyncadd (%p18040_p12), %s773_s25, 4294930384  ;;  %s13241_s20 = smul.u32 2304, %s15684_s19  ;;  %s791_s18 = scalar_lea.sflag [#allocation18], %s15696_s14 }
 0x175   : > { %s13242_s0 = smul.u32 12, %s15684_s19 }
 0x176   : > { %s15733_s27 = scalar_lea.vmem [#allocation16], %s13241_s20 }
 0x177   : > { %s15736_s1 = scalar_lea.vmem [#allocation17], %s13242_s0 }
 0x178   : > { %15153 = dma.done.wait (%p18040_p12), %s791_s18, 37056  }
 0x179   : > { %15155 = vsyncadd (%p18040_p12), %s791_s18, 4294930240  ;;  %s15742_s4 = scalar_lea.vmem [#allocation19], %s13241_s20  ;;  %s809_s8 = scalar_lea.sflag [#allocation21], %s15684_s19 }
 0x17a   : > { %s812_s29 = scalar_lea.vmem [#allocation20], %s15687_s23 }
 0x17b   : > { %15157 = dma.done.wait (%p18040_p12), %s809_s8, 48  }
 0x17c   : > { %15159 = vsyncadd (%p18040_p12), %s809_s8, 4294967248  ;;  %p11678_p8 = scmp.ne.s32.totalorder %s18041_s30, 0 }
 0x17d   : > { %s18042_s0 = sld [smem:[#allocation36_spill]] (!%p11678_p8) }
 0x17e   : > { %913 = sbr.rel (%p11678_p8) target bundleno = 391 (0x187), region = 132 }
 0x183   : > { %v914_v0 = vld [vmem:[%s18042_s0] sm:$0xff]  ;;  %v915_v1 = vld [vmem:[%s18042_s0 + $0x8] sm:$0xff]  ;;  %v916_v2 = vld [vmem:[%s18042_s0 + $0x10] sm:$0xff] }
 0x184   : > { %920 = vst [vmem:[#allocation2 + $0x28] sm:$0xff] %v914_v0  ;;  %921 = vst [vmem:[#allocation2 + $0x10] sm:$0xff] %v915_v1  ;;  %v917_v3 = vld [vmem:[%s18042_s0 + $0x18] sm:$0xff]  ;;  %v918_v4 = vld [vmem:[%s18042_s0 + $0x20] sm:$0xff] }
 0x185   : > { %922 = vst [vmem:[#allocation2 + $0x8] sm:$0xff] %v916_v2  ;;  %v919_v5 = vld [vmem:[%s18042_s0 + $0x28] sm:$0xff]  ;;  %923 = vst [vmem:[#allocation2] sm:$0xff] %v917_v3 }
 0x186   : > { %924 = vst [vmem:[#allocation2 + $0x18] sm:$0xff] %v918_v4  ;;  %925 = vst [vmem:[#allocation2 + $0x20] sm:$0xff] %v919_v5 }
 0x187 PF: > { %v13394_v16 = vld [vmem:[%s15706_s17 + $0x1fc] ss:$36 sps:$4 sm:$0xff]   ;;  %v13397_v18 = vld [vmem:[%s15706_s17 + $0x1b4] ss:$36 sps:$4 sm:$0xff]   ;;  %v13400_v20 = vld [vmem:[%s15706_s17 + $0x16c] ss:$36 sps:$4 sm:$0xff]  }
 0x188   : > { %v13396_v17 = vld [vmem:[%s15706_s17 + $0x1f8] ss:$36 sps:$4 sm:$0xff]   ;;  %2417 = vmatprep.subr.bf16.mxu0 %v13394_v16  ;;  %v13399_v19 = vld [vmem:[%s15706_s17 + $0x1b0] ss:$36 sps:$4 sm:$0xff]   ;;  %v13402_v21 = vld [vmem:[%s15706_s17 + $0x168] ss:$36 sps:$4 sm:$0xff]  }
 0x189   : > { %2418 = vmatpush1.bf16.msra.mxu0 %v13396_v17  ;;  %v13418_v22 = vld [vmem:[%s15706_s17 + $0x67c] ss:$36 sps:$4 sm:$0xff]   ;;  %v13403_v23 = vld [vmem:[%s15706_s17 + $0x124] ss:$36 sps:$4 sm:$0xff]   ;;  %v13409_v28 = vld [vmem:[%s15706_s17 + $0x94] ss:$36 sps:$4 sm:$0xff]  }
 0x18a   : > { %2419 = vmatprep.subr.bf16.mxu0 %v13397_v18  ;;  %v13422_v24 = vld [vmem:[%s15706_s17 + $0x678] ss:$36 sps:$4 sm:$0xff]   ;;  %2460 = vmatprep.subr.bf16.mxu1 %v13418_v22  ;;  %v13405_v25 = vld [vmem:[%s15706_s17 + $0x120] ss:$36 sps:$4 sm:$0xff]   ;;  %v13411_v29 = vld [vmem:[%s15706_s17 + $0x90] ss:$36 sps:$4 sm:$0xff]  }
 0x18b   : > { %v926_v6 = vld [vmem:[#allocation2 + $0x28] sm:$0xff]  ;;  %v927_v7 = vld [vmem:[#allocation2 + $0x10] sm:$0xff]  ;;  %2461 = vmatpush1.bf16.msra.mxu1 %v13422_v24  ;;  %v13406_v26 = vld [vmem:[%s15706_s17 + $0xdc] ss:$36 sps:$4 sm:$0xff]   ;;  %vm15196_vm0 = vmmov 0   ;;  %vm2848_vm1 = vcmask 261120  }
 0x18c   : > { %v928_v8 = vld [vmem:[#allocation2 + $0x8] sm:$0xff]  ;;  %v934_v9 = vadd.f32 %v927_v7, %v926_v6  ;;  %v929_v10 = vld [vmem:[#allocation2] sm:$0xff]  ;;  %v13408_v27 = vld [vmem:[%s15706_s17 + $0xd8] ss:$36 sps:$4 sm:$0xff]   ;;  %vm2914_vm2 = vcmask 1043456   ;;  %vm2897_vm4 = vcmask 64512  }
 0x18d   : > { %v930_v11 = vld [vmem:[#allocation2 + $0x18] sm:$0xff]  ;;  %v931_v12 = vld [vmem:[#allocation2 + $0x20] sm:$0xff]  ;;  %2420 = vmatpush1.bf16.msra.mxu0 %v13399_v19  ;;  %v13412_v30 = vld [vmem:[%s15706_s17 + $0x4c] ss:$36 sps:$4 sm:$0xff]   ;;  %vm4230_vm5 = vcmask 523264   ;;  %vm4232_vm6 = vcmask 785408  }
 0x18e   : > { %v938_v13 = vadd.f32 %v930_v11, %v929_v10  ;;  %v935_v14 = vadd.f32 %v934_v9, %v928_v8  ;;  %2421 = vmatprep.subr.bf16.mxu0 %v13400_v20  ;;  %v13414_v31 = vld [vmem:[%s15706_s17 + $0x48] ss:$36 sps:$4 sm:$0xff]   ;;  %v13417_v33 = vld [vmem:[%s15706_s17] ss:$36 sps:$4 sm:$0xff]   ;;  %v13423_v35 = vld [vmem:[%s15706_s17 + $0x438] ss:$36 sps:$4 sm:$0xff]  }
 0x18f   : > { %v13415_v32 = vld [vmem:[%s15706_s17 + $0x4] ss:$36 sps:$4 sm:$0xff]   ;;  %v13420_v34 = vld [vmem:[%s15706_s17 + $0x43c] ss:$36 sps:$4 sm:$0xff]   ;;  %v13424_v56 = vld [vmem:[%s15706_s17 + $0x634] ss:$36 sps:$4 sm:$0xff]  }
 0x190   : > { %936 = vadd.xlane.f32.xlu0 %v935_v14  ;;  %v939_v15 = vadd.f32 %v938_v13, %v931_v12  ;;  %v13426_v57 = vld [vmem:[%s15706_s17 + $0x3f4] ss:$36 sps:$4 sm:$0xff]   ;;  %2462 = vmatprep.subr.bf16.mxu1 %v13424_v56  ;;  %v13430_v60 = vld [vmem:[%s15706_s17 + $0x5ec] ss:$36 sps:$4 sm:$0xff]   ;;  %v13436_v0 = vld [vmem:[%s15706_s17 + $0x5a4] ss:$36 sps:$4 sm:$0xff]  }
 0x191   : > { %2422 = vmatpush1.bf16.msra.mxu0 %v13402_v21  ;;  %v13428_v58 = vld [vmem:[%s15706_s17 + $0x630] ss:$36 sps:$4 sm:$0xff]   ;;  %v13434_v62 = vld [vmem:[%s15706_s17 + $0x5e8] ss:$36 sps:$4 sm:$0xff]   ;;  %v13440_v2 = vld [vmem:[%s15706_s17 + $0x5a0] ss:$36 sps:$4 sm:$0xff]  }
 0x192   : > { %2423 = vmatprep.subr.bf16.mxu0 %v13403_v23  ;;  %v13429_v59 = vld [vmem:[%s15706_s17 + $0x3f0] ss:$36 sps:$4 sm:$0xff]   ;;  %2463 = vmatpush1.bf16.msra.mxu1 %v13428_v58  ;;  %v13435_v63 = vld [vmem:[%s15706_s17 + $0x3a8] ss:$36 sps:$4 sm:$0xff]   ;;  %v13441_v3 = vld [vmem:[%s15706_s17 + $0x360] ss:$36 sps:$4 sm:$0xff]  }
 0x193   : > { %v13432_v61 = vld [vmem:[%s15706_s17 + $0x3ac] ss:$36 sps:$4 sm:$0xff]   ;;  %2464 = vmatprep.subr.bf16.mxu1 %v13430_v60  ;;  %v13438_v1 = vld [vmem:[%s15706_s17 + $0x364] ss:$36 sps:$4 sm:$0xff]   ;;  %v13442_v4 = vld [vmem:[%s15706_s17 + $0x55c] ss:$36 sps:$4 sm:$0xff]  }
 0x194   : > { %940 = vadd.xlane.f32.xlu0 %v939_v15  ;;  %v13444_v5 = vld [vmem:[%s15706_s17 + $0x31c] ss:$36 sps:$4 sm:$0xff]   ;;  %v13450_v9 = vld [vmem:[%s15706_s17 + $0x2d4] ss:$36 sps:$4 sm:$0xff]   ;;  %v13456_v13 = vld [vmem:[%s15706_s17 + $0x28c] ss:$36 sps:$4 sm:$0xff]  }
 0x195   : > { %2424 = vmatpush1.bf16.msra.mxu0 %v13405_v25  ;;  %v13458_v14 = vld [vmem:[%s15706_s17 + $0x4c8] ss:$36 sps:$4 sm:$0xff]   ;;  %v15194_v15 = vmov 0   ;;  %v13464_v19 = vld [vmem:[%s15706_s17 + $0x480] ss:$36 sps:$4 sm:$0xff]  }
 0x196   : > { %2425 = vmatprep.subr.bf16.mxu0 %v13406_v26  ;;  %2465 = vmatpush1.bf16.msra.mxu1 %v13434_v62  ;;  %v13459_v16 = vld [vmem:[%s15706_s17 + $0x288] ss:$36 sps:$4 sm:$0xff]   ;;  %v13465_v20 = vld [vmem:[%s15706_s17 + $0x240] ss:$36 sps:$4 sm:$0xff]  }
 0x197   : > { %2466 = vmatprep.subr.bf16.mxu1 %v13436_v0  ;;  %2492 = vmatprep.mubr.bf16.mxu1 %v15194_v15  ;;  %v13460_v17 = vld [vmem:[%s15706_s17 + $0x484] ss:$36 sps:$4 sm:$0xff]  }
 0x198   : > { %v13462_v18 = vld [vmem:[%s15706_s17 + $0x244] ss:$36 sps:$4 sm:$0xff]  }
 0x199   : > { %2426 = vmatpush1.bf16.msra.mxu0 %v13408_v27  ;;  %v13468_v21 = vld [vmem:[%s15706_s17 + $0x204] ss:$36 sps:$4 sm:$0xff]  }
 0x19a   : > { %2427 = vmatprep.subr.bf16.mxu0 %v13409_v28  ;;  %2467 = vmatpush1.bf16.msra.mxu1 %v13440_v2  ;;  %v13471_v22 = vld [vmem:[%s15706_s17 + $0x684] ss:$36 sps:$4 sm:$0xff]   ;;  %v13474_v2 = vld [vmem:[%s15706_s17 + $0x1bc] ss:$36 sps:$4 sm:$0xff]  }
 0x19b   : > { %2468 = vmatprep.subr.bf16.mxu1 %v13442_v4 }
 0x19d   : > { %2428 = vmatpush1.bf16.msra.mxu0 %v13411_v29  ;;  %v978_v29 = vlaneseq }
 0x19e   : > { %2429 = vmatprep.subr.bf16.mxu0 %v13412_v30 }
 0x19f   : > { %v15845_v30 = vshrl.u32 %v978_v29, 7 }
 0x1a1   : > { %2430 = vmatpush1.bf16.msra.mxu0 %v13414_v31  ;;  %v15848_v31 = vsub.s32 1, %v15845_v30 }
 0x1a2   : > { %2431 = vmatprep.subr.bf16.mxu0 %v13415_v32  ;;  %v15851_v32 = vsub.s32 2, %v15845_v30 }
 0x1a5   : > { %2432 = vmatpush1.bf16.msra.mxu0 %v13417_v33  ;;  %v932_v33 = vld [vmem:[%s713_s15] sm:$0x7]  ;;  %s15197_s15 = smov 96  }
 0x1a6   : > { %2433 = vmatprep.subr.bf16.mxu0 %v13420_v34  ;;  %v15856_v34 = vsub.s32 0, %v15845_v30 }
 0x1a9   : > { %2434 = vmatpush2.bf16.msra.mxu0 %v13423_v35 }
 0x1aa   : > { %2435 = vmatprep.subr.bf16.mxu0 %v13426_v57 }
 0x1ad   : > { %2436 = vmatpush2.bf16.msra.mxu0 %v13429_v59  ;;  %v13466_v59 = vld [vmem:[%s15706_s17 + $0x200] ss:$36 sps:$4 sm:$0xff]  }
 0x1ae   : > { %2437 = vmatprep.subr.bf16.mxu0 %v13432_v61 }
 0x1b1   : > { %2438 = vmatpush2.bf16.msra.mxu0 %v13435_v63  ;;  %v13469_v63 = vld [vmem:[%s15706_s17 + $0x680] ss:$36 sps:$4 sm:$0xff]  }
 0x1b2   : > { %2439 = vmatprep.subr.bf16.mxu0 %v13438_v1 }
 0x1b5   : > { %2440 = vmatpush2.bf16.msra.mxu0 %v13441_v3  ;;  %v13477_v3 = vld [vmem:[%s15706_s17 + $0x63c] ss:$36 sps:$4 sm:$0xff]  }
 0x1b6   : > { %2441 = vmatprep.subr.bf16.mxu0 %v13444_v5  ;;  %v13472_v5 = vld [vmem:[%s15706_s17 + $0x1b8] ss:$36 sps:$4 sm:$0xff]  }
 0x219   : > { %v937_v36 = vpop.xlane.xlu0 %936 }
 0x21a   : > { %v943_v37 = vmul.f32 0.0026041667, %v937_v36  ;;  %v933_v36 = vld [vmem:[%s722_s21] sm:$0x7]  ;;  %s15198_s21 = smov 32  }
 0x21c   : > { %v15789_v38 = vsub.f32 %v926_v6, %v943_v37  ;;  %v15791_v39 = vsub.f32 %v927_v7, %v943_v37  ;;  %v15793_v40 = vsub.f32 %v928_v8, %v943_v37  ;;  %v13446_v6 = vld [vmem:[%s15706_s17 + $0x558] ss:$36 sps:$4 sm:$0xff]  }
 0x21d   : > { %v941_v41 = vpop.xlane.xlu0 %940  ;;  %v13447_v7 = vld [vmem:[%s15706_s17 + $0x318] ss:$36 sps:$4 sm:$0xff]   ;;  %2469 = vmatpush1.bf16.msra.mxu1 %v13446_v6 }
 0x21e   : > { %v944_v42 = vmul.f32 0.0026041667, %v941_v41  ;;  %v951_v43 = vmul.f32 %v15789_v38, %v15789_v38  ;;  %v952_v44 = vmul.f32 %v15791_v39, %v15791_v39  ;;  %v953_v45 = vmul.f32 %v15793_v40, %v15793_v40  ;;  %v13448_v8 = vld [vmem:[%s15706_s17 + $0x514] ss:$36 sps:$4 sm:$0xff]   ;;  %2442 = vmatpush2.bf16.msra.mxu0 %v13447_v7 }
 0x21f   : > { %2470 = vmatprep.subr.bf16.mxu1 %v13448_v8  ;;  %2443 = vmatprep.subr.bf16.mxu0 %v13450_v9  ;;  %v985_v41 = vrot.slane %v932_v33, %v15848_v31  ;;  %v13475_v6 = vld [vmem:[%s15706_s17 + $0x638] ss:$36 sps:$4 sm:$0xff]   ;;  %v13478_v9 = vld [vmem:[%s15706_s17 + $0x170] ss:$36 sps:$4 sm:$0xff]  }
 0x220   : > { %v15801_v46 = vsub.f32 %v929_v10, %v944_v42  ;;  %v15803_v47 = vsub.f32 %v930_v11, %v944_v42  ;;  %v957_v48 = vadd.f32 %v952_v44, %v951_v43  ;;  %v15805_v49 = vsub.f32 %v931_v12, %v944_v42  ;;  %v13452_v10 = vld [vmem:[%s15706_s17 + $0x510] ss:$36 sps:$4 sm:$0xff]  }
 0x221   : > { %v13453_v11 = vld [vmem:[%s15706_s17 + $0x2d0] ss:$36 sps:$4 sm:$0xff]   ;;  %2471 = vmatpush1.bf16.msra.mxu1 %v13452_v10  ;;  %v989_v43 = vrot.slane %v932_v33, %v15851_v32 }
 0x222   : > { %v958_v50 = vadd.f32 %v957_v48, %v953_v45  ;;  %v954_v51 = vmul.f32 %v15801_v46, %v15801_v46  ;;  %v955_v52 = vmul.f32 %v15803_v47, %v15803_v47  ;;  %v956_v53 = vmul.f32 %v15805_v49, %v15805_v49  ;;  %v13454_v12 = vld [vmem:[%s15706_s17 + $0x4cc] ss:$36 sps:$4 sm:$0xff]   ;;  %2444 = vmatpush2.bf16.msra.mxu0 %v13453_v11  ;;  %v13480_v7 = vld [vmem:[%s15706_s17 + $0x174] ss:$36 sps:$4 sm:$0xff]  }
 0x223   : > { %2472 = vmatprep.subr.bf16.mxu1 %v13454_v12  ;;  %2445 = vmatprep.subr.bf16.mxu0 %v13456_v13  ;;  %v981_v45 = vrot.slane %v932_v33, %v15856_v34  ;;  %v13483_v8 = vld [vmem:[%s15706_s17 + $0x5f4] ss:$36 sps:$4 sm:$0xff]   ;;  %v13486_v11 = vld [vmem:[%s15706_s17 + $0x12c] ss:$36 sps:$4 sm:$0xff]  }
 0x224   : > { %959 = vadd.xlane.f32.xlu1 %v958_v50  ;;  %v961_v54 = vadd.f32 %v955_v52, %v954_v51  ;;  %v1007_v50 = vrot.slane %v933_v36, %v15848_v31  ;;  %v1011_v51 = vrot.slane %v933_v36, %v15851_v32  ;;  %v13481_v10 = vld [vmem:[%s15706_s17 + $0x5f0] ss:$36 sps:$4 sm:$0xff]   ;;  %v13484_v13 = vld [vmem:[%s15706_s17 + $0x128] ss:$36 sps:$4 sm:$0xff]  }
 0x225   : > { %2473 = vmatpush1.bf16.msra.mxu1 %v13458_v14  ;;  %v13489_v12 = vld [vmem:[%s15706_s17 + $0x5ac] ss:$36 sps:$4 sm:$0xff]  }
 0x226   : > { %v962_v55 = vadd.f32 %v961_v54, %v956_v53  ;;  %2446 = vmatpush2.bf16.msra.mxu0 %v13459_v16  ;;  %2474 = vmatprep.subr.bf16.mxu1 %v13460_v17  ;;  %v13487_v14 = vld [vmem:[%s15706_s17 + $0x5a8] ss:$36 sps:$4 sm:$0xff]  }
 0x227   : > { %2447 = vmatprep.subr.bf16.mxu0 %v13462_v18  ;;  %v13492_v16 = vld [vmem:[%s15706_s17 + $0xe4] ss:$36 sps:$4 sm:$0xff]   ;;  %v13513_v33 = vld [vmem:[%s15706_s17 + $0x48c] ss:$36 sps:$4 sm:$0xff]  }
 0x228   : > { %963 = vadd.xlane.f32.xlu1 %v962_v55  ;;  %v13495_v17 = vld [vmem:[%s15706_s17 + $0x564] ss:$36 sps:$4 sm:$0xff]  }
 0x229   : > { %2475 = vmatpush1.bf16.msra.mxu1 %v13464_v19  ;;  %v13490_v18 = vld [vmem:[%s15706_s17 + $0xe0] ss:$36 sps:$4 sm:$0xff]  }
 0x22a   : > { %2448 = vmatpush2.bf16.msra.mxu0 %v13465_v20  ;;  %2503 = vmatprep.subr.bf16.mxu1 %v13468_v21  ;;  %v13493_v19 = vld [vmem:[%s15706_s17 + $0x560] ss:$36 sps:$4 sm:$0xff]  }
 0x22b   : > { %2546 = vmatprep.subr.bf16.mxu0 %v13471_v22  ;;  %v13498_v20 = vld [vmem:[%s15706_s17 + $0x9c] ss:$36 sps:$4 sm:$0xff]  }
 0x22c   : > { %v13501_v21 = vld [vmem:[%s15706_s17 + $0x51c] ss:$36 sps:$4 sm:$0xff]  }
 0x22d   : > { %v13496_v22 = vld [vmem:[%s15706_s17 + $0x98] ss:$36 sps:$4 sm:$0xff]  }
 0x2ad   : > { %v960_v23 = vpop.xlane.xlu1 %959 }
 0x2ae   : > { %v965_v24 = vmul.f32 0.0026041667, %v960_v23  ;;  %v13499_v23 = vld [vmem:[%s15706_s17 + $0x518] ss:$36 sps:$4 sm:$0xff]  }
 0x2b0   : > { %v967_v25 = vadd.f32 1e-06, %v965_v24  ;;  %v13504_v24 = vld [vmem:[%s15706_s17 + $0x54] ss:$36 sps:$4 sm:$0xff]  }
 0x2b1   : > { %v964_v26 = vpop.xlane.xlu1 %963 }
 0x2b2   : > { %14618 = vrsqrt.f32 %v967_v25  ;;  %v966_v27 = vmul.f32 0.0026041667, %v964_v26  ;;  %v13507_v25 = vld [vmem:[%s15706_s17 + $0x4d4] ss:$36 sps:$4 sm:$0xff]  }
 0x2b3   : > { %v13502_v26 = vld [vmem:[%s15706_s17 + $0x50] ss:$36 sps:$4 sm:$0xff]  }
 0x2b4   : > { %v968_v28 = vadd.f32 1e-06, %v966_v27  ;;  %v13505_v27 = vld [vmem:[%s15706_s17 + $0x4d0] ss:$36 sps:$4 sm:$0xff]  }
 0x2b6   : > { %14620 = vrsqrt.f32 %v968_v28  ;;  %v13510_v28 = vld [vmem:[%s15706_s17 + $0xc] ss:$36 sps:$4 sm:$0xff]  }
 0x2bf   : > { %v14619_v35 = vpop.eup %14618 }
 0x2c0   : > { %v972_v37 = vmul.f32 %v14619_v35, %v15791_v39  ;;  %v973_v42 = vmul.f32 %v14619_v35, %v15793_v40  ;;  %v971_v44 = vmul.f32 %v14619_v35, %v15789_v38  ;;  %v1003_v38 = vrot.slane %v933_v36, %v15856_v34  ;;  %v13508_v35 = vld [vmem:[%s15706_s17 + $0x8] ss:$36 sps:$4 sm:$0xff]  }
 0x2c1   : > { %v13511_v36 = vld [vmem:[%s15706_s17 + $0x488] ss:$36 sps:$4 sm:$0xff]  }
 0x2c2   : > { %v994_v39 = vmul.f32 %v985_v41, %v972_v37  ;;  %v995_v54 = vmul.f32 %v989_v43, %v973_v42  ;;  %v993_v55 = vmul.f32 %v981_v45, %v971_v44  ;;  %v13516_v37 = vld [vmem:[%s15706_s17 + $0x444] ss:$36 sps:$4 sm:$0xff]   ;;  %v13522_v44 = vld [vmem:[%s15706_s17 + $0x3fc] ss:$36 sps:$4 sm:$0xff]  }
 0x2c3   : > { %v14621_v48 = vpop.eup %14620  ;;  %v13514_v42 = vld [vmem:[%s15706_s17 + $0x440] ss:$36 sps:$4 sm:$0xff]  }
 0x2c4   : > { %v975_v52 = vmul.f32 %v14621_v48, %v15803_v47  ;;  %v976_v53 = vmul.f32 %v14621_v48, %v15805_v49  ;;  %v974_v40 = vmul.f32 %v14621_v48, %v15801_v46  ;;  %v1016_v60 = vadd.f32 %v1007_v50, %v994_v39  ;;  %v13520_v48 = vld [vmem:[%s15706_s17 + $0x3f8] ss:$36 sps:$4 sm:$0xff]   ;;  %v13526_v39 = vld [vmem:[%s15706_s17 + $0x3b0] ss:$36 sps:$4 sm:$0xff]  }
 0x2c5   : > { %v1017_v47 = vadd.f32 %v1011_v51, %v995_v54  ;;  %v1015_v49 = vadd.f32 %v1003_v38, %v993_v55  ;;  %v13534_v54 = vld [vmem:[%s15706_s17 + $0x36c] ss:$36 sps:$4 sm:$0xff]  }
 0x2c6   : > { %v997_v56 = vmul.f32 %v985_v41, %v975_v52  ;;  %v998_v57 = vmul.f32 %v989_v43, %v976_v53  ;;  %v996_v58 = vmul.f32 %v981_v45, %v974_v40  ;;  %v13519_v41 = vld [vmem:[%s15706_s17 + $0x20c] ss:$36 sps:$4 sm:$0xff]   ;;  %v13525_v45 = vld [vmem:[%s15706_s17 + $0x1c4] ss:$36 sps:$4 sm:$0xff]   ;;  %v13531_v52 = vld [vmem:[%s15706_s17 + $0x17c] ss:$36 sps:$4 sm:$0xff]  }
 0x2c7   : > { %v13517_v43 = vld [vmem:[%s15706_s17 + $0x208] ss:$36 sps:$4 sm:$0xff]   ;;  %v13529_v53 = vld [vmem:[%s15706_s17 + $0x178] ss:$36 sps:$4 sm:$0xff]  }
 0x2c8   : > { %v1019_v61 = vadd.f32 %v1007_v50, %v997_v56  ;;  %v1020_v62 = vadd.f32 %v1011_v51, %v998_v57  ;;  %v1018_v46 = vadd.f32 %v1003_v38, %v996_v58  ;;  %v13523_v50 = vld [vmem:[%s15706_s17 + $0x1c0] ss:$36 sps:$4 sm:$0xff]   ;;  %v13528_v51 = vld [vmem:[%s15706_s17 + $0x3b4] ss:$36 sps:$4 sm:$0xff]   ;;  %v13532_v55 = vld [vmem:[%s15706_s17 + $0x368] ss:$36 sps:$4 sm:$0xff]  }
 0x2c9   : > { %v13537_v40 = vld [vmem:[%s15706_s17 + $0x134] ss:$36 sps:$4 sm:$0xff]   ;;  %v13540_v56 = vld [vmem:[%s15706_s17 + $0x324] ss:$36 sps:$4 sm:$0xff]   ;;  %v13543_v57 = vld [vmem:[%s15706_s17 + $0xec] ss:$36 sps:$4 sm:$0xff]  }
 0x2ca   : > { %v15874_v0 = vpack.c.bf16 %v1019_v61, %v1016_v60  ;;  %v15876_v1 = vpack.c.bf16 %v1020_v62, %v1017_v47  ;;  %v15880_v4 = vpack.c.bf16 %v1018_v46, %v1015_v49  ;;  %v13535_v38 = vld [vmem:[%s15706_s17 + $0x130] ss:$36 sps:$4 sm:$0xff]   ;;  %v13538_v58 = vld [vmem:[%s15706_s17 + $0x320] ss:$36 sps:$4 sm:$0xff]   ;;  %v13544_v47 = vld [vmem:[%s15706_s17 + $0x2d8] ss:$36 sps:$4 sm:$0xff]  }
 0x2cb   : > { %v13546_v60 = vld [vmem:[%s15706_s17 + $0x2dc] ss:$36 sps:$4 sm:$0xff]   ;;  %v13549_v61 = vld [vmem:[%s15706_s17 + $0xa4] ss:$36 sps:$4 sm:$0xff]   ;;  %v13550_v46 = vld [vmem:[%s15706_s17 + $0x290] ss:$36 sps:$4 sm:$0xff]  }
 0x2cc   : > { %2449 = vmatprep.mubr.bf16.mxu0 %v15874_v0  ;;  %2493 = vmatmul.mubr.bf16.vlgmr.msra.gmra.mxu1 %v15876_v1  ;;  %v13547_v62 = vld [vmem:[%s15706_s17 + $0xa0] ss:$36 sps:$4 sm:$0xff]  }
 0x2cd   : > { %2504 = vmatpush1.bf16.msra.mxu1 %v13466_v59  ;;  %2450 = vmatmul.mubr.bf16.vlgmr.msra.gmra.mxu0 %v15880_v4  ;;  %v13541_v59 = vld [vmem:[%s15706_s17 + $0xe8] ss:$36 sps:$4 sm:$0xff]   ;;  %v13555_v49 = vld [vmem:[%s15706_s17 + $0x5c] ss:$36 sps:$4 sm:$0xff]  }
 0x2ce   : > { %2535 = vmatprep.mubr.bf16.mxu1 %v15874_v0  ;;  %2547 = vmatpush1.bf16.msra.mxu0 %v13469_v63  ;;  %v13552_v63 = vld [vmem:[%s15706_s17 + $0x294] ss:$36 sps:$4 sm:$0xff]  }
 0x2cf   : > { %2505 = vmatprep.subr.bf16.mxu1 %v13474_v2  ;;  %2548 = vmatprep.subr.bf16.mxu0 %v13477_v3  ;;  %v13553_v2 = vld [vmem:[%s15706_s17 + $0x58] ss:$36 sps:$4 sm:$0xff]   ;;  %v13558_v3 = vld [vmem:[%s15706_s17 + $0x24c] ss:$36 sps:$4 sm:$0xff]  }
 0x2d0   : > { %2578 = vmatprep.mubr.bf16.mxu0 %v15194_v15 }
 0x2d1   : > { %2506 = vmatpush1.bf16.msra.mxu1 %v13472_v5  ;;  %v13561_v5 = vld [vmem:[%s15706_s17 + $0x14] ss:$36 sps:$4 sm:$0xff]  }
 0x2d2   : > { %2549 = vmatpush1.bf16.msra.mxu0 %v13475_v6  ;;  %2507 = vmatprep.subr.bf16.mxu1 %v13480_v7  ;;  %v13556_v6 = vld [vmem:[%s15706_s17 + $0x248] ss:$36 sps:$4 sm:$0xff]   ;;  %v13559_v7 = vld [vmem:[%s15706_s17 + $0x10] ss:$36 sps:$4 sm:$0xff]  }
 0x2d3   : > { %2550 = vmatprep.subr.bf16.mxu0 %v13483_v8  ;;  %v13564_v8 = vld [vmem:[%s15706_s17 + $0x68c] ss:$36 sps:$4 sm:$0xff]  }
 0x2d5   : > { %2508 = vmatpush1.bf16.msra.mxu1 %v13478_v9  ;;  %v13567_v9 = vld [vmem:[%s15706_s17 + $0x44c] ss:$36 sps:$4 sm:$0xff]  }
 0x2d6   : > { %2551 = vmatpush1.bf16.msra.mxu0 %v13481_v10  ;;  %2509 = vmatprep.subr.bf16.mxu1 %v13486_v11  ;;  %v13562_v10 = vld [vmem:[%s15706_s17 + $0x688] ss:$36 sps:$4 sm:$0xff]  }
 0x2d7   : > { %2552 = vmatprep.subr.bf16.mxu0 %v13489_v12  ;;  %v13565_v11 = vld [vmem:[%s15706_s17 + $0x448] ss:$36 sps:$4 sm:$0xff]  }
 0x2d8   : > { %v13570_v12 = vld [vmem:[%s15706_s17 + $0x644] ss:$36 sps:$4 sm:$0xff]  }
 0x2d9   : > { %2510 = vmatpush1.bf16.msra.mxu1 %v13484_v13  ;;  %v13573_v13 = vld [vmem:[%s15706_s17 + $0x404] ss:$36 sps:$4 sm:$0xff]  }
 0x2da   : > { %2553 = vmatpush1.bf16.msra.mxu0 %v13487_v14  ;;  %2511 = vmatprep.subr.bf16.mxu1 %v13492_v16  ;;  %v13568_v14 = vld [vmem:[%s15706_s17 + $0x640] ss:$36 sps:$4 sm:$0xff]  }
 0x2db   : > { %2554 = vmatprep.subr.bf16.mxu0 %v13495_v17  ;;  %v13571_v16 = vld [vmem:[%s15706_s17 + $0x400] ss:$36 sps:$4 sm:$0xff]  }
 0x2dc   : > { %v13576_v17 = vld [vmem:[%s15706_s17 + $0x5fc] ss:$36 sps:$4 sm:$0xff]  }
 0x2dd   : > { %2512 = vmatpush1.bf16.msra.mxu1 %v13490_v18  ;;  %v13579_v18 = vld [vmem:[%s15706_s17 + $0x3bc] ss:$36 sps:$4 sm:$0xff]  }
 0x2de   : > { %2555 = vmatpush1.bf16.msra.mxu0 %v13493_v19  ;;  %2513 = vmatprep.subr.bf16.mxu1 %v13498_v20  ;;  %v13574_v19 = vld [vmem:[%s15706_s17 + $0x5f8] ss:$36 sps:$4 sm:$0xff]  }
 0x2df   : > { %2556 = vmatprep.subr.bf16.mxu0 %v13501_v21  ;;  %v13577_v20 = vld [vmem:[%s15706_s17 + $0x3b8] ss:$36 sps:$4 sm:$0xff]  }
 0x2e0   : > { %v13582_v21 = vld [vmem:[%s15706_s17 + $0x5b4] ss:$36 sps:$4 sm:$0xff]  }
 0x2e1   : > { %2514 = vmatpush1.bf16.msra.mxu1 %v13496_v22  ;;  %v13585_v22 = vld [vmem:[%s15706_s17 + $0x374] ss:$36 sps:$4 sm:$0xff]  }
 0x2e2   : > { %2557 = vmatpush1.bf16.msra.mxu0 %v13499_v23  ;;  %2515 = vmatprep.subr.bf16.mxu1 %v13504_v24  ;;  %v13580_v23 = vld [vmem:[%s15706_s17 + $0x5b0] ss:$36 sps:$4 sm:$0xff]  }
 0x2e3   : > { %2558 = vmatprep.subr.bf16.mxu0 %v13507_v25  ;;  %v13583_v24 = vld [vmem:[%s15706_s17 + $0x370] ss:$36 sps:$4 sm:$0xff]  }
 0x2e4   : > { %v13588_v25 = vld [vmem:[%s15706_s17 + $0x56c] ss:$36 sps:$4 sm:$0xff]  }
 0x2e5   : > { %2516 = vmatpush1.bf16.msra.mxu1 %v13502_v26  ;;  %v13591_v26 = vld [vmem:[%s15706_s17 + $0x32c] ss:$36 sps:$4 sm:$0xff]  }
 0x2e6   : > { %2559 = vmatpush1.bf16.msra.mxu0 %v13505_v27  ;;  %2517 = vmatprep.subr.bf16.mxu1 %v13510_v28  ;;  %v13586_v27 = vld [vmem:[%s15706_s17 + $0x568] ss:$36 sps:$4 sm:$0xff]  }
 0x2e7   : > { %2560 = vmatprep.subr.bf16.mxu0 %v13513_v33  ;;  %v13589_v28 = vld [vmem:[%s15706_s17 + $0x328] ss:$36 sps:$4 sm:$0xff]  }
 0x2e8   : > { %v13594_v33 = vld [vmem:[%s15706_s17 + $0x524] ss:$36 sps:$4 sm:$0xff]  }
 0x2e9   : > { %2518 = vmatpush1.bf16.msra.mxu1 %v13508_v35  ;;  %v13597_v35 = vld [vmem:[%s15706_s17 + $0x2e4] ss:$36 sps:$4 sm:$0xff]  }
 0x2ea   : > { %2561 = vmatpush1.bf16.msra.mxu0 %v13511_v36  ;;  %2519 = vmatprep.subr.bf16.mxu1 %v13516_v37  ;;  %v13592_v36 = vld [vmem:[%s15706_s17 + $0x520] ss:$36 sps:$4 sm:$0xff]  }
 0x2eb   : > { %2589 = vmatprep.subr.bf16.mxu0 %v13519_v41  ;;  %v13595_v37 = vld [vmem:[%s15706_s17 + $0x2e0] ss:$36 sps:$4 sm:$0xff]  }
 0x2ec   : > { %v13600_v41 = vld [vmem:[%s15706_s17 + $0x4dc] ss:$36 sps:$4 sm:$0xff]  }
 0x2ed   : > { %2520 = vmatpush2.bf16.msra.mxu1 %v13514_v42  ;;  %2579 = vmatmul.mubr.bf16.vlgmr.msra.gmra.mxu0 %v15876_v1  ;;  %v13603_v42 = vld [vmem:[%s15706_s17 + $0x29c] ss:$36 sps:$4 sm:$0xff]  }
 0x2ee   : > { %2590 = vmatpush1.bf16.msra.mxu0 %v13517_v43  ;;  %2621 = vmatprep.mubr.bf16.mxu0 %v15874_v0  ;;  %v13598_v43 = vld [vmem:[%s15706_s17 + $0x4d8] ss:$36 sps:$4 sm:$0xff]  }
 0x2ef   : > { %2521 = vmatprep.subr.bf16.mxu1 %v13522_v44  ;;  %2591 = vmatprep.subr.bf16.mxu0 %v13525_v45  ;;  %v13601_v44 = vld [vmem:[%s15706_s17 + $0x298] ss:$36 sps:$4 sm:$0xff]  }
 0x2f0   : > { %v13606_v45 = vld [vmem:[%s15706_s17 + $0x494] ss:$36 sps:$4 sm:$0xff]  }
 0x2f1   : > { %2522 = vmatpush2.bf16.msra.mxu1 %v13520_v48  ;;  %v13609_v48 = vld [vmem:[%s15706_s17 + $0x254] ss:$36 sps:$4 sm:$0xff]  }
 0x2f2   : > { %2592 = vmatpush1.bf16.msra.mxu0 %v13523_v50  ;;  %2523 = vmatprep.subr.bf16.mxu1 %v13528_v51  ;;  %v13604_v50 = vld [vmem:[%s15706_s17 + $0x490] ss:$36 sps:$4 sm:$0xff]  }
 0x2f3   : > { %2593 = vmatprep.subr.bf16.mxu0 %v13531_v52  ;;  %v13607_v51 = vld [vmem:[%s15706_s17 + $0x250] ss:$36 sps:$4 sm:$0xff]  }
 0x2f4   : > { %v13612_v52 = vld [vmem:[%s15706_s17 + $0x214] ss:$36 sps:$4 sm:$0xff]  }
 0x2f5   : > { %2524 = vmatpush2.bf16.msra.mxu1 %v13526_v39  ;;  %v13615_v39 = vld [vmem:[%s15706_s17 + $0x694] ss:$36 sps:$4 sm:$0xff]  }
 0x2f6   : > { %2594 = vmatpush1.bf16.msra.mxu0 %v13529_v53  ;;  %2525 = vmatprep.subr.bf16.mxu1 %v13534_v54  ;;  %v13610_v53 = vld [vmem:[%s15706_s17 + $0x210] ss:$36 sps:$4 sm:$0xff]  }
 0x2f7   : > { %2595 = vmatprep.subr.bf16.mxu0 %v13537_v40  ;;  %v13613_v54 = vld [vmem:[%s15706_s17 + $0x690] ss:$36 sps:$4 sm:$0xff]  }
 0x2f8   : > { %v13618_v40 = vld [vmem:[%s15706_s17 + $0x1cc] ss:$36 sps:$4 sm:$0xff]  }
 0x2f9   : > { %2526 = vmatpush2.bf16.msra.mxu1 %v13532_v55  ;;  %v13621_v55 = vld [vmem:[%s15706_s17 + $0x64c] ss:$36 sps:$4 sm:$0xff]  }
 0x2fa   : > { %2596 = vmatpush1.bf16.msra.mxu0 %v13535_v38  ;;  %2527 = vmatprep.subr.bf16.mxu1 %v13540_v56  ;;  %v13616_v38 = vld [vmem:[%s15706_s17 + $0x1c8] ss:$36 sps:$4 sm:$0xff]  }
 0x2fb   : > { %2597 = vmatprep.subr.bf16.mxu0 %v13543_v57  ;;  %v13619_v56 = vld [vmem:[%s15706_s17 + $0x648] ss:$36 sps:$4 sm:$0xff]  }
 0x2fc   : > { %v13624_v57 = vld [vmem:[%s15706_s17 + $0x184] ss:$36 sps:$4 sm:$0xff]  }
 0x2fd   : > { %2528 = vmatpush2.bf16.msra.mxu1 %v13538_v58  ;;  %v13627_v58 = vld [vmem:[%s15706_s17 + $0x604] ss:$36 sps:$4 sm:$0xff]  }
 0x2fe   : > { %2598 = vmatpush1.bf16.msra.mxu0 %v13541_v59  ;;  %2529 = vmatprep.subr.bf16.mxu1 %v13546_v60  ;;  %v13622_v59 = vld [vmem:[%s15706_s17 + $0x180] ss:$36 sps:$4 sm:$0xff]  }
 0x2ff   : > { %2599 = vmatprep.subr.bf16.mxu0 %v13549_v61  ;;  %v13625_v60 = vld [vmem:[%s15706_s17 + $0x600] ss:$36 sps:$4 sm:$0xff]  }
 0x300   : > { %v13630_v61 = vld [vmem:[%s15706_s17 + $0x13c] ss:$36 sps:$4 sm:$0xff]  }
 0x301   : > { %2530 = vmatpush2.bf16.msra.mxu1 %v13544_v47  ;;  %v13633_v47 = vld [vmem:[%s15706_s17 + $0x5bc] ss:$36 sps:$4 sm:$0xff]  }
 0x302   : > { %2600 = vmatpush1.bf16.msra.mxu0 %v13547_v62  ;;  %2531 = vmatprep.subr.bf16.mxu1 %v13552_v63  ;;  %v13628_v62 = vld [vmem:[%s15706_s17 + $0x138] ss:$36 sps:$4 sm:$0xff]  }
 0x303   : > { %2601 = vmatprep.subr.bf16.mxu0 %v13555_v49  ;;  %v13631_v63 = vld [vmem:[%s15706_s17 + $0x5b8] ss:$36 sps:$4 sm:$0xff]  }
 0x304   : > { %v13636_v49 = vld [vmem:[%s15706_s17 + $0xf4] ss:$36 sps:$4 sm:$0xff]  }
 0x305   : > { %2532 = vmatpush2.bf16.msra.mxu1 %v13550_v46  ;;  %v13639_v46 = vld [vmem:[%s15706_s17 + $0x574] ss:$36 sps:$4 sm:$0xff]  }
 0x306   : > { %2602 = vmatpush1.bf16.msra.mxu0 %v13553_v2  ;;  %2533 = vmatprep.subr.bf16.mxu1 %v13558_v3  ;;  %v13634_v2 = vld [vmem:[%s15706_s17 + $0xf0] ss:$36 sps:$4 sm:$0xff]  }
 0x307   : > { %2603 = vmatprep.subr.bf16.mxu0 %v13561_v5  ;;  %v13637_v3 = vld [vmem:[%s15706_s17 + $0x570] ss:$36 sps:$4 sm:$0xff]  }
 0x308   : > { %v13642_v5 = vld [vmem:[%s15706_s17 + $0xac] ss:$36 sps:$4 sm:$0xff]  }
 0x309   : > { %2534 = vmatpush2.bf16.msra.mxu1 %v13556_v6  ;;  %v13645_v6 = vld [vmem:[%s15706_s17 + $0x52c] ss:$36 sps:$4 sm:$0xff]  }
 0x30a   : > { %2604 = vmatpush1.bf16.msra.mxu0 %v13559_v7  ;;  %2632 = vmatprep.subr.bf16.mxu1 %v13564_v8  ;;  %v13640_v7 = vld [vmem:[%s15706_s17 + $0xa8] ss:$36 sps:$4 sm:$0xff]  }
 0x30b   : > { %2605 = vmatprep.subr.bf16.mxu0 %v13567_v9  ;;  %v13643_v8 = vld [vmem:[%s15706_s17 + $0x528] ss:$36 sps:$4 sm:$0xff]  }
 0x30c   : > { %2536 = vmatmul.mubr.bf16.vlgmr.msra.gmra.mxu1 %v15880_v4  ;;  %v13648_v9 = vld [vmem:[%s15706_s17 + $0x64] ss:$36 sps:$4 sm:$0xff]  }
 0x30d   : > { %2633 = vmatpush1.bf16.msra.mxu1 %v13562_v10  ;;  %2664 = vmatprep.mubr.bf16.mxu1 %v15194_v15  ;;  %v13651_v10 = vld [vmem:[%s15706_s17 + $0x4e4] ss:$36 sps:$4 sm:$0xff]  }
 0x30e   : > { %2606 = vmatpush2.bf16.msra.mxu0 %v13565_v11  ;;  %2634 = vmatprep.subr.bf16.mxu1 %v13570_v12  ;;  %v13646_v11 = vld [vmem:[%s15706_s17 + $0x60] ss:$36 sps:$4 sm:$0xff]  }
 0x30f   : > { %2607 = vmatprep.subr.bf16.mxu0 %v13573_v13  ;;  %v13649_v12 = vld [vmem:[%s15706_s17 + $0x4e0] ss:$36 sps:$4 sm:$0xff]  }
 0x310   : > { %v13654_v13 = vld [vmem:[%s15706_s17 + $0x1c] ss:$36 sps:$4 sm:$0xff]  }
 0x311   : > { %2635 = vmatpush1.bf16.msra.mxu1 %v13568_v14  ;;  %v13657_v14 = vld [vmem:[%s15706_s17 + $0x49c] ss:$36 sps:$4 sm:$0xff]  }
 0x312   : > { %2608 = vmatpush2.bf16.msra.mxu0 %v13571_v16  ;;  %2636 = vmatprep.subr.bf16.mxu1 %v13576_v17  ;;  %v13652_v16 = vld [vmem:[%s15706_s17 + $0x18] ss:$36 sps:$4 sm:$0xff]  }
 0x313   : > { %2609 = vmatprep.subr.bf16.mxu0 %v13579_v18  ;;  %v13655_v17 = vld [vmem:[%s15706_s17 + $0x498] ss:$36 sps:$4 sm:$0xff]  }
 0x314   : > { %v13660_v18 = vld [vmem:[%s15706_s17 + $0x454] ss:$36 sps:$4 sm:$0xff]  }
 0x315   : > { %2637 = vmatpush1.bf16.msra.mxu1 %v13574_v19  ;;  %v13661_v19 = vld [vmem:[%s15706_s17 + $0x458] ss:$36 sps:$4 sm:$0xff]  }
 0x316   : > { %2610 = vmatpush2.bf16.msra.mxu0 %v13577_v20  ;;  %2638 = vmatprep.subr.bf16.mxu1 %v13582_v21  ;;  %v13658_v20 = vld [vmem:[%s15706_s17 + $0x450] ss:$36 sps:$4 sm:$0xff]   ;;  %v13662_v21 = vld [vmem:[%s15706_s17 + $0x218] ss:$36 sps:$4 sm:$0xff]  }
 0x317   : > { %2611 = vmatprep.subr.bf16.mxu0 %v13585_v22  ;;  %v13665_v22 = vld [vmem:[%s15706_s17 + $0x40c] ss:$36 sps:$4 sm:$0xff]  }
 0x319   : > { %2639 = vmatpush1.bf16.msra.mxu1 %v13580_v23  ;;  %v13666_v23 = vld [vmem:[%s15706_s17 + $0x410] ss:$36 sps:$4 sm:$0xff]  }
 0x31a   : > { %2612 = vmatpush2.bf16.msra.mxu0 %v13583_v24  ;;  %2640 = vmatprep.subr.bf16.mxu1 %v13588_v25  ;;  %v13663_v24 = vld [vmem:[%s15706_s17 + $0x408] ss:$36 sps:$4 sm:$0xff]   ;;  %v13667_v25 = vld [vmem:[%s15706_s17 + $0x1d0] ss:$36 sps:$4 sm:$0xff]  }
 0x31b   : > { %2613 = vmatprep.subr.bf16.mxu0 %v13591_v26  ;;  %v13670_v26 = vld [vmem:[%s15706_s17 + $0x3c4] ss:$36 sps:$4 sm:$0xff]  }
 0x31d   : > { %2641 = vmatpush1.bf16.msra.mxu1 %v13586_v27  ;;  %v13671_v27 = vld [vmem:[%s15706_s17 + $0x3c8] ss:$36 sps:$4 sm:$0xff]  }
 0x31e   : > { %2614 = vmatpush2.bf16.msra.mxu0 %v13589_v28  ;;  %2642 = vmatprep.subr.bf16.mxu1 %v13594_v33  ;;  %v13668_v28 = vld [vmem:[%s15706_s17 + $0x3c0] ss:$36 sps:$4 sm:$0xff]   ;;  %v13672_v33 = vld [vmem:[%s15706_s17 + $0x188] ss:$36 sps:$4 sm:$0xff]  }
 0x31f   : > { %2615 = vmatprep.subr.bf16.mxu0 %v13597_v35  ;;  %v13675_v35 = vld [vmem:[%s15706_s17 + $0x37c] ss:$36 sps:$4 sm:$0xff]  }
 0x321   : > { %2643 = vmatpush1.bf16.msra.mxu1 %v13592_v36  ;;  %v13676_v36 = vld [vmem:[%s15706_s17 + $0x380] ss:$36 sps:$4 sm:$0xff]  }
 0x322   : > { %2616 = vmatpush2.bf16.msra.mxu0 %v13595_v37  ;;  %2644 = vmatprep.subr.bf16.mxu1 %v13600_v41  ;;  %v13677_v37 = vld [vmem:[%s15706_s17 + $0x140] ss:$36 sps:$4 sm:$0xff]   ;;  %v13680_v41 = vld [vmem:[%s15706_s17 + $0x334] ss:$36 sps:$4 sm:$0xff]  }
 0x323   : > { %2617 = vmatprep.subr.bf16.mxu0 %v13603_v42  ;;  %v13681_v42 = vld [vmem:[%s15706_s17 + $0x338] ss:$36 sps:$4 sm:$0xff]  }
 0x325   : > { %2645 = vmatpush1.bf16.msra.mxu1 %v13598_v43  ;;  %v13678_v43 = vld [vmem:[%s15706_s17 + $0x330] ss:$36 sps:$4 sm:$0xff]  }
 0x326   : > { %2618 = vmatpush2.bf16.msra.mxu0 %v13601_v44  ;;  %2646 = vmatprep.subr.bf16.mxu1 %v13606_v45  ;;  %v13682_v44 = vld [vmem:[%s15706_s17 + $0xf8] ss:$36 sps:$4 sm:$0xff]   ;;  %v13685_v45 = vld [vmem:[%s15706_s17 + $0x2ec] ss:$36 sps:$4 sm:$0xff]  }
 0x327   : > { %2619 = vmatprep.subr.bf16.mxu0 %v13609_v48  ;;  %v13686_v48 = vld [vmem:[%s15706_s17 + $0x2f0] ss:$36 sps:$4 sm:$0xff]  }
 0x329   : > { %2647 = vmatpush1.bf16.msra.mxu1 %v13604_v50  ;;  %v13683_v50 = vld [vmem:[%s15706_s17 + $0x2e8] ss:$36 sps:$4 sm:$0xff]  }
 0x32a   : > { %2620 = vmatpush2.bf16.msra.mxu0 %v13607_v51  ;;  %2675 = vmatprep.subr.bf16.mxu1 %v13612_v52  ;;  %v13687_v51 = vld [vmem:[%s15706_s17 + $0xb0] ss:$36 sps:$4 sm:$0xff]   ;;  %v13690_v52 = vld [vmem:[%s15706_s17 + $0x2a4] ss:$36 sps:$4 sm:$0xff]  }
 0x32b   : > { %2718 = vmatprep.subr.bf16.mxu0 %v13615_v39  ;;  %v13691_v39 = vld [vmem:[%s15706_s17 + $0x2a8] ss:$36 sps:$4 sm:$0xff]  }
 0x32c   : > { %2665 = vmatmul.mubr.bf16.vlgmr.msra.gmra.mxu1 %v15876_v1 }
 0x32d   : > { %2622 = vmatmul.mubr.bf16.vlgmr.msra.gmra.mxu0 %v15880_v4  ;;  %2676 = vmatpush1.bf16.msra.mxu1 %v13610_v53  ;;  %v13688_v53 = vld [vmem:[%s15706_s17 + $0x2a0] ss:$36 sps:$4 sm:$0xff]  }
 0x32e   : > { %2707 = vmatprep.mubr.bf16.mxu1 %v15874_v0  ;;  %2719 = vmatpush1.bf16.msra.mxu0 %v13613_v54  ;;  %v13692_v54 = vld [vmem:[%s15706_s17 + $0x68] ss:$36 sps:$4 sm:$0xff]  }
 0x32f   : > { %2677 = vmatprep.subr.bf16.mxu1 %v13618_v40  ;;  %2720 = vmatprep.subr.bf16.mxu0 %v13621_v55  ;;  %v13695_v40 = vld [vmem:[%s15706_s17 + $0x25c] ss:$36 sps:$4 sm:$0xff]  }
 0x330   : > { %2750 = vmatprep.mubr.bf16.mxu0 %v15194_v15  ;;  %v13696_v55 = vld [vmem:[%s15706_s17 + $0x260] ss:$36 sps:$4 sm:$0xff]  }
 0x331   : > { %2678 = vmatpush1.bf16.msra.mxu1 %v13616_v38  ;;  %v13693_v38 = vld [vmem:[%s15706_s17 + $0x258] ss:$36 sps:$4 sm:$0xff]  }
 0x332   : > { %2721 = vmatpush1.bf16.msra.mxu0 %v13619_v56  ;;  %2679 = vmatprep.subr.bf16.mxu1 %v13624_v57  ;;  %v13697_v56 = vld [vmem:[%s15706_s17 + $0x20] ss:$36 sps:$4 sm:$0xff]   ;;  %v13698_v57 = vld [vmem:[%s15706_s17 + $0x698] ss:$36 sps:$4 sm:$0xff]  }
 0x333   : > { %2722 = vmatprep.subr.bf16.mxu0 %v13627_v58  ;;  %v15195_v58 = vmov 0.0  }
 0x335   : > { %2680 = vmatpush1.bf16.msra.mxu1 %v13622_v59  ;;  %v13699_v59 = vld [vmem:[%s15706_s17 + $0x650] ss:$36 sps:$4 sm:$0xff]  }
 0x336   : > { %2723 = vmatpush1.bf16.msra.mxu0 %v13625_v60  ;;  %2681 = vmatprep.subr.bf16.mxu1 %v13630_v61  ;;  %v13700_v60 = vld [vmem:[%s15706_s17 + $0x608] ss:$36 sps:$4 sm:$0xff]   ;;  %v13702_v61 = vld [vmem:[%s15706_s17 + $0x578] ss:$36 sps:$4 sm:$0xff]  }
 0x337   : > { %2724 = vmatprep.subr.bf16.mxu0 %v13633_v47  ;;  %v13703_v47 = vld [vmem:[%s15706_s17 + $0x530] ss:$36 sps:$4 sm:$0xff]  }
 0x339   : > { %2682 = vmatpush1.bf16.msra.mxu1 %v13628_v62  ;;  %v13704_v62 = vld [vmem:[%s15706_s17 + $0x4e8] ss:$36 sps:$4 sm:$0xff]  }
 0x33a   : > { %2725 = vmatpush1.bf16.msra.mxu0 %v13631_v63  ;;  %2683 = vmatprep.subr.bf16.mxu1 %v13636_v49  ;;  %v13705_v63 = vld [vmem:[%s15706_s17 + $0x4a0] ss:$36 sps:$4 sm:$0xff]  }
 0x33b   : > { %2726 = vmatprep.subr.bf16.mxu0 %v13639_v46  ;;  %v16076_v49 = vld [vmem:[%s15709_s6] sm:$0xff] }
 0x33d   : > { %2684 = vmatpush1.bf16.msra.mxu1 %v13634_v2  ;;  %v16081_v2 = vrot.slane %v16076_v49, %v15848_v31 }
 0x33e   : > { %2727 = vmatpush1.bf16.msra.mxu0 %v13637_v3  ;;  %2685 = vmatprep.subr.bf16.mxu1 %v13642_v5 }
 0x33f   : > { %2728 = vmatprep.subr.bf16.mxu0 %v13645_v6 }
 0x341   : > { %2686 = vmatpush1.bf16.msra.mxu1 %v13640_v7  ;;  %v1271_v7 = vrot.slane %v16076_v49, %v15856_v34 }
 0x342   : > { %2729 = vmatpush1.bf16.msra.mxu0 %v13643_v8  ;;  %2687 = vmatprep.subr.bf16.mxu1 %v13648_v9 }
 0x343   : > { %2730 = vmatprep.subr.bf16.mxu0 %v13651_v10 }
 0x345   : > { %2688 = vmatpush1.bf16.msra.mxu1 %v13646_v11 }
 0x346   : > { %2731 = vmatpush1.bf16.msra.mxu0 %v13649_v12  ;;  %2689 = vmatprep.subr.bf16.mxu1 %v13654_v13  ;;  %v16093_v13 = vsub.s32 3, %v15845_v30 }
 0x347   : > { %2732 = vmatprep.subr.bf16.mxu0 %v13657_v14 }
 0x349   : > { %2690 = vmatpush1.bf16.msra.mxu1 %v13652_v16  ;;  %v1279_v16 = vrot.slane %v16076_v49, %v15851_v32 }
 0x34a   : > { %2733 = vmatpush1.bf16.msra.mxu0 %v13655_v17  ;;  %2691 = vmatprep.subr.bf16.mxu1 %v13660_v18 }
 0x34b   : > { %12595 = vmatprep.subr.bf16.mxu0 %v13661_v19  ;;  %v16103_v19 = vrot.slane %v16076_v49, %v16093_v13 }
 0x34d   : > { %2692 = vmatpush2.bf16.msra.mxu1 %v13658_v20  ;;  %2751 = vmatmul.mubr.bf16.vlgmr.msra.gmra.mxu0 %v15876_v1 }
 0x34e   : > { %12596 = vmatpush3.bf16.msra.mxu0 %v13662_v21  ;;  %2793 = vmatprep.mubr.bf16.mxu0 %v15874_v0  ;;  %v13673_v0 = vld [vmem:[%s15706_s17 + $0x378] ss:$36 sps:$4 sm:$0xff]  }
 0x34f   : > { %2693 = vmatprep.subr.bf16.mxu1 %v13665_v22  ;;  %12597 = vmatprep.subr.bf16.mxu0 %v13666_v23 }
 0x351   : > { %2694 = vmatpush2.bf16.msra.mxu1 %v13663_v24 }
 0x352   : > { %12598 = vmatpush3.bf16.msra.mxu0 %v13667_v25  ;;  %2695 = vmatprep.subr.bf16.mxu1 %v13670_v26 }
 0x353   : > { %12599 = vmatprep.subr.bf16.mxu0 %v13671_v27 }
 0x355   : > { %2696 = vmatpush2.bf16.msra.mxu1 %v13668_v28 }
 0x356   : > { %12600 = vmatpush3.bf16.msra.mxu0 %v13672_v33  ;;  %2697 = vmatprep.subr.bf16.mxu1 %v13675_v35 }
 0x357   : > { %12601 = vmatprep.subr.bf16.mxu0 %v13676_v36 }
 0x359   : > { %2698 = vmatpush2.bf16.msra.mxu1 %v13673_v0 }
 0x35a   : > { %12602 = vmatpush3.bf16.msra.mxu0 %v13677_v37  ;;  %2699 = vmatprep.subr.bf16.mxu1 %v13680_v41 }
 0x35b   : > { %12603 = vmatprep.subr.bf16.mxu0 %v13681_v42 }
 0x35d   : > { %2700 = vmatpush2.bf16.msra.mxu1 %v13678_v43  ;;  %v18003_v43 = vsub.s32 4, %v15845_v30 }
 0x35e   : > { %12604 = vmatpush3.bf16.msra.mxu0 %v13682_v44  ;;  %2701 = vmatprep.subr.bf16.mxu1 %v13685_v45  ;;  %v1290_v44 = vsub.s32 5, %v15845_v30 }
 0x35f   : > { %12605 = vmatprep.subr.bf16.mxu0 %v13686_v48  ;;  %v1287_v48 = vrot.slane %v16076_v49, %v18003_v43 }
 0x361   : > { %2702 = vmatpush2.bf16.msra.mxu1 %v13683_v50 }
 0x362   : > { %12606 = vmatpush3.bf16.msra.mxu0 %v13687_v51  ;;  %2703 = vmatprep.subr.bf16.mxu1 %v13690_v52  ;;  %v16133_v52 = vrot.slane %v16076_v49, %v1290_v44 }
 0x363   : > { %12607 = vmatprep.subr.bf16.mxu0 %v13691_v39 }
 0x365   : > { %2704 = vmatpush2.bf16.msra.mxu1 %v13688_v53 }
 0x366   : > { %12608 = vmatpush3.bf16.msra.mxu0 %v13692_v54  ;;  %2705 = vmatprep.subr.bf16.mxu1 %v13695_v40 }
 0x367   : > { %12609 = vmatprep.subr.bf16.mxu0 %v13696_v55 }
 0x369   : > { %2706 = vmatpush2.bf16.msra.mxu1 %v13693_v38 }
 0x36a   : > { %12610 = vmatpush3.bf16.msra.mxu0 %v13697_v56  ;;  %12885 = vmatprep.subr.bf16.mxu1 %v15195_v58 }
 0x36b   : > { %12929 = vmatprep.subr.bf16.mxu0 %v15195_v58 }
 0x36c   : > { %2708 = vmatmul.mubr.bf16.vlgmr.msra.gmra.mxu1 %v15880_v4 }
 0x36d   : > { %2794 = vmatmul.mubr.bf16.vlgmr.msra.gmra.mxu0 %v15880_v4  ;;  %12886 = vmatpush3.bf16.msra.mxu1 %v13698_v57  ;;  %v13701_v4 = vld [vmem:[%s15706_s17 + $0x5c0] ss:$36 sps:$4 sm:$0xff]   ;;  %s15199_s17 = smov 64  }
 0x36e   : > { %12887 = vmatprep.subr.bf16.mxu1 %v15195_v58  ;;  %12901 = vmatprep.mubr.msk.bf16.mxu1 %vm15196_vm0, %v15195_v58 }
 0x36f   : > { %12931 = vmatprep.mubr.msk.bf16.mxu0 %vm15196_vm0, %v15195_v58 }
 0x371   : > { %12888 = vmatpush3.bf16.msra.mxu1 %v13699_v59 }
 0x372   : > { %12889 = vmatprep.subr.bf16.mxu1 %v15195_v58 }
 0x375   : > { %12890 = vmatpush3.bf16.msra.mxu1 %v13700_v60 }
 0x376   : > { %12891 = vmatprep.subr.bf16.mxu1 %v15195_v58 }
 0x379   : > { %12892 = vmatpush3.bf16.msra.mxu1 %v13701_v4 }
 0x37a   : > { %12893 = vmatprep.subr.bf16.mxu1 %v15195_v58 }
 0x37d   : > { %12894 = vmatpush3.bf16.msra.mxu1 %v13702_v61 }
 0x37e   : > { %12895 = vmatprep.subr.bf16.mxu1 %v15195_v58 }
 0x381   : > { %12896 = vmatpush3.bf16.msra.mxu1 %v13703_v47 }
 0x382   : > { %12897 = vmatprep.subr.bf16.mxu1 %v15195_v58 }
 0x385   : > { %12898 = vmatpush3.bf16.msra.mxu1 %v13704_v62 }
 0x386   : > { %12899 = vmatprep.subr.bf16.mxu1 %v15195_v58 }
 0x389   : > { %12900 = vmatpush3.bf16.msra.mxu1 %v13705_v63  ;;  %v18002_v63 = vsub.s32 6, %v15845_v30 }
 0x38a   : > { %12905 = vmatprep.subr.bf16.mxu1 %v15195_v58 }
 0x38c   : > { %12902 = vmatmul.mubr.bf16.vlgmr.msra.gmra.mxu1 %v15876_v1  ;;  %v2494_v46 = vpop.f32.mrf.mxu1 }
 0x38d   : > { %v2451_v3 = vpop.f32.mrf.mxu0  ;;  %12907 = vmatprep.mubr.msk.bf16.mxu1 %vm15196_vm0, %v15195_v58 }
 0x38e   : > { %v2496_v5 = vpop.f32.mrf.mxu1  ;;  %v2452_v35 = vadd.f32 %v2451_v3, %v1271_v7  ;;  %v18001_v3 = vsub.s32 7, %v15845_v30 }
 0x38f   : > { %v2453_v6 = vpop.f32.mrf.mxu0 }
 0x390   : > { %v2454_v8 = vadd.f32 %v2453_v6, %v16081_v2  ;;  %v2498_v11 = vpop.f32.mrf.mxu1  ;;  %v2495_v41 = vadd.f32 %v2494_v46, %v2452_v35 }
 0x391   : > { %v2455_v9 = vpop.f32.mrf.mxu0 }
 0x392   : > { %v16088_v10 = vadd.f32 %v2496_v5, %v2454_v8  ;;  %v2456_v1 = vadd.f32 %v2455_v9, %v1271_v7  ;;  %v16099_v17 = vpop.f32.mrf.mxu1  ;;  %v16115_v42 = vpack.c.bf16 %v2495_v41, %v2495_v41  ;;  %v1295_v5 = vrot.slane %v16076_v49, %v18002_v63  ;;  %v11679_v41 = vld [vmem:[%s15709_s6 + $0x8] ss:$0 sm:$0xff]  ;;  %s18043_s6 = scalar_lea.vmem [#allocation13], %s15687_s23 }
 0x393   : > { %v16095_v14 = vpop.f32.mrf.mxu0  ;;  %v16154_v8 = vrot.slane %v16076_v49, %v18001_v3 }
 0x394   : > { %v16090_v12 = vadd.f32 %v2498_v11, %v2456_v1 }
 0x3ad   : > { %v2580_v18 = vpop.f32.mrf.mxu0 }
 0x3af   : > { %v2582_v22 = vpop.f32.mrf.mxu0 }
 0x3b1   : > { %v2584_v33 = vpop.f32.mrf.mxu0 }
 0x3b3   : > { %v16128_v50 = vpop.f32.mrf.mxu0 }
 0x3cc   : > { %v2537_v20 = vpop.f32.mrf.mxu1 }
 0x3cd   : > { %v2538_v21 = vadd.f32 %v2537_v20, %v1279_v16 }
 0x3ce   : > { %v2539_v23 = vpop.f32.mrf.mxu1 }
 0x3cf   : > { %v16105_v24 = vadd.f32 %v2580_v18, %v2538_v21  ;;  %v2540_v25 = vadd.f32 %v2539_v23, %v16103_v19 }
 0x3d0   : > { %v2541_v26 = vpop.f32.mrf.mxu1 }
 0x3d1   : > { %v2583_v27 = vadd.f32 %v2582_v22, %v2540_v25  ;;  %v2542_v28 = vadd.f32 %v2541_v26, %v1279_v16 }
 0x3d2   : > { %v16123_v45 = vpop.f32.mrf.mxu1 }
 0x3d3   : > { %v16108_v36 = vpack.c.bf16 %v2583_v27, %v2583_v27  ;;  %v16110_v0 = vadd.f32 %v2584_v33, %v2542_v28 }
 0x3d5   : > { %v2853_v37 = vsel %vm2848_vm1, %v16108_v36, 0 }
 0x3d6   : > { %12906 = vmatpush3.bf16.xpose.msra.mxu1 %v2853_v37 }
 0x3d7   : > { %12911 = vmatprep.subr.bf16.mxu1 %v15195_v58 }
 0x3dd   : > { %12908 = vmatmul.mubr.msk.bf16.vlgmr.msra.gmra.mxu1 %vm2848_vm1, %v16115_v42 }
 0x3de   : > { %12913 = vmatprep.mubr.msk.bf16.mxu1 %vm15196_vm0, %v15195_v58 }
 0x3ec   : > { %v2666_v51 = vpop.f32.mrf.mxu1 }
 0x3ed   : > { %v2623_v39 = vpop.f32.mrf.mxu0 }
 0x3ee   : > { %v2624_v53 = vadd.f32 %v2623_v39, %v1287_v48  ;;  %v2668_v54 = vpop.f32.mrf.mxu1 }
 0x3ef   : > { %v2625_v40 = vpop.f32.mrf.mxu0 }
 0x3f0   : > { %v2667_v55 = vadd.f32 %v2666_v51, %v2624_v53  ;;  %v2626_v38 = vadd.f32 %v2625_v40, %v16133_v52  ;;  %v2670_v60 = vpop.f32.mrf.mxu1 }
 0x3f1   : > { %v2627_v56 = vpop.f32.mrf.mxu0 }
 0x3f2   : > { %v16136_v57 = vadd.f32 %v2668_v54, %v2626_v38  ;;  %v2628_v59 = vadd.f32 %v2627_v56, %v1287_v48  ;;  %v16147_v6 = vpop.f32.mrf.mxu1 }
 0x3f3   : > { %v16140_v61 = vpop.f32.mrf.mxu0 }
 0x3f4   : > { %v16138_v4 = vadd.f32 %v2670_v60, %v2628_v59  ;;  %v16174_v60 = vand.u32 127, %v978_v29  ;;  %v16184_v29 = vpack.c.bf16 %v2667_v55, %v2667_v55  ;;  %v2544_v55 = vadd.f32 %v16123_v45, %v16103_v19 }
 0x3f5   : > { %v2630_v45 = vadd.f32 %v16140_v61, %v16133_v52 }
 0x3f6   : > { %vm2845_vm3 = vcmp.lt.s32.totalorder %v16174_v60, 5  ;;  %v16215_v19 = vpack.c.bf16 %v16138_v4, %v16138_v4 }
 0x40d   : > { %v2752_v47 = vpop.f32.mrf.mxu0 }
 0x40f   : > { %v2754_v62 = vpop.f32.mrf.mxu0 }
 0x411   : > { %v2756_v46 = vpop.f32.mrf.mxu0 }
 0x413   : > { %v16149_v7 = vpop.f32.mrf.mxu0 }
 0x42c   : > { %v2709_v9 = vpop.f32.mrf.mxu1 }
 0x42d   : > { %v2710_v1 = vadd.f32 %v2709_v9, %v1295_v5  ;;  %v12611_v11 = vpop.f32.mrf.mxu0 }
 0x42e   : > { %v2711_v16 = vpop.f32.mrf.mxu1 }
 0x42f   : > { %v2753_v18 = vadd.f32 %v2752_v47, %v2710_v1  ;;  %v2712_v20 = vadd.f32 %v2711_v16, %v16154_v8  ;;  %v12612_v21 = vpop.f32.mrf.mxu0  ;;  %v16194_v16 = vpack.c.bf16 %v16136_v57, %v16136_v57 }
 0x430   : > { %v12613_v22 = vadd.f32 %v12612_v21, %v12611_v11  ;;  %v2713_v23 = vpop.f32.mrf.mxu1 }
 0x431   : > { %v16157_v25 = vpack.c.bf16 %v2753_v18, %v2753_v18  ;;  %v16159_v26 = vadd.f32 %v2754_v62, %v2712_v20  ;;  %v2714_v27 = vadd.f32 %v2713_v23, %v1295_v5  ;;  %v12614_v28 = vpop.f32.mrf.mxu0  ;;  %v2587_v18 = vadd.f32 %v16128_v50, %v2544_v55 }
 0x432   : > { %v16167_v51 = vpop.f32.mrf.mxu1  ;;  %v2796_v39 = vadd.f32 %v12613_v22, %v11679_v41  ;;  %v2673_v50 = vadd.f32 %v16147_v6, %v2630_v45  ;;  %v3297_v22 = vpack.c.bf16 %v16088_v10, %v16088_v10  ;;  %v16250_v23 = vpack.c.bf16 %v16105_v24, %v16105_v24 }
 0x433   : > { %v16161_v49 = vadd.f32 %v2756_v46, %v2714_v27  ;;  %v12615_v33 = vpop.f32.mrf.mxu0  ;;  %v2916_v35 = vsel %vm2914_vm2, %v16157_v25, 0  ;;  %v16205_v20 = vpack.c.bf16 %v2587_v18, %v2587_v18  ;;  %v16260_v10 = vpack.c.bf16 %v16090_v12, %v16090_v12 }
 0x434   : > { %v12616_v37 = vadd.f32 %v12615_v33, %v12614_v28  ;;  %12912 = vmatpush3.bf16.msra.mxu1 %v2916_v35  ;;  %v16226_v57 = vpack.c.bf16 %v2673_v50, %v2673_v50  ;;  %v2458_v24 = vadd.f32 %v16095_v14, %v16081_v2  ;;  %v16281_v2 = vpack.c.bf16 %v16110_v0, %v16110_v0 }
 0x435   : > { %12917 = vmatprep.subr.bf16.mxu1 %v15195_v58  ;;  %v16657_v60 = vpack.c.bf16 %v16161_v49, %v16161_v49 }
 0x436   : > { %v2799_v48 = vadd.f32 %v12616_v37, %v11679_v41 }
 0x44c   : > { %v2836_v53 = vpop.f32.mrf.mxu1 }
 0x44d   : > { %v16169_v54 = vadd.f32 %v2836_v53, %v2796_v39 }
 0x44e   : > { %v12903_v40 = vpop.f32.mrf.mxu1 }
 0x44f   : > { %v3303_v40 = vsel %vm2848_vm1, %v16184_v29, 0 }
 0x450   : > { %v2839_v38 = vpop.f32.mrf.mxu1 }
 0x451   : > { %v16171_v56 = vadd.f32 %v2839_v38, %v2799_v48 }
 0x452   : > { %v12904_v59 = vpop.f32.mrf.mxu1 }
 0x49d   : > { %v2889_v47 = vpop.f32.mrf.mxu1 }
 0x49e   : > { %v2895_v62 = vmul.f32 0.17677669, %v2889_v47 }
 0x49f   : > { %v12909_v46 = vpop.f32.mrf.mxu1 }
 0x4a0   : > { %v2896_v5 = vsel %vm2845_vm3, %v2895_v62, -1e+30 }
 0x4a1   : > { %v2892_v9 = vpop.f32.mrf.mxu1  ;;  %v2898_v1 = vsel %vm2897_vm4, %v2896_v5, -inf }
 0x4a2   : > { %2899 = vmax.xlane.f32.xlu0 %v2898_v1 }
 0x4a3   : > { %v12910_v11 = vpop.f32.mrf.mxu1 }
 0x4b8   : > { %2962 = vrot.lane.b32.xlu0 %v16108_v36, %s15197_s15 }
 0x4bc   : > { %3187 = vrot.lane.b32.xlu0 %v16108_v36, %s15198_s21 }
 0x4c0   : > { %3410 = vrot.lane.b32.xlu0 %v16184_v29, %s15197_s15 }
 0x4c4   : > { %3523 = vrot.lane.b32.xlu0 %v16184_v29, %s15199_s17 }
 0x4c8   : > { %3635 = vrot.lane.b32.xlu0 %v16184_v29, %s15198_s21  ;;  %v3751_v29 = vsel %vm2848_vm1, %v16194_v16, 0 }
 0x4cc   : > { %3858 = vrot.lane.b32.xlu0 %v16194_v16, %s15197_s15 }
 0x4d0   : > { %3971 = vrot.lane.b32.xlu0 %v16194_v16, %s15199_s17 }
 0x4d4   : > { %4083 = vrot.lane.b32.xlu0 %v16194_v16, %s15198_s21 }
 0x4d8   : > { %4353 = vrot.lane.b32.xlu0 %v16205_v20, %s15197_s15 }
 0x4dc   : > { %4466 = vrot.lane.b32.xlu0 %v16205_v20, %s15199_s17 }
 0x4e0   : > { %4578 = vrot.lane.b32.xlu0 %v16205_v20, %s15198_s21 }
 0x4e4   : > { %4801 = vrot.lane.b32.xlu0 %v16215_v19, %s15197_s15 }
 0x4e8   : > { %4914 = vrot.lane.b32.xlu0 %v16215_v19, %s15199_s17 }
 0x4ec   : > { %5026 = vrot.lane.b32.xlu0 %v16215_v19, %s15198_s21 }
 0x4f0   : > { %5249 = vrot.lane.b32.xlu0 %v16226_v57, %s15197_s15 }
 0x4f4   : > { %5362 = vrot.lane.b32.xlu0 %v16226_v57, %s15199_s17 }
 0x4f8   : > { %5474 = vrot.lane.b32.xlu0 %v16226_v57, %s15198_s21 }
 0x52b   : > { %v2900_v52 = vpop.xlane.xlu0 %2899 }
 0x52c   : > { %v2901_v4 = vsub.f32 %v2896_v5, %v2900_v52 }
 0x52e   : > { %v2902_v61 = vmul.f32 1.442695, %v2901_v4 }
 0x530   : > { %14622 = vpow2.f32 %v2902_v61 }
 0x53d   : > { %v14623_v21 = vpop.eup %14622 }
 0x53e   : > { %v2904_v6 = vsel %vm2897_vm4, %v14623_v21, 0.0 }
 0x53f   : > { %2905 = vadd.xlane.f32.xlu1 %v2904_v6  ;;  %v4246_v6 = vsel %vm2848_vm1, %v16205_v20, 0 }
 0x550   : > { %2959 = vrot.lane.b32.xlu1 %v16115_v42, %s15197_s15 }
 0x554   : > { %3075 = vrot.lane.b32.xlu1 %v16108_v36, %s15199_s17  ;;  %v2501_v36 = vadd.f32 %v16099_v17, %v2458_v24  ;;  %v2963_v17 = vpop.permute.xlu0 %2962 }
 0x555   : > { %v2968_v39 = vsel %vm2848_vm1, %v2963_v17, 0 }
 0x558   : > { %3073 = vrot.lane.b32.xlu1 %v16115_v42, %s15199_s17  ;;  %v3188_v33 = vpop.permute.xlu0 %3187 }
 0x559   : > { %v3193_v41 = vsel %vm2848_vm1, %v3188_v33, 0 }
 0x55c   : > { %3185 = vrot.lane.b32.xlu1 %v16115_v42, %s15198_s21  ;;  %v16271_v42 = vpack.c.bf16 %v2501_v36, %v2501_v36  ;;  %v3411_v38 = vpop.permute.xlu0 %3410 }
 0x55d   : > { %v3416_v59 = vsel %vm2848_vm1, %v3411_v38, 0 }
 0x560   : > { %3407 = vrot.lane.b32.xlu1 %v3297_v22, %s15197_s15  ;;  %v3524_v47 = vpop.permute.xlu0 %3523 }
 0x561   : > { %v3529_v46 = vsel %vm2848_vm1, %v3524_v47, 0 }
 0x564   : > { %3521 = vrot.lane.b32.xlu1 %v3297_v22, %s15199_s17  ;;  %v3636_v5 = vpop.permute.xlu0 %3635 }
 0x565   : > { %v3641_v1 = vsel %vm2848_vm1, %v3636_v5, 0 }
 0x568   : > { %3633 = vrot.lane.b32.xlu1 %v3297_v22, %s15198_s21  ;;  %v3859_v55 = vpop.permute.xlu0 %3858 }
 0x569   : > { %v3864_v18 = vsel %vm2848_vm1, %v3859_v55, 0 }
 0x56c   : > { %3855 = vrot.lane.b32.xlu1 %v16250_v23, %s15197_s15  ;;  %v3972_v45 = vpop.permute.xlu0 %3971 }
 0x56d   : > { %v3977_v50 = vsel %vm2848_vm1, %v3972_v45, 0 }
 0x570   : > { %3969 = vrot.lane.b32.xlu1 %v16250_v23, %s15199_s17  ;;  %v4084_v52 = vpop.permute.xlu0 %4083 }
 0x571   : > { %v4089_v61 = vsel %vm2848_vm1, %v4084_v52, 0 }
 0x574   : > { %4081 = vrot.lane.b32.xlu1 %v16250_v23, %s15198_s21 }
 0x578   : > { %4350 = vrot.lane.b32.xlu1 %v16260_v10, %s15197_s15 }
 0x57c   : > { %4464 = vrot.lane.b32.xlu1 %v16260_v10, %s15199_s17 }
 0x580   : > { %4576 = vrot.lane.b32.xlu1 %v16260_v10, %s15198_s21 }
 0x584   : > { %4798 = vrot.lane.b32.xlu1 %v16271_v42, %s15197_s15 }
 0x588   : > { %4912 = vrot.lane.b32.xlu1 %v16271_v42, %s15199_s17 }
 0x58c   : > { %5024 = vrot.lane.b32.xlu1 %v16271_v42, %s15198_s21 }
 0x590   : > { %5246 = vrot.lane.b32.xlu1 %v16281_v2, %s15197_s15 }
 0x594   : > { %5360 = vrot.lane.b32.xlu1 %v16281_v2, %s15199_s17 }
 0x598   : > { %5472 = vrot.lane.b32.xlu1 %v16281_v2, %s15198_s21 }
 0x5c8   : > { %v2906_v12 = vpop.xlane.xlu1 %2905 }
 0x5c9   : > { %14624 = vrcp.f32 %v2906_v12 }
 0x5cc   : > { %v2960_v14 = vpop.permute.xlu1 %2959 }
 0x5d0   : > { %v3076_v27 = vpop.permute.xlu1 %3075 }
 0x5d1   : > { %v3081_v28 = vsel %vm2848_vm1, %v3076_v27, 0  ;;  %v4694_v27 = vsel %vm2848_vm1, %v16215_v19, 0 }
 0x5d2   : > { %12930 = vmatpush3.bf16.xpose.msra.mxu0 %v3081_v28 }
 0x5d3   : > { %12941 = vmatprep.subr.bf16.mxu0 %v15195_v58 }
 0x5d4   : > { %v3074_v37 = vpop.permute.xlu1 %3073 }
 0x5d6   : > { %v14625_v0 = vpop.eup %14624 }
 0x5d7   : > { %v2908_v35 = vmul.f32 %v14625_v0, %v14623_v21 }
 0x5d8   : > { %v3186_v53 = vpop.permute.xlu1 %3185 }
 0x5d9   : > { %12932 = vmatmul.mubr.msk.bf16.vlgmr.msra.gmra.mxu0 %vm2848_vm1, %v3074_v37  ;;  %v2909_v48 = vpack.c.bf16 %v2908_v35, %v2908_v35 }
 0x5da   : > { %12942 = vmatpush3.bf16.xpose.msra.mxu0 %v3193_v41  ;;  %12943 = vmatprep.mubr.msk.bf16.mxu0 %vm15196_vm0, %v15195_v58 }
 0x5db   : > { %12914 = vmatmul.mubr.msk.bf16.vlgmr.msra.gmra.mxu1 %vm2897_vm4, %v2909_v48  ;;  %12953 = vmatprep.subr.bf16.mxu0 %v15195_v58 }
 0x5dc   : > { %12918 = vmatpush3.bf16.xpose.msra.mxu1 %v2968_v39  ;;  %12919 = vmatprep.mubr.msk.bf16.mxu1 %vm15196_vm0, %v15195_v58  ;;  %v3408_v62 = vpop.permute.xlu1 %3407  ;;  %v5142_v39 = vsel %vm2848_vm1, %v16226_v57, 0 }
 0x5dd   : > { %12923 = vmatprep.subr.bf16.mxu1 %v15195_v58 }
 0x5e0   : > { %v3522_v9 = vpop.permute.xlu1 %3521 }
 0x5e1   : > { %12944 = vmatmul.mubr.msk.bf16.vlgmr.msra.gmra.mxu0 %vm2848_vm1, %v3186_v53 }
 0x5e2   : > { %12954 = vmatpush3.bf16.xpose.msra.mxu0 %v3303_v40  ;;  %12955 = vmatprep.mubr.msk.bf16.mxu0 %vm15196_vm0, %v15195_v58 }
 0x5e3   : > { %12920 = vmatmul.mubr.msk.bf16.vlgmr.msra.gmra.mxu1 %vm2848_vm1, %v2960_v14  ;;  %12965 = vmatprep.subr.bf16.mxu0 %v15195_v58 }
 0x5e4   : > { %12925 = vmatprep.mubr.msk.bf16.mxu1 %vm15196_vm0, %v15195_v58  ;;  %v3634_v11 = vpop.permute.xlu1 %3633 }
 0x5e8   : > { %v3856_v16 = vpop.permute.xlu1 %3855 }
 0x5e9   : > { %12956 = vmatmul.mubr.msk.bf16.vlgmr.msra.gmra.mxu0 %vm2848_vm1, %v3297_v22  ;;  %v4354_v22 = vpop.permute.xlu0 %4353 }
 0x5ea   : > { %12966 = vmatpush3.bf16.xpose.msra.mxu0 %v3416_v59  ;;  %12967 = vmatprep.mubr.msk.bf16.mxu0 %vm15196_vm0, %v15195_v58 }
 0x5eb   : > { %12977 = vmatprep.subr.bf16.mxu0 %v15195_v58 }
 0x5ec   : > { %v3970_v4 = vpop.permute.xlu1 %3969 }
 0x5ed   : > { %v4467_v24 = vpop.permute.xlu0 %4466 }
 0x5ee   : > { %v4472_v36 = vsel %vm2848_vm1, %v4467_v24, 0 }
 0x5f0   : > { %v4082_v21 = vpop.permute.xlu1 %4081 }
 0x5f1   : > { %12968 = vmatmul.mubr.msk.bf16.vlgmr.msra.gmra.mxu0 %vm2848_vm1, %v3408_v62  ;;  %v4579_v12 = vpop.permute.xlu0 %4578 }
 0x5f2   : > { %12978 = vmatpush3.bf16.xpose.msra.mxu0 %v3529_v46  ;;  %12979 = vmatprep.mubr.msk.bf16.mxu0 %vm15196_vm0, %v15195_v58  ;;  %v4584_v14 = vsel %vm2848_vm1, %v4579_v12, 0 }
 0x5f3   : > { %12989 = vmatprep.subr.bf16.mxu0 %v15195_v58 }
 0x5f4   : > { %v4351_v20 = vpop.permute.xlu1 %4350 }
 0x5f5   : > { %v4802_v28 = vpop.permute.xlu0 %4801 }
 0x5f6   : > { %v4807_v0 = vsel %vm2848_vm1, %v4802_v28, 0 }
 0x5f9   : > { %12980 = vmatmul.mubr.msk.bf16.vlgmr.msra.gmra.mxu0 %vm2848_vm1, %v3522_v9  ;;  %v4915_v33 = vpop.permute.xlu0 %4914 }
 0x5fa   : > { %12990 = vmatpush3.bf16.xpose.msra.mxu0 %v3641_v1  ;;  %12991 = vmatprep.mubr.msk.bf16.mxu0 %vm15196_vm0, %v15195_v58  ;;  %v4920_v35 = vsel %vm2848_vm1, %v4915_v33, 0 }
 0x5fb   : > { %13001 = vmatprep.subr.bf16.mxu0 %v15195_v58 }
 0x5fd   : > { %v5027_v37 = vpop.permute.xlu0 %5026 }
 0x5fe   : > { %v5032_v41 = vsel %vm2848_vm1, %v5027_v37, 0 }
 0x601   : > { %12992 = vmatmul.mubr.msk.bf16.vlgmr.msra.gmra.mxu0 %vm2848_vm1, %v3634_v11  ;;  %v5250_v53 = vpop.permute.xlu0 %5249 }
 0x602   : > { %13002 = vmatpush3.bf16.xpose.msra.mxu0 %v3751_v29  ;;  %13003 = vmatprep.mubr.msk.bf16.mxu0 %vm15196_vm0, %v15195_v58  ;;  %v5255_v40 = vsel %vm2848_vm1, %v5250_v53, 0 }
 0x603   : > { %13013 = vmatprep.subr.bf16.mxu0 %v15195_v58 }
 0x605   : > { %v5363_v38 = vpop.permute.xlu0 %5362 }
 0x606   : > { %v5368_v59 = vsel %vm2848_vm1, %v5363_v38, 0 }
 0x609   : > { %13004 = vmatmul.mubr.msk.bf16.vlgmr.msra.gmra.mxu0 %vm2848_vm1, %v16250_v23  ;;  %v4359_v23 = vsel %vm2848_vm1, %v4354_v22, 0  ;;  %v5475_v47 = vpop.permute.xlu0 %5474 }
 0x60a   : > { %13014 = vmatpush3.bf16.xpose.msra.mxu0 %v3864_v18  ;;  %13015 = vmatprep.mubr.msk.bf16.mxu0 %vm15196_vm0, %v15195_v58  ;;  %v5480_v62 = vsel %vm2848_vm1, %v5475_v47, 0 }
 0x60b   : > { %13025 = vmatprep.subr.bf16.mxu0 %v15195_v58 }
 0x611   : > { %13016 = vmatmul.mubr.msk.bf16.vlgmr.msra.gmra.mxu0 %vm2848_vm1, %v3856_v16 }
 0x612   : > { %13026 = vmatpush3.bf16.xpose.msra.mxu0 %v3977_v50  ;;  %13027 = vmatprep.mubr.msk.bf16.mxu0 %vm15196_vm0, %v15195_v58 }
 0x613   : > { %13037 = vmatprep.subr.bf16.mxu0 %v15195_v58 }
 0x619   : > { %13028 = vmatmul.mubr.msk.bf16.vlgmr.msra.gmra.mxu0 %vm2848_vm1, %v3970_v4 }
 0x61a   : > { %13038 = vmatpush3.bf16.xpose.msra.mxu0 %v4089_v61  ;;  %13039 = vmatprep.mubr.msk.bf16.mxu0 %vm15196_vm0, %v15195_v58 }
 0x61b   : > { %13049 = vmatprep.subr.bf16.mxu0 %v15195_v58 }
 0x621   : > { %13040 = vmatmul.mubr.msk.bf16.vlgmr.msra.gmra.mxu0 %vm2848_vm1, %v4082_v21 }
 0x622   : > { %13050 = vmatpush3.bf16.xpose.msra.mxu0 %v4246_v6  ;;  %13051 = vmatprep.mubr.msk.bf16.mxu0 %vm15196_vm0, %v15195_v58 }
 0x623   : > { %13061 = vmatprep.subr.bf16.mxu0 %v15195_v58 }
 0x629   : > { %13052 = vmatmul.mubr.msk.bf16.vlgmr.msra.gmra.mxu0 %vm2848_vm1, %v16260_v10  ;;  %v4465_v10 = vpop.permute.xlu1 %4464 }
 0x62a   : > { %13062 = vmatpush3.bf16.xpose.msra.mxu0 %v4359_v23  ;;  %13063 = vmatprep.mubr.msk.bf16.mxu0 %vm15196_vm0, %v15195_v58 }
 0x62b   : > { %13073 = vmatprep.subr.bf16.mxu0 %v15195_v58 }
 0x62d   : > { %v4577_v17 = vpop.permute.xlu1 %4576 }
 0x631   : > { %13064 = vmatmul.mubr.msk.bf16.vlgmr.msra.gmra.mxu0 %vm2848_vm1, %v4351_v20  ;;  %v4799_v19 = vpop.permute.xlu1 %4798 }
 0x632   : > { %13074 = vmatpush3.bf16.xpose.msra.mxu0 %v4472_v36  ;;  %13075 = vmatprep.mubr.msk.bf16.mxu0 %vm15196_vm0, %v15195_v58 }
 0x633   : > { %13085 = vmatprep.subr.bf16.mxu0 %v15195_v58 }
 0x639   : > { %13076 = vmatmul.mubr.msk.bf16.vlgmr.msra.gmra.mxu0 %vm2848_vm1, %v4465_v10 }
 0x63a   : > { %13086 = vmatpush3.bf16.xpose.msra.mxu0 %v4584_v14  ;;  %13087 = vmatprep.mubr.msk.bf16.mxu0 %vm15196_vm0, %v15195_v58 }
 0x63b   : > { %13097 = vmatprep.subr.bf16.mxu0 %v15195_v58 }
 0x641   : > { %13088 = vmatmul.mubr.msk.bf16.vlgmr.msra.gmra.mxu0 %vm2848_vm1, %v4577_v17 }
 0x642   : > { %13098 = vmatpush3.bf16.xpose.msra.mxu0 %v4694_v27  ;;  %13099 = vmatprep.mubr.msk.bf16.mxu0 %vm15196_vm0, %v15195_v58 }
 0x643   : > { %13109 = vmatprep.subr.bf16.mxu0 %v15195_v58 }
 0x649   : > { %13100 = vmatmul.mubr.msk.bf16.vlgmr.msra.gmra.mxu0 %vm2848_vm1, %v16271_v42  ;;  %v4913_v42 = vpop.permute.xlu1 %4912 }
 0x64a   : > { %13110 = vmatpush3.bf16.xpose.msra.mxu0 %v4807_v0  ;;  %13111 = vmatprep.mubr.msk.bf16.mxu0 %vm15196_vm0, %v15195_v58 }
 0x64b   : > { %13121 = vmatprep.subr.bf16.mxu0 %v15195_v58 }
 0x64d   : > { %v5025_v48 = vpop.permute.xlu1 %5024 }
 0x651   : > { %13112 = vmatmul.mubr.msk.bf16.vlgmr.msra.gmra.mxu0 %vm2848_vm1, %v4799_v19  ;;  %v5247_v57 = vpop.permute.xlu1 %5246 }
 0x652   : > { %13122 = vmatpush3.bf16.xpose.msra.mxu0 %v4920_v35  ;;  %13123 = vmatprep.mubr.msk.bf16.mxu0 %vm15196_vm0, %v15195_v58 }
 0x653   : > { %13133 = vmatprep.subr.bf16.mxu0 %v15195_v58 }
 0x659   : > { %13124 = vmatmul.mubr.msk.bf16.vlgmr.msra.gmra.mxu0 %vm2848_vm1, %v4913_v42 }
 0x65a   : > { %13134 = vmatpush3.bf16.xpose.msra.mxu0 %v5032_v41  ;;  %13135 = vmatprep.mubr.msk.bf16.mxu0 %vm15196_vm0, %v15195_v58 }
 0x65b   : > { %13145 = vmatprep.subr.bf16.mxu0 %v15195_v58 }
 0x661   : > { %13136 = vmatmul.mubr.msk.bf16.vlgmr.msra.gmra.mxu0 %vm2848_vm1, %v5025_v48 }
 0x662   : > { %13146 = vmatpush3.bf16.xpose.msra.mxu0 %v5142_v39  ;;  %13147 = vmatprep.mubr.msk.bf16.mxu0 %vm15196_vm0, %v15195_v58 }
 0x663   : > { %13157 = vmatprep.subr.bf16.mxu0 %v15195_v58 }
 0x669   : > { %13148 = vmatmul.mubr.msk.bf16.vlgmr.msra.gmra.mxu0 %vm2848_vm1, %v16281_v2  ;;  %v5361_v2 = vpop.permute.xlu1 %5360 }
 0x66a   : > { %13158 = vmatpush3.bf16.xpose.msra.mxu0 %v5255_v40  ;;  %13159 = vmatprep.mubr.msk.bf16.mxu0 %vm15196_vm0, %v15195_v58 }
 0x66b   : > { %13169 = vmatprep.subr.bf16.mxu0 %v15195_v58 }
 0x66d   : > { %v5473_v46 = vpop.permute.xlu1 %5472 }
 0x671   : > { %13160 = vmatmul.mubr.msk.bf16.vlgmr.msra.gmra.mxu0 %vm2848_vm1, %v5247_v57 }
 0x672   : > { %13170 = vmatpush3.bf16.xpose.msra.mxu0 %v5368_v59  ;;  %13171 = vmatprep.mubr.msk.bf16.mxu0 %vm15196_vm0, %v15195_v58 }
 0x673   : > { %13181 = vmatprep.subr.bf16.mxu0 %v15195_v58 }
 0x679   : > { %13172 = vmatmul.mubr.msk.bf16.vlgmr.msra.gmra.mxu0 %vm2848_vm1, %v5361_v2 }
 0x67a   : > { %13182 = vmatpush3.bf16.xpose.msra.mxu0 %v5480_v62  ;;  %13183 = vmatprep.mubr.msk.bf16.mxu0 %vm15196_vm0, %v15195_v58 }
 0x681   : > { %13184 = vmatmul.mubr.msk.bf16.vlgmr.msra.gmra.mxu0 %vm2848_vm1, %v5473_v46 }
 0x699   : > { %v3117_v5 = vpop.f32.mrf.mxu0 }
 0x69a   : > { %v3123_v9 = vmul.f32 0.17677669, %v3117_v5 }
 0x69b   : > { %v16413_v1 = vpop.f32.mrf.mxu1  ;;  %v12933_v11 = vpop.f32.mrf.mxu0 }
 0x69c   : > { %v16417_v29 = vsel %vm2845_vm3, %v3123_v9, -1e+30 }
 0x69d   : > { %v12915_v55 = vpop.f32.mrf.mxu1  ;;  %v3120_v18 = vpop.f32.mrf.mxu0  ;;  %v3125_v45 = vsel %vm2897_vm4, %v16417_v29, -inf }
 0x69e   : > { %3126 = vmax.xlane.f32.xlu1 %v3125_v45 }
 0x69f   : > { %v2955_v16 = vpop.f32.mrf.mxu1  ;;  %v12934_v50 = vpop.f32.mrf.mxu0 }
 0x6a0   : > { %v16451_v16 = vpack.c.bf16 %v16159_v26, %v16159_v26 }
 0x6a1   : > { %v12916_v52 = vpop.f32.mrf.mxu1  ;;  %v3229_v4 = vpop.f32.mrf.mxu0 }
 0x6a2   : > { %v3235_v61 = vmul.f32 0.17677669, %v3229_v4 }
 0x6a3   : > { %v16421_v21 = vpop.f32.mrf.mxu1  ;;  %v12945_v6 = vpop.f32.mrf.mxu0 }
 0x6a4   : > { %v16425_v22 = vsel %vm2845_vm3, %v3235_v61, -1e+30 }
 0x6a5   : > { %v12921_v23 = vpop.f32.mrf.mxu1  ;;  %v3232_v24 = vpop.f32.mrf.mxu0  ;;  %v3237_v20 = vsel %vm2897_vm4, %v16425_v22, -inf }
 0x6a6   : > { %3238 = vmax.xlane.f32.xlu0 %v3237_v20 }
 0x6a7   : > { %v3007_v36 = vpop.f32.mrf.mxu1  ;;  %v12946_v12 = vpop.f32.mrf.mxu0 }
 0x6a9   : > { %v12922_v10 = vpop.f32.mrf.mxu1  ;;  %v3339_v14 = vpop.f32.mrf.mxu0 }
 0x6aa   : > { %v3345_v17 = vmul.f32 0.17677669, %v3339_v14 }
 0x6ab   : > { %v12957_v27 = vpop.f32.mrf.mxu0 }
 0x6ac   : > { %v16431_v28 = vsel %vm2845_vm3, %v3345_v17, -1e+30 }
 0x6ad   : > { %v3342_v0 = vpop.f32.mrf.mxu0  ;;  %v3347_v33 = vsel %vm2897_vm4, %v16431_v28, -inf }
 0x6ae   : > { %3348 = vmax.xlane.f32.xlu0 %v3347_v33 }
 0x6af   : > { %v12958_v19 = vpop.f32.mrf.mxu0 }
 0x6b1   : > { %v3452_v35 = vpop.f32.mrf.mxu0 }
 0x6b2   : > { %v3458_v37 = vmul.f32 0.17677669, %v3452_v35 }
 0x6b3   : > { %v12969_v42 = vpop.f32.mrf.mxu0 }
 0x6b4   : > { %v16437_v41 = vsel %vm2845_vm3, %v3458_v37, -1e+30 }
 0x6b5   : > { %v3455_v48 = vpop.f32.mrf.mxu0  ;;  %v3460_v39 = vsel %vm2897_vm4, %v16437_v41, -inf }
 0x6b6   : > { %3461 = vmax.xlane.f32.xlu0 %v3460_v39 }
 0x6b7   : > { %v12970_v53 = vpop.f32.mrf.mxu0 }
 0x6b9   : > { %v3565_v40 = vpop.f32.mrf.mxu0 }
 0x6ba   : > { %v3571_v38 = vmul.f32 0.17677669, %v3565_v40 }
 0x6bb   : > { %v12981_v57 = vpop.f32.mrf.mxu0 }
 0x6bc   : > { %v16443_v59 = vsel %vm2845_vm3, %v3571_v38, -1e+30 }
 0x6bd   : > { %v3568_v47 = vpop.f32.mrf.mxu0  ;;  %v3573_v2 = vsel %vm2897_vm4, %v16443_v59, -inf }
 0x6be   : > { %3574 = vmax.xlane.f32.xlu1 %v3573_v2 }
 0x6bf   : > { %v12982_v62 = vpop.f32.mrf.mxu0 }
 0x6c1   : > { %v3677_v46 = vpop.f32.mrf.mxu0 }
 0x6c2   : > { %v3683_v14 = vmul.f32 0.17677669, %v3677_v46 }
 0x6c3   : > { %v12993_v5 = vpop.f32.mrf.mxu0 }
 0x6c5   : > { %v3680_v9 = vpop.f32.mrf.mxu0 }
 0x6c7   : > { %v12994_v11 = vpop.f32.mrf.mxu0 }
 0x6c9   : > { %v3787_v55 = vpop.f32.mrf.mxu0 }
 0x6ca   : > { %v3793_v40 = vmul.f32 0.17677669, %v3787_v55 }
 0x6cb   : > { %v13005_v18 = vpop.f32.mrf.mxu0 }
 0x6cc   : > { %3137 = vrot.lane.b32.xlu0 %v16157_v25, %s15199_s17  ;;  %v16481_v5 = vsel %vm2845_vm3, %v3793_v40, -1e+30 }
 0x6cd   : > { %v3790_v45 = vpop.f32.mrf.mxu0  ;;  %v3795_v11 = vsel %vm2897_vm4, %v16481_v5, -inf }
 0x6cf   : > { %3025 = vrot.lane.b32.xlu1 %v16157_v25, %s15197_s15  ;;  %v13006_v50 = vpop.f32.mrf.mxu0 }
 0x6d0   : > { %3473 = vrot.lane.b32.xlu0 %v16451_v16, %s15197_s15 }
 0x6d1   : > { %v3900_v52 = vpop.f32.mrf.mxu0 }
 0x6d2   : > { %v3906_v0 = vmul.f32 0.17677669, %v3900_v52 }
 0x6d3   : > { %3249 = vrot.lane.b32.xlu1 %v16157_v25, %s15198_s21  ;;  %v13017_v4 = vpop.f32.mrf.mxu0  ;;  %v16463_v25 = vsel %vm2845_vm3, %v3683_v14, -1e+30 }
 0x6d4   : > { %v3685_v35 = vsel %vm2897_vm4, %v16463_v25, -inf  ;;  %v16469_v48 = vsel %vm2845_vm3, %v3906_v0, -1e+30 }
 0x6d5   : > { %v3903_v61 = vpop.f32.mrf.mxu0  ;;  %v3908_v53 = vsel %vm2897_vm4, %v16469_v48, -inf }
 0x6d7   : > { %3585 = vrot.lane.b32.xlu1 %v16451_v16, %s15199_s17  ;;  %v13018_v6 = vpop.f32.mrf.mxu0 }
 0x6d9   : > { %v4013_v23 = vpop.f32.mrf.mxu0 }
 0x6da   : > { %v4019_v62 = vmul.f32 0.17677669, %v4013_v23 }
 0x6db   : > { %v13029_v26 = vpop.f32.mrf.mxu0 }
 0x6dc   : > { %v16487_v45 = vsel %vm2845_vm3, %v4019_v62, -1e+30 }
 0x6dd   : > { %v4016_v24 = vpop.f32.mrf.mxu0  ;;  %v4021_v52 = vsel %vm2897_vm4, %v16487_v45, -inf }
 0x6df   : > { %v13030_v20 = vpop.f32.mrf.mxu0 }
 0x6e1   : > { %v4125_v36 = vpop.f32.mrf.mxu0 }
 0x6e2   : > { %v4131_v37 = vmul.f32 0.17677669, %v4125_v36 }
 0x6e3   : > { %v13041_v12 = vpop.f32.mrf.mxu0 }
 0x6e4   : > { %v16475_v57 = vsel %vm2845_vm3, %v4131_v37, -1e+30 }
 0x6e5   : > { %v4128_v10 = vpop.f32.mrf.mxu0  ;;  %v4133_v2 = vsel %vm2897_vm4, %v16475_v57, -inf }
 0x6e7   : > { %v13042_v17 = vpop.f32.mrf.mxu0 }
 0x6e9   : > { %v4282_v27 = vpop.f32.mrf.mxu0 }
 0x6ea   : > { %v4288_v55 = vmul.f32 0.17677669, %v4282_v27 }
 0x6eb   : > { %v13053_v33 = vpop.f32.mrf.mxu0 }
 0x6ec   : > { %v16493_v6 = vsel %vm2845_vm3, %v4288_v55, -1e+30 }
 0x6ed   : > { %v4285_v19 = vpop.f32.mrf.mxu0  ;;  %v4290_v26 = vsel %vm2897_vm4, %v16493_v6, -inf }
 0x6ef   : > { %3686 = vmax.xlane.f32.xlu0 %v3685_v35  ;;  %v13054_v42 = vpop.f32.mrf.mxu0 }
 0x6f1   : > { %v4395_v39 = vpop.f32.mrf.mxu0 }
 0x6f2   : > { %v4401_v4 = vmul.f32 0.17677669, %v4395_v39 }
 0x6f3   : > { %3909 = vmax.xlane.f32.xlu0 %v3908_v53  ;;  %v13065_v38 = vpop.f32.mrf.mxu0 }
 0x6f4   : > { %v16499_v36 = vsel %vm2845_vm3, %v4401_v4, -1e+30 }
 0x6f5   : > { %v4398_v47 = vpop.f32.mrf.mxu0  ;;  %v4403_v10 = vsel %vm2897_vm4, %v16499_v36, -inf }
 0x6f7   : > { %4134 = vmax.xlane.f32.xlu0 %v4133_v2  ;;  %v13066_v46 = vpop.f32.mrf.mxu0 }
 0x6f9   : > { %v4508_v9 = vpop.f32.mrf.mxu0 }
 0x6fa   : > { %v4514_v24 = vmul.f32 0.17677669, %v4508_v9 }
 0x6fb   : > { %3796 = vmax.xlane.f32.xlu1 %v3795_v11  ;;  %v13077_v18 = vpop.f32.mrf.mxu0 }
 0x6fc   : > { %v16505_v27 = vsel %vm2845_vm3, %v4514_v24, -1e+30 }
 0x6fd   : > { %v4511_v50 = vpop.f32.mrf.mxu0  ;;  %v4516_v19 = vsel %vm2897_vm4, %v16505_v27, -inf }
 0x6ff   : > { %4022 = vmax.xlane.f32.xlu1 %v4021_v52  ;;  %v13078_v61 = vpop.f32.mrf.mxu0 }
 0x701   : > { %v4620_v23 = vpop.f32.mrf.mxu0 }
 0x702   : > { %v4626_v14 = vmul.f32 0.17677669, %v4620_v23 }
 0x703   : > { %4291 = vmax.xlane.f32.xlu1 %v4290_v26  ;;  %v13089_v20 = vpop.f32.mrf.mxu0 }
 0x704   : > { %v16511_v37 = vsel %vm2845_vm3, %v4626_v14, -1e+30 }
 0x705   : > { %v4623_v12 = vpop.f32.mrf.mxu0  ;;  %v4628_v40 = vsel %vm2897_vm4, %v16511_v37, -inf }
 0x707   : > { %4404 = vmax.xlane.f32.xlu1 %v4403_v10  ;;  %v13090_v17 = vpop.f32.mrf.mxu0 }
 0x709   : > { %v4730_v0 = vpop.f32.mrf.mxu0 }
 0x70a   : > { %v4736_v33 = vmul.f32 0.17677669, %v4730_v0 }
 0x70b   : > { %4517 = vmax.xlane.f32.xlu1 %v4516_v19  ;;  %v13101_v35 = vpop.f32.mrf.mxu0 }
 0x70c   : > { %v16515_v42 = vsel %vm2845_vm3, %v4736_v33, -1e+30 }
 0x70d   : > { %v4733_v39 = vpop.f32.mrf.mxu0  ;;  %v4738_v53 = vsel %vm2897_vm4, %v16515_v42, -inf }
 0x70e   : > { %4739 = vmax.xlane.f32.xlu0 %v4738_v53 }
 0x70f   : > { %4629 = vmax.xlane.f32.xlu1 %v4628_v40  ;;  %v13102_v38 = vpop.f32.mrf.mxu0 }
 0x711   : > { %v4843_v47 = vpop.f32.mrf.mxu0 }
 0x712   : > { %v4849_v2 = vmul.f32 0.17677669, %v4843_v47 }
 0x713   : > { %v13113_v62 = vpop.f32.mrf.mxu0 }
 0x714   : > { %v16523_v46 = vsel %vm2845_vm3, %v4849_v2, -1e+30 }
 0x715   : > { %v4846_v9 = vpop.f32.mrf.mxu0  ;;  %v4851_v11 = vsel %vm2897_vm4, %v16523_v46, -inf }
 0x716   : > { %4852 = vmax.xlane.f32.xlu1 %v4851_v11 }
 0x717   : > { %v13114_v55 = vpop.f32.mrf.mxu0 }
 0x719   : > { %v4956_v18 = vpop.f32.mrf.mxu0 }
 0x71a   : > { %v4962_v50 = vmul.f32 0.17677669, %v4956_v18 }
 0x71b   : > { %v13125_v52 = vpop.f32.mrf.mxu0 }
 0x71c   : > { %v16529_v4 = vsel %vm2845_vm3, %v4962_v50, -1e+30 }
 0x71d   : > { %v4959_v61 = vpop.f32.mrf.mxu0  ;;  %v4964_v23 = vsel %vm2897_vm4, %v16529_v4, -inf }
 0x71e   : > { %4965 = vmax.xlane.f32.xlu0 %v4964_v23 }
 0x71f   : > { %v13126_v26 = vpop.f32.mrf.mxu0 }
 0x721   : > { %v5068_v24 = vpop.f32.mrf.mxu0 }
 0x722   : > { %v5074_v20 = vmul.f32 0.17677669, %v5068_v24 }
 0x723   : > { %v13137_v12 = vpop.f32.mrf.mxu0 }
 0x724   : > { %v16535_v10 = vsel %vm2845_vm3, %v5074_v20, -1e+30 }
 0x725   : > { %v5071_v14 = vpop.f32.mrf.mxu0  ;;  %v5076_v17 = vsel %vm2897_vm4, %v16535_v10, -inf }
 0x726   : > { %5077 = vmax.xlane.f32.xlu1 %v5076_v17 }
 0x727   : > { %v3127_v0 = vpop.xlane.xlu1 %3126  ;;  %v13138_v33 = vpop.f32.mrf.mxu0 }
 0x728   : > { %v3128_v19 = vsub.f32 %v16417_v29, %v3127_v0 }
 0x729   : > { %v5178_v35 = vpop.f32.mrf.mxu0 }
 0x72a   : > { %v3129_v39 = vmul.f32 1.442695, %v3128_v19  ;;  %v5184_v53 = vmul.f32 0.17677669, %v5178_v35 }
 0x72b   : > { %v13149_v40 = vpop.f32.mrf.mxu0 }
 0x72c   : > { %14626 = vpow2.f32 %v3129_v39  ;;  %v16542_v38 = vsel %vm2845_vm3, %v5184_v53, -1e+30 }
 0x72d   : > { %v5181_v47 = vpop.f32.mrf.mxu0  ;;  %v5186_v2 = vsel %vm2897_vm4, %v16542_v38, -inf }
 0x72e   : > { %5187 = vmax.xlane.f32.xlu0 %v5186_v2 }
 0x72f   : > { %v13150_v62 = vpop.f32.mrf.mxu0  ;;  %v3239_v9 = vpop.xlane.xlu0 %3238 }
 0x730   : > { %v3240_v11 = vsub.f32 %v16425_v22, %v3239_v9 }
 0x731   : > { %v5291_v55 = vpop.f32.mrf.mxu0 }
 0x732   : > { %v3241_v29 = vmul.f32 1.442695, %v3240_v11  ;;  %v5297_v18 = vmul.f32 0.17677669, %v5291_v55 }
 0x733   : > { %v13161_v50 = vpop.f32.mrf.mxu0 }
 0x734   : > { %14628 = vpow2.f32 %v3241_v29  ;;  %v16549_v52 = vsel %vm2845_vm3, %v5297_v18, -1e+30 }
 0x735   : > { %v5294_v61 = vpop.f32.mrf.mxu0  ;;  %v5299_v23 = vsel %vm2897_vm4, %v16549_v52, -inf }
 0x736   : > { %5300 = vmax.xlane.f32.xlu1 %v5299_v23 }
 0x737   : > { %v13162_v26 = vpop.f32.mrf.mxu0  ;;  %v3349_v24 = vpop.xlane.xlu0 %3348 }
 0x738   : > { %v3350_v20 = vsub.f32 %v16431_v28, %v3349_v24 }
 0x739   : > { %v16554_v12 = vpop.eup %14626  ;;  %v16556_v22 = vpop.f32.mrf.mxu0 }
 0x73a   : > { %v3351_v14 = vmul.f32 1.442695, %v3350_v20  ;;  %v3131_v17 = vsel %vm2897_vm4, %v16554_v12, 0.0 }
 0x73b   : > { %3132 = vadd.xlane.f32.xlu0 %v3131_v17  ;;  %v13173_v0 = vpop.f32.mrf.mxu0 }
 0x73c   : > { %14630 = vpow2.f32 %v3351_v14 }
 0x73d   : > { %v5407_v33 = vpop.f32.mrf.mxu0 }
 0x73f   : > { %v13174_v19 = vpop.f32.mrf.mxu0  ;;  %v3462_v35 = vpop.xlane.xlu0 %3461 }
 0x740   : > { %v3463_v39 = vsub.f32 %v16437_v41, %v3462_v35 }
 0x741   : > { %v16561_v53 = vpop.eup %14628  ;;  %v5516_v40 = vpop.f32.mrf.mxu0 }
 0x742   : > { %v3464_v28 = vmul.f32 1.442695, %v3463_v39  ;;  %v3243_v47 = vsel %vm2897_vm4, %v16561_v53, 0.0 }
 0x743   : > { %v13185_v2 = vpop.f32.mrf.mxu0  ;;  %3244 = vadd.xlane.f32.xlu0 %v3243_v47  ;;  %v16580_v20 = vpop.permute.xlu0 %3137 }
 0x744   : > { %14632 = vpow2.f32 %v3464_v28 }
 0x745   : > { %v5519_v62 = vpop.f32.mrf.mxu0 }
 0x747   : > { %v3575_v9 = vpop.xlane.xlu1 %3574  ;;  %v13186_v11 = vpop.f32.mrf.mxu0 }
 0x748   : > { %v3576_v55 = vsub.f32 %v16443_v59, %v3575_v9  ;;  %v16582_v14 = vpop.permute.xlu0 %3473 }
 0x749   : > { %v16566_v29 = vpop.eup %14630 }
 0x74a   : > { %v3577_v18 = vmul.f32 1.442695, %v3576_v55  ;;  %v3353_v41 = vsel %vm2897_vm4, %v16566_v29, 0.0 }
 0x74b   : > { %v3026_v50 = vpop.permute.xlu1 %3025  ;;  %3354 = vadd.xlane.f32.xlu0 %v3353_v41 }
 0x74c   : > { %14634 = vpow2.f32 %v3577_v18  ;;  %v3031_v61 = vsel %vm2914_vm2, %v3026_v50, 0 }
 0x74d   : > { %12924 = vmatpush3.bf16.msra.mxu1 %v3031_v61 }
 0x74e   : > { %12935 = vmatprep.subr.bf16.mxu1 %v15195_v58 }
 0x74f   : > { %v16585_v33 = vpop.permute.xlu1 %3249 }
 0x751   : > { %v16572_v23 = vpop.eup %14632 }
 0x752   : > { %v3466_v26 = vsel %vm2897_vm4, %v16572_v23, 0.0 }
 0x753   : > { %3467 = vadd.xlane.f32.xlu0 %v3466_v26  ;;  %v16588_v47 = vpop.permute.xlu1 %3585 }
 0x759   : > { %v16576_v59 = vpop.eup %14634 }
 0x75a   : > { %v3579_v24 = vsel %vm2897_vm4, %v16576_v59, 0.0 }
 0x75b   : > { %3580 = vadd.xlane.f32.xlu0 %v3579_v24 }
 0x778   : > { %v3687_v17 = vpop.xlane.xlu0 %3686 }
 0x779   : > { %v3688_v0 = vsub.f32 %v16463_v25, %v3687_v17 }
 0x77b   : > { %v3689_v19 = vmul.f32 1.442695, %v3688_v0  ;;  %v5522_v0 = vmul.f32 0.17677669, %v5516_v40 }
 0x77c   : > { %v3910_v35 = vpop.xlane.xlu0 %3909 }
 0x77d   : > { %14636 = vpow2.f32 %v3689_v19  ;;  %v3911_v39 = vsub.f32 %v16469_v48, %v3910_v35  ;;  %v16608_v35 = vsel %vm2845_vm3, %v5522_v0, -1e+30  ;;  %v5410_v0 = vmul.f32 0.17677669, %v16556_v22 }
 0x77e   : > { %v5524_v40 = vsel %vm2897_vm4, %v16608_v35, -inf }
 0x77f   : > { %v3912_v28 = vmul.f32 1.442695, %v3911_v39 }
 0x780   : > { %v4135_v2 = vpop.xlane.xlu0 %4134 }
 0x781   : > { %14638 = vpow2.f32 %v3912_v28  ;;  %v4136_v62 = vsub.f32 %v16475_v57, %v4135_v2  ;;  %v3010_v28 = vmul.f32 0.17677669, %v16421_v21  ;;  %v16630_v21 = vpack.c.bf16 %v16169_v54, %v16169_v54 }
 0x783   : > { %v4137_v9 = vmul.f32 1.442695, %v4136_v62 }
 0x784   : > { %v3797_v11 = vpop.xlane.xlu1 %3796 }
 0x785   : > { %14640 = vpow2.f32 %v4137_v9  ;;  %v3798_v55 = vsub.f32 %v16481_v5, %v3797_v11  ;;  %v3011_v9 = vsel %vm2845_vm3, %v3010_v28, -1e+30 }
 0x787   : > { %v3799_v25 = vmul.f32 1.442695, %v3798_v55 }
 0x788   : > { %v4023_v18 = vpop.xlane.xlu1 %4022 }
 0x789   : > { %14642 = vpow2.f32 %v3799_v25  ;;  %v4024_v41 = vsub.f32 %v16487_v45, %v4023_v18  ;;  %v3012_v25 = vsel %vm2897_vm4, %v3011_v9, -inf }
 0x78a   : > { %v16593_v50 = vpop.eup %14636 }
 0x78b   : > { %v4025_v48 = vmul.f32 1.442695, %v4024_v41  ;;  %v3691_v61 = vsel %vm2897_vm4, %v16593_v50, 0.0 }
 0x78c   : > { %v4292_v26 = vpop.xlane.xlu1 %4291  ;;  %3692 = vadd.xlane.f32.xlu0 %v3691_v61 }
 0x78d   : > { %14644 = vpow2.f32 %v4025_v48  ;;  %v4293_v57 = vsub.f32 %v16493_v6, %v4292_v26 }
 0x78e   : > { %v16598_v24 = vpop.eup %14638 }
 0x78f   : > { %v4294_v17 = vmul.f32 1.442695, %v4293_v57  ;;  %v3914_v5 = vsel %vm2897_vm4, %v16598_v24, 0.0 }
 0x790   : > { %3915 = vadd.xlane.f32.xlu1 %v3914_v5  ;;  %v4405_v18 = vpop.xlane.xlu1 %4404 }
 0x791   : > { %14646 = vpow2.f32 %v4294_v17  ;;  %v4406_v26 = vsub.f32 %v16499_v36, %v4405_v18 }
 0x792   : > { %v16602_v45 = vpop.eup %14640 }
 0x793   : > { %v4139_v19 = vsel %vm2897_vm4, %v16602_v45, 0.0  ;;  %v4407_v5 = vmul.f32 1.442695, %v4406_v26 }
 0x794   : > { %4140 = vadd.xlane.f32.xlu1 %v4139_v19  ;;  %v4518_v41 = vpop.xlane.xlu1 %4517 }
 0x795   : > { %v4519_v48 = vsub.f32 %v16505_v27, %v4518_v41 }
 0x796   : > { %v16610_v6 = vpop.eup %14642 }
 0x797   : > { %v3801_v39 = vsel %vm2897_vm4, %v16610_v6, 0.0  ;;  %v4740_v61 = vpop.xlane.xlu0 %4739  ;;  %v4520_v57 = vmul.f32 1.442695, %v4519_v48 }
 0x798   : > { %3802 = vadd.xlane.f32.xlu0 %v3801_v39  ;;  %5525 = vmax.xlane.f32.xlu1 %v5524_v40  ;;  %v4741_v17 = vsub.f32 %v16515_v42, %v4740_v61  ;;  %v5411_v39 = vsel %vm2845_vm3, %v5410_v0, -1e+30 }
 0x799   : > { %14648 = vpow2.f32 %v4520_v57  ;;  %v5412_v27 = vsel %vm2897_vm4, %v5411_v39, -inf }
 0x79a   : > { %v16617_v2 = vpop.eup %14644  ;;  %v4742_v54 = vmul.f32 1.442695, %v4741_v17  ;;  %14650 = vpow2.f32 %v4407_v5 }
 0x79b   : > { %v4027_v62 = vsel %vm2897_vm4, %v16617_v2, 0.0 }
 0x79c   : > { %4028 = vadd.xlane.f32.xlu0 %v4027_v62  ;;  %14652 = vpow2.f32 %v4742_v54 }
 0x79e   : > { %v16623_v11 = vpop.eup %14646 }
 0x79f   : > { %v4296_v55 = vsel %vm2897_vm4, %v16623_v11, 0.0 }
 0x7a0   : > { %4297 = vadd.xlane.f32.xlu1 %v4296_v55  ;;  %3013 = vmax.xlane.f32.xlu0 %v3012_v25 }
 0x7a6   : > { %v16640_v19 = vpop.eup %14648 }
 0x7a7   : > { %v16644_v40 = vpop.eup %14650  ;;  %v4522_v36 = vsel %vm2897_vm4, %v16640_v19, 0.0  ;;  %v4966_v62 = vpop.xlane.xlu0 %4965 }
 0x7a8   : > { %v4409_v22 = vsel %vm2897_vm4, %v16644_v40, 0.0 }
 0x7a9   : > { %v16649_v42 = vpop.eup %14652 }
 0x7aa   : > { %v4744_v28 = vsel %vm2897_vm4, %v16649_v42, 0.0 }
 0x7b1   : > { %3921 = vrot.lane.b32.xlu1 %v16630_v21, %s15197_s15 }
 0x7b6   : > { %3697 = vrot.lane.b32.xlu0 %v16451_v16, %s15198_s21 }
 0x7b7   : > { %v5188_v55 = vpop.xlane.xlu0 %5187 }
 0x7b8   : > { %v5189_v25 = vsub.f32 %v16542_v38, %v5188_v55  ;;  %v2716_v38 = vadd.f32 %v16167_v51, %v16154_v8 }
 0x7ba   : > { %v5190_v18 = vmul.f32 1.442695, %v5189_v25  ;;  %v2759_v54 = vadd.f32 %v16149_v7, %v2716_v38  ;;  %v4630_v7 = vpop.xlane.xlu1 %4629 }
 0x7bb   : > { %v4631_v51 = vsub.f32 %v16511_v37, %v4630_v7 }
 0x7bc   : > { %14654 = vpow2.f32 %v5190_v18 }
 0x7bd   : > { %v4632_v38 = vmul.f32 1.442695, %v4631_v51 }
 0x7be   : > { %v4853_v18 = vpop.xlane.xlu1 %4852 }
 0x7c4   : > { %v16668_v49 = vpop.xlane.xlu0 %3132 }
 0x7c9   : > { %v16674_v61 = vpop.eup %14654 }
 0x7ca   : > { %v5192_v57 = vsel %vm2897_vm4, %v16674_v61, 0.0 }
 0x7cc   : > { %v16670_v41 = vpop.xlane.xlu0 %3244 }
 0x7d4   : > { %v16672_v48 = vpop.xlane.xlu0 %3354 }
 0x7d5   : > { %4523 = vadd.xlane.f32.xlu1 %v4522_v36  ;;  %5413 = vmax.xlane.f32.xlu0 %v5412_v27  ;;  %v16689_v36 = vpack.c.bf16 %v2759_v54, %v2759_v54 }
 0x7d9   : > { %4745 = vadd.xlane.f32.xlu1 %v4744_v28  ;;  %4410 = vadd.xlane.f32.xlu0 %v4409_v22 }
 0x7dc   : > { %v16676_v26 = vpop.xlane.xlu0 %3467 }
 0x7e4   : > { %v16680_v17 = vpop.xlane.xlu0 %3580 }
 0x7ea   : > { %4416 = vrot.lane.b32.xlu1 %v16657_v60, %s15197_s15 }
 0x7ee   : > { %4528 = vrot.lane.b32.xlu1 %v16657_v60, %s15199_s17 }
 0x7ef   : > { %4033 = vrot.lane.b32.xlu0 %v16630_v21, %s15199_s17 }
 0x7f2   : > { %4640 = vrot.lane.b32.xlu1 %v16657_v60, %s15198_s21 }
 0x815   : > { %v16684_v5 = vpop.xlane.xlu0 %3692 }
 0x816   : > { %5193 = vadd.xlane.f32.xlu1 %v5192_v57 }
 0x821   : > { %v16687_v0 = vpop.xlane.xlu0 %3802 }
 0x825   : > { %v16691_v27 = vpop.xlane.xlu0 %4028 }
 0x827   : > { %4976 = vrot.lane.b32.xlu1 %v16689_v36, %s15199_s17 }
 0x829   : > { %v3014_v28 = vpop.xlane.xlu0 %3013 }
 0x82a   : > { %v3015_v22 = vsub.f32 %v3011_v9, %v3014_v28  ;;  %v4854_v9 = vsub.f32 %v16523_v46, %v4853_v18  ;;  %v16729_v18 = vpack.c.bf16 %v16171_v56, %v16171_v56 }
 0x82c   : > { %v3016_v55 = vmul.f32 1.442695, %v3015_v22  ;;  %v4855_v22 = vmul.f32 1.442695, %v4854_v9 }
 0x82d   : > { %v16702_v57 = vpop.permute.xlu0 %3697 }
 0x82e   : > { %14656 = vpow2.f32 %v3016_v55  ;;  %v4967_v55 = vsub.f32 %v16529_v4, %v4966_v62 }
 0x82f   : > { %14658 = vpow2.f32 %v4632_v38 }
 0x830   : > { %v4968_v63 = vmul.f32 1.442695, %v4967_v55 }
 0x83b   : > { %v16695_v25 = vpop.eup %14656 }
 0x83c   : > { %v3018_v8 = vsel %vm2897_vm4, %v16695_v25, 0.0  ;;  %v16707_v7 = vpop.eup %14658 }
 0x83d   : > { %3019 = vadd.xlane.f32.xlu0 %v3018_v8  ;;  %v5078_v8 = vpop.xlane.xlu1 %5077  ;;  %v4634_v46 = vsel %vm2897_vm4, %v16707_v7, 0.0 }
 0x83e   : > { %v5079_v43 = vsub.f32 %v16535_v10, %v5078_v8 }
 0x840   : > { %v5080_v37 = vmul.f32 1.442695, %v5079_v43 }
 0x841   : > { %v5301_v38 = vpop.xlane.xlu1 %5300 }
 0x842   : > { %v5302_v9 = vsub.f32 %v16549_v52, %v5301_v38 }
 0x845   : > { %v16744_v55 = vpop.xlane.xlu1 %3915 }
 0x853   : > { %4145 = vrot.lane.b32.xlu0 %v16630_v21, %s15198_s21 }
 0x85e   : > { %v5414_v54 = vpop.xlane.xlu0 %5413 }
 0x85f   : > { %v5415_v28 = vsub.f32 %v5411_v39, %v5414_v54  ;;  %v5303_v54 = vmul.f32 1.442695, %v5302_v9 }
 0x861   : > { %v5416_v3 = vmul.f32 1.442695, %v5415_v28 }
 0x863   : > { %14660 = vpow2.f32 %v5416_v3 }
 0x864   : > { %14662 = vpow2.f32 %v4855_v22  ;;  %v16742_v22 = vpop.xlane.xlu0 %4410 }
 0x865   : > { %14664 = vpow2.f32 %v4968_v63 }
 0x866   : > { %14666 = vpow2.f32 %v5080_v37  ;;  %v16748_v37 = vpop.xlane.xlu1 %4140 }
 0x867   : > { %14668 = vpow2.f32 %v5303_v54  ;;  %v3143_v54 = vsel %vm2914_vm2, %v16580_v20, 0 }
 0x868   : > { %v16746_v8 = vpop.permute.xlu0 %4033 }
 0x86a   : > { %v5526_v52 = vpop.xlane.xlu1 %5525 }
 0x870   : > { %v16709_v51 = vpop.eup %14660 }
 0x871   : > { %v5418_v4 = vsel %vm2897_vm4, %v16709_v51, 0.0  ;;  %v16715_v39 = vpop.eup %14662 }
 0x872   : > { %4635 = vadd.xlane.f32.xlu0 %v4634_v46  ;;  %5419 = vadd.xlane.f32.xlu1 %v5418_v4  ;;  %v4857_v3 = vsel %vm2897_vm4, %v16715_v39, 0.0  ;;  %v16719_v63 = vpop.eup %14664  ;;  %v5527_v4 = vsub.f32 %v16608_v35, %v5526_v52 }
 0x873   : > { %v4970_v43 = vsel %vm2897_vm4, %v16719_v63, 0.0  ;;  %v16723_v10 = vpop.eup %14666 }
 0x874   : > { %v5082_v62 = vsel %vm2897_vm4, %v16723_v10, 0.0  ;;  %v16738_v28 = vpop.eup %14668 }
 0x875   : > { %v5305_v56 = vsel %vm2897_vm4, %v16738_v28, 0.0 }
 0x876   : > { %4858 = vadd.xlane.f32.xlu0 %v4857_v3  ;;  %v5528_v3 = vmul.f32 1.442695, %v5527_v4  ;;  %v3479_v4 = vsel %vm2914_vm2, %v16582_v14, 0 }
 0x87a   : > { %4971 = vadd.xlane.f32.xlu0 %v4970_v43 }
 0x87e   : > { %5083 = vadd.xlane.f32.xlu0 %v5082_v62 }
 0x883   : > { %5312 = vrot.lane.b32.xlu1 %v16729_v18, %s15197_s15 }
 0x887   : > { %5424 = vrot.lane.b32.xlu1 %v16729_v18, %s15199_s17 }
 0x894   : > { %4864 = vrot.lane.b32.xlu0 %v16689_v36, %s15197_s15 }
 0x8b3   : > { %5306 = vadd.xlane.f32.xlu0 %v5305_v56 }
 0x8c6   : > { %v3020_v46 = vpop.xlane.xlu0 %3019 }
 0x8c7   : > { %14670 = vrcp.f32 %v3020_v46 }
 0x8c8   : > { %14672 = vrcp.f32 %v16668_v49 }
 0x8c9   : > { %5088 = vrot.lane.b32.xlu0 %v16689_v36, %s15198_s21  ;;  %14674 = vrcp.f32 %v16670_v41 }
 0x8ca   : > { %14676 = vpow2.f32 %v5528_v3 }
 0x8cb   : > { %14678 = vrcp.f32 %v16672_v48 }
 0x8cc   : > { %14680 = vrcp.f32 %v16676_v26 }
 0x8cd   : > { %14682 = vrcp.f32 %v16680_v17 }
 0x8ce   : > { %14684 = vrcp.f32 %v16684_v5 }
 0x8cf   : > { %14686 = vrcp.f32 %v16687_v0 }
 0x8d0   : > { %14688 = vrcp.f32 %v16744_v55 }
 0x8d1   : > { %14690 = vrcp.f32 %v16691_v27 }
 0x8d2   : > { %14692 = vrcp.f32 %v16748_v37 }
 0x8d4   : > { %v14671_v43 = vpop.eup %14670 }
 0x8d5   : > { %v3022_v62 = vmul.f32 %v14671_v43, %v16695_v25  ;;  %v14673_v9 = vpop.eup %14672  ;;  %v3255_v25 = vsel %vm2914_vm2, %v16585_v33, 0  ;;  %v3364_v33 = vsel %vm2914_vm2, %v16451_v16, 0 }
 0x8d6   : > { %v3135_v35 = vmul.f32 %v14673_v9, %v16554_v12  ;;  %v14675_v41 = vpop.eup %14674 }
 0x8d7   : > { %v3023_v38 = vpack.c.bf16 %v3022_v62, %v3022_v62  ;;  %v3247_v20 = vmul.f32 %v14675_v41, %v16561_v53  ;;  %v16772_v48 = vpop.eup %14676  ;;  %v4298_v62 = vpop.xlane.xlu1 %4297 }
 0x8d8   : > { %v3136_v49 = vpack.c.bf16 %v3135_v35, %v3135_v35  ;;  %v5530_v12 = vsel %vm2897_vm4, %v16772_v48, 0.0  ;;  %v14679_v46 = vpop.eup %14678  ;;  %14694 = vrcp.f32 %v4298_v62  ;;  %v4755_v62 = vsel %vm2914_vm2, %v16689_v36, 0 }
 0x8d9   : > { %12926 = vmatmul.mubr.msk.bf16.vlgmr.msra.gmra.mxu1 %vm2897_vm4, %v3023_v38  ;;  %v3248_v56 = vpack.c.bf16 %v3247_v20, %v3247_v20  ;;  %v3357_v53 = vmul.f32 %v14679_v46, %v16566_v29  ;;  %v14681_v52 = vpop.eup %14680  ;;  %v3591_v29 = vsel %vm2914_vm2, %v16588_v47, 0  ;;  %v3703_v47 = vsel %vm2914_vm2, %v16702_v57, 0 }
 0x8da   : > { %12936 = vmatpush3.bf16.msra.mxu1 %v3143_v54  ;;  %12937 = vmatprep.mubr.msk.bf16.mxu1 %vm15196_vm0, %v15195_v58  ;;  %v3470_v16 = vmul.f32 %v14681_v52, %v16572_v23  ;;  %v14683_v3 = vpop.eup %14682  ;;  %v3812_v57 = vsel %vm2914_vm2, %v16630_v21, 0  ;;  %14696 = vrcp.f32 %v16742_v22  ;;  %v4307_v46 = vsel %vm2914_vm2, %v16657_v60, 0 }
 0x8db   : > { %12947 = vmatprep.subr.bf16.mxu1 %v15195_v58  ;;  %v3358_v26 = vpack.c.bf16 %v3357_v53, %v3357_v53  ;;  %v3583_v14 = vmul.f32 %v14683_v3, %v16576_v59  ;;  %v14685_v5 = vpop.eup %14684  ;;  %v3922_v38 = vpop.permute.xlu1 %3921 }
 0x8dc   : > { %v3471_v17 = vpack.c.bf16 %v3470_v16, %v3470_v16  ;;  %v3695_v59 = vmul.f32 %v14685_v5, %v16593_v50  ;;  %v14687_v43 = vpop.eup %14686  ;;  %v3927_v54 = vsel %vm2914_vm2, %v3922_v38, 0 }
 0x8dd   : > { %v3584_v23 = vpack.c.bf16 %v3583_v14, %v3583_v14  ;;  %v3805_v55 = vmul.f32 %v14687_v43, %v16610_v6  ;;  %v14689_v9 = vpop.eup %14688  ;;  %v4039_v6 = vsel %vm2914_vm2, %v16746_v8, 0 }
 0x8de   : > { %v3696_v0 = vpack.c.bf16 %v3695_v59, %v3695_v59  ;;  %v3918_v21 = vmul.f32 %v14689_v9, %v16598_v24  ;;  %v14691_v35 = vpop.eup %14690 }
 0x8df   : > { %v3806_v50 = vpack.c.bf16 %v3805_v55, %v3805_v55  ;;  %v4031_v37 = vmul.f32 %v14691_v35, %v16617_v2  ;;  %v4524_v20 = vpop.xlane.xlu1 %4523 }
 0x8e0   : > { %v3919_v27 = vpack.c.bf16 %v3918_v21, %v3918_v21  ;;  %14698 = vrcp.f32 %v4524_v20 }
 0x8e1   : > { %12938 = vmatmul.mubr.msk.bf16.vlgmr.msra.gmra.mxu1 %vm2897_vm4, %v3136_v49  ;;  %v4146_v49 = vpop.permute.xlu0 %4145  ;;  %v4032_v41 = vpack.c.bf16 %v4031_v37, %v4031_v37 }
 0x8e2   : > { %12948 = vmatpush3.bf16.msra.mxu1 %v3255_v25  ;;  %12949 = vmatprep.mubr.msk.bf16.mxu1 %vm15196_vm0, %v15195_v58  ;;  %v14693_v25 = vpop.eup %14692  ;;  %v4151_v24 = vsel %vm2914_vm2, %v4146_v49, 0 }
 0x8e3   : > { %12959 = vmatprep.subr.bf16.mxu1 %v15195_v58  ;;  %v4143_v8 = vmul.f32 %v14693_v25, %v16602_v45 }
 0x8e5   : > { %v14695_v2 = vpop.eup %14694 }
 0x8e6   : > { %v4300_v22 = vmul.f32 %v14695_v2, %v16623_v11 }
 0x8e7   : > { %v14697_v45 = vpop.eup %14696 }
 0x8e8   : > { %5531 = vadd.xlane.f32.xlu0 %v5530_v12  ;;  %v4144_v12 = vpack.c.bf16 %v4143_v8, %v4143_v8  ;;  %v4301_v53 = vpack.c.bf16 %v4300_v22, %v4300_v22  ;;  %v4413_v60 = vmul.f32 %v14697_v45, %v16644_v40 }
 0x8e9   : > { %12950 = vmatmul.mubr.msk.bf16.vlgmr.msra.gmra.mxu1 %vm2897_vm4, %v3248_v56  ;;  %v4746_v56 = vpop.xlane.xlu1 %4745 }
 0x8ea   : > { %12960 = vmatpush3.bf16.msra.mxu1 %v3364_v33  ;;  %12961 = vmatprep.mubr.msk.bf16.mxu1 %vm15196_vm0, %v15195_v58  ;;  %v4414_v16 = vpack.c.bf16 %v4413_v60, %v4413_v60 }
 0x8eb   : > { %12971 = vmatprep.subr.bf16.mxu1 %v15195_v58 }
 0x8ed   : > { %v4417_v33 = vpop.permute.xlu1 %4416  ;;  %v14699_v11 = vpop.eup %14698 }
 0x8ee   : > { %v4422_v52 = vsel %vm2914_vm2, %v4417_v33, 0  ;;  %v4526_v3 = vmul.f32 %v14699_v11, %v16640_v19 }
 0x8f1   : > { %12962 = vmatmul.mubr.msk.bf16.vlgmr.msra.gmra.mxu1 %vm2897_vm4, %v3358_v26 }
 0x8f2   : > { %12972 = vmatpush3.bf16.msra.mxu1 %v3479_v4  ;;  %12973 = vmatprep.mubr.msk.bf16.mxu1 %vm15196_vm0, %v15195_v58  ;;  %v4529_v4 = vpop.permute.xlu1 %4528 }
 0x8f3   : > { %12983 = vmatprep.subr.bf16.mxu1 %v15195_v58 }
 0x8f6   : > { %v4641_v14 = vpop.permute.xlu1 %4640 }
 0x8f7   : > { %v4646_v5 = vsel %vm2914_vm2, %v4641_v14, 0 }
 0x8f9   : > { %12974 = vmatmul.mubr.msk.bf16.vlgmr.msra.gmra.mxu1 %vm2897_vm4, %v3471_v17  ;;  %v4534_v17 = vsel %vm2914_vm2, %v4529_v4, 0 }
 0x8fa   : > { %12984 = vmatpush3.bf16.msra.mxu1 %v3591_v29  ;;  %12985 = vmatprep.mubr.msk.bf16.mxu1 %vm15196_vm0, %v15195_v58 }
 0x8fb   : > { %12995 = vmatprep.subr.bf16.mxu1 %v15195_v58  ;;  %v4636_v26 = vpop.xlane.xlu0 %4635 }
 0x8fc   : > { %14700 = vrcp.f32 %v4636_v26 }
 0x8fd   : > { %14702 = vrcp.f32 %v4746_v56 }
 0x8fe   : > { %5536 = vrot.lane.b32.xlu0 %v16729_v18, %s15198_s21 }
 0x8ff   : > { %v4859_v29 = vpop.xlane.xlu0 %4858 }
 0x900   : > { %14704 = vrcp.f32 %v4859_v29 }
 0x901   : > { %12986 = vmatmul.mubr.msk.bf16.vlgmr.msra.gmra.mxu1 %vm2897_vm4, %v3584_v23  ;;  %v4527_v23 = vpack.c.bf16 %v4526_v3, %v4526_v3 }
 0x902   : > { %12996 = vmatpush3.bf16.msra.mxu1 %v3703_v47  ;;  %12997 = vmatprep.mubr.msk.bf16.mxu1 %vm15196_vm0, %v15195_v58 }
 0x903   : > { %13007 = vmatprep.subr.bf16.mxu1 %v15195_v58  ;;  %v4972_v47 = vpop.xlane.xlu0 %4971 }
 0x904   : > { %14706 = vrcp.f32 %v4972_v47 }
 0x907   : > { %v5084_v43 = vpop.xlane.xlu0 %5083 }
 0x908   : > { %14708 = vrcp.f32 %v5084_v43 }
 0x909   : > { %12998 = vmatmul.mubr.msk.bf16.vlgmr.msra.gmra.mxu1 %vm2897_vm4, %v3696_v0  ;;  %v14701_v40 = vpop.eup %14700 }
 0x90a   : > { %13008 = vmatpush3.bf16.msra.mxu1 %v3812_v57  ;;  %13009 = vmatprep.mubr.msk.bf16.mxu1 %vm15196_vm0, %v15195_v58  ;;  %v4638_v59 = vmul.f32 %v14701_v40, %v16707_v7  ;;  %v14703_v19 = vpop.eup %14702 }
 0x90b   : > { %13019 = vmatprep.subr.bf16.mxu1 %v15195_v58  ;;  %v4748_v57 = vmul.f32 %v14703_v19, %v16649_v42  ;;  %v4865_v55 = vpop.permute.xlu0 %4864 }
 0x90c   : > { %v4639_v0 = vpack.c.bf16 %v4638_v59, %v4638_v59  ;;  %v4870_v9 = vsel %vm2914_vm2, %v4865_v55, 0 }
 0x90d   : > { %v4749_v38 = vpack.c.bf16 %v4748_v57, %v4748_v57  ;;  %v14705_v7 = vpop.eup %14704 }
 0x90e   : > { %v4861_v36 = vmul.f32 %v14705_v7, %v16715_v39 }
 0x910   : > { %v4862_v21 = vpack.c.bf16 %v4861_v36, %v4861_v36 }
 0x911   : > { %13010 = vmatmul.mubr.msk.bf16.vlgmr.msra.gmra.mxu1 %vm2897_vm4, %v3806_v50  ;;  %v5194_v50 = vpop.xlane.xlu1 %5193  ;;  %v14707_v42 = vpop.eup %14706 }
 0x912   : > { %13020 = vmatpush3.bf16.msra.mxu1 %v3927_v54  ;;  %13021 = vmatprep.mubr.msk.bf16.mxu1 %vm15196_vm0, %v15195_v58  ;;  %14710 = vrcp.f32 %v5194_v50 }
 0x913   : > { %13031 = vmatprep.subr.bf16.mxu1 %v15195_v58 }
 0x915   : > { %v4977_v54 = vpop.permute.xlu1 %4976  ;;  %v14709_v39 = vpop.eup %14708 }
 0x916   : > { %v4982_v35 = vsel %vm2914_vm2, %v4977_v54, 0  ;;  %v5086_v25 = vmul.f32 %v14709_v39, %v16723_v10 }
 0x919   : > { %13022 = vmatmul.mubr.msk.bf16.vlgmr.msra.gmra.mxu1 %vm2897_vm4, %v3919_v27  ;;  %v5420_v8 = vpop.xlane.xlu1 %5419 }
 0x91a   : > { %13032 = vmatpush3.bf16.msra.mxu1 %v4039_v6  ;;  %13033 = vmatprep.mubr.msk.bf16.mxu1 %vm15196_vm0, %v15195_v58  ;;  %v4974_v6 = vmul.f32 %v14707_v42, %v16719_v63  ;;  %v5203_v63 = vsel %vm2914_vm2, %v16729_v18, 0 }
 0x91b   : > { %13043 = vmatprep.subr.bf16.mxu1 %v15195_v58 }
 0x91c   : > { %v4975_v49 = vpack.c.bf16 %v4974_v6, %v4974_v6 }
 0x91d   : > { %v5313_v2 = vpop.permute.xlu1 %5312 }
 0x91f   : > { %v14711_v20 = vpop.eup %14710 }
 0x921   : > { %13034 = vmatmul.mubr.msk.bf16.vlgmr.msra.gmra.mxu1 %vm2897_vm4, %v4032_v41  ;;  %v5425_v33 = vpop.permute.xlu1 %5424 }
 0x922   : > { %13044 = vmatpush3.bf16.msra.mxu1 %v4151_v24  ;;  %13045 = vmatprep.mubr.msk.bf16.mxu1 %vm15196_vm0, %v15195_v58  ;;  %v5087_v24 = vpack.c.bf16 %v5086_v25, %v5086_v25  ;;  %v5430_v45 = vsel %vm2914_vm2, %v5425_v33, 0 }
 0x923   : > { %13055 = vmatprep.subr.bf16.mxu1 %v15195_v58 }
 0x929   : > { %13046 = vmatmul.mubr.msk.bf16.vlgmr.msra.gmra.mxu1 %vm2897_vm4, %v4144_v12  ;;  %v5196_v12 = vmul.f32 %v14711_v20, %v16674_v61 }
 0x92a   : > { %13056 = vmatpush3.bf16.msra.mxu1 %v4307_v46  ;;  %13057 = vmatprep.mubr.msk.bf16.mxu1 %vm15196_vm0, %v15195_v58  ;;  %v5318_v46 = vsel %vm2914_vm2, %v5313_v2, 0 }
 0x92b   : > { %13067 = vmatprep.subr.bf16.mxu1 %v15195_v58  ;;  %v5197_v56 = vpack.c.bf16 %v5196_v12, %v5196_v12 }
 0x931   : > { %13058 = vmatmul.mubr.msk.bf16.vlgmr.msra.gmra.mxu1 %vm2897_vm4, %v4301_v53 }
 0x932   : > { %13068 = vmatpush3.bf16.msra.mxu1 %v4422_v52  ;;  %13069 = vmatprep.mubr.msk.bf16.mxu1 %vm15196_vm0, %v15195_v58 }
 0x933   : > { %13079 = vmatprep.subr.bf16.mxu1 %v15195_v58 }
 0x939   : > { %13070 = vmatmul.mubr.msk.bf16.vlgmr.msra.gmra.mxu1 %vm2897_vm4, %v4414_v16 }
 0x93a   : > { %13080 = vmatpush3.bf16.msra.mxu1 %v4534_v17  ;;  %13081 = vmatprep.mubr.msk.bf16.mxu1 %vm15196_vm0, %v15195_v58 }
 0x93b   : > { %13091 = vmatprep.subr.bf16.mxu1 %v15195_v58 }
 0x93c   : > { %v5307_v27 = vpop.xlane.xlu0 %5306 }
 0x93d   : > { %14712 = vrcp.f32 %v5307_v27 }
 0x93e   : > { %14714 = vrcp.f32 %v5420_v8 }
 0x940   : > { %v5089_v37 = vpop.permute.xlu0 %5088 }
 0x941   : > { %13082 = vmatmul.mubr.msk.bf16.vlgmr.msra.gmra.mxu1 %vm2897_vm4, %v4527_v23  ;;  %v5094_v41 = vsel %vm2914_vm2, %v5089_v37, 0 }
 0x942   : > { %13092 = vmatpush3.bf16.msra.mxu1 %v4646_v5  ;;  %13093 = vmatprep.mubr.msk.bf16.mxu1 %vm15196_vm0, %v15195_v58 }
 0x943   : > { %13103 = vmatprep.subr.bf16.mxu1 %v15195_v58 }
 0x949   : > { %13094 = vmatmul.mubr.msk.bf16.vlgmr.msra.gmra.mxu1 %vm2897_vm4, %v4639_v0 }
 0x94a   : > { %13104 = vmatpush3.bf16.msra.mxu1 %v4755_v62  ;;  %13105 = vmatprep.mubr.msk.bf16.mxu1 %vm15196_vm0, %v15195_v58  ;;  %v14713_v10 = vpop.eup %14712 }
 0x94b   : > { %13115 = vmatprep.subr.bf16.mxu1 %v15195_v58  ;;  %v5309_v18 = vmul.f32 %v14713_v10, %v16738_v28  ;;  %v14715_v61 = vpop.eup %14714 }
 0x94c   : > { %v5422_v26 = vmul.f32 %v14715_v61, %v16709_v51 }
 0x94d   : > { %v5310_v53 = vpack.c.bf16 %v5309_v18, %v5309_v18 }
 0x94e   : > { %v5423_v28 = vpack.c.bf16 %v5422_v26, %v5422_v26 }
 0x951   : > { %13106 = vmatmul.mubr.msk.bf16.vlgmr.msra.gmra.mxu1 %vm2897_vm4, %v4749_v38 }
 0x952   : > { %13116 = vmatpush3.bf16.msra.mxu1 %v4870_v9  ;;  %13117 = vmatprep.mubr.msk.bf16.mxu1 %vm15196_vm0, %v15195_v58 }
 0x953   : > { %13127 = vmatprep.subr.bf16.mxu1 %v15195_v58 }
 0x959   : > { %13118 = vmatmul.mubr.msk.bf16.vlgmr.msra.gmra.mxu1 %vm2897_vm4, %v4862_v21 }
 0x95a   : > { %13128 = vmatpush3.bf16.msra.mxu1 %v4982_v35  ;;  %13129 = vmatprep.mubr.msk.bf16.mxu1 %vm15196_vm0, %v15195_v58 }
 0x95b   : > { %13139 = vmatprep.subr.bf16.mxu1 %v15195_v58 }
 0x961   : > { %13130 = vmatmul.mubr.msk.bf16.vlgmr.msra.gmra.mxu1 %vm2897_vm4, %v4975_v49 }
 0x962   : > { %13140 = vmatpush3.bf16.msra.mxu1 %v5094_v41  ;;  %13141 = vmatprep.mubr.msk.bf16.mxu1 %vm15196_vm0, %v15195_v58 }
 0x963   : > { %13151 = vmatprep.subr.bf16.mxu1 %v15195_v58 }
 0x969   : > { %13142 = vmatmul.mubr.msk.bf16.vlgmr.msra.gmra.mxu1 %vm2897_vm4, %v5087_v24 }
 0x96a   : > { %13152 = vmatpush3.bf16.msra.mxu1 %v5203_v63  ;;  %13153 = vmatprep.mubr.msk.bf16.mxu1 %vm15196_vm0, %v15195_v58 }
 0x96b   : > { %13163 = vmatprep.subr.bf16.mxu1 %v15195_v58 }
 0x971   : > { %13154 = vmatmul.mubr.msk.bf16.vlgmr.msra.gmra.mxu1 %vm2897_vm4, %v5197_v56  ;;  %v5532_v22 = vpop.xlane.xlu0 %5531 }
 0x972   : > { %13164 = vmatpush3.bf16.msra.mxu1 %v5318_v46  ;;  %13165 = vmatprep.mubr.msk.bf16.mxu1 %vm15196_vm0, %v15195_v58  ;;  %14716 = vrcp.f32 %v5532_v22 }
 0x973   : > { %13175 = vmatprep.subr.bf16.mxu1 %v15195_v58 }
 0x975   : > { %v5537_v52 = vpop.permute.xlu0 %5536 }
 0x976   : > { %v5542_v4 = vsel %vm2914_vm2, %v5537_v52, 0 }
 0x979   : > { %13166 = vmatmul.mubr.msk.bf16.vlgmr.msra.gmra.mxu1 %vm2897_vm4, %v5310_v53 }
 0x97a   : > { %13176 = vmatpush3.bf16.msra.mxu1 %v5430_v45  ;;  %13177 = vmatprep.mubr.msk.bf16.mxu1 %vm15196_vm0, %v15195_v58 }
 0x97b   : > { %13187 = vmatprep.subr.bf16.mxu1 %v15195_v58 }
 0x97f   : > { %v14717_v60 = vpop.eup %14716 }
 0x980   : > { %v5534_v16 = vmul.f32 %v14717_v60, %v16772_v48 }
 0x981   : > { %13178 = vmatmul.mubr.msk.bf16.vlgmr.msra.gmra.mxu1 %vm2897_vm4, %v5423_v28 }
 0x982   : > { %13188 = vmatpush3.bf16.msra.mxu1 %v5542_v4  ;;  %13189 = vmatprep.mubr.msk.bf16.mxu1 %vm15196_vm0, %v15195_v58  ;;  %v5535_v11 = vpack.c.bf16 %v5534_v16, %v5534_v16 }
 0x989   : > { %13190 = vmatmul.mubr.msk.bf16.vlgmr.msra.gmra.mxu1 %vm2897_vm4, %v5535_v11 }
 0x98a   : > { %6204 = vmatprep.mubr.bf16.mxu1 %v15194_v15 }
 0x999   : > { %v3067_v51 = vpop.f32.mrf.mxu1 }
 0x99b   : > { %v12927_v17 = vpop.f32.mrf.mxu1 }
 0x99c   : > { %v13706_v17 = vld [vmem:[%s15716_s22 + $0xa8] ss:$12 sps:$4 sm:$0xff]  }
 0x99d   : > { %v3070_v3 = vpop.f32.mrf.mxu1 }
 0x99e   : > { %v13708_v3 = vld [vmem:[%s15716_s22 + $0xac] ss:$12 sps:$4 sm:$0xff]  }
 0x99f   : > { %v12928_v29 = vpop.f32.mrf.mxu1  ;;  %6129 = vmatprep.subr.bf16.mxu0 %v13708_v3 }
 0x9a0   : > { %6130 = vmatpush1.bf16.msra.mxu0 %v13706_v17 }
 0x9a1   : > { %v3179_v14 = vpop.f32.mrf.mxu1 }
 0x9a3   : > { %v12939_v23 = vpop.f32.mrf.mxu1 }
 0x9a5   : > { %v3182_v40 = vpop.f32.mrf.mxu1 }
 0x9a7   : > { %v12940_v5 = vpop.f32.mrf.mxu1 }
 0x9a9   : > { %v3291_v47 = vpop.f32.mrf.mxu1 }
 0x9ab   : > { %v12951_v59 = vpop.f32.mrf.mxu1 }
 0x9ad   : > { %v3294_v0 = vpop.f32.mrf.mxu1 }
 0x9af   : > { %v12952_v19 = vpop.f32.mrf.mxu1 }
 0x9b0   : > { %v13711_v19 = vld [vmem:[%s15716_s22 + $0x94] ss:$12 sps:$4 sm:$0xff]  }
 0x9b1   : > { %v16915_v43 = vpop.f32.mrf.mxu1  ;;  %6131 = vmatprep.subr.bf16.mxu0 %v13711_v19 }
 0x9b3   : > { %v12963_v48 = vpop.f32.mrf.mxu1 }
 0x9b5   : > { %v3403_v62 = vpop.f32.mrf.mxu1 }
 0x9b6   : > { %v13709_v62 = vld [vmem:[%s15716_s22 + $0x90] ss:$12 sps:$4 sm:$0xff]  }
 0x9b7   : > { %v12964_v57 = vpop.f32.mrf.mxu1  ;;  %6132 = vmatpush1.bf16.msra.mxu0 %v13709_v62  ;;  %v13751_v62 = vld [vmem:[%s15716_s22 + $0x138] ss:$12 sps:$4 sm:$0xff]  }
 0x9b8   : > { %v13714_v57 = vld [vmem:[%s15716_s22 + $0x7c] ss:$12 sps:$4 sm:$0xff]  }
 0x9b9   : > { %v16917_v55 = vpop.f32.mrf.mxu1  ;;  %6133 = vmatprep.subr.bf16.mxu0 %v13714_v57 }
 0x9bb   : > { %v12975_v38 = vpop.f32.mrf.mxu1 }
 0x9bd   : > { %v3518_v7 = vpop.f32.mrf.mxu1 }
 0x9be   : > { %v13712_v7 = vld [vmem:[%s15716_s22 + $0x78] ss:$12 sps:$4 sm:$0xff]  }
 0x9bf   : > { %v12976_v50 = vpop.f32.mrf.mxu1  ;;  %6134 = vmatpush1.bf16.msra.mxu0 %v13712_v7  ;;  %v13756_v7 = vld [vmem:[%s15716_s22 + $0x1b4] ss:$12 sps:$4 sm:$0xff]  }
 0x9c0   : > { %v13724_v50 = vld [vmem:[%s15716_s22 + $0x228] ss:$12 sps:$4 sm:$0xff]  }
 0x9c1   : > { %v16919_v9 = vpop.f32.mrf.mxu1 }
 0x9c3   : > { %v12987_v36 = vpop.f32.mrf.mxu1 }
 0x9c4   : > { %v13726_v36 = vld [vmem:[%s15716_s22 + $0x22c] ss:$12 sps:$4 sm:$0xff]  }
 0x9c5   : > { %v3630_v54 = vpop.f32.mrf.mxu1  ;;  %6172 = vmatprep.subr.bf16.mxu1 %v13726_v36 }
 0x9c6   : > { %6173 = vmatpush1.bf16.msra.mxu1 %v13724_v50  ;;  %v13759_v50 = vld [vmem:[%s15716_s22 + $0x124] ss:$12 sps:$4 sm:$0xff]  }
 0x9c7   : > { %v12988_v21 = vpop.f32.mrf.mxu1 }
 0x9c8   : > { %v13732_v21 = vld [vmem:[%s15716_s22 + $0x214] ss:$12 sps:$4 sm:$0xff]  }
 0x9c9   : > { %v16921_v42 = vpop.f32.mrf.mxu1  ;;  %6174 = vmatprep.subr.bf16.mxu1 %v13732_v21  ;;  %v13762_v21 = vld [vmem:[%s15716_s22 + $0x19c] ss:$12 sps:$4 sm:$0xff]  }
 0x9cb   : > { %v12999_v27 = vpop.f32.mrf.mxu1 }
 0x9cd   : > { %v3742_v35 = vpop.f32.mrf.mxu1 }
 0x9ce   : > { %v13715_v35 = vld [vmem:[%s15716_s22 + $0x60] ss:$12 sps:$4 sm:$0xff]  }
 0x9cf   : > { %v13000_v6 = vpop.f32.mrf.mxu1 }
 0x9d0   : > { %v13730_v6 = vld [vmem:[%s15716_s22 + $0x210] ss:$12 sps:$4 sm:$0xff]  }
 0x9d1   : > { %v16923_v37 = vpop.f32.mrf.mxu1  ;;  %6175 = vmatpush1.bf16.msra.mxu1 %v13730_v6  ;;  %v13765_v6 = vld [vmem:[%s15716_s22 + $0x10c] ss:$12 sps:$4 sm:$0xff]  }
 0x9d3   : > { %v13011_v49 = vpop.f32.mrf.mxu1 }
 0x9d4   : > { %v13720_v49 = vld [vmem:[%s15716_s22 + $0x4c] ss:$12 sps:$4 sm:$0xff]  }
 0x9d5   : > { %v3851_v39 = vpop.f32.mrf.mxu1 }
 0x9d7   : > { %v13012_v41 = vpop.f32.mrf.mxu1 }
 0x9d8   : > { %v13738_v41 = vld [vmem:[%s15716_s22 + $0x1fc] ss:$12 sps:$4 sm:$0xff]  }
 0x9d9   : > { %v16925_v25 = vpop.f32.mrf.mxu1  ;;  %6176 = vmatprep.subr.bf16.mxu1 %v13738_v41 }
 0x9db   : > { %v13023_v24 = vpop.f32.mrf.mxu1 }
 0x9dd   : > { %v3966_v20 = vpop.f32.mrf.mxu1 }
 0x9df   : > { %v13024_v8 = vpop.f32.mrf.mxu1 }
 0x9e0   : > { %v13718_v8 = vld [vmem:[%s15716_s22 + $0x48] ss:$12 sps:$4 sm:$0xff]  }
 0x9e1   : > { %v16927_v63 = vpop.f32.mrf.mxu1 }
 0x9e3   : > { %v13035_v12 = vpop.f32.mrf.mxu1 }
 0x9e4   : > { %v13736_v12 = vld [vmem:[%s15716_s22 + $0x1f8] ss:$12 sps:$4 sm:$0xff]  }
 0x9e5   : > { %v4078_v2 = vpop.f32.mrf.mxu1  ;;  %6177 = vmatpush1.bf16.msra.mxu1 %v13736_v12 }
 0x9e6   : > { %v13723_v2 = vld [vmem:[%s15716_s22 + $0x34] ss:$12 sps:$4 sm:$0xff]  }
 0x9e7   : > { %v13036_v56 = vpop.f32.mrf.mxu1 }
 0x9e9   : > { %v16929_v10 = vpop.f32.mrf.mxu1 }
 0x9eb   : > { %v13047_v46 = vpop.f32.mrf.mxu1 }
 0x9ed   : > { %v4190_v22 = vpop.f32.mrf.mxu1 }
 0x9ee   : > { %v13721_v22 = vld [vmem:[%s15716_s22 + $0x30] ss:$12 sps:$4 sm:$0xff]  }
 0x9ef   : > { %v13048_v18 = vpop.f32.mrf.mxu1 }
 0x9f1   : > { %v16931_v33 = vpop.f32.mrf.mxu1 }
 0x9f3   : > { %v13059_v53 = vpop.f32.mrf.mxu1 }
 0x9f5   : > { %v4346_v61 = vpop.f32.mrf.mxu1 }
 0x9f6   : > { %v13727_v61 = vld [vmem:[%s15716_s22 + $0x18] ss:$12 sps:$4 sm:$0xff]  }
 0x9f7   : > { %v13060_v45 = vpop.f32.mrf.mxu1 }
 0x9f8   : > { %v13735_v45 = vld [vmem:[%s15716_s22 + $0x4] ss:$12 sps:$4 sm:$0xff]  }
 0x9f9   : > { %v4458_v26 = vpop.f32.mrf.mxu1 }
 0x9fa   : > { %v13349_v52 = vpack.i.bf16 %v4458_v26, %v3067_v51 }
 0x9fb   : > { %v13071_v28 = vpop.f32.mrf.mxu1 }
 0x9fc   : > { %13350 = vrot.lane.b32.xlu1 %v13349_v52, %s15198_s21  ;;  %v13733_v28 = vld [vmem:[%s15716_s22] ss:$12 sps:$4 sm:$0xff]  }
 0x9fd   : > { %v4461_v60 = vpop.f32.mrf.mxu1 }
 0x9fe   : > { %v13741_v60 = vld [vmem:[%s15716_s22 + $0x16c] ss:$12 sps:$4 sm:$0xff]  }
 0x9ff   : > { %v13072_v4 = vpop.f32.mrf.mxu1 }
 0xa01   : > { %v4570_v16 = vpop.f32.mrf.mxu1 }
 0xa02   : > { %v13379_v11 = vpack.i.bf16 %v4570_v16, %v3179_v14 }
 0xa03   : > { %v13083_v29 = vpop.f32.mrf.mxu1 }
 0xa04   : > { %13380 = vrot.lane.b32.xlu0 %v13379_v11, %s15199_s17  ;;  %v13739_v11 = vld [vmem:[%s15716_s22 + $0x168] ss:$12 sps:$4 sm:$0xff]   ;;  %v13744_v29 = vld [vmem:[%s15716_s22 + $0x1e4] ss:$12 sps:$4 sm:$0xff]  }
 0xa05   : > { %v4573_v23 = vpop.f32.mrf.mxu1  ;;  %6178 = vmatprep.subr.bf16.mxu1 %v13744_v29 }
 0xa06   : > { %v13742_v23 = vld [vmem:[%s15716_s22 + $0x1e0] ss:$12 sps:$4 sm:$0xff]  }
 0xa07   : > { %v13084_v51 = vpop.f32.mrf.mxu1  ;;  %6179 = vmatpush1.bf16.msra.mxu1 %v13742_v23 }
 0xa08   : > { %v13747_v51 = vld [vmem:[%s15716_s22 + $0x154] ss:$12 sps:$4 sm:$0xff]  }
 0xa09   : > { %v4682_v40 = vpop.f32.mrf.mxu1 }
 0xa0a   : > { %v13389_v5 = vpack.i.bf16 %v4682_v40, %v3291_v47  ;;  %v13717_v47 = vld [vmem:[%s15716_s22 + $0x64] ss:$12 sps:$4 sm:$0xff]  }
 0xa0b   : > { %v13095_v59 = vpop.f32.mrf.mxu1  ;;  %6135 = vmatprep.subr.bf16.mxu0 %v13717_v47  ;;  %v13754_v47 = vld [vmem:[%s15716_s22 + $0x1b0] ss:$12 sps:$4 sm:$0xff]  }
 0xa0c   : > { %13390 = vrot.lane.b32.xlu0 %v13389_v5, %s15197_s15  ;;  %6136 = vmatpush1.bf16.msra.mxu0 %v13715_v35  ;;  %v13745_v5 = vld [vmem:[%s15716_s22 + $0x150] ss:$12 sps:$4 sm:$0xff]   ;;  %v13750_v59 = vld [vmem:[%s15716_s22 + $0x1cc] ss:$12 sps:$4 sm:$0xff]  }
 0xa0d   : > { %v4685_v14 = vpop.f32.mrf.mxu1  ;;  %6137 = vmatprep.subr.bf16.mxu0 %v13720_v49  ;;  %6180 = vmatprep.subr.bf16.mxu1 %v13750_v59  ;;  %v13760_v35 = vld [vmem:[%s15716_s22 + $0x198] ss:$12 sps:$4 sm:$0xff]  }
 0xa0e   : > { %v13748_v14 = vld [vmem:[%s15716_s22 + $0x1c8] ss:$12 sps:$4 sm:$0xff]  }
 0xa0f   : > { %v13096_v0 = vpop.f32.mrf.mxu1  ;;  %6181 = vmatpush1.bf16.msra.mxu1 %v13748_v14 }
 0xa10   : > { %6138 = vmatpush1.bf16.msra.mxu0 %v13718_v8  ;;  %v13753_v0 = vld [vmem:[%s15716_s22 + $0x13c] ss:$12 sps:$4 sm:$0xff]   ;;  %6182 = vmatprep.subr.bf16.mxu1 %v13756_v7  ;;  %v13771_v8 = vld [vmem:[%s15716_s22 + $0xf4] ss:$12 sps:$4 sm:$0xff]  }
 0xa11   : > { %v16939_v48 = vpop.f32.mrf.mxu1  ;;  %6139 = vmatprep.subr.bf16.mxu0 %v13723_v2  ;;  %v13769_v2 = vld [vmem:[%s15716_s22 + $0xf0] ss:$12 sps:$4 sm:$0xff]  }
 0xa13   : > { %v13107_v38 = vpop.f32.mrf.mxu1  ;;  %6183 = vmatpush1.bf16.msra.mxu1 %v13754_v47 }
 0xa14   : > { %6140 = vmatpush1.bf16.msra.mxu0 %v13721_v22  ;;  %6184 = vmatprep.subr.bf16.mxu1 %v13762_v21  ;;  %v13772_v22 = vld [vmem:[%s15716_s22 + $0x170] ss:$12 sps:$4 sm:$0xff]  }
 0xa15   : > { %v4794_v54 = vpop.f32.mrf.mxu1  ;;  %v13776_v21 = vld [vmem:[%s15716_s22 + $0xb0] ss:$12 sps:$4 sm:$0xff]  }
 0xa16   : > { %v13757_v54 = vld [vmem:[%s15716_s22 + $0x120] ss:$12 sps:$4 sm:$0xff]  }
 0xa17   : > { %v13108_v27 = vpop.f32.mrf.mxu1  ;;  %6185 = vmatpush1.bf16.msra.mxu1 %v13760_v35 }
 0xa19   : > { %v4906_v39 = vpop.f32.mrf.mxu1 }
 0xa1a   : > { %v13354_v24 = vpack.i.bf16 %v4906_v39, %v16917_v55  ;;  %v13729_v55 = vld [vmem:[%s15716_s22 + $0x1c] ss:$12 sps:$4 sm:$0xff]  }
 0xa1b   : > { %v13119_v20 = vpop.f32.mrf.mxu1  ;;  %6141 = vmatprep.subr.bf16.mxu0 %v13729_v55  ;;  %v13763_v39 = vld [vmem:[%s15716_s22 + $0x108] ss:$12 sps:$4 sm:$0xff]  }
 0xa1c   : > { %13355 = vrot.lane.b32.xlu1 %v13354_v24, %s15198_s21  ;;  %6142 = vmatpush1.bf16.msra.mxu0 %v13727_v61  ;;  %v13766_v20 = vld [vmem:[%s15716_s22 + $0x180] ss:$12 sps:$4 sm:$0xff]   ;;  %v13775_v55 = vld [vmem:[%s15716_s22 + $0xdc] ss:$12 sps:$4 sm:$0xff]   ;;  %v13773_v61 = vld [vmem:[%s15716_s22 + $0xd8] ss:$12 sps:$4 sm:$0xff]  }
 0xa1d   : > { %v4909_v56 = vpop.f32.mrf.mxu1  ;;  %6143 = vmatprep.subr.bf16.mxu0 %v13735_v45 }
 0xa1f   : > { %v13120_v46 = vpop.f32.mrf.mxu1 }
 0xa20   : > { %6144 = vmatpush1.bf16.msra.mxu0 %v13733_v28 }
 0xa21   : > { %v16959_v18 = vpop.f32.mrf.mxu1  ;;  %6145 = vmatprep.subr.bf16.mxu0 %v13741_v60 }
 0xa23   : > { %v13131_v53 = vpop.f32.mrf.mxu1 }
 0xa24   : > { %6146 = vmatpush2.bf16.msra.mxu0 %v13739_v11  ;;  %v13374_v11 = vpack.i.bf16 %v16959_v18, %v16919_v9 }
 0xa25   : > { %v5021_v26 = vpop.f32.mrf.mxu1  ;;  %6147 = vmatprep.subr.bf16.mxu0 %v13747_v51 }
 0xa26   : > { %v13778_v26 = vld [vmem:[%s15716_s22 + $0xc0] ss:$12 sps:$4 sm:$0xff]  }
 0xa27   : > { %v13132_v52 = vpop.f32.mrf.mxu1 }
 0xa28   : > { %6148 = vmatpush2.bf16.msra.mxu0 %v13745_v5  ;;  %v13780_v52 = vld [vmem:[%s15716_s22 + $0xc4] ss:$12 sps:$4 sm:$0xff]  }
 0xa29   : > { %v16965_v4 = vpop.f32.mrf.mxu1  ;;  %6149 = vmatprep.subr.bf16.mxu0 %v13753_v0 }
 0xa2b   : > { %v13143_v16 = vpop.f32.mrf.mxu1 }
 0xa2c   : > { %6150 = vmatpush2.bf16.msra.mxu0 %v13751_v62 }
 0xa2d   : > { %v5133_v17 = vpop.f32.mrf.mxu1  ;;  %6151 = vmatprep.subr.bf16.mxu0 %v13759_v50 }
 0xa2f   : > { %v13144_v3 = vpop.f32.mrf.mxu1 }
 0xa30   : > { %6152 = vmatpush2.bf16.msra.mxu0 %v13757_v54  ;;  %v13384_v3 = vpack.i.bf16 %v16965_v4, %v16921_v42 }
 0xa31   : > { %v16971_v40 = vpop.f32.mrf.mxu1  ;;  %6153 = vmatprep.subr.bf16.mxu0 %v13765_v6  ;;  %v13777_v6 = vld [vmem:[%s15716_s22 + $0x158] ss:$12 sps:$4 sm:$0xff]  }
 0xa33   : > { %v13155_v19 = vpop.f32.mrf.mxu1 }
 0xa34   : > { %6154 = vmatpush2.bf16.msra.mxu0 %v13763_v39 }
 0xa35   : > { %v5242_v57 = vpop.f32.mrf.mxu1  ;;  %6155 = vmatprep.subr.bf16.mxu0 %v13771_v8 }
 0xa37   : > { %v13156_v38 = vpop.f32.mrf.mxu1 }
 0xa38   : > { %6156 = vmatpush2.bf16.msra.mxu0 %v13769_v2  ;;  %v13781_v2 = vld [vmem:[%s15716_s22 + $0x98] ss:$12 sps:$4 sm:$0xff]  }
 0xa39   : > { %v5354_v36 = vpop.f32.mrf.mxu1  ;;  %6157 = vmatprep.subr.bf16.mxu0 %v13775_v55  ;;  %v13782_v55 = vld [vmem:[%s15716_s22 + $0x140] ss:$12 sps:$4 sm:$0xff]  }
 0xa3a   : > { %v13359_v27 = vpack.i.bf16 %v5354_v36, %v16925_v25  ;;  %v13768_v25 = vld [vmem:[%s15716_s22 + $0x184] ss:$12 sps:$4 sm:$0xff]  }
 0xa3b   : > { %v13167_v49 = vpop.f32.mrf.mxu1  ;;  %6186 = vmatprep.subr.bf16.mxu1 %v13768_v25 }
 0xa3c   : > { %13360 = vrot.lane.b32.xlu1 %v13359_v27, %s15198_s21  ;;  %6187 = vmatpush1.bf16.msra.mxu1 %v13766_v20 }
 0xa3d   : > { %v5357_v41 = vpop.f32.mrf.mxu1  ;;  %12722 = vmatprep.subr.bf16.mxu1 %v13772_v22  ;;  %6158 = vmatpush2.bf16.msra.mxu0 %v13773_v61 }
 0xa3e   : > { %6159 = vmatprep.subr.bf16.mxu0 %v13780_v52 }
 0xa3f   : > { %v13168_v24 = vpop.f32.mrf.mxu1 }
 0xa41   : > { %v5466_v12 = vpop.f32.mrf.mxu1  ;;  %6160 = vmatpush2.bf16.msra.mxu0 %v13778_v26 }
 0xa42   : > { %v13364_v56 = vpack.i.bf16 %v5466_v12, %v16927_v63  ;;  %13193 = vmatprep.subr.bf16.mxu0 %v15195_v58 }
 0xa43   : > { %v13179_v46 = vpop.f32.mrf.mxu1 }
 0xa44   : > { %13365 = vrot.lane.b32.xlu1 %v13364_v56, %s15199_s17 }
 0xa45   : > { %v5469_v53 = vpop.f32.mrf.mxu1 }
 0xa47   : > { %v13180_v45 = vpop.f32.mrf.mxu1 }
 0xa49   : > { %v5578_v28 = vpop.f32.mrf.mxu1 }
 0xa4a   : > { %v13369_v63 = vpack.i.bf16 %v5578_v28, %v16929_v10 }
 0xa4b   : > { %v13191_v60 = vpop.f32.mrf.mxu1 }
 0xa4c   : > { %13370 = vrot.lane.b32.xlu1 %v13369_v63, %s15197_s15  ;;  %v13783_v60 = vld [vmem:[%s15716_s22 + $0x80] ss:$12 sps:$4 sm:$0xff]  }
 0xa4d   : > { %v5581_v16 = vpop.f32.mrf.mxu1 }
 0xa4e   : > { %v13784_v16 = vld [vmem:[%s15716_s22 + $0x230] ss:$12 sps:$4 sm:$0xff]  }
 0xa4f   : > { %v13192_v17 = vpop.f32.mrf.mxu1 }
 0xa50   : > { %13375 = vrot.lane.b32.xlu1 %v13374_v11, %s15199_s17  ;;  %v13785_v11 = vld [vmem:[%s15716_s22 + $0x128] ss:$12 sps:$4 sm:$0xff]  }
 0xa54   : > { %13385 = vrot.lane.b32.xlu1 %v13384_v3, %s15197_s15  ;;  %v13786_v3 = vld [vmem:[%s15716_s22 + $0x68] ss:$12 sps:$4 sm:$0xff]  }
 0xa6e   : > { %v13351_v29 = vpop.permute.xlu1 %13350 }
 0xa6f   : > { %v13353_v7 = vunpack.i.h.bf16 %v13351_v29  ;;  %v13352_v47 = vunpack.i.l.bf16 %v13351_v29  ;;  %v13787_v29 = vld [vmem:[%s15716_s22 + $0x218] ss:$12 sps:$4 sm:$0xff]  }
 0xa71   : > { %v5620_v8 = vsel %vm2848_vm1, %v16931_v33, %v13353_v7  ;;  %v4229_v12 = vsel %vm2848_vm1, %v16413_v1, %v13352_v47 }
 0xa76   : > { %v13381_v19 = vpop.permute.xlu0 %13380 }
 0xa77   : > { %v13382_v27 = vunpack.i.l.bf16 %v13381_v19 }
 0xa79   : > { %v4231_v46 = vsel %vm4230_vm5, %v4229_v12, %v13382_v27 }
 0xa7e   : > { %v13391_v50 = vpop.permute.xlu0 %13390 }
 0xa7f   : > { %v13393_v41 = vunpack.i.h.bf16 %v13391_v50  ;;  %v13392_v24 = vunpack.i.l.bf16 %v13391_v50 }
 0xa81   : > { %v4233_v26 = vsel %vm4232_vm6, %v4231_v46, %v13392_v24  ;;  %v14770_v46 = vld [vmem:[#allocation2 + $0x10] sm:$0xff] }
 0xa8e   : > { %v13356_v10 = vpop.permute.xlu1 %13355 }
 0xa8f   : > { %v13358_v49 = vunpack.i.h.bf16 %v13356_v10  ;;  %v13357_v39 = vunpack.i.l.bf16 %v13356_v10  ;;  %v13788_v10 = vld [vmem:[%s15716_s22 + $0x110] ss:$12 sps:$4 sm:$0xff]  }
 0xa91   : > { %v5623_v53 = vsel %vm2848_vm1, %v16939_v48, %v13358_v49  ;;  %v4234_v33 = vsel %vm2848_vm1, %v16915_v43, %v13357_v39 }
 0xaae   : > { %v13361_v23 = vpop.permute.xlu1 %13360 }
 0xaaf   : > { %v13363_v5 = vunpack.i.h.bf16 %v13361_v23  ;;  %v13362_v59 = vunpack.i.l.bf16 %v13361_v23  ;;  %v13789_v23 = vld [vmem:[%s15716_s22 + $0x50] ss:$12 sps:$4 sm:$0xff]  }
 0xab1   : > { %v5626_v18 = vsel %vm2848_vm1, %v16971_v40, %v13363_v5  ;;  %v4237_v42 = vsel %vm2848_vm1, %v16923_v37, %v13362_v59  ;;  %v13383_v40 = vunpack.i.h.bf16 %v13381_v19  ;;  %v13791_v5 = vld [vmem:[%s15716_s22 + $0xf8] ss:$12 sps:$4 sm:$0xff]   ;;  %v13795_v19 = vld [vmem:[%s15716_s22 + $0x20] ss:$12 sps:$4 sm:$0xff]  }
 0xab2   : > { %v13792_v59 = vld [vmem:[%s15716_s22 + $0x38] ss:$12 sps:$4 sm:$0xff]  }
 0xab3   : > { %v5621_v56 = vsel %vm4230_vm5, %v5620_v8, %v13383_v40 }
 0xab4   : > { %v5622_v45 = vsel %vm4232_vm6, %v5621_v56, %v13393_v41 }
 0xab5   : > { %v5629_v17 = vpack.c.bf16 %v5622_v45, %v4233_v26 }
 0xab6   : > { %v13366_v51 = vpop.permute.xlu1 %13365 }
 0xab7   : > { %v13368_v14 = vunpack.i.h.bf16 %v13366_v51  ;;  %v13367_v0 = vunpack.i.l.bf16 %v13366_v51  ;;  %v13790_v51 = vld [vmem:[%s15716_s22 + $0x200] ss:$12 sps:$4 sm:$0xff]  }
 0xab9   : > { %v5627_v57 = vsel %vm4230_vm5, %v5626_v18, %v13368_v14  ;;  %v4238_v38 = vsel %vm4230_vm5, %v4237_v42, %v13367_v0  ;;  %v13793_v14 = vld [vmem:[%s15716_s22 + $0x1e8] ss:$12 sps:$4 sm:$0xff]   ;;  %v13794_v0 = vld [vmem:[%s15716_s22 + $0xe0] ss:$12 sps:$4 sm:$0xff]  }
 0xaba   : > { %v13797_v18 = vld [vmem:[%s15716_s22 + $0xc8] ss:$12 sps:$4 sm:$0xff]  }
 0xabb   : > { %v13798_v42 = vld [vmem:[%s15716_s22 + $0x8] ss:$12 sps:$4 sm:$0xff]  }
 0xabe   : > { %v13371_v9 = vpop.permute.xlu1 %13370 }
 0xabf   : > { %v13373_v4 = vunpack.i.h.bf16 %v13371_v9  ;;  %v13372_v62 = vunpack.i.l.bf16 %v13371_v9  ;;  %v13796_v9 = vld [vmem:[%s15716_s22 + $0x1d0] ss:$12 sps:$4 sm:$0xff]  }
 0xac1   : > { %v5628_v36 = vsel %vm4232_vm6, %v5627_v57, %v13373_v4  ;;  %v4239_v54 = vsel %vm4232_vm6, %v4238_v38, %v13372_v62  ;;  %v13799_v4 = vld [vmem:[%s15716_s22 + $0x1b8] ss:$12 sps:$4 sm:$0xff]   ;;  %v13800_v62 = vld [vmem:[%s15716_s22 + $0x1a0] ss:$12 sps:$4 sm:$0xff]   ;;  %v13801_v57 = vld [vmem:[%s15716_s22 + $0x188] ss:$12 sps:$4 sm:$0xff]  }
 0xac2   : > { %v17017_v37 = vpack.c.bf16 %v5628_v36, %v4239_v54  ;;  %v13376_v35 = vpop.permute.xlu1 %13375  ;;  %v5728_v54 = vld [vmem:[%s758_s28] sm:$0x7]  ;;  %s18044_s22 = scalar_lea.vmem [#allocation14], %s15687_s23  ;;  %s18048_s23 = sld [smem:[#allocation31_spill]] }
 0xac3   : > { %v13378_v25 = vunpack.i.h.bf16 %v13376_v35  ;;  %v13377_v20 = vunpack.i.l.bf16 %v13376_v35  ;;  %v5733_v35 = vrot.slane %v5728_v54, %v15856_v34  ;;  %v5741_v8 = vrot.slane %v5728_v54, %v15851_v32 }
 0xac4   : > { %6205 = vmatmul.mubr.bf16.vlgmr.msra.gmra.mxu1 %v17017_v37 }
 0xac5   : > { %12723 = vmatpush3.bf16.msra.mxu1 %v13776_v21  ;;  %v5624_v52 = vsel %vm4230_vm5, %v5623_v53, %v13378_v25  ;;  %v4235_v28 = vsel %vm4230_vm5, %v4234_v33, %v13377_v20  ;;  %v5737_v21 = vrot.slane %v5728_v54, %v15848_v31  ;;  %v13819_v54 = vld [vmem:[%s15733_s27 + $0xc4] ss:$48 sps:$4 sm:$0xff]  }
 0xac6   : > { %v13386_v22 = vpop.permute.xlu1 %13385  ;;  %12724 = vmatprep.subr.bf16.mxu1 %v13777_v6 }
 0xac7   : > { %v13388_v61 = vunpack.i.h.bf16 %v13386_v22  ;;  %v13387_v1 = vunpack.i.l.bf16 %v13386_v22 }
 0xac8   : > { %p12592_p1 = scmp.ne.s32.totalorder %s18048_s23, 11 }
 0xac9   : > { %12725 = vmatpush3.bf16.msra.mxu1 %v13781_v2  ;;  %v4236_v63 = vsel %vm4232_vm6, %v4235_v28, %v13387_v1  ;;  %v5625_v48 = vsel %vm4232_vm6, %v5624_v52, %v13388_v61  ;;  %v14771_v1 = vld [vmem:[#allocation2 + $0x28] sm:$0xff]  ;;  %s18049_s24 = sld [smem:[#allocation37_spill]] (!%p12592_p1) }
 0xaca   : > { %12726 = vmatprep.subr.bf16.mxu1 %v13782_v55  ;;  %v5630_v43 = vpack.c.bf16 %v5625_v48, %v4236_v63  ;;  %v14772_v63 = vld [vmem:[#allocation2 + $0x18] sm:$0xff]  ;;  %s18051_s20 = sld [smem:[#allocation43_spill]] (!%p12592_p1) }
 0xacc   : > { %6161 = vmatprep.mubr.bf16.mxu0 %v5630_v43  ;;  %6247 = vmatprep.mubr.bf16.mxu1 %v5630_v43 }
 0xacd   : > { %12727 = vmatpush3.bf16.msra.mxu1 %v13783_v60  ;;  %6162 = vmatmul.mubr.bf16.vlgmr.msra.gmra.mxu0 %v5629_v17  ;;  %v14773_v60 = vld [vmem:[#allocation2 + $0x8] sm:$0xff] }
 0xace   : > { %13194 = vmatpush3.bf16.msra.mxu0 %v13784_v16  ;;  %12728 = vmatprep.subr.bf16.mxu1 %v13785_v11 }
 0xacf   : > { %13195 = vmatprep.subr.bf16.mxu0 %v15195_v58  ;;  %13209 = vmatprep.mubr.msk.bf16.mxu0 %vm15196_vm0, %v15195_v58 }
 0xad0   : > { %s18052_s2 = smov (!%p12592_p1), %s18051_s20 }
 0xad1   : > { %12729 = vmatpush3.bf16.msra.mxu1 %v13786_v3  ;;  %v14774_v3 = vld [vmem:[#allocation2] sm:$0xff] }
 0xad2   : > { %13196 = vmatpush3.bf16.msra.mxu0 %v13787_v29  ;;  %12730 = vmatprep.subr.bf16.mxu1 %v13788_v10 }
 0xad3   : > { %13197 = vmatprep.subr.bf16.mxu0 %v15195_v58 }
 0xad5   : > { %12731 = vmatpush3.bf16.msra.mxu1 %v13789_v23 }
 0xad6   : > { %13198 = vmatpush3.bf16.msra.mxu0 %v13790_v51  ;;  %12732 = vmatprep.subr.bf16.mxu1 %v13791_v5  ;;  %v14775_v5 = vld [vmem:[#allocation2 + $0x20] sm:$0xff] }
 0xad7   : > { %13199 = vmatprep.subr.bf16.mxu0 %v15195_v58 }
 0xad9   : > { %12733 = vmatpush3.bf16.msra.mxu1 %v13792_v59 }
 0xada   : > { %13200 = vmatpush3.bf16.msra.mxu0 %v13793_v14  ;;  %12734 = vmatprep.subr.bf16.mxu1 %v13794_v0 }
 0xadb   : > { %13201 = vmatprep.subr.bf16.mxu0 %v15195_v58 }
 0xadd   : > { %12735 = vmatpush3.bf16.msra.mxu1 %v13795_v19  ;;  %v13802_v19 = vld [vmem:[%s15733_s27 + $0x2a0] ss:$48 sps:$4 sm:$0xff]  }
 0xade   : > { %13202 = vmatpush3.bf16.msra.mxu0 %v13796_v9  ;;  %12736 = vmatprep.subr.bf16.mxu1 %v13797_v18  ;;  %v13804_v9 = vld [vmem:[%s15733_s27 + $0x2a4] ss:$48 sps:$4 sm:$0xff]  }
 0xadf   : > { %13203 = vmatprep.subr.bf16.mxu0 %v15195_v58  ;;  %v13807_v18 = vld [vmem:[%s15733_s27 + $0x244] ss:$48 sps:$4 sm:$0xff]  }
 0xae1   : > { %12737 = vmatpush3.bf16.msra.mxu1 %v13798_v42  ;;  %v13805_v42 = vld [vmem:[%s15733_s27 + $0x240] ss:$48 sps:$4 sm:$0xff]  }
 0xae2   : > { %13204 = vmatpush3.bf16.msra.mxu0 %v13799_v4  ;;  %8186 = vmatprep.subr.bf16.mxu1 %v13804_v9  ;;  %v13810_v4 = vld [vmem:[%s15733_s27 + $0x1e4] ss:$48 sps:$4 sm:$0xff]  }
 0xae3   : > { %13205 = vmatprep.subr.bf16.mxu0 %v15195_v58  ;;  %v13852_v9 = vld [vmem:[%s15733_s27 + $0x724] ss:$48 sps:$4 sm:$0xff]  }
 0xae4   : > { %6248 = vmatmul.mubr.bf16.vlgmr.msra.gmra.mxu1 %v5629_v17 }
 0xae5   : > { %8187 = vmatpush1.bf16.msra.mxu1 %v13802_v19  ;;  %v13849_v19 = vld [vmem:[%s15733_s27 + $0x484] ss:$48 sps:$4 sm:$0xff]  }
 0xae6   : > { %13206 = vmatpush3.bf16.msra.mxu0 %v13800_v62  ;;  %8188 = vmatprep.subr.bf16.mxu1 %v13807_v18  ;;  %v13826_v62 = vld [vmem:[%s15733_s27 + $0x8a0] ss:$48 sps:$4 sm:$0xff]   ;;  %v13855_v18 = vld [vmem:[%s15733_s27 + $0x424] ss:$48 sps:$4 sm:$0xff]  }
 0xae7   : > { %13207 = vmatprep.subr.bf16.mxu0 %v15195_v58 }
 0xae9   : > { %8189 = vmatpush1.bf16.msra.mxu1 %v13805_v42  ;;  %v13850_v42 = vld [vmem:[%s15733_s27 + $0x720] ss:$48 sps:$4 sm:$0xff]  }
 0xaea   : > { %13208 = vmatpush3.bf16.msra.mxu0 %v13801_v57  ;;  %v13828_v57 = vld [vmem:[%s15733_s27 + $0x8a4] ss:$48 sps:$4 sm:$0xff]   ;;  %8190 = vmatprep.subr.bf16.mxu1 %v13810_v4  ;;  %v13853_v4 = vld [vmem:[%s15733_s27 + $0x420] ss:$48 sps:$4 sm:$0xff]  }
 0xaeb   : > { %8229 = vmatprep.subr.bf16.mxu0 %v13828_v57  ;;  %v13861_v57 = vld [vmem:[%s15733_s27 + $0x3c4] ss:$48 sps:$4 sm:$0xff]  }
 0xaed   : > { %13210 = vmatmul.mubr.bf16.vlgmr.msra.gmra.mxu0 %v17017_v37 }
 0xaee   : > { %8261 = vmatprep.mubr.bf16.mxu0 %v15194_v15  ;;  %8230 = vmatpush1.bf16.msra.mxu0 %v13826_v62  ;;  %v13858_v62 = vld [vmem:[%s15733_s27 + $0x6c4] ss:$48 sps:$4 sm:$0xff]  }
 0xb84   : > { %v6206_v38 = vpop.f32.mrf.mxu1 }
 0xb86   : > { %v6208_v47 = vpop.f32.mrf.mxu1 }
 0xb88   : > { %v6210_v36 = vpop.f32.mrf.mxu1 }
 0xb8a   : > { %v6212_v27 = vpop.f32.mrf.mxu1 }
 0xb8d   : > { %v6163_v7 = vpop.f32.mrf.mxu0 }
 0xb8e   : > { %v6164_v39 = vadd.f32 %v6163_v7, %v5733_v35  ;;  %v13813_v7 = vld [vmem:[%s15733_s27 + $0x184] ss:$48 sps:$4 sm:$0xff]  }
 0xb8f   : > { %v6165_v50 = vpop.f32.mrf.mxu0 }
 0xb90   : > { %v6166_v6 = vadd.f32 %v6165_v50, %v5737_v21  ;;  %v6207_v12 = vadd.f32 %v6206_v38, %v6164_v39  ;;  %v13808_v38 = vld [vmem:[%s15733_s27 + $0x1e0] ss:$48 sps:$4 sm:$0xff]   ;;  %v13816_v50 = vld [vmem:[%s15733_s27 + $0x124] ss:$48 sps:$4 sm:$0xff]  }
 0xb91   : > { %v6167_v40 = vpop.f32.mrf.mxu0  ;;  %8191 = vmatpush1.bf16.msra.mxu1 %v13808_v38  ;;  %v13856_v38 = vld [vmem:[%s15733_s27 + $0x6c0] ss:$48 sps:$4 sm:$0xff]  }
 0xb92   : > { %v6209_v41 = vadd.f32 %v6208_v47, %v6166_v6  ;;  %v6168_v2 = vadd.f32 %v6167_v40, %v5733_v35  ;;  %v17076_v45 = vadd.f32 %v14771_v1, %v6207_v12  ;;  %v13811_v47 = vld [vmem:[%s15733_s27 + $0x180] ss:$48 sps:$4 sm:$0xff]   ;;  %8192 = vmatprep.subr.bf16.mxu1 %v13813_v7  ;;  %v13822_v40 = vld [vmem:[%s15733_s27 + $0x64] ss:$48 sps:$4 sm:$0xff]  }
 0xb93   : > { %v6169_v49 = vpop.f32.mrf.mxu0  ;;  %v13825_v35 = vld [vmem:[%s15733_s27 + $0x4] ss:$48 sps:$4 sm:$0xff]   ;;  %v13823_v6 = vld [vmem:[%s15733_s27] ss:$48 sps:$4 sm:$0xff]  }
 0xb94   : > { %v6170_v24 = vadd.f32 %v6169_v49, %v5737_v21  ;;  %v17074_v22 = vadd.f32 %v14770_v46, %v6209_v41  ;;  %v6211_v26 = vadd.f32 %v6210_v36, %v6168_v2  ;;  %v13814_v36 = vld [vmem:[%s15733_s27 + $0x120] ss:$48 sps:$4 sm:$0xff]  }
 0xb95   : > { %8193 = vmatpush1.bf16.msra.mxu1 %v13811_v47  ;;  %v13817_v21 = vld [vmem:[%s15733_s27 + $0xc0] ss:$48 sps:$4 sm:$0xff]   ;;  %v13864_v47 = vld [vmem:[%s15733_s27 + $0x664] ss:$48 sps:$4 sm:$0xff]  }
 0xb96   : > { %v6213_v55 = vadd.f32 %v6212_v27, %v6170_v24  ;;  %v6305_v11 = vadd.f32 %v17074_v22, %v17076_v45  ;;  %v17084_v29 = vadd.f32 %v14774_v3, %v6211_v26  ;;  %8194 = vmatprep.subr.bf16.mxu1 %v13816_v50  ;;  %v13820_v27 = vld [vmem:[%s15733_s27 + $0x60] ss:$48 sps:$4 sm:$0xff]   ;;  %v13840_v3 = vld [vmem:[%s15733_s27 + $0x7e4] ss:$48 sps:$4 sm:$0xff]  }
 0xb97   : > { %v13829_v49 = vld [vmem:[%s15733_s27 + $0x5a0] ss:$48 sps:$4 sm:$0xff]   ;;  %v13867_v50 = vld [vmem:[%s15733_s27 + $0x364] ss:$48 sps:$4 sm:$0xff]  }
 0xb98   : > { %v17078_v48 = vadd.f32 %v14772_v63, %v6213_v55  ;;  %v13859_v7 = vld [vmem:[%s15733_s27 + $0x3c0] ss:$48 sps:$4 sm:$0xff]  }
 0xb99   : > { %8195 = vmatpush1.bf16.msra.mxu1 %v13814_v36  ;;  %v13862_v36 = vld [vmem:[%s15733_s27 + $0x660] ss:$48 sps:$4 sm:$0xff]  }
 0xb9a   : > { %v6309_v14 = vadd.f32 %v17078_v48, %v17084_v29  ;;  %8196 = vmatprep.subr.bf16.mxu1 %v13819_v54  ;;  %v13865_v54 = vld [vmem:[%s15733_s27 + $0x360] ss:$48 sps:$4 sm:$0xff]  }
 0xb9d   : > { %8197 = vmatpush1.bf16.msra.mxu1 %v13817_v21  ;;  %v13870_v21 = vld [vmem:[%s15733_s27 + $0x604] ss:$48 sps:$4 sm:$0xff]  }
 0xb9e   : > { %8198 = vmatprep.subr.bf16.mxu1 %v13822_v40  ;;  %v13873_v40 = vld [vmem:[%s15733_s27 + $0x304] ss:$48 sps:$4 sm:$0xff]  }
 0xba1   : > { %8199 = vmatpush1.bf16.msra.mxu1 %v13820_v27  ;;  %v13868_v27 = vld [vmem:[%s15733_s27 + $0x600] ss:$48 sps:$4 sm:$0xff]  }
 0xba2   : > { %8200 = vmatprep.subr.bf16.mxu1 %v13825_v35  ;;  %v13871_v35 = vld [vmem:[%s15733_s27 + $0x300] ss:$48 sps:$4 sm:$0xff]  }
 0xba4   : > { %v12738_v58 = vpop.f32.mrf.mxu1 }
 0xba5   : > { %8201 = vmatpush1.bf16.msra.mxu1 %v13823_v6  ;;  %v13876_v6 = vld [vmem:[%s15733_s27 + $0x2ac] ss:$48 sps:$4 sm:$0xff]  }
 0xba6   : > { %v12739_v37 = vpop.f32.mrf.mxu1 }
 0xba7   : > { %v12740_v25 = vadd.f32 %v12739_v37, %v12738_v58  ;;  %v13831_v58 = vld [vmem:[%s15733_s27 + $0x5a4] ss:$48 sps:$4 sm:$0xff]  }
 0xba8   : > { %v12741_v20 = vpop.f32.mrf.mxu1  ;;  %8202 = vmatprep.subr.bf16.mxu1 %v13831_v58  ;;  %v13879_v58 = vld [vmem:[%s15733_s27 + $0x8ac] ss:$48 sps:$4 sm:$0xff]  }
 0xba9   : > { %v6250_v33 = vadd.f32 %v12740_v25, %v5741_v8  ;;  %8203 = vmatpush2.bf16.msra.mxu1 %v13829_v49 }
 0xbaa   : > { %v12742_v56 = vpop.f32.mrf.mxu1 }
 0xbab   : > { %v12743_v53 = vadd.f32 %v12742_v56, %v12741_v20 }
 0xbad   : > { %v6290_v61 = vpop.f32.mrf.mxu0  ;;  %v6253_v16 = vadd.f32 %v12743_v53, %v5741_v8 }
 0xbae   : > { %v6291_v52 = vadd.f32 %v6290_v61, %v6250_v33 }
 0xbaf   : > { %v13211_v28 = vpop.f32.mrf.mxu0 }
 0xbb0   : > { %v17080_v43 = vadd.f32 %v14773_v60, %v6291_v52  ;;  %v13834_v60 = vld [vmem:[%s15733_s27 + $0x844] ss:$48 sps:$4 sm:$0xff]  }
 0xbb1   : > { %v6293_v17 = vpop.f32.mrf.mxu0  ;;  %8231 = vmatprep.subr.bf16.mxu0 %v13834_v60 }
 0xbb2   : > { %v6294_v10 = vadd.f32 %v6293_v17, %v6253_v16  ;;  %v6306_v23 = vadd.f32 %v6305_v11, %v17080_v43  ;;  %v13832_v16 = vld [vmem:[%s15733_s27 + $0x840] ss:$48 sps:$4 sm:$0xff]   ;;  %v13837_v11 = vld [vmem:[%s15733_s27 + $0x544] ss:$48 sps:$4 sm:$0xff]  }
 0xbb3   : > { %v13212_v51 = vpop.f32.mrf.mxu0  ;;  %v13835_v17 = vld [vmem:[%s15733_s27 + $0x540] ss:$48 sps:$4 sm:$0xff]   ;;  %8204 = vmatprep.subr.bf16.mxu1 %v13837_v11  ;;  %8232 = vmatpush1.bf16.msra.mxu0 %v13832_v16 }
 0xbb4   : > { %v17087_v59 = vadd.f32 %v14775_v5, %v6294_v10  ;;  %6307 = vadd.xlane.f32.xlu1 %v6306_v23  ;;  %8205 = vmatpush2.bf16.msra.mxu1 %v13835_v17  ;;  %v13838_v10 = vld [vmem:[%s15733_s27 + $0x7e0] ss:$48 sps:$4 sm:$0xff]   ;;  %v13843_v23 = vld [vmem:[%s15733_s27 + $0x4e4] ss:$48 sps:$4 sm:$0xff]  }
 0xbb5   : > { %8233 = vmatprep.subr.bf16.mxu0 %v13840_v3  ;;  %v13841_v51 = vld [vmem:[%s15733_s27 + $0x4e0] ss:$48 sps:$4 sm:$0xff]   ;;  %8206 = vmatprep.subr.bf16.mxu1 %v13843_v23 }
 0xbb6   : > { %v6310_v0 = vadd.f32 %v6309_v14, %v17087_v59  ;;  %v13844_v5 = vld [vmem:[%s15733_s27 + $0x780] ss:$48 sps:$4 sm:$0xff]   ;;  %v13846_v14 = vld [vmem:[%s15733_s27 + $0x784] ss:$48 sps:$4 sm:$0xff]  }
 0xbb7   : > { %8234 = vmatpush1.bf16.msra.mxu0 %v13838_v10 }
 0xbb8   : > { %6311 = vadd.xlane.f32.xlu0 %v6310_v0  ;;  %8207 = vmatpush2.bf16.msra.mxu1 %v13841_v51  ;;  %v13847_v0 = vld [vmem:[%s15733_s27 + $0x480] ss:$48 sps:$4 sm:$0xff]  }
 0xbb9   : > { %8235 = vmatprep.subr.bf16.mxu0 %v13846_v14  ;;  %8208 = vmatprep.subr.bf16.mxu1 %v13849_v19 }
 0xbbb   : > { %8236 = vmatpush1.bf16.msra.mxu0 %v13844_v5 }
 0xbbc   : > { %8209 = vmatpush2.bf16.msra.mxu1 %v13847_v0  ;;  %8237 = vmatprep.subr.bf16.mxu0 %v13852_v9 }
 0xbbd   : > { %8210 = vmatprep.subr.bf16.mxu1 %v13855_v18  ;;  %v13874_v18 = vld [vmem:[%s15733_s27 + $0x2a8] ss:$48 sps:$4 sm:$0xff]  }
 0xbbf   : > { %8238 = vmatpush1.bf16.msra.mxu0 %v13850_v42 }
 0xbc0   : > { %8211 = vmatpush2.bf16.msra.mxu1 %v13853_v4  ;;  %8239 = vmatprep.subr.bf16.mxu0 %v13858_v62  ;;  %v13877_v62 = vld [vmem:[%s15733_s27 + $0x8a8] ss:$48 sps:$4 sm:$0xff]  }
 0xbc1   : > { %8212 = vmatprep.subr.bf16.mxu1 %v13861_v57 }
 0xbc3   : > { %8240 = vmatpush1.bf16.msra.mxu0 %v13856_v38  ;;  %v13882_v38 = vld [vmem:[%s15733_s27 + $0x24c] ss:$48 sps:$4 sm:$0xff]  }
 0xbc4   : > { %8213 = vmatpush2.bf16.msra.mxu1 %v13859_v7  ;;  %8241 = vmatprep.subr.bf16.mxu0 %v13864_v47  ;;  %v13885_v7 = vld [vmem:[%s15733_s27 + $0x84c] ss:$48 sps:$4 sm:$0xff]   ;;  %v13880_v47 = vld [vmem:[%s15733_s27 + $0x248] ss:$48 sps:$4 sm:$0xff]  }
 0xbc5   : > { %8214 = vmatprep.subr.bf16.mxu1 %v13867_v50  ;;  %v13883_v50 = vld [vmem:[%s15733_s27 + $0x848] ss:$48 sps:$4 sm:$0xff]  }
 0xbc7   : > { %8242 = vmatpush1.bf16.msra.mxu0 %v13862_v36  ;;  %v13888_v36 = vld [vmem:[%s15733_s27 + $0x1ec] ss:$48 sps:$4 sm:$0xff]  }
 0xbc8   : > { %8215 = vmatpush2.bf16.msra.mxu1 %v13865_v54  ;;  %8243 = vmatprep.subr.bf16.mxu0 %v13870_v21  ;;  %v13891_v54 = vld [vmem:[%s15733_s27 + $0x7ec] ss:$48 sps:$4 sm:$0xff]   ;;  %v13886_v21 = vld [vmem:[%s15733_s27 + $0x1e8] ss:$48 sps:$4 sm:$0xff]  }
 0xbc9   : > { %8216 = vmatprep.subr.bf16.mxu1 %v13873_v40  ;;  %v13889_v40 = vld [vmem:[%s15733_s27 + $0x7e8] ss:$48 sps:$4 sm:$0xff]  }
 0xbcb   : > { %8244 = vmatpush1.bf16.msra.mxu0 %v13868_v27  ;;  %v13894_v27 = vld [vmem:[%s15733_s27 + $0x18c] ss:$48 sps:$4 sm:$0xff]  }
 0xbcc   : > { %8217 = vmatpush2.bf16.msra.mxu1 %v13871_v35  ;;  %8272 = vmatprep.subr.bf16.mxu0 %v13876_v6  ;;  %v13897_v35 = vld [vmem:[%s15733_s27 + $0x78c] ss:$48 sps:$4 sm:$0xff]   ;;  %v13892_v6 = vld [vmem:[%s15733_s27 + $0x188] ss:$48 sps:$4 sm:$0xff]  }
 0xbcd   : > { %8315 = vmatprep.subr.bf16.mxu1 %v13879_v58  ;;  %v13895_v58 = vld [vmem:[%s15733_s27 + $0x788] ss:$48 sps:$4 sm:$0xff]  }
 0xc3d   : > { %v6308_v39 = vpop.xlane.xlu1 %6307 }
 0xc3e   : > { %v6313_v37 = vmul.f32 0.0026041667, %v6308_v39 }
 0xc40   : > { %v17113_v41 = vsub.f32 %v17076_v45, %v6313_v37  ;;  %v17116_v24 = vsub.f32 %v17074_v22, %v6313_v37  ;;  %v17119_v25 = vsub.f32 %v17080_v43, %v6313_v37 }
 0xc41   : > { %v6312_v20 = vpop.xlane.xlu0 %6311 }
 0xc42   : > { %v6321_v8 = vmul.f32 %v17113_v41, %v17113_v41  ;;  %v6322_v12 = vmul.f32 %v17116_v24, %v17116_v24  ;;  %v6314_v2 = vmul.f32 0.0026041667, %v6312_v20  ;;  %v6323_v56 = vmul.f32 %v17119_v25, %v17119_v25 }
 0xc44   : > { %v17128_v46 = vsub.f32 %v17084_v29, %v6314_v2  ;;  %v17131_v55 = vsub.f32 %v17078_v48, %v6314_v2  ;;  %v17134_v53 = vsub.f32 %v17087_v59, %v6314_v2  ;;  %v6327_v33 = vadd.f32 %v6322_v12, %v6321_v8  ;;  %v6303_v2 = vld [vmem:[%s18043_s6] sm:$0x7] }
 0xc46   : > { %v6324_v61 = vmul.f32 %v17128_v46, %v17128_v46  ;;  %v6325_v1 = vmul.f32 %v17131_v55, %v17131_v55  ;;  %v6328_v26 = vadd.f32 %v6327_v33, %v6323_v56  ;;  %v6326_v52 = vmul.f32 %v17134_v53, %v17134_v53  ;;  %v6304_v33 = vld [vmem:[%s18044_s22] sm:$0x7] }
 0xc47   : > { %v6377_v16 = vrot.slane %v6304_v33, %v15848_v31  ;;  %v6381_v11 = vrot.slane %v6304_v33, %v15851_v32 }
 0xc48   : > { %6329 = vadd.xlane.f32.xlu0 %v6328_v26  ;;  %v6331_v28 = vadd.f32 %v6325_v1, %v6324_v61  ;;  %v6355_v1 = vrot.slane %v6303_v2, %v15848_v31 }
 0xc4a   : > { %v6332_v63 = vadd.f32 %v6331_v28, %v6326_v52  ;;  %v6359_v52 = vrot.slane %v6303_v2, %v15851_v32 }
 0xc4c   : > { %6333 = vadd.xlane.f32.xlu0 %v6332_v63  ;;  %v6351_v63 = vrot.slane %v6303_v2, %v15856_v34  ;;  %v13904_v2 = vld [vmem:[%s15733_s27 + $0xc8] ss:$48 sps:$4 sm:$0xff]  }
 0xcd1   : > { %v6330_v49 = vpop.xlane.xlu0 %6329 }
 0xcd2   : > { %v6335_v39 = vmul.f32 0.0026041667, %v6330_v49  ;;  %v13900_v49 = vld [vmem:[%s15733_s27 + $0x12c] ss:$48 sps:$4 sm:$0xff]  }
 0xcd4   : > { %v6337_v37 = vadd.f32 1e-06, %v6335_v39  ;;  %v13903_v39 = vld [vmem:[%s15733_s27 + $0x72c] ss:$48 sps:$4 sm:$0xff]  }
 0xcd5   : > { %v6334_v20 = vpop.xlane.xlu0 %6333 }
 0xcd6   : > { %14718 = vrsqrt.f32 %v6337_v37  ;;  %v6336_v8 = vmul.f32 0.0026041667, %v6334_v20  ;;  %v13898_v37 = vld [vmem:[%s15733_s27 + $0x128] ss:$48 sps:$4 sm:$0xff]  }
 0xcd7   : > { %v13901_v20 = vld [vmem:[%s15733_s27 + $0x728] ss:$48 sps:$4 sm:$0xff]  }
 0xcd8   : > { %v6338_v12 = vadd.f32 1e-06, %v6336_v8  ;;  %v13906_v8 = vld [vmem:[%s15733_s27 + $0xcc] ss:$48 sps:$4 sm:$0xff]  }
 0xcda   : > { %14720 = vrsqrt.f32 %v6338_v12  ;;  %v13909_v12 = vld [vmem:[%s15733_s27 + $0x6cc] ss:$48 sps:$4 sm:$0xff]  }
 0xce3   : > { %v14719_v56 = vpop.eup %14718 }
 0xce4   : > { %v6342_v61 = vmul.f32 %v14719_v56, %v17116_v24  ;;  %v6343_v26 = vmul.f32 %v14719_v56, %v17119_v25  ;;  %v6341_v28 = vmul.f32 %v14719_v56, %v17113_v41  ;;  %v6373_v41 = vrot.slane %v6304_v33, %v15856_v34  ;;  %v13907_v56 = vld [vmem:[%s15733_s27 + $0x6c8] ss:$48 sps:$4 sm:$0xff]   ;;  %v13912_v33 = vld [vmem:[%s15733_s27 + $0x6c] ss:$48 sps:$4 sm:$0xff]  }
 0xce6   : > { %v6364_v3 = vmul.f32 %v6355_v1, %v6342_v61  ;;  %v6365_v10 = vmul.f32 %v6359_v52, %v6343_v26  ;;  %v6363_v23 = vmul.f32 %v6351_v63, %v6341_v28  ;;  %v13915_v61 = vld [vmem:[%s15733_s27 + $0x66c] ss:$48 sps:$4 sm:$0xff]   ;;  %v13913_v26 = vld [vmem:[%s15733_s27 + $0x668] ss:$48 sps:$4 sm:$0xff]  }
 0xce7   : > { %v14721_v60 = vpop.eup %14720  ;;  %v13921_v28 = vld [vmem:[%s15733_s27 + $0x60c] ss:$48 sps:$4 sm:$0xff]  }
 0xce8   : > { %v6345_v17 = vmul.f32 %v14721_v60, %v17131_v55  ;;  %v6346_v24 = vmul.f32 %v14721_v60, %v17134_v53  ;;  %v6344_v25 = vmul.f32 %v14721_v60, %v17128_v46  ;;  %v6386_v0 = vadd.f32 %v6377_v16, %v6364_v3  ;;  %v13919_v60 = vld [vmem:[%s15733_s27 + $0x608] ss:$48 sps:$4 sm:$0xff]   ;;  %v13925_v3 = vld [vmem:[%s15733_s27 + $0x2b0] ss:$48 sps:$4 sm:$0xff]  }
 0xce9   : > { %v6387_v9 = vadd.f32 %v6381_v11, %v6365_v10  ;;  %v6385_v53 = vadd.f32 %v6373_v41, %v6363_v23  ;;  %v13933_v10 = vld [vmem:[%s15733_s27 + $0x254] ss:$48 sps:$4 sm:$0xff]   ;;  %v13931_v23 = vld [vmem:[%s15733_s27 + $0x250] ss:$48 sps:$4 sm:$0xff]  }
 0xcea   : > { %v6367_v51 = vmul.f32 %v6355_v1, %v6345_v17  ;;  %v6368_v5 = vmul.f32 %v6359_v52, %v6346_v24  ;;  %v6366_v14 = vmul.f32 %v6351_v63, %v6344_v25  ;;  %v13910_v1 = vld [vmem:[%s15733_s27 + $0x68] ss:$48 sps:$4 sm:$0xff]   ;;  %v13918_v52 = vld [vmem:[%s15733_s27 + $0xc] ss:$48 sps:$4 sm:$0xff]  }
 0xceb   : > { %v13916_v63 = vld [vmem:[%s15733_s27 + $0x8] ss:$48 sps:$4 sm:$0xff]   ;;  %v13930_v24 = vld [vmem:[%s15733_s27 + $0x54c] ss:$48 sps:$4 sm:$0xff]  }
 0xcec   : > { %v6389_v19 = vadd.f32 %v6377_v16, %v6367_v51  ;;  %v6390_v55 = vadd.f32 %v6381_v11, %v6368_v5  ;;  %v6388_v42 = vadd.f32 %v6373_v41, %v6366_v14  ;;  %v13924_v16 = vld [vmem:[%s15733_s27 + $0x5ac] ss:$48 sps:$4 sm:$0xff]   ;;  %v13927_v11 = vld [vmem:[%s15733_s27 + $0x2b4] ss:$48 sps:$4 sm:$0xff]   ;;  %v13922_v17 = vld [vmem:[%s15733_s27 + $0x5a8] ss:$48 sps:$4 sm:$0xff]  }
 0xced   : > { %v13928_v25 = vld [vmem:[%s15733_s27 + $0x548] ss:$48 sps:$4 sm:$0xff]   ;;  %v13936_v41 = vld [vmem:[%s15733_s27 + $0x4ec] ss:$48 sps:$4 sm:$0xff]   ;;  %v13939_v51 = vld [vmem:[%s15733_s27 + $0x1f4] ss:$48 sps:$4 sm:$0xff]  }
 0xcee   : > { %v17189_v4 = vpack.c.bf16 %v6389_v19, %v6386_v0  ;;  %v17191_v46 = vpack.c.bf16 %v6390_v55, %v6387_v9  ;;  %v17194_v57 = vpack.c.bf16 %v6388_v42, %v6385_v53  ;;  %v13934_v5 = vld [vmem:[%s15733_s27 + $0x4e8] ss:$48 sps:$4 sm:$0xff]   ;;  %v13937_v14 = vld [vmem:[%s15733_s27 + $0x1f0] ss:$48 sps:$4 sm:$0xff]   ;;  %v13942_v0 = vld [vmem:[%s15733_s27 + $0x48c] ss:$48 sps:$4 sm:$0xff]  }
 0xcef   : > { %v13945_v19 = vld [vmem:[%s15733_s27 + $0x194] ss:$48 sps:$4 sm:$0xff]   ;;  %v13940_v9 = vld [vmem:[%s15733_s27 + $0x488] ss:$48 sps:$4 sm:$0xff]   ;;  %v13943_v55 = vld [vmem:[%s15733_s27 + $0x190] ss:$48 sps:$4 sm:$0xff]  }
 0xcf0   : > { %8218 = vmatprep.mubr.bf16.mxu1 %v17189_v4  ;;  %8262 = vmatmul.mubr.bf16.vlgmr.msra.gmra.mxu0 %v17191_v46  ;;  %v13951_v53 = vld [vmem:[%s15733_s27 + $0x134] ss:$48 sps:$4 sm:$0xff]   ;;  %v13946_v42 = vld [vmem:[%s15733_s27 + $0x428] ss:$48 sps:$4 sm:$0xff]  }
 0xcf1   : > { %8273 = vmatpush1.bf16.msra.mxu0 %v13874_v18  ;;  %8219 = vmatmul.mubr.bf16.vlgmr.msra.gmra.mxu1 %v17194_v57  ;;  %v13948_v18 = vld [vmem:[%s15733_s27 + $0x42c] ss:$48 sps:$4 sm:$0xff]  }
 0xcf2   : > { %8304 = vmatprep.mubr.bf16.mxu0 %v17189_v4  ;;  %8316 = vmatpush1.bf16.msra.mxu1 %v13877_v62  ;;  %v13949_v62 = vld [vmem:[%s15733_s27 + $0x130] ss:$48 sps:$4 sm:$0xff]  }
 0xcf3   : > { %8274 = vmatprep.subr.bf16.mxu0 %v13882_v38  ;;  %8317 = vmatprep.subr.bf16.mxu1 %v13885_v7  ;;  %v13954_v38 = vld [vmem:[%s15733_s27 + $0x3cc] ss:$48 sps:$4 sm:$0xff]   ;;  %v13957_v7 = vld [vmem:[%s15733_s27 + $0xd4] ss:$48 sps:$4 sm:$0xff]  }
 0xcf4   : > { %8347 = vmatprep.mubr.bf16.mxu1 %v15194_v15 }
 0xcf5   : > { %8275 = vmatpush1.bf16.msra.mxu0 %v13880_v47  ;;  %v13952_v47 = vld [vmem:[%s15733_s27 + $0x3c8] ss:$48 sps:$4 sm:$0xff]  }
 0xcf6   : > { %8318 = vmatpush1.bf16.msra.mxu1 %v13883_v50  ;;  %8276 = vmatprep.subr.bf16.mxu0 %v13888_v36  ;;  %v13955_v50 = vld [vmem:[%s15733_s27 + $0xd0] ss:$48 sps:$4 sm:$0xff]   ;;  %v13960_v36 = vld [vmem:[%s15733_s27 + $0x36c] ss:$48 sps:$4 sm:$0xff]  }
 0xcf7   : > { %8319 = vmatprep.subr.bf16.mxu1 %v13891_v54  ;;  %v13963_v54 = vld [vmem:[%s15733_s27 + $0x74] ss:$48 sps:$4 sm:$0xff]  }
 0xcf9   : > { %8277 = vmatpush1.bf16.msra.mxu0 %v13886_v21  ;;  %v13958_v21 = vld [vmem:[%s15733_s27 + $0x368] ss:$48 sps:$4 sm:$0xff]  }
 0xcfa   : > { %8320 = vmatpush1.bf16.msra.mxu1 %v13889_v40  ;;  %8278 = vmatprep.subr.bf16.mxu0 %v13894_v27  ;;  %v13961_v40 = vld [vmem:[%s15733_s27 + $0x70] ss:$48 sps:$4 sm:$0xff]   ;;  %v13966_v27 = vld [vmem:[%s15733_s27 + $0x30c] ss:$48 sps:$4 sm:$0xff]  }
 0xcfb   : > { %8321 = vmatprep.subr.bf16.mxu1 %v13897_v35  ;;  %v13969_v35 = vld [vmem:[%s15733_s27 + $0x14] ss:$48 sps:$4 sm:$0xff]  }
 0xcfd   : > { %8279 = vmatpush1.bf16.msra.mxu0 %v13892_v6  ;;  %v13964_v6 = vld [vmem:[%s15733_s27 + $0x308] ss:$48 sps:$4 sm:$0xff]  }
 0xcfe   : > { %8322 = vmatpush1.bf16.msra.mxu1 %v13895_v58  ;;  %8280 = vmatprep.subr.bf16.mxu0 %v13900_v49  ;;  %v13967_v58 = vld [vmem:[%s15733_s27 + $0x10] ss:$48 sps:$4 sm:$0xff]   ;;  %v13972_v49 = vld [vmem:[%s15733_s27 + $0x8b4] ss:$48 sps:$4 sm:$0xff]  }
 0xcff   : > { %8323 = vmatprep.subr.bf16.mxu1 %v13903_v39  ;;  %v13975_v39 = vld [vmem:[%s15733_s27 + $0x5b4] ss:$48 sps:$4 sm:$0xff]  }
 0xd01   : > { %8281 = vmatpush1.bf16.msra.mxu0 %v13898_v37  ;;  %v13970_v37 = vld [vmem:[%s15733_s27 + $0x8b0] ss:$48 sps:$4 sm:$0xff]  }
 0xd02   : > { %8324 = vmatpush1.bf16.msra.mxu1 %v13901_v20  ;;  %8282 = vmatprep.subr.bf16.mxu0 %v13906_v8  ;;  %v13973_v20 = vld [vmem:[%s15733_s27 + $0x5b0] ss:$48 sps:$4 sm:$0xff]   ;;  %v13978_v8 = vld [vmem:[%s15733_s27 + $0x854] ss:$48 sps:$4 sm:$0xff]  }
 0xd03   : > { %8325 = vmatprep.subr.bf16.mxu1 %v13909_v12  ;;  %v13981_v12 = vld [vmem:[%s15733_s27 + $0x554] ss:$48 sps:$4 sm:$0xff]  }
 0xd05   : > { %8283 = vmatpush1.bf16.msra.mxu0 %v13904_v2  ;;  %v13976_v2 = vld [vmem:[%s15733_s27 + $0x850] ss:$48 sps:$4 sm:$0xff]  }
 0xd06   : > { %8326 = vmatpush1.bf16.msra.mxu1 %v13907_v56  ;;  %8284 = vmatprep.subr.bf16.mxu0 %v13912_v33  ;;  %v13979_v56 = vld [vmem:[%s15733_s27 + $0x550] ss:$48 sps:$4 sm:$0xff]   ;;  %v13984_v33 = vld [vmem:[%s15733_s27 + $0x7f4] ss:$48 sps:$4 sm:$0xff]  }
 0xd07   : > { %8327 = vmatprep.subr.bf16.mxu1 %v13915_v61  ;;  %v13987_v61 = vld [vmem:[%s15733_s27 + $0x4f4] ss:$48 sps:$4 sm:$0xff]  }
 0xd09   : > { %8285 = vmatpush1.bf16.msra.mxu0 %v13910_v1  ;;  %v13982_v1 = vld [vmem:[%s15733_s27 + $0x7f0] ss:$48 sps:$4 sm:$0xff]  }
 0xd0a   : > { %8328 = vmatpush1.bf16.msra.mxu1 %v13913_v26  ;;  %8286 = vmatprep.subr.bf16.mxu0 %v13918_v52  ;;  %v13985_v26 = vld [vmem:[%s15733_s27 + $0x4f0] ss:$48 sps:$4 sm:$0xff]   ;;  %v13990_v52 = vld [vmem:[%s15733_s27 + $0x794] ss:$48 sps:$4 sm:$0xff]  }
 0xd0b   : > { %8329 = vmatprep.subr.bf16.mxu1 %v13921_v28  ;;  %v13993_v28 = vld [vmem:[%s15733_s27 + $0x494] ss:$48 sps:$4 sm:$0xff]  }
 0xd0d   : > { %8287 = vmatpush1.bf16.msra.mxu0 %v13916_v63  ;;  %v13988_v63 = vld [vmem:[%s15733_s27 + $0x790] ss:$48 sps:$4 sm:$0xff]  }
 0xd0e   : > { %8330 = vmatpush1.bf16.msra.mxu1 %v13919_v60  ;;  %8288 = vmatprep.subr.bf16.mxu0 %v13924_v16  ;;  %v13991_v60 = vld [vmem:[%s15733_s27 + $0x490] ss:$48 sps:$4 sm:$0xff]   ;;  %v13996_v16 = vld [vmem:[%s15733_s27 + $0x734] ss:$48 sps:$4 sm:$0xff]  }
 0xd0f   : > { %8358 = vmatprep.subr.bf16.mxu1 %v13927_v11  ;;  %v13999_v11 = vld [vmem:[%s15733_s27 + $0x434] ss:$48 sps:$4 sm:$0xff]  }
 0xd11   : > { %8289 = vmatpush2.bf16.msra.mxu0 %v13922_v17  ;;  %8348 = vmatmul.mubr.bf16.vlgmr.msra.gmra.mxu1 %v17191_v46  ;;  %v13994_v17 = vld [vmem:[%s15733_s27 + $0x730] ss:$48 sps:$4 sm:$0xff]  }
 0xd12   : > { %8359 = vmatpush1.bf16.msra.mxu1 %v13925_v3  ;;  %8390 = vmatprep.mubr.bf16.mxu1 %v17189_v4  ;;  %v13997_v3 = vld [vmem:[%s15733_s27 + $0x430] ss:$48 sps:$4 sm:$0xff]  }
 0xd13   : > { %8290 = vmatprep.subr.bf16.mxu0 %v13930_v24  ;;  %8360 = vmatprep.subr.bf16.mxu1 %v13933_v10  ;;  %v14002_v24 = vld [vmem:[%s15733_s27 + $0x6d4] ss:$48 sps:$4 sm:$0xff]  }
 0xd14   : > { %v14005_v10 = vld [vmem:[%s15733_s27 + $0x3d4] ss:$48 sps:$4 sm:$0xff]  }
 0xd15   : > { %8291 = vmatpush2.bf16.msra.mxu0 %v13928_v25  ;;  %v14000_v25 = vld [vmem:[%s15733_s27 + $0x6d0] ss:$48 sps:$4 sm:$0xff]  }
 0xd16   : > { %8361 = vmatpush1.bf16.msra.mxu1 %v13931_v23  ;;  %8292 = vmatprep.subr.bf16.mxu0 %v13936_v41  ;;  %v14003_v23 = vld [vmem:[%s15733_s27 + $0x3d0] ss:$48 sps:$4 sm:$0xff]   ;;  %v14008_v41 = vld [vmem:[%s15733_s27 + $0x674] ss:$48 sps:$4 sm:$0xff]  }
 0xd17   : > { %8362 = vmatprep.subr.bf16.mxu1 %v13939_v51  ;;  %v14011_v51 = vld [vmem:[%s15733_s27 + $0x374] ss:$48 sps:$4 sm:$0xff]  }
 0xd19   : > { %8293 = vmatpush2.bf16.msra.mxu0 %v13934_v5  ;;  %v14006_v5 = vld [vmem:[%s15733_s27 + $0x670] ss:$48 sps:$4 sm:$0xff]  }
 0xd1a   : > { %8363 = vmatpush1.bf16.msra.mxu1 %v13937_v14  ;;  %8294 = vmatprep.subr.bf16.mxu0 %v13942_v0  ;;  %v14009_v14 = vld [vmem:[%s15733_s27 + $0x370] ss:$48 sps:$4 sm:$0xff]   ;;  %v14014_v0 = vld [vmem:[%s15733_s27 + $0x614] ss:$48 sps:$4 sm:$0xff]  }
 0xd1b   : > { %8364 = vmatprep.subr.bf16.mxu1 %v13945_v19  ;;  %v14017_v19 = vld [vmem:[%s15733_s27 + $0x314] ss:$48 sps:$4 sm:$0xff]  }
 0xd1d   : > { %8295 = vmatpush2.bf16.msra.mxu0 %v13940_v9  ;;  %v14012_v9 = vld [vmem:[%s15733_s27 + $0x610] ss:$48 sps:$4 sm:$0xff]  }
 0xd1e   : > { %8365 = vmatpush1.bf16.msra.mxu1 %v13943_v55  ;;  %8296 = vmatprep.subr.bf16.mxu0 %v13948_v18  ;;  %v14015_v55 = vld [vmem:[%s15733_s27 + $0x310] ss:$48 sps:$4 sm:$0xff]   ;;  %v14020_v18 = vld [vmem:[%s15733_s27 + $0x2bc] ss:$48 sps:$4 sm:$0xff]  }
 0xd1f   : > { %8366 = vmatprep.subr.bf16.mxu1 %v13951_v53  ;;  %v14023_v53 = vld [vmem:[%s15733_s27 + $0x8bc] ss:$48 sps:$4 sm:$0xff]  }
 0xd21   : > { %8297 = vmatpush2.bf16.msra.mxu0 %v13946_v42  ;;  %v14018_v42 = vld [vmem:[%s15733_s27 + $0x2b8] ss:$48 sps:$4 sm:$0xff]  }
 0xd22   : > { %8367 = vmatpush1.bf16.msra.mxu1 %v13949_v62  ;;  %8298 = vmatprep.subr.bf16.mxu0 %v13954_v38  ;;  %v14021_v62 = vld [vmem:[%s15733_s27 + $0x8b8] ss:$48 sps:$4 sm:$0xff]   ;;  %v14026_v38 = vld [vmem:[%s15733_s27 + $0x25c] ss:$48 sps:$4 sm:$0xff]  }
 0xd23   : > { %8368 = vmatprep.subr.bf16.mxu1 %v13957_v7  ;;  %v14029_v7 = vld [vmem:[%s15733_s27 + $0x85c] ss:$48 sps:$4 sm:$0xff]  }
 0xd25   : > { %8299 = vmatpush2.bf16.msra.mxu0 %v13952_v47  ;;  %v14024_v47 = vld [vmem:[%s15733_s27 + $0x258] ss:$48 sps:$4 sm:$0xff]  }
 0xd26   : > { %8369 = vmatpush1.bf16.msra.mxu1 %v13955_v50  ;;  %8300 = vmatprep.subr.bf16.mxu0 %v13960_v36  ;;  %v14027_v50 = vld [vmem:[%s15733_s27 + $0x858] ss:$48 sps:$4 sm:$0xff]   ;;  %v14032_v36 = vld [vmem:[%s15733_s27 + $0x1fc] ss:$48 sps:$4 sm:$0xff]  }
 0xd27   : > { %8370 = vmatprep.subr.bf16.mxu1 %v13963_v54  ;;  %v14035_v54 = vld [vmem:[%s15733_s27 + $0x7fc] ss:$48 sps:$4 sm:$0xff]  }
 0xd29   : > { %8301 = vmatpush2.bf16.msra.mxu0 %v13958_v21  ;;  %v14030_v21 = vld [vmem:[%s15733_s27 + $0x1f8] ss:$48 sps:$4 sm:$0xff]  }
 0xd2a   : > { %8371 = vmatpush1.bf16.msra.mxu1 %v13961_v40  ;;  %8302 = vmatprep.subr.bf16.mxu0 %v13966_v27  ;;  %v14033_v40 = vld [vmem:[%s15733_s27 + $0x7f8] ss:$48 sps:$4 sm:$0xff]   ;;  %v14038_v27 = vld [vmem:[%s15733_s27 + $0x19c] ss:$48 sps:$4 sm:$0xff]  }
 0xd2b   : > { %8372 = vmatprep.subr.bf16.mxu1 %v13969_v35  ;;  %v14041_v35 = vld [vmem:[%s15733_s27 + $0x79c] ss:$48 sps:$4 sm:$0xff]  }
 0xd2d   : > { %8303 = vmatpush2.bf16.msra.mxu0 %v13964_v6  ;;  %v14036_v6 = vld [vmem:[%s15733_s27 + $0x198] ss:$48 sps:$4 sm:$0xff]  }
 0xd2e   : > { %8373 = vmatpush1.bf16.msra.mxu1 %v13967_v58  ;;  %8401 = vmatprep.subr.bf16.mxu0 %v13972_v49  ;;  %v14039_v58 = vld [vmem:[%s15733_s27 + $0x798] ss:$48 sps:$4 sm:$0xff]   ;;  %v14044_v49 = vld [vmem:[%s15733_s27 + $0x13c] ss:$48 sps:$4 sm:$0xff]  }
 0xd2f   : > { %8374 = vmatprep.subr.bf16.mxu1 %v13975_v39  ;;  %v14047_v39 = vld [vmem:[%s15733_s27 + $0x73c] ss:$48 sps:$4 sm:$0xff]  }
 0xd30   : > { %8305 = vmatmul.mubr.bf16.vlgmr.msra.gmra.mxu0 %v17194_v57 }
 0xd31   : > { %8402 = vmatpush1.bf16.msra.mxu0 %v13970_v37  ;;  %8433 = vmatprep.mubr.bf16.mxu0 %v15194_v15  ;;  %v14042_v37 = vld [vmem:[%s15733_s27 + $0x138] ss:$48 sps:$4 sm:$0xff]  }
 0xd32   : > { %8375 = vmatpush2.bf16.msra.mxu1 %v13973_v20  ;;  %8403 = vmatprep.subr.bf16.mxu0 %v13978_v8  ;;  %v14045_v20 = vld [vmem:[%s15733_s27 + $0x738] ss:$48 sps:$4 sm:$0xff]   ;;  %v14050_v8 = vld [vmem:[%s15733_s27 + $0xdc] ss:$48 sps:$4 sm:$0xff]  }
 0xd33   : > { %8376 = vmatprep.subr.bf16.mxu1 %v13981_v12  ;;  %v14053_v12 = vld [vmem:[%s15733_s27 + $0x6dc] ss:$48 sps:$4 sm:$0xff]  }
 0xd35   : > { %8404 = vmatpush1.bf16.msra.mxu0 %v13976_v2  ;;  %v14048_v2 = vld [vmem:[%s15733_s27 + $0xd8] ss:$48 sps:$4 sm:$0xff]  }
 0xd36   : > { %8377 = vmatpush2.bf16.msra.mxu1 %v13979_v56  ;;  %8405 = vmatprep.subr.bf16.mxu0 %v13984_v33  ;;  %v14051_v56 = vld [vmem:[%s15733_s27 + $0x6d8] ss:$48 sps:$4 sm:$0xff]   ;;  %v14056_v33 = vld [vmem:[%s15733_s27 + $0x7c] ss:$48 sps:$4 sm:$0xff]  }
 0xd37   : > { %8378 = vmatprep.subr.bf16.mxu1 %v13987_v61  ;;  %v14059_v61 = vld [vmem:[%s15733_s27 + $0x67c] ss:$48 sps:$4 sm:$0xff]  }
 0xd39   : > { %8406 = vmatpush1.bf16.msra.mxu0 %v13982_v1  ;;  %v14054_v1 = vld [vmem:[%s15733_s27 + $0x78] ss:$48 sps:$4 sm:$0xff]  }
 0xd3a   : > { %8379 = vmatpush2.bf16.msra.mxu1 %v13985_v26  ;;  %8407 = vmatprep.subr.bf16.mxu0 %v13990_v52  ;;  %v14057_v26 = vld [vmem:[%s15733_s27 + $0x678] ss:$48 sps:$4 sm:$0xff]   ;;  %v14062_v52 = vld [vmem:[%s15733_s27 + $0x1c] ss:$48 sps:$4 sm:$0xff]  }
 0xd3b   : > { %8380 = vmatprep.subr.bf16.mxu1 %v13993_v28  ;;  %v14065_v28 = vld [vmem:[%s15733_s27 + $0x61c] ss:$48 sps:$4 sm:$0xff]  }
 0xd3d   : > { %8408 = vmatpush1.bf16.msra.mxu0 %v13988_v63  ;;  %v14060_v63 = vld [vmem:[%s15733_s27 + $0x18] ss:$48 sps:$4 sm:$0xff]  }
 0xd3e   : > { %8381 = vmatpush2.bf16.msra.mxu1 %v13991_v60  ;;  %8409 = vmatprep.subr.bf16.mxu0 %v13996_v16  ;;  %v14063_v60 = vld [vmem:[%s15733_s27 + $0x618] ss:$48 sps:$4 sm:$0xff]   ;;  %v14068_v16 = vld [vmem:[%s15733_s27 + $0x5bc] ss:$48 sps:$4 sm:$0xff]  }
 0xd3f   : > { %8382 = vmatprep.subr.bf16.mxu1 %v13999_v11  ;;  %v14071_v11 = vld [vmem:[%s15733_s27 + $0x2c4] ss:$48 sps:$4 sm:$0xff]  }
 0xd41   : > { %8410 = vmatpush1.bf16.msra.mxu0 %v13994_v17  ;;  %v14066_v17 = vld [vmem:[%s15733_s27 + $0x5b8] ss:$48 sps:$4 sm:$0xff]  }
 0xd42   : > { %8383 = vmatpush2.bf16.msra.mxu1 %v13997_v3  ;;  %8411 = vmatprep.subr.bf16.mxu0 %v14002_v24  ;;  %v14069_v3 = vld [vmem:[%s15733_s27 + $0x2c0] ss:$48 sps:$4 sm:$0xff]   ;;  %v14074_v24 = vld [vmem:[%s15733_s27 + $0x55c] ss:$48 sps:$4 sm:$0xff]  }
 0xd43   : > { %8384 = vmatprep.subr.bf16.mxu1 %v14005_v10  ;;  %v14077_v10 = vld [vmem:[%s15733_s27 + $0x264] ss:$48 sps:$4 sm:$0xff]  }
 0xd45   : > { %8412 = vmatpush1.bf16.msra.mxu0 %v14000_v25  ;;  %v14072_v25 = vld [vmem:[%s15733_s27 + $0x558] ss:$48 sps:$4 sm:$0xff]  }
 0xd46   : > { %8385 = vmatpush2.bf16.msra.mxu1 %v14003_v23  ;;  %8413 = vmatprep.subr.bf16.mxu0 %v14008_v41  ;;  %v14075_v23 = vld [vmem:[%s15733_s27 + $0x260] ss:$48 sps:$4 sm:$0xff]   ;;  %v14080_v41 = vld [vmem:[%s15733_s27 + $0x4fc] ss:$48 sps:$4 sm:$0xff]  }
 0xd47   : > { %8386 = vmatprep.subr.bf16.mxu1 %v14011_v51  ;;  %v14083_v51 = vld [vmem:[%s15733_s27 + $0x204] ss:$48 sps:$4 sm:$0xff]  }
 0xd49   : > { %8414 = vmatpush1.bf16.msra.mxu0 %v14006_v5  ;;  %v14078_v5 = vld [vmem:[%s15733_s27 + $0x4f8] ss:$48 sps:$4 sm:$0xff]  }
 0xd4a   : > { %8387 = vmatpush2.bf16.msra.mxu1 %v14009_v14  ;;  %8415 = vmatprep.subr.bf16.mxu0 %v14014_v0  ;;  %v14081_v14 = vld [vmem:[%s15733_s27 + $0x200] ss:$48 sps:$4 sm:$0xff]   ;;  %v14086_v0 = vld [vmem:[%s15733_s27 + $0x49c] ss:$48 sps:$4 sm:$0xff]  }
 0xd4b   : > { %8388 = vmatprep.subr.bf16.mxu1 %v14017_v19  ;;  %v14089_v19 = vld [vmem:[%s15733_s27 + $0x1a4] ss:$48 sps:$4 sm:$0xff]  }
 0xd4d   : > { %8416 = vmatpush1.bf16.msra.mxu0 %v14012_v9  ;;  %v14084_v9 = vld [vmem:[%s15733_s27 + $0x498] ss:$48 sps:$4 sm:$0xff]  }
 0xd4e   : > { %8389 = vmatpush2.bf16.msra.mxu1 %v14015_v55  ;;  %8444 = vmatprep.subr.bf16.mxu0 %v14020_v18  ;;  %v14087_v55 = vld [vmem:[%s15733_s27 + $0x1a0] ss:$48 sps:$4 sm:$0xff]   ;;  %v14092_v18 = vld [vmem:[%s15733_s27 + $0x43c] ss:$48 sps:$4 sm:$0xff]  }
 0xd4f   : > { %8487 = vmatprep.subr.bf16.mxu1 %v14023_v53  ;;  %v14095_v53 = vld [vmem:[%s15733_s27 + $0x144] ss:$48 sps:$4 sm:$0xff]  }
 0xd50   : > { %8434 = vmatmul.mubr.bf16.vlgmr.msra.gmra.mxu0 %v17191_v46 }
 0xd51   : > { %8391 = vmatmul.mubr.bf16.vlgmr.msra.gmra.mxu1 %v17194_v57  ;;  %8445 = vmatpush1.bf16.msra.mxu0 %v14018_v42  ;;  %v14090_v42 = vld [vmem:[%s15733_s27 + $0x438] ss:$48 sps:$4 sm:$0xff]  }
 0xd52   : > { %8476 = vmatprep.mubr.bf16.mxu0 %v17189_v4  ;;  %8488 = vmatpush1.bf16.msra.mxu1 %v14021_v62  ;;  %v14093_v62 = vld [vmem:[%s15733_s27 + $0x140] ss:$48 sps:$4 sm:$0xff]  }
 0xd53   : > { %8446 = vmatprep.subr.bf16.mxu0 %v14026_v38  ;;  %8489 = vmatprep.subr.bf16.mxu1 %v14029_v7  ;;  %v14098_v38 = vld [vmem:[%s15733_s27 + $0x3dc] ss:$48 sps:$4 sm:$0xff]   ;;  %v14101_v7 = vld [vmem:[%s15733_s27 + $0xe4] ss:$48 sps:$4 sm:$0xff]  }
 0xd54   : > { %8519 = vmatprep.mubr.bf16.mxu1 %v15194_v15 }
 0xd55   : > { %8447 = vmatpush1.bf16.msra.mxu0 %v14024_v47  ;;  %v14096_v47 = vld [vmem:[%s15733_s27 + $0x3d8] ss:$48 sps:$4 sm:$0xff]  }
 0xd56   : > { %8490 = vmatpush1.bf16.msra.mxu1 %v14027_v50  ;;  %8448 = vmatprep.subr.bf16.mxu0 %v14032_v36  ;;  %v14099_v50 = vld [vmem:[%s15733_s27 + $0xe0] ss:$48 sps:$4 sm:$0xff]   ;;  %v14104_v36 = vld [vmem:[%s15733_s27 + $0x37c] ss:$48 sps:$4 sm:$0xff]  }
 0xd57   : > { %8491 = vmatprep.subr.bf16.mxu1 %v14035_v54  ;;  %v14107_v54 = vld [vmem:[%s15733_s27 + $0x84] ss:$48 sps:$4 sm:$0xff]  }
 0xd59   : > { %8449 = vmatpush1.bf16.msra.mxu0 %v14030_v21  ;;  %v14102_v21 = vld [vmem:[%s15733_s27 + $0x378] ss:$48 sps:$4 sm:$0xff]  }
 0xd5a   : > { %8492 = vmatpush1.bf16.msra.mxu1 %v14033_v40  ;;  %8450 = vmatprep.subr.bf16.mxu0 %v14038_v27  ;;  %v14105_v40 = vld [vmem:[%s15733_s27 + $0x80] ss:$48 sps:$4 sm:$0xff]   ;;  %v14110_v27 = vld [vmem:[%s15733_s27 + $0x31c] ss:$48 sps:$4 sm:$0xff]  }
 0xd5b   : > { %8493 = vmatprep.subr.bf16.mxu1 %v14041_v35  ;;  %v14113_v35 = vld [vmem:[%s15733_s27 + $0x24] ss:$48 sps:$4 sm:$0xff]  }
 0xd5d   : > { %8451 = vmatpush1.bf16.msra.mxu0 %v14036_v6  ;;  %v14108_v6 = vld [vmem:[%s15733_s27 + $0x318] ss:$48 sps:$4 sm:$0xff]  }
 0xd5e   : > { %8494 = vmatpush1.bf16.msra.mxu1 %v14039_v58  ;;  %8452 = vmatprep.subr.bf16.mxu0 %v14044_v49  ;;  %v14111_v58 = vld [vmem:[%s15733_s27 + $0x20] ss:$48 sps:$4 sm:$0xff]   ;;  %v14116_v49 = vld [vmem:[%s15733_s27 + $0x8c4] ss:$48 sps:$4 sm:$0xff]  }
 0xd5f   : > { %8495 = vmatprep.subr.bf16.mxu1 %v14047_v39  ;;  %v14119_v39 = vld [vmem:[%s15733_s27 + $0x5c4] ss:$48 sps:$4 sm:$0xff]  }
 0xd61   : > { %8453 = vmatpush1.bf16.msra.mxu0 %v14042_v37  ;;  %v14114_v37 = vld [vmem:[%s15733_s27 + $0x8c0] ss:$48 sps:$4 sm:$0xff]  }
 0xd62   : > { %8496 = vmatpush1.bf16.msra.mxu1 %v14045_v20  ;;  %8454 = vmatprep.subr.bf16.mxu0 %v14050_v8  ;;  %v14117_v20 = vld [vmem:[%s15733_s27 + $0x5c0] ss:$48 sps:$4 sm:$0xff]   ;;  %v14122_v8 = vld [vmem:[%s15733_s27 + $0x864] ss:$48 sps:$4 sm:$0xff]  }
 0xd63   : > { %8497 = vmatprep.subr.bf16.mxu1 %v14053_v12  ;;  %v14125_v12 = vld [vmem:[%s15733_s27 + $0x564] ss:$48 sps:$4 sm:$0xff]  }
 0xd65   : > { %8455 = vmatpush1.bf16.msra.mxu0 %v14048_v2  ;;  %v14120_v2 = vld [vmem:[%s15733_s27 + $0x860] ss:$48 sps:$4 sm:$0xff]  }
 0xd66   : > { %8498 = vmatpush1.bf16.msra.mxu1 %v14051_v56  ;;  %8456 = vmatprep.subr.bf16.mxu0 %v14056_v33  ;;  %v14123_v56 = vld [vmem:[%s15733_s27 + $0x560] ss:$48 sps:$4 sm:$0xff]   ;;  %v14128_v33 = vld [vmem:[%s15733_s27 + $0x804] ss:$48 sps:$4 sm:$0xff]  }
 0xd67   : > { %8499 = vmatprep.subr.bf16.mxu1 %v14059_v61  ;;  %v14131_v61 = vld [vmem:[%s15733_s27 + $0x504] ss:$48 sps:$4 sm:$0xff]  }
 0xd69   : > { %8457 = vmatpush1.bf16.msra.mxu0 %v14054_v1  ;;  %v14126_v1 = vld [vmem:[%s15733_s27 + $0x800] ss:$48 sps:$4 sm:$0xff]  }
 0xd6a   : > { %8500 = vmatpush1.bf16.msra.mxu1 %v14057_v26  ;;  %8458 = vmatprep.subr.bf16.mxu0 %v14062_v52  ;;  %v14129_v26 = vld [vmem:[%s15733_s27 + $0x500] ss:$48 sps:$4 sm:$0xff]   ;;  %v14134_v52 = vld [vmem:[%s15733_s27 + $0x7a4] ss:$48 sps:$4 sm:$0xff]  }
 0xd6b   : > { %8501 = vmatprep.subr.bf16.mxu1 %v14065_v28  ;;  %v14137_v28 = vld [vmem:[%s15733_s27 + $0x4a4] ss:$48 sps:$4 sm:$0xff]  }
 0xd6d   : > { %8459 = vmatpush1.bf16.msra.mxu0 %v14060_v63  ;;  %v14132_v63 = vld [vmem:[%s15733_s27 + $0x7a0] ss:$48 sps:$4 sm:$0xff]  }
 0xd6e   : > { %8502 = vmatpush1.bf16.msra.mxu1 %v14063_v60  ;;  %8460 = vmatprep.subr.bf16.mxu0 %v14068_v16  ;;  %v14135_v60 = vld [vmem:[%s15733_s27 + $0x4a0] ss:$48 sps:$4 sm:$0xff]   ;;  %v14140_v16 = vld [vmem:[%s15733_s27 + $0x744] ss:$48 sps:$4 sm:$0xff]  }
 0xd6f   : > { %8530 = vmatprep.subr.bf16.mxu1 %v14071_v11  ;;  %v14143_v11 = vld [vmem:[%s15733_s27 + $0x444] ss:$48 sps:$4 sm:$0xff]  }
 0xd71   : > { %8461 = vmatpush2.bf16.msra.mxu0 %v14066_v17  ;;  %8520 = vmatmul.mubr.bf16.vlgmr.msra.gmra.mxu1 %v17191_v46  ;;  %v14138_v17 = vld [vmem:[%s15733_s27 + $0x740] ss:$48 sps:$4 sm:$0xff]  }
 0xd72   : > { %8531 = vmatpush1.bf16.msra.mxu1 %v14069_v3  ;;  %8562 = vmatprep.mubr.bf16.mxu1 %v17189_v4  ;;  %v14141_v3 = vld [vmem:[%s15733_s27 + $0x440] ss:$48 sps:$4 sm:$0xff]  }
 0xd73   : > { %8462 = vmatprep.subr.bf16.mxu0 %v14074_v24  ;;  %8532 = vmatprep.subr.bf16.mxu1 %v14077_v10  ;;  %v14146_v24 = vld [vmem:[%s15733_s27 + $0x6e4] ss:$48 sps:$4 sm:$0xff]  }
 0xd74   : > { %v14149_v10 = vld [vmem:[%s15733_s27 + $0x3e4] ss:$48 sps:$4 sm:$0xff]  }
 0xd75   : > { %8463 = vmatpush2.bf16.msra.mxu0 %v14072_v25  ;;  %v14144_v25 = vld [vmem:[%s15733_s27 + $0x6e0] ss:$48 sps:$4 sm:$0xff]  }
 0xd76   : > { %8533 = vmatpush1.bf16.msra.mxu1 %v14075_v23  ;;  %8464 = vmatprep.subr.bf16.mxu0 %v14080_v41  ;;  %v14147_v23 = vld [vmem:[%s15733_s27 + $0x3e0] ss:$48 sps:$4 sm:$0xff]   ;;  %v14152_v41 = vld [vmem:[%s15733_s27 + $0x684] ss:$48 sps:$4 sm:$0xff]  }
 0xd77   : > { %8534 = vmatprep.subr.bf16.mxu1 %v14083_v51  ;;  %v14155_v51 = vld [vmem:[%s15733_s27 + $0x384] ss:$48 sps:$4 sm:$0xff]  }
 0xd79   : > { %8465 = vmatpush2.bf16.msra.mxu0 %v14078_v5  ;;  %v14150_v5 = vld [vmem:[%s15733_s27 + $0x680] ss:$48 sps:$4 sm:$0xff]  }
 0xd7a   : > { %8535 = vmatpush1.bf16.msra.mxu1 %v14081_v14  ;;  %8466 = vmatprep.subr.bf16.mxu0 %v14086_v0  ;;  %v14153_v14 = vld [vmem:[%s15733_s27 + $0x380] ss:$48 sps:$4 sm:$0xff]   ;;  %v14158_v0 = vld [vmem:[%s15733_s27 + $0x624] ss:$48 sps:$4 sm:$0xff]  }
 0xd7b   : > { %8536 = vmatprep.subr.bf16.mxu1 %v14089_v19  ;;  %v14161_v19 = vld [vmem:[%s15733_s27 + $0x324] ss:$48 sps:$4 sm:$0xff]  }
 0xd7d   : > { %8467 = vmatpush2.bf16.msra.mxu0 %v14084_v9  ;;  %v14156_v9 = vld [vmem:[%s15733_s27 + $0x620] ss:$48 sps:$4 sm:$0xff]  }
 0xd7e   : > { %8537 = vmatpush1.bf16.msra.mxu1 %v14087_v55  ;;  %8468 = vmatprep.subr.bf16.mxu0 %v14092_v18  ;;  %v14159_v55 = vld [vmem:[%s15733_s27 + $0x320] ss:$48 sps:$4 sm:$0xff]   ;;  %v14164_v18 = vld [vmem:[%s15733_s27 + $0x2cc] ss:$48 sps:$4 sm:$0xff]  }
 0xd7f   : > { %8538 = vmatprep.subr.bf16.mxu1 %v14095_v53  ;;  %v14167_v53 = vld [vmem:[%s15733_s27 + $0x8cc] ss:$48 sps:$4 sm:$0xff]  }
 0xd81   : > { %8469 = vmatpush2.bf16.msra.mxu0 %v14090_v42  ;;  %v17404_v42 = vld [vmem:[%s15736_s1] sm:$0xff] }
 0xd82   : > { %8539 = vmatpush1.bf16.msra.mxu1 %v14093_v62  ;;  %8470 = vmatprep.subr.bf16.mxu0 %v14098_v38  ;;  %v14162_v62 = vld [vmem:[%s15733_s27 + $0x2c8] ss:$48 sps:$4 sm:$0xff]  }
 0xd83   : > { %8540 = vmatprep.subr.bf16.mxu1 %v14101_v7  ;;  %v14165_v38 = vld [vmem:[%s15733_s27 + $0x8c8] ss:$48 sps:$4 sm:$0xff]   ;;  %v6689_v7 = vrot.slane %v17404_v42, %v15856_v34 }
 0xd85   : > { %8471 = vmatpush2.bf16.msra.mxu0 %v14096_v47  ;;  %v14170_v47 = vld [vmem:[%s15733_s27 + $0x26c] ss:$48 sps:$4 sm:$0xff]  }
 0xd86   : > { %8541 = vmatpush1.bf16.msra.mxu1 %v14099_v50  ;;  %8472 = vmatprep.subr.bf16.mxu0 %v14104_v36  ;;  %v14173_v50 = vld [vmem:[%s15733_s27 + $0x86c] ss:$48 sps:$4 sm:$0xff]  }
 0xd87   : > { %8542 = vmatprep.subr.bf16.mxu1 %v14107_v54  ;;  %v6693_v54 = vrot.slane %v17404_v42, %v15848_v31 }
 0xd89   : > { %8473 = vmatpush2.bf16.msra.mxu0 %v14102_v21 }
 0xd8a   : > { %8543 = vmatpush1.bf16.msra.mxu1 %v14105_v40  ;;  %8474 = vmatprep.subr.bf16.mxu0 %v14110_v27  ;;  %v14168_v40 = vld [vmem:[%s15733_s27 + $0x268] ss:$48 sps:$4 sm:$0xff]  }
 0xd8b   : > { %8544 = vmatprep.subr.bf16.mxu1 %v14113_v35 }
 0xd8d   : > { %8475 = vmatpush2.bf16.msra.mxu0 %v14108_v6  ;;  %v14171_v6 = vld [vmem:[%s15733_s27 + $0x868] ss:$48 sps:$4 sm:$0xff]  }
 0xd8e   : > { %8545 = vmatpush1.bf16.msra.mxu1 %v14111_v58  ;;  %8573 = vmatprep.subr.bf16.mxu0 %v14116_v49  ;;  %v14176_v58 = vld [vmem:[%s15733_s27 + $0x20c] ss:$48 sps:$4 sm:$0xff]  }
 0xd8f   : > { %8546 = vmatprep.subr.bf16.mxu1 %v14119_v39  ;;  %v14179_v39 = vld [vmem:[%s15733_s27 + $0x80c] ss:$48 sps:$4 sm:$0xff]  }
 0xd90   : > { %8477 = vmatmul.mubr.bf16.vlgmr.msra.gmra.mxu0 %v17194_v57 }
 0xd91   : > { %8574 = vmatpush1.bf16.msra.mxu0 %v14114_v37  ;;  %8605 = vmatprep.mubr.bf16.mxu0 %v15194_v15 }
 0xd92   : > { %8547 = vmatpush2.bf16.msra.mxu1 %v14117_v20  ;;  %8575 = vmatprep.subr.bf16.mxu0 %v14122_v8 }
 0xd93   : > { %8548 = vmatprep.subr.bf16.mxu1 %v14125_v12 }
 0xd95   : > { %8576 = vmatpush1.bf16.msra.mxu0 %v14120_v2 }
 0xd96   : > { %8549 = vmatpush2.bf16.msra.mxu1 %v14123_v56  ;;  %8577 = vmatprep.subr.bf16.mxu0 %v14128_v33 }
 0xd97   : > { %8550 = vmatprep.subr.bf16.mxu1 %v14131_v61  ;;  %v14177_v61 = vld [vmem:[%s15733_s27 + $0x808] ss:$48 sps:$4 sm:$0xff]  }
 0xd99   : > { %8578 = vmatpush1.bf16.msra.mxu0 %v14126_v1  ;;  %v14182_v1 = vld [vmem:[%s15733_s27 + $0x1ac] ss:$48 sps:$4 sm:$0xff]  }
 0xd9a   : > { %8551 = vmatpush2.bf16.msra.mxu1 %v14129_v26  ;;  %8579 = vmatprep.subr.bf16.mxu0 %v14134_v52  ;;  %v14185_v52 = vld [vmem:[%s15733_s27 + $0x7ac] ss:$48 sps:$4 sm:$0xff]  }
 0xd9b   : > { %8552 = vmatprep.subr.bf16.mxu1 %v14137_v28 }
 0xd9d   : > { %8580 = vmatpush1.bf16.msra.mxu0 %v14132_v63 }
 0xd9e   : > { %8553 = vmatpush2.bf16.msra.mxu1 %v14135_v60  ;;  %8581 = vmatprep.subr.bf16.mxu0 %v14140_v16  ;;  %v14180_v60 = vld [vmem:[%s15733_s27 + $0x1a8] ss:$48 sps:$4 sm:$0xff]  }
 0xd9f   : > { %8554 = vmatprep.subr.bf16.mxu1 %v14143_v11 }
 0xda1   : > { %8582 = vmatpush1.bf16.msra.mxu0 %v14138_v17  ;;  %v14183_v17 = vld [vmem:[%s15733_s27 + $0x7a8] ss:$48 sps:$4 sm:$0xff]  }
 0xda2   : > { %8555 = vmatpush2.bf16.msra.mxu1 %v14141_v3  ;;  %8583 = vmatprep.subr.bf16.mxu0 %v14146_v24  ;;  %v14188_v3 = vld [vmem:[%s15733_s27 + $0x14c] ss:$48 sps:$4 sm:$0xff]  }
 0xda3   : > { %8556 = vmatprep.subr.bf16.mxu1 %v14149_v10  ;;  %v14191_v10 = vld [vmem:[%s15733_s27 + $0x74c] ss:$48 sps:$4 sm:$0xff]  }
 0xda5   : > { %8584 = vmatpush1.bf16.msra.mxu0 %v14144_v25 }
 0xda6   : > { %8557 = vmatpush2.bf16.msra.mxu1 %v14147_v23  ;;  %8585 = vmatprep.subr.bf16.mxu0 %v14152_v41  ;;  %v14186_v23 = vld [vmem:[%s15733_s27 + $0x148] ss:$48 sps:$4 sm:$0xff]  }
 0xda7   : > { %8558 = vmatprep.subr.bf16.mxu1 %v14155_v51  ;;  %v14189_v41 = vld [vmem:[%s15733_s27 + $0x748] ss:$48 sps:$4 sm:$0xff]   ;;  %v14194_v51 = vld [vmem:[%s15733_s27 + $0xec] ss:$48 sps:$4 sm:$0xff]  }
 0xda9   : > { %8586 = vmatpush1.bf16.msra.mxu0 %v14150_v5  ;;  %v14197_v5 = vld [vmem:[%s15733_s27 + $0x6ec] ss:$48 sps:$4 sm:$0xff]  }
 0xdaa   : > { %8559 = vmatpush2.bf16.msra.mxu1 %v14153_v14  ;;  %8587 = vmatprep.subr.bf16.mxu0 %v14158_v0  ;;  %v14192_v14 = vld [vmem:[%s15733_s27 + $0xe8] ss:$48 sps:$4 sm:$0xff]  }
 0xdab   : > { %8560 = vmatprep.subr.bf16.mxu1 %v14161_v19  ;;  %v14195_v0 = vld [vmem:[%s15733_s27 + $0x6e8] ss:$48 sps:$4 sm:$0xff]   ;;  %v14200_v19 = vld [vmem:[%s15733_s27 + $0x8c] ss:$48 sps:$4 sm:$0xff]  }
 0xdad   : > { %8588 = vmatpush1.bf16.msra.mxu0 %v14156_v9  ;;  %v14203_v9 = vld [vmem:[%s15733_s27 + $0x68c] ss:$48 sps:$4 sm:$0xff]  }
 0xdae   : > { %8561 = vmatpush2.bf16.msra.mxu1 %v14159_v55  ;;  %8616 = vmatprep.subr.bf16.mxu0 %v14164_v18  ;;  %v14198_v18 = vld [vmem:[%s15733_s27 + $0x88] ss:$48 sps:$4 sm:$0xff]  }
 0xdaf   : > { %8659 = vmatprep.subr.bf16.mxu1 %v14167_v53  ;;  %v14201_v53 = vld [vmem:[%s15733_s27 + $0x688] ss:$48 sps:$4 sm:$0xff]  }
 0xdb0   : > { %8606 = vmatmul.mubr.bf16.vlgmr.msra.gmra.mxu0 %v17191_v46  ;;  %v8263_v36 = vpop.f32.mrf.mxu0 }
 0xdb1   : > { %8563 = vmatmul.mubr.bf16.vlgmr.msra.gmra.mxu1 %v17194_v57  ;;  %8617 = vmatpush1.bf16.msra.mxu0 %v14162_v62  ;;  %v8220_v21 = vpop.f32.mrf.mxu1  ;;  %v14206_v62 = vld [vmem:[%s15733_s27 + $0x2c] ss:$48 sps:$4 sm:$0xff]  }
 0xdb2   : > { %8648 = vmatprep.mubr.bf16.mxu0 %v17189_v4  ;;  %v8221_v27 = vadd.f32 %v8220_v21, %v6689_v7  ;;  %8660 = vmatpush1.bf16.msra.mxu1 %v14165_v38  ;;  %v8265_v35 = vpop.f32.mrf.mxu0  ;;  %v14174_v4 = vld [vmem:[%s15733_s27 + $0x208] ss:$48 sps:$4 sm:$0xff]   ;;  %v14209_v38 = vld [vmem:[%s15733_s27 + $0x62c] ss:$48 sps:$4 sm:$0xff]  }
 0xdb3   : > { %v8222_v49 = vpop.f32.mrf.mxu1  ;;  %8618 = vmatprep.subr.bf16.mxu0 %v14170_v47  ;;  %8661 = vmatprep.subr.bf16.mxu1 %v14173_v50 }
 0xdb4   : > { %v17421_v37 = vadd.f32 %v8263_v36, %v8221_v27  ;;  %v8223_v20 = vadd.f32 %v8222_v49, %v6693_v54  ;;  %8691 = vmatprep.mubr.bf16.mxu1 %v15194_v15  ;;  %v8267_v56 = vpop.f32.mrf.mxu0  ;;  %v14204_v36 = vld [vmem:[%s15733_s27 + $0x28] ss:$48 sps:$4 sm:$0xff]  }
 0xdb5   : > { %8619 = vmatpush1.bf16.msra.mxu0 %v14168_v40  ;;  %v8224_v8 = vpop.f32.mrf.mxu1 }
 0xdb6   : > { %v8726_v12 = vmul.f32 0.70710677, %v17421_v37  ;;  %v17426_v2 = vadd.f32 %v8265_v35, %v8223_v20  ;;  %v8225_v33 = vadd.f32 %v8224_v8, %v6689_v7  ;;  %8662 = vmatpush1.bf16.msra.mxu1 %v14171_v6  ;;  %8620 = vmatprep.subr.bf16.mxu0 %v14176_v58  ;;  %v8269_v11 = vpop.f32.mrf.mxu0  ;;  %v8702_v21 = vmul.f32 0.5, %v17421_v37  ;;  %v14212_v35 = vld [vmem:[%s15733_s27 + $0x5cc] ss:$48 sps:$4 sm:$0xff]  }
 0xdb7   : > { %v8226_v26 = vpop.f32.mrf.mxu1  ;;  %8663 = vmatprep.subr.bf16.mxu1 %v14179_v39  ;;  %v14215_v6 = vld [vmem:[%s15742_s4 + $0xac] ss:$12 sps:$4 sm:$0xff]   ;;  %v14210_v37 = vld [vmem:[%s15733_s27 + $0x5c8] ss:$48 sps:$4 sm:$0xff]  }
 0xdb8   : > { %14722 = verf.f32 %v8726_v12  ;;  %v8727_v15 = vmul.f32 0.70710677, %v17426_v2  ;;  %v8268_v28 = vadd.f32 %v8267_v56, %v8225_v33  ;;  %v8227_v63 = vadd.f32 %v8226_v26, %v6693_v54  ;;  %v14207_v54 = vld [vmem:[%s15733_s27 + $0x628] ss:$48 sps:$4 sm:$0xff]   ;;  %v14213_v33 = vld [vmem:[%s15742_s4 + $0xa8] ss:$12 sps:$4 sm:$0xff]  }
 0xdb9   : > { %8621 = vmatpush1.bf16.msra.mxu0 %v14174_v4  ;;  %v8703_v8 = vmul.f32 0.5, %v17426_v2 }
 0xdba   : > { %v8738_v16 = vmul.f32 0.70710677, %v8268_v28  ;;  %8664 = vmatpush1.bf16.msra.mxu1 %v14177_v61  ;;  %8622 = vmatprep.subr.bf16.mxu0 %v14182_v1  ;;  %14724 = verf.f32 %v8727_v15  ;;  %v8270_v24 = vadd.f32 %v8269_v11, %v8227_v63  ;;  %v8714_v40 = vmul.f32 0.5, %v8268_v28  ;;  %v14218_v61 = vld [vmem:[%s15733_s27 + $0x56c] ss:$48 sps:$4 sm:$0xff]  }
 0xdbb   : > { %8665 = vmatprep.subr.bf16.mxu1 %v14185_v52  ;;  %v14221_v52 = vld [vmem:[%s15742_s4 + $0x94] ss:$12 sps:$4 sm:$0xff]   ;;  %v14219_v28 = vld [vmem:[%s15742_s4 + $0x90] ss:$12 sps:$4 sm:$0xff]  }
 0xdbc   : > { %14726 = verf.f32 %v8738_v16  ;;  %v8739_v25 = vmul.f32 0.70710677, %v8270_v24  ;;  %v8715_v4 = vmul.f32 0.5, %v8270_v24  ;;  %v14216_v15 = vld [vmem:[%s15733_s27 + $0x568] ss:$48 sps:$4 sm:$0xff]  }
 0xdbd   : > { %8623 = vmatpush1.bf16.msra.mxu0 %v14180_v60  ;;  %v14224_v63 = vld [vmem:[%s15733_s27 + $0x50c] ss:$48 sps:$4 sm:$0xff]   ;;  %v14227_v60 = vld [vmem:[%s15742_s4 + $0x7c] ss:$12 sps:$4 sm:$0xff]   ;;  %v14222_v16 = vld [vmem:[%s15733_s27 + $0x508] ss:$48 sps:$4 sm:$0xff]  }
 0xdbe   : > { %8666 = vmatpush1.bf16.msra.mxu1 %v14183_v17  ;;  %8624 = vmatprep.subr.bf16.mxu0 %v14188_v3  ;;  %14728 = verf.f32 %v8739_v25  ;;  %v14230_v11 = vld [vmem:[%s15733_s27 + $0x4ac] ss:$48 sps:$4 sm:$0xff]   ;;  %v14228_v3 = vld [vmem:[%s15733_s27 + $0x4a8] ss:$48 sps:$4 sm:$0xff]   ;;  %v14239_v25 = vld [vmem:[%s15742_s4 + $0x4c] ss:$12 sps:$4 sm:$0xff]  }
 0xdbf   : > { %8667 = vmatprep.subr.bf16.mxu1 %v14191_v10  ;;  %v14233_v17 = vld [vmem:[%s15742_s4 + $0x64] ss:$12 sps:$4 sm:$0xff]   ;;  %v14231_v24 = vld [vmem:[%s15742_s4 + $0x60] ss:$12 sps:$4 sm:$0xff]  }
 0xdc0   : > { %v14236_v10 = vld [vmem:[%s15733_s27 + $0x44c] ss:$48 sps:$4 sm:$0xff]  }
 0xdc1   : > { %8625 = vmatpush1.bf16.msra.mxu0 %v14186_v23  ;;  %v14234_v23 = vld [vmem:[%s15733_s27 + $0x448] ss:$48 sps:$4 sm:$0xff]  }
 0xdc2   : > { %8668 = vmatpush1.bf16.msra.mxu1 %v14189_v41  ;;  %8626 = vmatprep.subr.bf16.mxu0 %v14194_v51  ;;  %v14237_v41 = vld [vmem:[%s15742_s4 + $0x48] ss:$12 sps:$4 sm:$0xff]  }
 0xdc3   : > { %8669 = vmatprep.subr.bf16.mxu1 %v14197_v5  ;;  %v14242_v51 = vld [vmem:[%s15733_s27 + $0x3ec] ss:$48 sps:$4 sm:$0xff]  }
 0xdc4   : > { %v14245_v5 = vld [vmem:[%s15742_s4 + $0x34] ss:$12 sps:$4 sm:$0xff]  }
 0xdc5   : > { %v14723_v55 = vpop.eup %14722  ;;  %8627 = vmatpush1.bf16.msra.mxu0 %v14192_v14  ;;  %v14240_v14 = vld [vmem:[%s15733_s27 + $0x3e8] ss:$48 sps:$4 sm:$0xff]  }
 0xdc6   : > { %8670 = vmatpush1.bf16.msra.mxu1 %v14195_v0  ;;  %8628 = vmatprep.subr.bf16.mxu0 %v14200_v19  ;;  %v8774_v47 = vadd.f32 1.0, %v14723_v55  ;;  %v14243_v0 = vld [vmem:[%s15742_s4 + $0x30] ss:$12 sps:$4 sm:$0xff]   ;;  %v14248_v19 = vld [vmem:[%s15733_s27 + $0x38c] ss:$48 sps:$4 sm:$0xff]  }
 0xdc7   : > { %8671 = vmatprep.subr.bf16.mxu1 %v14203_v9  ;;  %v14725_v7 = vpop.eup %14724  ;;  %v14251_v9 = vld [vmem:[%s15742_s4 + $0x1c] ss:$12 sps:$4 sm:$0xff]   ;;  %v14246_v55 = vld [vmem:[%s15733_s27 + $0x388] ss:$48 sps:$4 sm:$0xff]  }
 0xdc8   : > { %v8775_v58 = vadd.f32 1.0, %v14725_v7  ;;  %v8798_v39 = vmul.f32 %v8774_v47, %v8702_v21  ;;  %v14255_v7 = vld [vmem:[%s15742_s4] ss:$12 sps:$4 sm:$0xff]   ;;  %v14261_v21 = vld [vmem:[%s15742_s4 + $0x168] ss:$12 sps:$4 sm:$0xff]  }
 0xdc9   : > { %v14727_v50 = vpop.eup %14726  ;;  %8629 = vmatpush1.bf16.msra.mxu0 %v14198_v18  ;;  %v14249_v18 = vld [vmem:[%s15742_s4 + $0x18] ss:$12 sps:$4 sm:$0xff]  }
 0xdca   : > { %v8786_v27 = vadd.f32 1.0, %v14727_v50  ;;  %8672 = vmatpush1.bf16.msra.mxu1 %v14201_v53  ;;  %8630 = vmatprep.subr.bf16.mxu0 %v14206_v62  ;;  %v8799_v1 = vmul.f32 %v8775_v58, %v8703_v8  ;;  %v14254_v53 = vld [vmem:[%s15733_s27 + $0x32c] ss:$48 sps:$4 sm:$0xff]   ;;  %v14260_v47 = vld [vmem:[%s15742_s4 + $0x22c] ss:$12 sps:$4 sm:$0xff]  }
 0xdcb   : > { %8673 = vmatprep.subr.bf16.mxu1 %v14209_v38  ;;  %v14729_v49 = vpop.eup %14728  ;;  %v14257_v62 = vld [vmem:[%s15742_s4 + $0x4] ss:$12 sps:$4 sm:$0xff]   ;;  %v14263_v50 = vld [vmem:[%s15742_s4 + $0x16c] ss:$12 sps:$4 sm:$0xff]   ;;  %v14272_v8 = vld [vmem:[%s15742_s4 + $0x1fc] ss:$12 sps:$4 sm:$0xff]  }
 0xdcc   : > { %v8810_v20 = vmul.f32 %v8786_v27, %v8714_v40  ;;  %v8787_v12 = vadd.f32 1.0, %v14729_v49  ;;  %v14252_v38 = vld [vmem:[%s15733_s27 + $0x328] ss:$48 sps:$4 sm:$0xff]   ;;  %v6701_v27 = vrot.slane %v17404_v42, %v16093_v13 }
 0xdcd   : > { %8631 = vmatpush1.bf16.msra.mxu0 %v14204_v36  ;;  %v14266_v40 = vld [vmem:[%s15742_s4 + $0x214] ss:$12 sps:$4 sm:$0xff]   ;;  %v14264_v49 = vld [vmem:[%s15742_s4 + $0x210] ss:$12 sps:$4 sm:$0xff]  }
 0xdce   : > { %v17455_v56 = vpack.c.bf16 %v8810_v20, %v8798_v39  ;;  %8674 = vmatpush1.bf16.msra.mxu1 %v14207_v54  ;;  %8632 = vmatprep.subr.bf16.mxu0 %v14212_v35  ;;  %v8811_v26 = vmul.f32 %v8787_v12, %v8715_v4  ;;  %v14258_v54 = vld [vmem:[%s15742_s4 + $0x228] ss:$12 sps:$4 sm:$0xff]   ;;  %v14267_v20 = vld [vmem:[%s15742_s4 + $0x150] ss:$12 sps:$4 sm:$0xff]  }
 0xdcf   : > { %10771 = vmatprep.subr.bf16.mxu1 %v14215_v6  ;;  %v14269_v35 = vld [vmem:[%s15742_s4 + $0x154] ss:$12 sps:$4 sm:$0xff]  }
 0xdd0   : > { %v17461_v2 = vpack.c.bf16 %v8811_v26, %v8799_v1  ;;  %v14273_v26 = vld [vmem:[%s15742_s4 + $0x138] ss:$12 sps:$4 sm:$0xff]  }
 0xdd1   : > { %8633 = vmatpush2.bf16.msra.mxu0 %v14210_v37  ;;  %8692 = vmatmul.mubr.bf16.vlgmr.msra.gmra.mxu1 %v17191_v46  ;;  %v14225_v46 = vld [vmem:[%s15742_s4 + $0x78] ss:$12 sps:$4 sm:$0xff]   ;;  %v17492_v36 = vpop.f32.mrf.mxu1  ;;  %v14275_v37 = vld [vmem:[%s15742_s4 + $0x13c] ss:$12 sps:$4 sm:$0xff]  }
 0xdd2   : > { %10772 = vmatpush1.bf16.msra.mxu1 %v14213_v33  ;;  %8634 = vmatprep.subr.bf16.mxu0 %v14218_v61  ;;  %v14270_v61 = vld [vmem:[%s15742_s4 + $0x1f8] ss:$12 sps:$4 sm:$0xff]  }
 0xdd3   : > { %10803 = vmatprep.mubr.bf16.mxu1 %v17461_v2  ;;  %10773 = vmatprep.subr.bf16.mxu1 %v14221_v52  ;;  %v8351_v58 = vpop.f32.mrf.mxu1  ;;  %v14278_v52 = vld [vmem:[%s15742_s4 + $0x1e4] ss:$12 sps:$4 sm:$0xff]  }
 0xdd5   : > { %8635 = vmatpush2.bf16.msra.mxu0 %v14216_v15  ;;  %v17507_v33 = vpop.f32.mrf.mxu1 }
 0xdd6   : > { %10774 = vmatpush1.bf16.msra.mxu1 %v14219_v28  ;;  %8636 = vmatprep.subr.bf16.mxu0 %v14224_v63  ;;  %v14281_v28 = vld [vmem:[%s15742_s4 + $0x124] ss:$12 sps:$4 sm:$0xff]  }
 0xdd7   : > { %10775 = vmatprep.subr.bf16.mxu1 %v14227_v60  ;;  %v8355_v60 = vpop.f32.mrf.mxu1 }
 0xdd9   : > { %8637 = vmatpush2.bf16.msra.mxu0 %v14222_v16  ;;  %v14276_v16 = vld [vmem:[%s15742_s4 + $0x1e0] ss:$12 sps:$4 sm:$0xff]  }
 0xdda   : > { %10776 = vmatpush1.bf16.msra.mxu1 %v14225_v46  ;;  %8638 = vmatprep.subr.bf16.mxu0 %v14230_v11  ;;  %v14279_v11 = vld [vmem:[%s15742_s4 + $0x120] ss:$12 sps:$4 sm:$0xff]  }
 0xddb   : > { %10777 = vmatprep.subr.bf16.mxu1 %v14233_v17  ;;  %v14284_v17 = vld [vmem:[%s15742_s4 + $0x1cc] ss:$12 sps:$4 sm:$0xff]  }
 0xddd   : > { %8639 = vmatpush2.bf16.msra.mxu0 %v14228_v3  ;;  %v14287_v3 = vld [vmem:[%s15742_s4 + $0x10c] ss:$12 sps:$4 sm:$0xff]  }
 0xdde   : > { %10778 = vmatpush1.bf16.msra.mxu1 %v14231_v24  ;;  %8640 = vmatprep.subr.bf16.mxu0 %v14236_v10  ;;  %v14282_v10 = vld [vmem:[%s15742_s4 + $0x1c8] ss:$12 sps:$4 sm:$0xff]  }
 0xddf   : > { %10779 = vmatprep.subr.bf16.mxu1 %v14239_v25  ;;  %v14285_v25 = vld [vmem:[%s15742_s4 + $0x108] ss:$12 sps:$4 sm:$0xff]  }
 0xde1   : > { %8641 = vmatpush2.bf16.msra.mxu0 %v14234_v23  ;;  %v14290_v23 = vld [vmem:[%s15742_s4 + $0x1b4] ss:$12 sps:$4 sm:$0xff]  }
 0xde2   : > { %10780 = vmatpush1.bf16.msra.mxu1 %v14237_v41  ;;  %8642 = vmatprep.subr.bf16.mxu0 %v14242_v51  ;;  %v14293_v41 = vld [vmem:[%s15742_s4 + $0xf4] ss:$12 sps:$4 sm:$0xff]   ;;  %v14288_v51 = vld [vmem:[%s15742_s4 + $0x1b0] ss:$12 sps:$4 sm:$0xff]  }
 0xde3   : > { %10781 = vmatprep.subr.bf16.mxu1 %v14245_v5  ;;  %v14291_v5 = vld [vmem:[%s15742_s4 + $0xf0] ss:$12 sps:$4 sm:$0xff]  }
 0xde5   : > { %8643 = vmatpush2.bf16.msra.mxu0 %v14240_v14  ;;  %v14296_v14 = vld [vmem:[%s15742_s4 + $0x19c] ss:$12 sps:$4 sm:$0xff]  }
 0xde6   : > { %10782 = vmatpush1.bf16.msra.mxu1 %v14243_v0  ;;  %8644 = vmatprep.subr.bf16.mxu0 %v14248_v19  ;;  %v14299_v0 = vld [vmem:[%s15742_s4 + $0xdc] ss:$12 sps:$4 sm:$0xff]   ;;  %v14294_v19 = vld [vmem:[%s15742_s4 + $0x198] ss:$12 sps:$4 sm:$0xff]  }
 0xde7   : > { %10783 = vmatprep.subr.bf16.mxu1 %v14251_v9  ;;  %v14297_v9 = vld [vmem:[%s15742_s4 + $0xd8] ss:$12 sps:$4 sm:$0xff]  }
 0xde9   : > { %8645 = vmatpush2.bf16.msra.mxu0 %v14246_v55  ;;  %v14302_v55 = vld [vmem:[%s15742_s4 + $0x184] ss:$12 sps:$4 sm:$0xff]  }
 0xdea   : > { %10784 = vmatpush1.bf16.msra.mxu1 %v14249_v18  ;;  %8646 = vmatprep.subr.bf16.mxu0 %v14254_v53  ;;  %v14305_v53 = vld [vmem:[%s15742_s4 + $0xc4] ss:$12 sps:$4 sm:$0xff]  }
 0xdeb   : > { %10785 = vmatprep.subr.bf16.mxu1 %v14257_v62  ;;  %v6697_v62 = vrot.slane %v17404_v42, %v15851_v32 }
 0xded   : > { %8647 = vmatpush2.bf16.msra.mxu0 %v14252_v38  ;;  %v14300_v38 = vld [vmem:[%s15742_s4 + $0x180] ss:$12 sps:$4 sm:$0xff]  }
 0xdee   : > { %10786 = vmatpush1.bf16.msra.mxu1 %v14255_v7  ;;  %10814 = vmatprep.subr.bf16.mxu0 %v14260_v47  ;;  %v14303_v47 = vld [vmem:[%s15742_s4 + $0xc0] ss:$12 sps:$4 sm:$0xff]  }
 0xdef   : > { %10787 = vmatprep.subr.bf16.mxu1 %v14263_v50  ;;  %v14308_v50 = vld [vmem:[%s15742_s4 + $0x2ec] ss:$12 sps:$4 sm:$0xff]  }
 0xdf0   : > { %v17500_v6 = vpop.f32.mrf.mxu0  ;;  %8649 = vmatmul.mubr.bf16.vlgmr.msra.gmra.mxu0 %v17194_v57 }
 0xdf1   : > { %10815 = vmatpush1.bf16.msra.mxu0 %v14258_v54 }
 0xdf2   : > { %v8308_v39 = vpop.f32.mrf.mxu0  ;;  %10788 = vmatpush2.bf16.msra.mxu1 %v14261_v21  ;;  %10816 = vmatprep.subr.bf16.mxu0 %v14266_v40  ;;  %v14311_v40 = vld [vmem:[%s15742_s4 + $0x3ac] ss:$12 sps:$4 sm:$0xff]  }
 0xdf3   : > { %v8309_v4 = vadd.f32 %v8308_v39, %v6701_v27  ;;  %10789 = vmatprep.subr.bf16.mxu1 %v14269_v35  ;;  %v14306_v39 = vld [vmem:[%s15742_s4 + $0x2e8] ss:$12 sps:$4 sm:$0xff]  }
 0xdf4   : > { %v8310_v12 = vpop.f32.mrf.mxu0 }
 0xdf5   : > { %v17509_v57 = vadd.f32 %v8351_v58, %v8309_v4  ;;  %10817 = vmatpush1.bf16.msra.mxu0 %v14264_v49  ;;  %v8311_v7 = vadd.f32 %v8310_v12, %v6697_v62  ;;  %v14314_v12 = vld [vmem:[%s15742_s4 + $0x2d4] ss:$12 sps:$4 sm:$0xff]  }
 0xdf6   : > { %v8312_v1 = vpop.f32.mrf.mxu0  ;;  %10790 = vmatpush2.bf16.msra.mxu1 %v14267_v20  ;;  %10818 = vmatprep.subr.bf16.mxu0 %v14272_v8 }
 0xdf7   : > { %v8729_v15 = vmul.f32 0.70710677, %v17509_v57  ;;  %10791 = vmatprep.subr.bf16.mxu1 %v14275_v37  ;;  %v8313_v63 = vadd.f32 %v8312_v1, %v6701_v27  ;;  %v8307_v27 = vadd.f32 %v17500_v6, %v6697_v62  ;;  %v8705_v35 = vmul.f32 0.5, %v17509_v57  ;;  %v14309_v37 = vld [vmem:[%s15742_s4 + $0x3a8] ss:$12 sps:$4 sm:$0xff]  }
 0xdf8   : > { %v17542_v20 = vadd.f32 %v17507_v33, %v8311_v7  ;;  %v14317_v6 = vld [vmem:[%s15742_s4 + $0x394] ss:$12 sps:$4 sm:$0xff]   ;;  %v6709_v33 = vrot.slane %v17404_v42, %v1290_v44  ;;  %v14323_v44 = vld [vmem:[%s15742_s4 + $0x37c] ss:$12 sps:$4 sm:$0xff]  }
 0xdf9   : > { %10819 = vmatpush1.bf16.msra.mxu0 %v14270_v61  ;;  %14730 = verf.f32 %v8729_v15  ;;  %v8356_v46 = vadd.f32 %v8355_v60, %v8313_v63  ;;  %v17548_v57 = vadd.f32 %v17492_v36, %v8307_v27  ;;  %v14320_v63 = vld [vmem:[%s15742_s4 + $0x2bc] ss:$12 sps:$4 sm:$0xff]   ;;  %v14338_v7 = vld [vmem:[%s15742_s4 + $0x274] ss:$12 sps:$4 sm:$0xff]  }
 0xdfa   : > { %10792 = vmatpush2.bf16.msra.mxu1 %v14273_v26  ;;  %10820 = vmatprep.subr.bf16.mxu0 %v14278_v52  ;;  %v14312_v52 = vld [vmem:[%s15742_s4 + $0x2d0] ss:$12 sps:$4 sm:$0xff]   ;;  %v8740_v15 = vmul.f32 0.70710677, %v17542_v20  ;;  %v14330_v62 = vld [vmem:[%s15742_s4 + $0x288] ss:$12 sps:$4 sm:$0xff]  }
 0xdfb   : > { %10793 = vmatprep.subr.bf16.mxu1 %v14281_v28  ;;  %v8741_v24 = vmul.f32 0.70710677, %v8356_v46  ;;  %v8717_v58 = vmul.f32 0.5, %v8356_v46  ;;  %v14315_v28 = vld [vmem:[%s15742_s4 + $0x390] ss:$12 sps:$4 sm:$0xff]  }
 0xdfc   : > { %v14347_v27 = vld [vmem:[%s15742_s4 + $0x31c] ss:$12 sps:$4 sm:$0xff]  }
 0xdfd   : > { %10821 = vmatpush1.bf16.msra.mxu0 %v14276_v16  ;;  %14732 = verf.f32 %v8741_v24  ;;  %v8728_v16 = vmul.f32 0.70710677, %v17548_v57 }
 0xdfe   : > { %10794 = vmatpush2.bf16.msra.mxu1 %v14279_v11  ;;  %10822 = vmatprep.subr.bf16.mxu0 %v14284_v17  ;;  %v14318_v17 = vld [vmem:[%s15742_s4 + $0x2b8] ss:$12 sps:$4 sm:$0xff]   ;;  %14734 = verf.f32 %v8740_v15  ;;  %v14348_v15 = vld [vmem:[%s15742_s4 + $0x240] ss:$12 sps:$4 sm:$0xff]  }
 0xdff   : > { %10795 = vmatprep.subr.bf16.mxu1 %v14287_v3  ;;  %14736 = verf.f32 %v8728_v16 }
 0xe01   : > { %10823 = vmatpush1.bf16.msra.mxu0 %v14282_v10  ;;  %v14321_v10 = vld [vmem:[%s15742_s4 + $0x378] ss:$12 sps:$4 sm:$0xff]  }
 0xe02   : > { %10796 = vmatpush2.bf16.msra.mxu1 %v14285_v25  ;;  %10824 = vmatprep.subr.bf16.mxu0 %v14290_v23  ;;  %v14326_v25 = vld [vmem:[%s15742_s4 + $0x2a4] ss:$12 sps:$4 sm:$0xff]  }
 0xe03   : > { %10797 = vmatprep.subr.bf16.mxu1 %v14293_v41  ;;  %v14329_v41 = vld [vmem:[%s15742_s4 + $0x364] ss:$12 sps:$4 sm:$0xff]  }
 0xe05   : > { %10825 = vmatpush1.bf16.msra.mxu0 %v14288_v51 }
 0xe06   : > { %10798 = vmatpush2.bf16.msra.mxu1 %v14291_v5  ;;  %10826 = vmatprep.subr.bf16.mxu0 %v14296_v14  ;;  %v14731_v18 = vpop.eup %14730  ;;  %v14324_v14 = vld [vmem:[%s15742_s4 + $0x2a0] ss:$12 sps:$4 sm:$0xff]  }
 0xe07   : > { %10799 = vmatprep.subr.bf16.mxu1 %v14299_v0  ;;  %v8777_v54 = vadd.f32 1.0, %v14731_v18  ;;  %v14335_v18 = vld [vmem:[%s15742_s4 + $0x34c] ss:$12 sps:$4 sm:$0xff]  }
 0xe09   : > { %10827 = vmatpush1.bf16.msra.mxu0 %v14294_v19  ;;  %v8801_v8 = vmul.f32 %v8777_v54, %v8705_v35  ;;  %v14327_v19 = vld [vmem:[%s15742_s4 + $0x360] ss:$12 sps:$4 sm:$0xff]   ;;  %v14339_v54 = vld [vmem:[%s15742_s4 + $0x330] ss:$12 sps:$4 sm:$0xff]  }
 0xe0a   : > { %10800 = vmatpush2.bf16.msra.mxu1 %v14297_v9  ;;  %10828 = vmatprep.subr.bf16.mxu0 %v14302_v55  ;;  %v14733_v21 = vpop.eup %14732  ;;  %v14332_v9 = vld [vmem:[%s15742_s4 + $0x28c] ss:$12 sps:$4 sm:$0xff]  }
 0xe0b   : > { %10801 = vmatprep.subr.bf16.mxu1 %v14305_v53  ;;  %v8789_v49 = vadd.f32 1.0, %v14733_v21  ;;  %v14344_v21 = vld [vmem:[%s15742_s4 + $0x25c] ss:$12 sps:$4 sm:$0xff]  }
 0xe0d   : > { %10829 = vmatpush1.bf16.msra.mxu0 %v14300_v38  ;;  %v8813_v4 = vmul.f32 %v8789_v49, %v8717_v58  ;;  %v14333_v38 = vld [vmem:[%s15742_s4 + $0x348] ss:$12 sps:$4 sm:$0xff]   ;;  %v14342_v58 = vld [vmem:[%s15742_s4 + $0x258] ss:$12 sps:$4 sm:$0xff]  }
 0xe0e   : > { %10802 = vmatpush2.bf16.msra.mxu1 %v14303_v47  ;;  %10830 = vmatprep.subr.bf16.mxu0 %v14308_v50  ;;  %v14341_v47 = vld [vmem:[%s15742_s4 + $0x334] ss:$12 sps:$4 sm:$0xff]   ;;  %v14336_v50 = vld [vmem:[%s15742_s4 + $0x270] ss:$12 sps:$4 sm:$0xff]  }
 0xe0f   : > { %10857 = vmatprep.subr.bf16.mxu1 %v14311_v40  ;;  %v17552_v1 = vpack.c.bf16 %v8813_v4, %v8801_v8  ;;  %v14735_v40 = vpop.eup %14734  ;;  %v14350_v8 = vld [vmem:[%s15742_s4 + $0x244] ss:$12 sps:$4 sm:$0xff]  }
 0xe10   : > { %v17550_v61 = vpop.f32.mrf.mxu0  ;;  %v14737_v35 = vpop.eup %14736  ;;  %v8788_v49 = vadd.f32 1.0, %v14735_v40  ;;  %v14353_v4 = vld [vmem:[%s15742_s4 + $0x304] ss:$12 sps:$4 sm:$0xff]   ;;  %v14383_v40 = vld [vmem:[%s15742_s4 + $0x4cc] ss:$12 sps:$4 sm:$0xff]  }
 0xe11   : > { %v17557_v26 = vpop.f32.mrf.mxu1  ;;  %10804 = vmatmul.mubr.bf16.vlgmr.msra.gmra.mxu1 %v17455_v56  ;;  %10831 = vmatpush2.bf16.msra.mxu0 %v14306_v39  ;;  %v14345_v39 = vld [vmem:[%s15742_s4 + $0x318] ss:$12 sps:$4 sm:$0xff]  }
 0xe12   : > { %10846 = vmatprep.mubr.bf16.mxu0 %v17552_v1  ;;  %v8437_v36 = vpop.f32.mrf.mxu0  ;;  %10858 = vmatpush1.bf16.msra.mxu1 %v14309_v37 }
 0xe13   : > { %v8394_v60 = vpop.f32.mrf.mxu1  ;;  %10832 = vmatprep.subr.bf16.mxu0 %v14314_v12  ;;  %10859 = vmatprep.subr.bf16.mxu1 %v14317_v6  ;;  %v8776_v12 = vadd.f32 1.0, %v14737_v35  ;;  %v8716_v6 = vmul.f32 0.5, %v17542_v20  ;;  %v14356_v20 = vld [vmem:[%s15742_s4 + $0x46c] ss:$12 sps:$4 sm:$0xff]   ;;  %v14381_v35 = vld [vmem:[%s15742_s4 + $0x4c8] ss:$12 sps:$4 sm:$0xff]  }
 0xe14   : > { %v8395_v46 = vadd.f32 %v8394_v60, %v6709_v33  ;;  %v17572_v24 = vpop.f32.mrf.mxu0  ;;  %v14359_v60 = vld [vmem:[%s15742_s4 + $0x52c] ss:$12 sps:$4 sm:$0xff]  }
 0xe15   : > { %v17567_v11 = vpop.f32.mrf.mxu1  ;;  %10833 = vmatpush2.bf16.msra.mxu0 %v14312_v52 }
 0xe16   : > { %v17570_v3 = vadd.f32 %v8437_v36, %v8395_v46  ;;  %10860 = vmatpush1.bf16.msra.mxu1 %v14315_v28  ;;  %10834 = vmatprep.subr.bf16.mxu0 %v14320_v63  ;;  %v8441_v0 = vpop.f32.mrf.mxu0  ;;  %v8704_v36 = vmul.f32 0.5, %v17548_v57  ;;  %v8812_v28 = vmul.f32 %v8788_v49, %v8716_v6  ;;  %v14351_v63 = vld [vmem:[%s15742_s4 + $0x300] ss:$12 sps:$4 sm:$0xff]  }
 0xe17   : > { %v8398_v23 = vpop.f32.mrf.mxu1  ;;  %10861 = vmatprep.subr.bf16.mxu1 %v14323_v44  ;;  %v14389_v49 = vld [vmem:[%s15742_s4 + $0x4b4] ss:$12 sps:$4 sm:$0xff]  }
 0xe18   : > { %v8731_v51 = vmul.f32 0.70710677, %v17570_v3  ;;  %v8399_v5 = vadd.f32 %v8398_v23, %v6709_v33  ;;  %v18045_v33 = vsub.s32 4, %v15845_v30  ;;  %v8707_v57 = vmul.f32 0.5, %v17570_v3 }
 0xe19   : > { %10835 = vmatpush2.bf16.msra.mxu0 %v14318_v17  ;;  %v8800_v17 = vmul.f32 %v8776_v12, %v8704_v36  ;;  %v14392_v12 = vld [vmem:[%s15742_s4 + $0x3dc] ss:$12 sps:$4 sm:$0xff]   ;;  %v14401_v36 = vld [vmem:[%s15742_s4 + $0x484] ss:$12 sps:$4 sm:$0xff]  }
 0xe1a   : > { %10862 = vmatpush1.bf16.msra.mxu1 %v14321_v10  ;;  %10836 = vmatprep.subr.bf16.mxu0 %v14326_v25  ;;  %14738 = verf.f32 %v8731_v51  ;;  %v8442_v55 = vadd.f32 %v8441_v0, %v8399_v5  ;;  %v6705_v52 = vrot.slane %v17404_v42, %v18045_v33  ;;  %v14365_v5 = vld [vmem:[%s15742_s4 + $0x514] ss:$12 sps:$4 sm:$0xff]   ;;  %v14393_v33 = vld [vmem:[%s15742_s4 + $0x498] ss:$12 sps:$4 sm:$0xff]  }
 0xe1b   : > { %10863 = vmatprep.subr.bf16.mxu1 %v14329_v41  ;;  %v14357_v41 = vld [vmem:[%s15742_s4 + $0x528] ss:$12 sps:$4 sm:$0xff]   ;;  %v17607_v51 = vpack.c.bf16 %v8812_v28, %v8800_v17 }
 0xe1c   : > { %v8743_v53 = vmul.f32 0.70710677, %v8442_v55  ;;  %v8397_v44 = vadd.f32 %v17567_v11, %v6705_v52  ;;  %v8393_v10 = vadd.f32 %v17557_v26, %v6705_v52  ;;  %v8719_v25 = vmul.f32 0.5, %v8442_v55  ;;  %v14354_v11 = vld [vmem:[%s15742_s4 + $0x468] ss:$12 sps:$4 sm:$0xff]  }
 0xe1d   : > { %10837 = vmatpush2.bf16.msra.mxu0 %v14324_v14  ;;  %v14362_v0 = vld [vmem:[%s15742_s4 + $0x454] ss:$12 sps:$4 sm:$0xff]   ;;  %v14363_v55 = vld [vmem:[%s15742_s4 + $0x510] ss:$12 sps:$4 sm:$0xff]  }
 0xe1e   : > { %10864 = vmatpush1.bf16.msra.mxu1 %v14327_v19  ;;  %10838 = vmatprep.subr.bf16.mxu0 %v14332_v9  ;;  %14740 = verf.f32 %v8743_v53  ;;  %v17612_v14 = vadd.f32 %v17572_v24, %v8397_v44  ;;  %v17617_v19 = vadd.f32 %v17550_v61, %v8393_v10  ;;  %v14360_v24 = vld [vmem:[%s15742_s4 + $0x450] ss:$12 sps:$4 sm:$0xff]  }
 0xe1f   : > { %10865 = vmatprep.subr.bf16.mxu1 %v14335_v18  ;;  %v14371_v18 = vld [vmem:[%s15742_s4 + $0x4fc] ss:$12 sps:$4 sm:$0xff]  }
 0xe20   : > { %v8742_v53 = vmul.f32 0.70710677, %v17612_v14  ;;  %v14368_v61 = vld [vmem:[%s15742_s4 + $0x43c] ss:$12 sps:$4 sm:$0xff]   ;;  %v8718_v44 = vmul.f32 0.5, %v17612_v14  ;;  %v8706_v17 = vmul.f32 0.5, %v17617_v19 }
 0xe21   : > { %10839 = vmatpush2.bf16.msra.mxu0 %v14330_v62  ;;  %v8730_v62 = vmul.f32 0.70710677, %v17617_v19  ;;  %v14405_v14 = vld [vmem:[%s15742_s4 + $0x6a8] ss:$12 sps:$4 sm:$0xff]  }
 0xe22   : > { %10866 = vmatpush1.bf16.msra.mxu1 %v14333_v38  ;;  %10840 = vmatprep.subr.bf16.mxu0 %v14338_v7  ;;  %v14369_v38 = vld [vmem:[%s15742_s4 + $0x4f8] ss:$12 sps:$4 sm:$0xff]   ;;  %14742 = verf.f32 %v8742_v53 }
 0xe23   : > { %10867 = vmatprep.subr.bf16.mxu1 %v14341_v47  ;;  %v14366_v7 = vld [vmem:[%s15742_s4 + $0x438] ss:$12 sps:$4 sm:$0xff]   ;;  %14744 = verf.f32 %v8730_v62 }
 0xe24   : > { %v14377_v47 = vld [vmem:[%s15742_s4 + $0x4e4] ss:$12 sps:$4 sm:$0xff]  }
 0xe25   : > { %10841 = vmatpush2.bf16.msra.mxu0 %v14336_v50  ;;  %v14374_v50 = vld [vmem:[%s15742_s4 + $0x424] ss:$12 sps:$4 sm:$0xff]  }
 0xe26   : > { %10868 = vmatpush1.bf16.msra.mxu1 %v14339_v54  ;;  %10842 = vmatprep.subr.bf16.mxu0 %v14344_v21  ;;  %v14375_v54 = vld [vmem:[%s15742_s4 + $0x4e0] ss:$12 sps:$4 sm:$0xff]  }
 0xe27   : > { %10869 = vmatprep.subr.bf16.mxu1 %v14347_v27  ;;  %v14739_v37 = vpop.eup %14738  ;;  %v14372_v21 = vld [vmem:[%s15742_s4 + $0x420] ss:$12 sps:$4 sm:$0xff]  }
 0xe28   : > { %v8779_v16 = vadd.f32 1.0, %v14739_v37  ;;  %v14380_v27 = vld [vmem:[%s15742_s4 + $0x40c] ss:$12 sps:$4 sm:$0xff]   ;;  %v14395_v37 = vld [vmem:[%s15742_s4 + $0x49c] ss:$12 sps:$4 sm:$0xff]  }
 0xe29   : > { %10843 = vmatpush2.bf16.msra.mxu0 %v14342_v58  ;;  %v14378_v58 = vld [vmem:[%s15742_s4 + $0x408] ss:$12 sps:$4 sm:$0xff]  }
 0xe2a   : > { %10870 = vmatpush1.bf16.msra.mxu1 %v14345_v39  ;;  %10844 = vmatprep.subr.bf16.mxu0 %v14350_v8  ;;  %v8803_v26 = vmul.f32 %v8779_v16, %v8707_v57  ;;  %v14386_v39 = vld [vmem:[%s15742_s4 + $0x3f4] ss:$12 sps:$4 sm:$0xff]   ;;  %v14387_v8 = vld [vmem:[%s15742_s4 + $0x4b0] ss:$12 sps:$4 sm:$0xff]   ;;  %v14407_v57 = vld [vmem:[%s15742_s4 + $0x6ac] ss:$12 sps:$4 sm:$0xff]  }
 0xe2b   : > { %10871 = vmatprep.subr.bf16.mxu1 %v14353_v4  ;;  %v14741_v46 = vpop.eup %14740  ;;  %v14384_v4 = vld [vmem:[%s15742_s4 + $0x3f0] ss:$12 sps:$4 sm:$0xff]   ;;  %v14396_v16 = vld [vmem:[%s15742_s4 + $0x3c0] ss:$12 sps:$4 sm:$0xff]  }
 0xe2c   : > { %v8791_v23 = vadd.f32 1.0, %v14741_v46  ;;  %v14404_v46 = vld [vmem:[%s15742_s4 + $0x5ec] ss:$12 sps:$4 sm:$0xff]  }
 0xe2d   : > { %10845 = vmatpush2.bf16.msra.mxu0 %v14348_v15  ;;  %v14390_v15 = vld [vmem:[%s15742_s4 + $0x3d8] ss:$12 sps:$4 sm:$0xff]  }
 0xe2e   : > { %10872 = vmatpush1.bf16.msra.mxu1 %v14351_v63  ;;  %10900 = vmatprep.subr.bf16.mxu0 %v14359_v60  ;;  %v8815_v3 = vmul.f32 %v8791_v23, %v8719_v25  ;;  %v14398_v63 = vld [vmem:[%s15742_s4 + $0x3c4] ss:$12 sps:$4 sm:$0xff]  }
 0xe2f   : > { %10873 = vmatprep.subr.bf16.mxu1 %v14356_v20  ;;  %v14743_v6 = vpop.eup %14742  ;;  %v14399_v20 = vld [vmem:[%s15742_s4 + $0x480] ss:$12 sps:$4 sm:$0xff]  }
 0xe30   : > { %10847 = vmatmul.mubr.bf16.vlgmr.msra.gmra.mxu0 %v17607_v51  ;;  %v17619_v9 = vpack.c.bf16 %v8815_v3, %v8803_v26  ;;  %v14745_v52 = vpop.eup %14744  ;;  %v8790_v28 = vadd.f32 1.0, %v14743_v6  ;;  %v14410_v26 = vld [vmem:[%s15742_s4 + $0x5d4] ss:$12 sps:$4 sm:$0xff]  }
 0xe31   : > { %10901 = vmatpush1.bf16.msra.mxu0 %v14357_v41  ;;  %v8778_v60 = vadd.f32 1.0, %v14745_v52  ;;  %v8521_v23 = vpop.f32.mrf.mxu1  ;;  %v18046_v41 = vsub.s32 6, %v15845_v30  ;;  %v14420_v52 = vld [vmem:[%s15742_s4 + $0x5a0] ss:$12 sps:$4 sm:$0xff]  }
 0xe32   : > { %10874 = vmatpush2.bf16.msra.mxu1 %v14354_v11  ;;  %10902 = vmatprep.subr.bf16.mxu0 %v14365_v5  ;;  %v8814_v10 = vmul.f32 %v8790_v28, %v8718_v44  ;;  %v14402_v5 = vld [vmem:[%s15742_s4 + $0x5e8] ss:$12 sps:$4 sm:$0xff]   ;;  %v14428_v28 = vld [vmem:[%s15742_s4 + $0x58c] ss:$12 sps:$4 sm:$0xff]  }
 0xe33   : > { %10889 = vmatprep.mubr.bf16.mxu1 %v17619_v9  ;;  %10875 = vmatprep.subr.bf16.mxu1 %v14362_v0  ;;  %v8802_v25 = vmul.f32 %v8778_v60, %v8706_v17  ;;  %v6713_v11 = vrot.slane %v17404_v42, %v18046_v41  ;;  %v18047_v0 = vsub.s32 7, %v15845_v30  ;;  %v14426_v44 = vld [vmem:[%s15742_s4 + $0x588] ss:$12 sps:$4 sm:$0xff]   ;;  %v14432_v17 = vld [vmem:[%s15742_s4 + $0x570] ss:$12 sps:$4 sm:$0xff]  }
 0xe35   : > { %10903 = vmatpush1.bf16.msra.mxu0 %v14363_v55  ;;  %v17660_v3 = vpack.c.bf16 %v8814_v10, %v8802_v25  ;;  %v6717_v19 = vrot.slane %v17404_v42, %v18047_v0  ;;  %v14413_v55 = vld [vmem:[%s15742_s4 + $0x694] ss:$12 sps:$4 sm:$0xff]   ;;  %v14435_v10 = vld [vmem:[%s15742_s4 + $0x630] ss:$12 sps:$4 sm:$0xff]  }
 0xe36   : > { %10876 = vmatpush2.bf16.msra.mxu1 %v14360_v24  ;;  %10904 = vmatprep.subr.bf16.mxu0 %v14371_v18  ;;  %v8523_v18 = vpop.f32.mrf.mxu1  ;;  %v14443_v25 = vld [vmem:[%s15742_s4 + $0x61c] ss:$12 sps:$4 sm:$0xff]  }
 0xe37   : > { %10877 = vmatprep.subr.bf16.mxu1 %v14368_v61  ;;  %v14408_v61 = vld [vmem:[%s15742_s4 + $0x5d0] ss:$12 sps:$4 sm:$0xff]  }
 0xe39   : > { %10905 = vmatpush1.bf16.msra.mxu0 %v14369_v38  ;;  %v14411_v38 = vld [vmem:[%s15742_s4 + $0x690] ss:$12 sps:$4 sm:$0xff]  }
 0xe3a   : > { %10878 = vmatpush2.bf16.msra.mxu1 %v14366_v7  ;;  %10906 = vmatprep.subr.bf16.mxu0 %v14377_v47  ;;  %v14416_v7 = vld [vmem:[%s15742_s4 + $0x5bc] ss:$12 sps:$4 sm:$0xff]  }
 0xe3b   : > { %10879 = vmatprep.subr.bf16.mxu1 %v14374_v50  ;;  %v14419_v47 = vld [vmem:[%s15742_s4 + $0x67c] ss:$12 sps:$4 sm:$0xff]  }
 0xe3d   : > { %10907 = vmatpush1.bf16.msra.mxu0 %v14375_v54  ;;  %v8525_v54 = vpop.f32.mrf.mxu1 }
 0xe3e   : > { %10880 = vmatpush2.bf16.msra.mxu1 %v14372_v21  ;;  %10908 = vmatprep.subr.bf16.mxu0 %v14383_v40 }
 0xe3f   : > { %10881 = vmatprep.subr.bf16.mxu1 %v14380_v27  ;;  %v8527_v6 = vpop.f32.mrf.mxu1 }
 0xe41   : > { %10909 = vmatpush1.bf16.msra.mxu0 %v14381_v35  ;;  %v14414_v35 = vld [vmem:[%s15742_s4 + $0x5b8] ss:$12 sps:$4 sm:$0xff]  }
 0xe42   : > { %10882 = vmatpush2.bf16.msra.mxu1 %v14378_v58  ;;  %10910 = vmatprep.subr.bf16.mxu0 %v14389_v49  ;;  %v14417_v49 = vld [vmem:[%s15742_s4 + $0x678] ss:$12 sps:$4 sm:$0xff]  }
 0xe43   : > { %10883 = vmatprep.subr.bf16.mxu1 %v14386_v39  ;;  %v14422_v39 = vld [vmem:[%s15742_s4 + $0x5a4] ss:$12 sps:$4 sm:$0xff]  }
 0xe45   : > { %10911 = vmatpush1.bf16.msra.mxu0 %v14387_v8 }
 0xe46   : > { %10884 = vmatpush2.bf16.msra.mxu1 %v14384_v4  ;;  %10912 = vmatprep.subr.bf16.mxu0 %v14395_v37  ;;  %v14425_v37 = vld [vmem:[%s15742_s4 + $0x664] ss:$12 sps:$4 sm:$0xff]  }
 0xe47   : > { %10885 = vmatprep.subr.bf16.mxu1 %v14392_v12 }
 0xe49   : > { %10913 = vmatpush1.bf16.msra.mxu0 %v14393_v33 }
 0xe4a   : > { %10886 = vmatpush2.bf16.msra.mxu1 %v14390_v15  ;;  %10914 = vmatprep.subr.bf16.mxu0 %v14401_v36  ;;  %v14423_v36 = vld [vmem:[%s15742_s4 + $0x660] ss:$12 sps:$4 sm:$0xff]  }
 0xe4b   : > { %10887 = vmatprep.subr.bf16.mxu1 %v14398_v63  ;;  %v14431_v63 = vld [vmem:[%s15742_s4 + $0x64c] ss:$12 sps:$4 sm:$0xff]  }
 0xe4d   : > { %10915 = vmatpush1.bf16.msra.mxu0 %v14399_v20  ;;  %v14429_v20 = vld [vmem:[%s15742_s4 + $0x648] ss:$12 sps:$4 sm:$0xff]  }
 0xe4e   : > { %10888 = vmatpush2.bf16.msra.mxu1 %v14396_v16  ;;  %10916 = vmatprep.subr.bf16.mxu0 %v14404_v46  ;;  %v14434_v16 = vld [vmem:[%s15742_s4 + $0x574] ss:$12 sps:$4 sm:$0xff]  }
 0xe4f   : > { %10943 = vmatprep.subr.bf16.mxu1 %v14407_v57  ;;  %v14437_v46 = vld [vmem:[%s15742_s4 + $0x634] ss:$12 sps:$4 sm:$0xff]   ;;  %v14440_v57 = vld [vmem:[%s15742_s4 + $0x55c] ss:$12 sps:$4 sm:$0xff]  }
 0xe50   : > { %v8478_v24 = vpop.f32.mrf.mxu0 }
 0xe51   : > { %v8479_v53 = vadd.f32 %v8478_v24, %v6713_v11  ;;  %10890 = vmatmul.mubr.bf16.vlgmr.msra.gmra.mxu1 %v17660_v3  ;;  %10917 = vmatpush2.bf16.msra.mxu0 %v14402_v5  ;;  %v14446_v5 = vld [vmem:[%s15742_s4 + $0x544] ss:$12 sps:$4 sm:$0xff]   ;;  %v14447_v24 = vld [vmem:[%s15742_s4 + $0x600] ss:$12 sps:$4 sm:$0xff]  }
 0xe52   : > { %v8480_v62 = vpop.f32.mrf.mxu0  ;;  %10944 = vmatpush1.bf16.msra.mxu1 %v14405_v14  ;;  %10918 = vmatprep.subr.bf16.mxu0 %v14410_v26  ;;  %v14449_v26 = vld [vmem:[%s15742_s4 + $0x604] ss:$12 sps:$4 sm:$0xff]  }
 0xe53   : > { %v17670_v30 = vadd.f32 %v8521_v23, %v8479_v53  ;;  %v8481_v42 = vadd.f32 %v8480_v62, %v6717_v19  ;;  %10945 = vmatprep.subr.bf16.mxu1 %v14413_v55  ;;  %v14438_v23 = vld [vmem:[%s15742_s4 + $0x558] ss:$12 sps:$4 sm:$0xff]   ;;  %v14444_v55 = vld [vmem:[%s15742_s4 + $0x540] ss:$12 sps:$4 sm:$0xff]  }
 0xe54   : > { %v8482_v50 = vpop.f32.mrf.mxu0  ;;  %v14476_v53 = vld [vmem:[%s15742_s4 + $0x82c] ss:$12 sps:$4 sm:$0xff]  }
 0xe55   : > { %v8732_v21 = vmul.f32 0.70710677, %v17670_v30  ;;  %v17674_v40 = vadd.f32 %v8523_v18, %v8481_v42  ;;  %v8483_v27 = vadd.f32 %v8482_v50, %v6713_v11  ;;  %10919 = vmatpush2.bf16.msra.mxu0 %v14408_v61  ;;  %v14441_v11 = vld [vmem:[%s15742_s4 + $0x618] ss:$12 sps:$4 sm:$0xff]  }
 0xe56   : > { %v8484_v58 = vpop.f32.mrf.mxu0  ;;  %10946 = vmatpush1.bf16.msra.mxu1 %v14411_v38  ;;  %10920 = vmatprep.subr.bf16.mxu0 %v14416_v7  ;;  %v17701_v7 = vld [vmem:[%s15736_s1 + $0x8] sm:$0xf]  ;;  %v14452_v42 = vld [vmem:[%s15742_s4 + $0x76c] ss:$12 sps:$4 sm:$0xff]  }
 0xe57   : > { %v8733_v8 = vmul.f32 0.70710677, %v17674_v40  ;;  %v8526_v4 = vadd.f32 %v8525_v54, %v8483_v27  ;;  %10947 = vmatprep.subr.bf16.mxu1 %v14419_v47  ;;  %v8485_v12 = vadd.f32 %v8484_v58, %v6717_v19  ;;  %14746 = verf.f32 %v8732_v21 }
 0xe58   : > { %v8709_v47 = vmul.f32 0.5, %v17674_v40  ;;  %v8708_v21 = vmul.f32 0.5, %v17670_v30  ;;  %v14455_v40 = vld [vmem:[%s15742_s4 + $0x754] ss:$12 sps:$4 sm:$0xff]   ;;  %v6725_v30 = vrot.slane %v17701_v7, %v15848_v31 }
 0xe59   : > { %v8744_v33 = vmul.f32 0.70710677, %v8526_v4  ;;  %10921 = vmatpush2.bf16.msra.mxu0 %v14414_v35  ;;  %14748 = verf.f32 %v8733_v8  ;;  %v8528_v15 = vadd.f32 %v8527_v6, %v8485_v12  ;;  %v8720_v38 = vmul.f32 0.5, %v8526_v4  ;;  %v14474_v12 = vld [vmem:[%s15742_s4 + $0x828] ss:$12 sps:$4 sm:$0xff]  }
 0xe5a   : > { %10948 = vmatpush1.bf16.msra.mxu1 %v14417_v49  ;;  %10922 = vmatprep.subr.bf16.mxu0 %v14422_v39  ;;  %v6721_v35 = vrot.slane %v17701_v7, %v15856_v34  ;;  %v14450_v39 = vld [vmem:[%s15742_s4 + $0x768] ss:$12 sps:$4 sm:$0xff]  }
 0xe5b   : > { %14750 = verf.f32 %v8744_v33  ;;  %10949 = vmatprep.subr.bf16.mxu1 %v14425_v37  ;;  %v8745_v60 = vmul.f32 0.70710677, %v8528_v15  ;;  %v8721_v50 = vmul.f32 0.5, %v8528_v15 }
 0xe5d   : > { %10923 = vmatpush2.bf16.msra.mxu0 %v14420_v52  ;;  %14752 = verf.f32 %v8745_v60  ;;  %v14481_v52 = vld [vmem:[%s15742_s4 + $0x814] ss:$12 sps:$4 sm:$0xff]   ;;  %v14458_v60 = vld [vmem:[%s15742_s4 + $0x73c] ss:$12 sps:$4 sm:$0xff]  }
 0xe5e   : > { %10950 = vmatpush1.bf16.msra.mxu1 %v14423_v36  ;;  %10924 = vmatprep.subr.bf16.mxu0 %v14428_v28  ;;  %v14453_v28 = vld [vmem:[%s15742_s4 + $0x750] ss:$12 sps:$4 sm:$0xff]  }
 0xe5f   : > { %10951 = vmatprep.subr.bf16.mxu1 %v14431_v63 }
 0xe61   : > { %10925 = vmatpush2.bf16.msra.mxu0 %v14426_v44 }
 0xe62   : > { %10952 = vmatpush1.bf16.msra.mxu1 %v14429_v20  ;;  %10926 = vmatprep.subr.bf16.mxu0 %v14434_v16  ;;  %v14479_v16 = vld [vmem:[%s15742_s4 + $0x810] ss:$12 sps:$4 sm:$0xff]  }
 0xe63   : > { %10953 = vmatprep.subr.bf16.mxu1 %v14437_v46 }
 0xe64   : > { %v14747_v41 = vpop.eup %14746 }
 0xe65   : > { %10927 = vmatpush2.bf16.msra.mxu0 %v14432_v17  ;;  %v8780_v62 = vadd.f32 1.0, %v14747_v41  ;;  %v14486_v17 = vld [vmem:[%s15742_s4 + $0x7fc] ss:$12 sps:$4 sm:$0xff]   ;;  %v14456_v41 = vld [vmem:[%s15742_s4 + $0x738] ss:$12 sps:$4 sm:$0xff]  }
 0xe66   : > { %10954 = vmatpush1.bf16.msra.mxu1 %v14435_v10  ;;  %10928 = vmatprep.subr.bf16.mxu0 %v14440_v57  ;;  %v14749_v14 = vpop.eup %14748 }
 0xe67   : > { %10955 = vmatprep.subr.bf16.mxu1 %v14443_v25  ;;  %v8781_v18 = vadd.f32 1.0, %v14749_v14  ;;  %v8804_v8 = vmul.f32 %v8780_v62, %v8708_v21  ;;  %v14464_v62 = vld [vmem:[%s15742_s4 + $0x70c] ss:$12 sps:$4 sm:$0xff]   ;;  %v14494_v21 = vld [vmem:[%s15742_s4 + $0x7c8] ss:$12 sps:$4 sm:$0xff]  }
 0xe68   : > { %v14751_v0 = vpop.eup %14750 }
 0xe69   : > { %v8792_v19 = vadd.f32 1.0, %v14751_v0  ;;  %10929 = vmatpush2.bf16.msra.mxu0 %v14438_v23  ;;  %v8805_v58 = vmul.f32 %v8781_v18, %v8709_v47  ;;  %v14484_v0 = vld [vmem:[%s15742_s4 + $0x7f8] ss:$12 sps:$4 sm:$0xff]  }
 0xe6a   : > { %10956 = vmatpush1.bf16.msra.mxu1 %v14441_v11  ;;  %10930 = vmatprep.subr.bf16.mxu0 %v14446_v5  ;;  %v14753_v61 = vpop.eup %14752  ;;  %v14461_v5 = vld [vmem:[%s15742_s4 + $0x724] ss:$12 sps:$4 sm:$0xff]   ;;  %v14496_v47 = vld [vmem:[%s15742_s4 + $0x7cc] ss:$12 sps:$4 sm:$0xff]  }
 0xe6b   : > { %10957 = vmatprep.subr.bf16.mxu1 %v14449_v26  ;;  %v8793_v54 = vadd.f32 1.0, %v14753_v61  ;;  %v8816_v27 = vmul.f32 %v8792_v19, %v8720_v38  ;;  %v14489_v38 = vld [vmem:[%s15742_s4 + $0x7e0] ss:$12 sps:$4 sm:$0xff]  }
 0xe6d   : > { %10931 = vmatpush2.bf16.msra.mxu0 %v14444_v55  ;;  %v8817_v49 = vmul.f32 %v8793_v54, %v8721_v50  ;;  %v17715_v6 = vpack.c.bf16 %v8816_v27, %v8804_v8  ;;  %v14491_v55 = vld [vmem:[%s15742_s4 + $0x7e4] ss:$12 sps:$4 sm:$0xff]   ;;  %v14462_v50 = vld [vmem:[%s15742_s4 + $0x708] ss:$12 sps:$4 sm:$0xff]  }
 0xe6e   : > { %10958 = vmatpush1.bf16.msra.mxu1 %v14447_v24  ;;  %10986 = vmatprep.subr.bf16.mxu0 %v14476_v53  ;;  %v14459_v53 = vld [vmem:[%s15742_s4 + $0x720] ss:$12 sps:$4 sm:$0xff]   ;;  %v14468_v8 = vld [vmem:[%s15742_s4 + $0x6d8] ss:$12 sps:$4 sm:$0xff]  }
 0xe6f   : > { %10959 = vmatprep.subr.bf16.mxu1 %v14452_v42  ;;  %v17710_v37 = vpack.c.bf16 %v8817_v49, %v8805_v58  ;;  %v14467_v54 = vld [vmem:[%s15742_s4 + $0x6f4] ss:$12 sps:$4 sm:$0xff]   ;;  %v14470_v58 = vld [vmem:[%s15742_s4 + $0x6dc] ss:$12 sps:$4 sm:$0xff]  }
 0xe70   : > { %v8607_v4 = vpop.f32.mrf.mxu0  ;;  %v14501_v27 = vld [vmem:[%s15742_s4 + $0x7b4] ss:$12 sps:$4 sm:$0xff]   ;;  %v14499_v49 = vld [vmem:[%s15742_s4 + $0x7b0] ss:$12 sps:$4 sm:$0xff]  }
 0xe71   : > { %v8564_v33 = vpop.f32.mrf.mxu1  ;;  %10932 = vmatprep.mubr.bf16.mxu0 %v17710_v37 }
 0xe72   : > { %v8565_v15 = vadd.f32 %v8564_v33, %v6721_v35  ;;  %v8609_v36 = vpop.f32.mrf.mxu0  ;;  %10960 = vmatpush2.bf16.msra.mxu1 %v14450_v39  ;;  %10933 = vmatmul.mubr.bf16.vlgmr.msra.gmra.mxu0 %v17715_v6  ;;  %v14506_v39 = vld [vmem:[%s15742_s4 + $0x79c] ss:$12 sps:$4 sm:$0xff]  }
 0xe73   : > { %v8566_v63 = vpop.f32.mrf.mxu1  ;;  %10961 = vmatprep.subr.bf16.mxu1 %v14455_v40  ;;  %10987 = vmatpush1.bf16.msra.mxu0 %v14474_v12  ;;  %v14504_v12 = vld [vmem:[%s15742_s4 + $0x798] ss:$12 sps:$4 sm:$0xff]  }
 0xe74   : > { %v17722_v44 = vadd.f32 %v8607_v4, %v8565_v15  ;;  %v8567_v20 = vadd.f32 %v8566_v63, %v6725_v30  ;;  %10988 = vmatprep.subr.bf16.mxu0 %v14481_v52  ;;  %v8611_v25 = vpop.f32.mrf.mxu0  ;;  %v14473_v4 = vld [vmem:[%s15742_s4 + $0x6c4] ss:$12 sps:$4 sm:$0xff]  }
 0xe75   : > { %v8568_v46 = vpop.f32.mrf.mxu1  ;;  %v14511_v52 = vld [vmem:[%s15742_s4 + $0x784] ss:$12 sps:$4 sm:$0xff]  }
 0xe76   : > { %v8734_v10 = vmul.f32 0.70710677, %v17722_v44  ;;  %v17727_v57 = vadd.f32 %v8609_v36, %v8567_v20  ;;  %v8569_v23 = vadd.f32 %v8568_v46, %v6721_v35  ;;  %10962 = vmatpush2.bf16.msra.mxu1 %v14453_v28  ;;  %v8613_v18 = vpop.f32.mrf.mxu0  ;;  %v14465_v35 = vld [vmem:[%s15742_s4 + $0x6f0] ss:$12 sps:$4 sm:$0xff]   ;;  %v14471_v36 = vld [vmem:[%s15742_s4 + $0x6c0] ss:$12 sps:$4 sm:$0xff]  }
 0xe77   : > { %v8570_v11 = vpop.f32.mrf.mxu1  ;;  %10963 = vmatprep.subr.bf16.mxu1 %v14458_v60  ;;  %10989 = vmatpush1.bf16.msra.mxu0 %v14479_v16  ;;  %v14477_v63 = vld [vmem:[%s15742_s4 + $0x170] ss:$12 sps:$4 sm:$0xff]   ;;  %v14509_v46 = vld [vmem:[%s15742_s4 + $0x780] ss:$12 sps:$4 sm:$0xff]  }
 0xe78   : > { %v8735_v14 = vmul.f32 0.70710677, %v17727_v57  ;;  %v8612_v26 = vadd.f32 %v8611_v25, %v8569_v23  ;;  %v8571_v19 = vadd.f32 %v8570_v11, %v6725_v30  ;;  %10990 = vmatprep.subr.bf16.mxu0 %v14486_v17  ;;  %14754 = verf.f32 %v8734_v10  ;;  %v14516_v23 = vld [vmem:[%s15742_s4 + $0x8ec] ss:$12 sps:$4 sm:$0xff]  }
 0xe79   : > { %v8711_v17 = vmul.f32 0.5, %v17727_v57 }
 0xe7a   : > { %v8746_v24 = vmul.f32 0.70710677, %v8612_v26  ;;  %10964 = vmatpush2.bf16.msra.mxu1 %v14456_v41  ;;  %14756 = verf.f32 %v8735_v14  ;;  %v8614_v61 = vadd.f32 %v8613_v18, %v8571_v19  ;;  %v8722_v16 = vmul.f32 0.5, %v8612_v26  ;;  %v14478_v19 = vld [vmem:[%s15742_s4 + $0xb0] ss:$12 sps:$4 sm:$0xff]  }
 0xe7b   : > { %10965 = vmatprep.subr.bf16.mxu1 %v14461_v5  ;;  %10991 = vmatpush1.bf16.msra.mxu0 %v14484_v0  ;;  %v8710_v41 = vmul.f32 0.5, %v17722_v44  ;;  %v14514_v0 = vld [vmem:[%s15742_s4 + $0x8e8] ss:$12 sps:$4 sm:$0xff]   ;;  %v14482_v44 = vld [vmem:[%s15742_s4 + $0x158] ss:$12 sps:$4 sm:$0xff]  }
 0xe7c   : > { %14758 = verf.f32 %v8746_v24  ;;  %v8747_v42 = vmul.f32 0.70710677, %v8614_v61  ;;  %10992 = vmatprep.subr.bf16.mxu0 %v14491_v55  ;;  %v8723_v10 = vmul.f32 0.5, %v8614_v61  ;;  %v14521_v24 = vld [vmem:[%s15742_s4 + $0x8d4] ss:$12 sps:$4 sm:$0xff]  }
 0xe7d   : > { %v14519_v18 = vld [vmem:[%s15742_s4 + $0x8d0] ss:$12 sps:$4 sm:$0xff]  }
 0xe7e   : > { %10966 = vmatpush2.bf16.msra.mxu1 %v14459_v53  ;;  %14760 = verf.f32 %v8747_v42  ;;  %v14483_v53 = vld [vmem:[%s15742_s4 + $0x98] ss:$12 sps:$4 sm:$0xff]   ;;  %v14526_v61 = vld [vmem:[%s15742_s4 + $0x8bc] ss:$12 sps:$4 sm:$0xff]   ;;  %v14488_v42 = vld [vmem:[%s15742_s4 + $0x80] ss:$12 sps:$4 sm:$0xff]  }
 0xe7f   : > { %10967 = vmatprep.subr.bf16.mxu1 %v14464_v62  ;;  %10993 = vmatpush1.bf16.msra.mxu0 %v14489_v38  ;;  %v14487_v62 = vld [vmem:[%s15742_s4 + $0x140] ss:$12 sps:$4 sm:$0xff]   ;;  %v14524_v38 = vld [vmem:[%s15742_s4 + $0x8b8] ss:$12 sps:$4 sm:$0xff]  }
 0xe80   : > { %10994 = vmatprep.subr.bf16.mxu0 %v14496_v47  ;;  %v14531_v47 = vld [vmem:[%s15742_s4 + $0x8a4] ss:$12 sps:$4 sm:$0xff]  }
 0xe82   : > { %10968 = vmatpush2.bf16.msra.mxu1 %v14462_v50  ;;  %v14492_v50 = vld [vmem:[%s15742_s4 + $0x128] ss:$12 sps:$4 sm:$0xff]  }
 0xe83   : > { %10969 = vmatprep.subr.bf16.mxu1 %v14467_v54  ;;  %10995 = vmatpush1.bf16.msra.mxu0 %v14494_v21  ;;  %v14493_v54 = vld [vmem:[%s15742_s4 + $0x68] ss:$12 sps:$4 sm:$0xff]   ;;  %v14536_v21 = vld [vmem:[%s15742_s4 + $0x88c] ss:$12 sps:$4 sm:$0xff]  }
 0xe84   : > { %10996 = vmatprep.subr.bf16.mxu0 %v14501_v27  ;;  %v14497_v27 = vld [vmem:[%s15742_s4 + $0x110] ss:$12 sps:$4 sm:$0xff]  }
 0xe85   : > { %v14755_v40 = vpop.eup %14754 }
 0xe86   : > { %10970 = vmatpush2.bf16.msra.mxu1 %v14465_v35  ;;  %v8782_v20 = vadd.f32 1.0, %v14755_v40  ;;  %v14534_v35 = vld [vmem:[%s15742_s4 + $0x888] ss:$12 sps:$4 sm:$0xff]   ;;  %v14503_v40 = vld [vmem:[%s15742_s4 + $0x38] ss:$12 sps:$4 sm:$0xff]  }
 0xe87   : > { %10971 = vmatprep.subr.bf16.mxu1 %v14470_v58  ;;  %v14757_v30 = vpop.eup %14756  ;;  %10997 = vmatpush1.bf16.msra.mxu0 %v14499_v49  ;;  %v14498_v58 = vld [vmem:[%s15742_s4 + $0x50] ss:$12 sps:$4 sm:$0xff]   ;;  %v14541_v49 = vld [vmem:[%s15742_s4 + $0x874] ss:$12 sps:$4 sm:$0xff]  }
 0xe88   : > { %10998 = vmatprep.subr.bf16.mxu0 %v14506_v39  ;;  %v8783_v28 = vadd.f32 1.0, %v14757_v30  ;;  %v8806_v26 = vmul.f32 %v8782_v20, %v8710_v41  ;;  %v14502_v39 = vld [vmem:[%s15742_s4 + $0xf8] ss:$12 sps:$4 sm:$0xff]   ;;  %v14507_v30 = vld [vmem:[%s15742_s4 + $0xe0] ss:$12 sps:$4 sm:$0xff]  }
 0xe89   : > { %v14759_v33 = vpop.eup %14758  ;;  %v14554_v20 = vld [vmem:[%s15742_s4 + $0x2f0] ss:$12 sps:$4 sm:$0xff]  }
 0xe8a   : > { %v8794_v15 = vadd.f32 1.0, %v14759_v33  ;;  %10972 = vmatpush2.bf16.msra.mxu1 %v14468_v8  ;;  %v8807_v5 = vmul.f32 %v8783_v28, %v8711_v17  ;;  %v14539_v8 = vld [vmem:[%s15742_s4 + $0x870] ss:$12 sps:$4 sm:$0xff]   ;;  %v14508_v33 = vld [vmem:[%s15742_s4 + $0x20] ss:$12 sps:$4 sm:$0xff]  }
 0xe8b   : > { %10973 = vmatprep.subr.bf16.mxu1 %v14473_v4  ;;  %v14761_v60 = vpop.eup %14760  ;;  %10999 = vmatpush1.bf16.msra.mxu0 %v14504_v12  ;;  %v14546_v4 = vld [vmem:[%s15742_s4 + $0x85c] ss:$12 sps:$4 sm:$0xff]   ;;  %v14544_v12 = vld [vmem:[%s15742_s4 + $0x858] ss:$12 sps:$4 sm:$0xff]  }
 0xe8c   : > { %v8795_v25 = vadd.f32 1.0, %v14761_v60  ;;  %11000 = vmatprep.subr.bf16.mxu0 %v14511_v52  ;;  %v8818_v11 = vmul.f32 %v8794_v15, %v8722_v16  ;;  %v14551_v52 = vld [vmem:[%s15742_s4 + $0x844] ss:$12 sps:$4 sm:$0xff]   ;;  %v14512_v15 = vld [vmem:[%s15742_s4 + $0xc8] ss:$12 sps:$4 sm:$0xff]   ;;  %v6729_v60 = vrot.slane %v17701_v7, %v15851_v32 }
 0xe8d   : > { %v14517_v16 = vld [vmem:[%s15742_s4 + $0x470] ss:$12 sps:$4 sm:$0xff]  }
 0xe8e   : > { %10974 = vmatpush2.bf16.msra.mxu1 %v14471_v36  ;;  %v8819_v14 = vmul.f32 %v8795_v25, %v8723_v10  ;;  %v17760_v55 = vpack.c.bf16 %v8818_v11, %v8806_v26  ;;  %v14549_v36 = vld [vmem:[%s15742_s4 + $0x840] ss:$12 sps:$4 sm:$0xff]   ;;  %v14522_v11 = vld [vmem:[%s15742_s4 + $0x458] ss:$12 sps:$4 sm:$0xff]  }
 0xe8f   : > { %12753 = vmatprep.subr.bf16.mxu1 %v14477_v63  ;;  %11001 = vmatpush1.bf16.msra.mxu0 %v14509_v46  ;;  %v14513_v63 = vld [vmem:[%s15742_s4 + $0x8] ss:$12 sps:$4 sm:$0xff]   ;;  %v6733_v46 = vrot.slane %v17701_v7, %v16093_v13 }
 0xe90   : > { %v17757_v57 = vpack.c.bf16 %v8819_v14, %v8807_v5  ;;  %11002 = vmatprep.subr.bf16.mxu0 %v14516_v23  ;;  %v14518_v23 = vld [vmem:[%s15742_s4 + $0x3b0] ss:$12 sps:$4 sm:$0xff]  }
 0xe91   : > { %v8693_v28 = vpop.f32.mrf.mxu1 }
 0xe92   : > { %10975 = vmatprep.mubr.bf16.mxu1 %v17757_v57 }
 0xe93   : > { %10976 = vmatmul.mubr.bf16.vlgmr.msra.gmra.mxu1 %v17760_v55  ;;  %11003 = vmatpush2.bf16.msra.mxu0 %v14514_v0  ;;  %v8695_v10 = vpop.f32.mrf.mxu1 }
 0xe94   : > { %12754 = vmatpush3.bf16.msra.mxu1 %v14478_v19  ;;  %11061 = vmatprep.mubr.bf16.mxu1 %v17461_v2  ;;  %v14529_v2 = vld [vmem:[%s15742_s4 + $0x8a0] ss:$12 sps:$4 sm:$0xff]  }
 0xe95   : > { %12755 = vmatprep.subr.bf16.mxu1 %v14482_v44  ;;  %11004 = vmatprep.subr.bf16.mxu0 %v14521_v24  ;;  %v8697_v0 = vpop.f32.mrf.mxu1  ;;  %v14523_v44 = vld [vmem:[%s15742_s4 + $0x398] ss:$12 sps:$4 sm:$0xff]  }
 0xe97   : > { %11005 = vmatpush2.bf16.msra.mxu0 %v14519_v18  ;;  %v14527_v18 = vld [vmem:[%s15742_s4 + $0x440] ss:$12 sps:$4 sm:$0xff]  }
 0xe98   : > { %12756 = vmatpush3.bf16.msra.mxu1 %v14483_v53  ;;  %11006 = vmatprep.subr.bf16.mxu0 %v14526_v61 }
 0xe99   : > { %12757 = vmatprep.subr.bf16.mxu1 %v14487_v62 }
 0xe9b   : > { %11007 = vmatpush2.bf16.msra.mxu0 %v14524_v38 }
 0xe9c   : > { %12758 = vmatpush3.bf16.msra.mxu1 %v14488_v42  ;;  %11008 = vmatprep.subr.bf16.mxu0 %v14531_v47  ;;  %v14528_v42 = vld [vmem:[%s15742_s4 + $0x380] ss:$12 sps:$4 sm:$0xff]   ;;  %v14532_v47 = vld [vmem:[%s15742_s4 + $0x428] ss:$12 sps:$4 sm:$0xff]  }
 0xe9d   : > { %12759 = vmatprep.subr.bf16.mxu1 %v14492_v50 }
 0xe9f   : > { %11009 = vmatpush2.bf16.msra.mxu0 %v14529_v2  ;;  %v14533_v2 = vld [vmem:[%s15742_s4 + $0x368] ss:$12 sps:$4 sm:$0xff]  }
 0xea0   : > { %12760 = vmatpush3.bf16.msra.mxu1 %v14493_v54  ;;  %11010 = vmatprep.subr.bf16.mxu0 %v14536_v21  ;;  %v14537_v54 = vld [vmem:[%s15742_s4 + $0x410] ss:$12 sps:$4 sm:$0xff]  }
 0xea1   : > { %12761 = vmatprep.subr.bf16.mxu1 %v14497_v27  ;;  %v14538_v21 = vld [vmem:[%s15742_s4 + $0x350] ss:$12 sps:$4 sm:$0xff]   ;;  %v14542_v27 = vld [vmem:[%s15742_s4 + $0x3f8] ss:$12 sps:$4 sm:$0xff]  }
 0xea3   : > { %11011 = vmatpush2.bf16.msra.mxu0 %v14534_v35  ;;  %v14543_v35 = vld [vmem:[%s15742_s4 + $0x338] ss:$12 sps:$4 sm:$0xff]  }
 0xea4   : > { %12762 = vmatpush3.bf16.msra.mxu1 %v14498_v58  ;;  %11012 = vmatprep.subr.bf16.mxu0 %v14541_v49  ;;  %v14547_v49 = vld [vmem:[%s15742_s4 + $0x3e0] ss:$12 sps:$4 sm:$0xff]  }
 0xea5   : > { %12763 = vmatprep.subr.bf16.mxu1 %v14502_v39 }
 0xea7   : > { %11013 = vmatpush2.bf16.msra.mxu0 %v14539_v8 }
 0xea8   : > { %12764 = vmatpush3.bf16.msra.mxu1 %v14503_v40  ;;  %11014 = vmatprep.subr.bf16.mxu0 %v14546_v4  ;;  %v14548_v4 = vld [vmem:[%s15742_s4 + $0x320] ss:$12 sps:$4 sm:$0xff]  }
 0xea9   : > { %12765 = vmatprep.subr.bf16.mxu1 %v14507_v30  ;;  %v14552_v30 = vld [vmem:[%s15742_s4 + $0x3c8] ss:$12 sps:$4 sm:$0xff]  }
 0xeab   : > { %11015 = vmatpush2.bf16.msra.mxu0 %v14544_v12 }
 0xeac   : > { %12766 = vmatpush3.bf16.msra.mxu1 %v14508_v33  ;;  %11016 = vmatprep.subr.bf16.mxu0 %v14551_v52 }
 0xead   : > { %12767 = vmatprep.subr.bf16.mxu1 %v14512_v15 }
 0xeaf   : > { %11017 = vmatpush2.bf16.msra.mxu0 %v14549_v36 }
 0xeb0   : > { %v8650_v17 = vpop.f32.mrf.mxu0  ;;  %12768 = vmatpush3.bf16.msra.mxu1 %v14513_v63  ;;  %12775 = vmatprep.subr.bf16.mxu0 %v14554_v20 }
 0xeb1   : > { %v8651_v25 = vadd.f32 %v8650_v17, %v6729_v60  ;;  %12797 = vmatprep.subr.bf16.mxu1 %v14517_v16  ;;  %v14553_v16 = vld [vmem:[%s15742_s4 + $0x308] ss:$12 sps:$4 sm:$0xff]  }
 0xeb2   : > { %v8652_v41 = vpop.f32.mrf.mxu0 }
 0xeb3   : > { %v8694_v5 = vadd.f32 %v8693_v28, %v8651_v25  ;;  %v8653_v14 = vadd.f32 %v8652_v41, %v6733_v46  ;;  %11062 = vmatmul.mubr.bf16.vlgmr.msra.gmra.mxu1 %v17455_v56  ;;  %v8699_v56 = vpop.f32.mrf.mxu1  ;;  %v14555_v41 = vld [vmem:[%s15742_s4 + $0x230] ss:$12 sps:$4 sm:$0xff]  }
 0xeb4   : > { %v8654_v26 = vpop.f32.mrf.mxu0  ;;  %12798 = vmatpush3.bf16.msra.mxu1 %v14518_v23  ;;  %11143 = vmatprep.mubr.bf16.mxu1 %v17619_v9 }
 0xeb5   : > { %v8736_v19 = vmul.f32 0.70710677, %v8694_v5  ;;  %v8696_v13 = vadd.f32 %v8695_v10, %v8653_v14  ;;  %v8655_v7 = vadd.f32 %v8654_v26, %v6729_v60  ;;  %12799 = vmatprep.subr.bf16.mxu1 %v14522_v11  ;;  %v8712_v60 = vmul.f32 0.5, %v8694_v5  ;;  %v14556_v10 = vld [vmem:[%s15742_s4 + $0x770] ss:$12 sps:$4 sm:$0xff]  }
 0xeb6   : > { %v8656_v24 = vpop.f32.mrf.mxu0  ;;  %v14557_v5 = vld [vmem:[%s15742_s4 + $0x6b0] ss:$12 sps:$4 sm:$0xff]   ;;  %v14558_v14 = vld [vmem:[%s15742_s4 + $0x2d8] ss:$12 sps:$4 sm:$0xff]  }
 0xeb7   : > { %v8737_v53 = vmul.f32 0.70710677, %v8696_v13  ;;  %v8698_v61 = vadd.f32 %v8697_v0, %v8655_v7  ;;  %v8657_v62 = vadd.f32 %v8656_v24, %v6733_v46  ;;  %14762 = verf.f32 %v8736_v19  ;;  %v14560_v26 = vld [vmem:[%s15742_s4 + $0x758] ss:$12 sps:$4 sm:$0xff]   ;;  %v14564_v7 = vld [vmem:[%s15742_s4 + $0x740] ss:$12 sps:$4 sm:$0xff]  }
 0xeb8   : > { %12800 = vmatpush3.bf16.msra.mxu1 %v14523_v44  ;;  %v8713_v36 = vmul.f32 0.5, %v8696_v13  ;;  %v14559_v0 = vld [vmem:[%s15742_s4 + $0x218] ss:$12 sps:$4 sm:$0xff]   ;;  %v14562_v13 = vld [vmem:[%s15742_s4 + $0x2c0] ss:$12 sps:$4 sm:$0xff]  }
 0xeb9   : > { %v8748_v38 = vmul.f32 0.70710677, %v8698_v61  ;;  %14764 = verf.f32 %v8737_v53  ;;  %v8700_v9 = vadd.f32 %v8699_v56, %v8657_v62  ;;  %12801 = vmatprep.subr.bf16.mxu1 %v14527_v18  ;;  %v8724_v15 = vmul.f32 0.5, %v8698_v61  ;;  %v14561_v19 = vld [vmem:[%s15742_s4 + $0x698] ss:$12 sps:$4 sm:$0xff]  }
 0xeba   : > { %v14563_v44 = vld [vmem:[%s15742_s4 + $0x200] ss:$12 sps:$4 sm:$0xff]   ;;  %v14568_v24 = vld [vmem:[%s15742_s4 + $0x728] ss:$12 sps:$4 sm:$0xff]   ;;  %v14570_v53 = vld [vmem:[%s15742_s4 + $0x290] ss:$12 sps:$4 sm:$0xff]  }
 0xebb   : > { %14766 = verf.f32 %v8748_v38  ;;  %v8749_v50 = vmul.f32 0.70710677, %v8700_v9  ;;  %v8725_v28 = vmul.f32 0.5, %v8700_v9  ;;  %v14569_v18 = vld [vmem:[%s15742_s4 + $0x668] ss:$12 sps:$4 sm:$0xff]  }
 0xebc   : > { %12802 = vmatpush3.bf16.msra.mxu1 %v14528_v42  ;;  %v14572_v61 = vld [vmem:[%s15742_s4 + $0x710] ss:$12 sps:$4 sm:$0xff]   ;;  %v14574_v38 = vld [vmem:[%s15742_s4 + $0x278] ss:$12 sps:$4 sm:$0xff]  }
 0xebd   : > { %14768 = verf.f32 %v8749_v50  ;;  %12803 = vmatprep.subr.bf16.mxu1 %v14532_v47  ;;  %v14571_v62 = vld [vmem:[%s15742_s4 + $0x1d0] ss:$12 sps:$4 sm:$0xff]   ;;  %v14576_v42 = vld [vmem:[%s15742_s4 + $0x6f8] ss:$12 sps:$4 sm:$0xff]   ;;  %v14578_v50 = vld [vmem:[%s15742_s4 + $0x260] ss:$12 sps:$4 sm:$0xff]  }
 0xebe   : > { %v14573_v56 = vld [vmem:[%s15742_s4 + $0x650] ss:$12 sps:$4 sm:$0xff]   ;;  %v14575_v9 = vld [vmem:[%s15742_s4 + $0x1b8] ss:$12 sps:$4 sm:$0xff]  }
 0xebf   : > { %v14577_v47 = vld [vmem:[%s15742_s4 + $0x638] ss:$12 sps:$4 sm:$0xff]  }
 0xec0   : > { %12804 = vmatpush3.bf16.msra.mxu1 %v14533_v2  ;;  %v14580_v2 = vld [vmem:[%s15742_s4 + $0x6e0] ss:$12 sps:$4 sm:$0xff]  }
 0xec1   : > { %12805 = vmatprep.subr.bf16.mxu1 %v14537_v54  ;;  %v14579_v54 = vld [vmem:[%s15742_s4 + $0x1a0] ss:$12 sps:$4 sm:$0xff]  }
 0xec4   : > { %12806 = vmatpush3.bf16.msra.mxu1 %v14538_v21  ;;  %v14763_v58 = vpop.eup %14762  ;;  %v14581_v21 = vld [vmem:[%s15742_s4 + $0x620] ss:$12 sps:$4 sm:$0xff]  }
 0xec5   : > { %12807 = vmatprep.subr.bf16.mxu1 %v14542_v27  ;;  %v8784_v52 = vadd.f32 1.0, %v14763_v58  ;;  %v14582_v27 = vld [vmem:[%s15742_s4 + $0x248] ss:$12 sps:$4 sm:$0xff]  }
 0xec6   : > { %v14765_v39 = vpop.eup %14764  ;;  %v14583_v58 = vld [vmem:[%s15742_s4 + $0x188] ss:$12 sps:$4 sm:$0xff]  }
 0xec7   : > { %v8785_v12 = vadd.f32 1.0, %v14765_v39  ;;  %v8808_v25 = vmul.f32 %v8784_v52, %v8712_v60  ;;  %v14586_v39 = vld [vmem:[%s15742_s4 + $0x5f0] ss:$12 sps:$4 sm:$0xff]   ;;  %v14601_v60 = vld [vmem:[%s15742_s4 + $0x488] ss:$12 sps:$4 sm:$0xff]  }
 0xec8   : > { %v14767_v8 = vpop.eup %14766  ;;  %12808 = vmatpush3.bf16.msra.mxu1 %v14543_v35  ;;  %v14584_v35 = vld [vmem:[%s15742_s4 + $0x6c8] ss:$12 sps:$4 sm:$0xff]   ;;  %v14594_v52 = vld [vmem:[%s15742_s4 + $0x590] ss:$12 sps:$4 sm:$0xff]  }
 0xec9   : > { %v8796_v40 = vadd.f32 1.0, %v14767_v8  ;;  %12809 = vmatprep.subr.bf16.mxu1 %v14547_v49  ;;  %v8809_v46 = vmul.f32 %v8785_v12, %v8713_v36  ;;  %v14585_v49 = vld [vmem:[%s15742_s4 + $0x608] ss:$12 sps:$4 sm:$0xff]   ;;  %v14587_v8 = vld [vmem:[%s15742_s4 + $0x530] ss:$12 sps:$4 sm:$0xff]  }
 0xeca   : > { %v14769_v33 = vpop.eup %14768  ;;  %v14591_v12 = vld [vmem:[%s15742_s4 + $0x500] ss:$12 sps:$4 sm:$0xff]  }
 0xecb   : > { %v8797_v63 = vadd.f32 1.0, %v14769_v33  ;;  %v8820_v20 = vmul.f32 %v8796_v40, %v8724_v15  ;;  %v14588_v40 = vld [vmem:[%s15742_s4 + $0x5d8] ss:$12 sps:$4 sm:$0xff]   ;;  %v14592_v33 = vld [vmem:[%s15742_s4 + $0x5a8] ss:$12 sps:$4 sm:$0xff]  }
 0xecc   : > { %12810 = vmatpush3.bf16.msra.mxu1 %v14548_v4  ;;  %v14589_v4 = vld [vmem:[%s15742_s4 + $0x518] ss:$12 sps:$4 sm:$0xff]   ;;  %v14598_v36 = vld [vmem:[%s15742_s4 + $0x560] ss:$12 sps:$4 sm:$0xff]  }
 0xecd   : > { %12811 = vmatprep.subr.bf16.mxu1 %v14552_v30  ;;  %v8821_v17 = vmul.f32 %v8797_v63, %v8725_v28  ;;  %v17820_v11 = vpack.c.bf16 %v8820_v20, %v8808_v25  ;;  %v14590_v30 = vld [vmem:[%s15742_s4 + $0x5c0] ss:$12 sps:$4 sm:$0xff]   ;;  %v14597_v15 = vld [vmem:[%s15742_s4 + $0x4b8] ss:$12 sps:$4 sm:$0xff]   ;;  %v14600_v63 = vld [vmem:[%s15742_s4 + $0x548] ss:$12 sps:$4 sm:$0xff]  }
 0xece   : > { %v14599_v28 = vld [vmem:[%s15742_s4 + $0x4a0] ss:$12 sps:$4 sm:$0xff]   ;;  %v14602_v20 = vld [vmem:[%s15742_s4 + $0x8f0] ss:$12 sps:$4 sm:$0xff]  }
 0xecf   : > { %v17817_v23 = vpack.c.bf16 %v8821_v17, %v8809_v46  ;;  %v14604_v46 = vld [vmem:[%s15742_s4 + $0x8d8] ss:$12 sps:$4 sm:$0xff]   ;;  %v14607_v25 = vld [vmem:[%s15742_s4 + $0x800] ss:$12 sps:$4 sm:$0xff]  }
 0xed0   : > { %12812 = vmatpush3.bf16.msra.mxu1 %v14553_v16  ;;  %v14603_v16 = vld [vmem:[%s15742_s4 + $0x830] ss:$12 sps:$4 sm:$0xff]   ;;  %v14605_v17 = vld [vmem:[%s15742_s4 + $0x818] ss:$12 sps:$4 sm:$0xff]  }
 0xed1   : > { %11018 = vmatprep.mubr.bf16.mxu0 %v17817_v23  ;;  %12841 = vmatprep.subr.bf16.mxu1 %v14556_v10  ;;  %v14606_v10 = vld [vmem:[%s15742_s4 + $0x8c0] ss:$12 sps:$4 sm:$0xff]  }
 0xed2   : > { %11019 = vmatmul.mubr.bf16.vlgmr.msra.gmra.mxu0 %v17820_v11 }
 0xed3   : > { %12776 = vmatpush3.bf16.msra.mxu0 %v14555_v41  ;;  %11144 = vmatmul.mubr.bf16.vlgmr.msra.gmra.mxu1 %v17660_v3  ;;  %v14565_v3 = vld [vmem:[%s15742_s4 + $0x680] ss:$12 sps:$4 sm:$0xff]   ;;  %v14608_v41 = vld [vmem:[%s15742_s4 + $0x8a8] ss:$12 sps:$4 sm:$0xff]  }
 0xed4   : > { %11102 = vmatprep.mubr.bf16.mxu0 %v17552_v1  ;;  %12842 = vmatpush3.bf16.msra.mxu1 %v14557_v5  ;;  %v14566_v1 = vld [vmem:[%s15742_s4 + $0x2a8] ss:$12 sps:$4 sm:$0xff]  }
 0xed5   : > { %11225 = vmatprep.mubr.bf16.mxu1 %v17757_v57  ;;  %12777 = vmatprep.subr.bf16.mxu0 %v14558_v14  ;;  %v14567_v57 = vld [vmem:[%s15742_s4 + $0x1e8] ss:$12 sps:$4 sm:$0xff]   ;;  %v14611_v14 = vld [vmem:[%s15742_s4 + $0x7d0] ss:$12 sps:$4 sm:$0xff]  }
 0xed6   : > { %12843 = vmatprep.subr.bf16.mxu1 %v14560_v26  ;;  %v14609_v5 = vld [vmem:[%s15742_s4 + $0x7e8] ss:$12 sps:$4 sm:$0xff]   ;;  %v14613_v26 = vld [vmem:[%s15742_s4 + $0x7b8] ss:$12 sps:$4 sm:$0xff]  }
 0xed7   : > { %12778 = vmatpush3.bf16.msra.mxu0 %v14559_v0  ;;  %v14614_v0 = vld [vmem:[%s15742_s4 + $0x860] ss:$12 sps:$4 sm:$0xff]  }
 0xed8   : > { %12844 = vmatpush3.bf16.msra.mxu1 %v14561_v19  ;;  %12779 = vmatprep.subr.bf16.mxu0 %v14562_v13  ;;  %v14615_v19 = vld [vmem:[%s15742_s4 + $0x7a0] ss:$12 sps:$4 sm:$0xff]   ;;  %v14616_v13 = vld [vmem:[%s15742_s4 + $0x848] ss:$12 sps:$4 sm:$0xff]  }
 0xed9   : > { %12845 = vmatprep.subr.bf16.mxu1 %v14564_v7  ;;  %v14617_v7 = vld [vmem:[%s15742_s4 + $0x788] ss:$12 sps:$4 sm:$0xff]  }
 0xedb   : > { %12780 = vmatpush3.bf16.msra.mxu0 %v14563_v44  ;;  %v10805_v44 = vpop.f32.mrf.mxu1 }
 0xedc   : > { %12846 = vmatpush3.bf16.msra.mxu1 %v14565_v3  ;;  %12781 = vmatprep.subr.bf16.mxu0 %v14566_v1 }
 0xedd   : > { %12847 = vmatprep.subr.bf16.mxu1 %v14568_v24  ;;  %v10807_v3 = vpop.f32.mrf.mxu1 }
 0xedf   : > { %12782 = vmatpush3.bf16.msra.mxu0 %v14567_v57  ;;  %v10809_v1 = vpop.f32.mrf.mxu1 }
 0xee0   : > { %12848 = vmatpush3.bf16.msra.mxu1 %v14569_v18  ;;  %12783 = vmatprep.subr.bf16.mxu0 %v14570_v53 }
 0xee1   : > { %12849 = vmatprep.subr.bf16.mxu1 %v14572_v61  ;;  %v10811_v57 = vpop.f32.mrf.mxu1 }
 0xee3   : > { %12784 = vmatpush3.bf16.msra.mxu0 %v14571_v62 }
 0xee4   : > { %12850 = vmatpush3.bf16.msra.mxu1 %v14573_v56  ;;  %12785 = vmatprep.subr.bf16.mxu0 %v14574_v38  ;;  %v9218_v56 = vld [vmem:[%s812_s29] sm:$0x7] }
 0xee5   : > { %12851 = vmatprep.subr.bf16.mxu1 %v14576_v42 }
 0xee7   : > { %12786 = vmatpush3.bf16.msra.mxu0 %v14575_v9 }
 0xee8   : > { %12852 = vmatpush3.bf16.msra.mxu1 %v14577_v47  ;;  %12787 = vmatprep.subr.bf16.mxu0 %v14578_v50  ;;  %v9223_v47 = vrot.slane %v9218_v56, %v15856_v34 }
 0xee9   : > { %12853 = vmatprep.subr.bf16.mxu1 %v14580_v2  ;;  %v9227_v2 = vrot.slane %v9218_v56, %v15848_v31 }
 0xeeb   : > { %12788 = vmatpush3.bf16.msra.mxu0 %v14579_v54 }
 0xeec   : > { %12854 = vmatpush3.bf16.msra.mxu1 %v14581_v21  ;;  %12789 = vmatprep.subr.bf16.mxu0 %v14582_v27  ;;  %v10806_v21 = vadd.f32 %v10805_v44, %v9223_v47  ;;  %v10808_v27 = vadd.f32 %v10807_v3, %v9227_v2 }
 0xeed   : > { %12855 = vmatprep.subr.bf16.mxu1 %v14584_v35 }
 0xeef   : > { %12790 = vmatpush3.bf16.msra.mxu0 %v14583_v58 }
 0xef0   : > { %12856 = vmatpush3.bf16.msra.mxu1 %v14585_v49  ;;  %12819 = vmatprep.subr.bf16.mxu0 %v14586_v39  ;;  %v10848_v24 = vpop.f32.mrf.mxu0  ;;  %v10810_v39 = vadd.f32 %v10809_v1, %v9223_v47 }
 0xef1   : > { %v10849_v35 = vadd.f32 %v10848_v24, %v10806_v21 }
 0xef2   : > { %11103 = vmatmul.mubr.bf16.vlgmr.msra.gmra.mxu0 %v17607_v51  ;;  %v14593_v51 = vld [vmem:[%s15742_s4 + $0x4e8] ss:$12 sps:$4 sm:$0xff]   ;;  %v10850_v18 = vpop.f32.mrf.mxu0 }
 0xef3   : > { %12820 = vmatpush3.bf16.msra.mxu0 %v14587_v8  ;;  %11184 = vmatprep.mubr.bf16.mxu0 %v17710_v37  ;;  %v14595_v37 = vld [vmem:[%s15742_s4 + $0x4d0] ss:$12 sps:$4 sm:$0xff]   ;;  %v10851_v8 = vadd.f32 %v10850_v18, %v10808_v27 }
 0xef4   : > { %11226 = vmatmul.mubr.bf16.vlgmr.msra.gmra.mxu1 %v17760_v55  ;;  %12821 = vmatprep.subr.bf16.mxu0 %v14588_v40  ;;  %v14596_v55 = vld [vmem:[%s15742_s4 + $0x578] ss:$12 sps:$4 sm:$0xff]   ;;  %v10852_v61 = vpop.f32.mrf.mxu0 }
 0xef6   : > { %v10854_v38 = vpop.f32.mrf.mxu0 }
 0xef7   : > { %12822 = vmatpush3.bf16.msra.mxu0 %v14589_v4  ;;  %v10812_v4 = vadd.f32 %v10811_v57, %v9227_v2 }
 0xef8   : > { %12823 = vmatprep.subr.bf16.mxu0 %v14590_v30  ;;  %v10853_v30 = vadd.f32 %v10852_v61, %v10810_v39 }
 0xefb   : > { %12824 = vmatpush3.bf16.msra.mxu0 %v14591_v12 }
 0xefc   : > { %12825 = vmatprep.subr.bf16.mxu0 %v14592_v33 }
 0xeff   : > { %12826 = vmatpush3.bf16.msra.mxu0 %v14593_v51 }
 0xf00   : > { %12827 = vmatprep.subr.bf16.mxu0 %v14594_v52 }
 0xf03   : > { %12828 = vmatpush3.bf16.msra.mxu0 %v14595_v37  ;;  %v10855_v37 = vadd.f32 %v10854_v38, %v10812_v4  ;;  %v9231_v38 = vrot.slane %v9218_v56, %v15851_v32 }
 0xf04   : > { %12829 = vmatprep.subr.bf16.mxu0 %v14596_v55 }
 0xf07   : > { %12830 = vmatpush3.bf16.msra.mxu0 %v14597_v15 }
 0xf08   : > { %12831 = vmatprep.subr.bf16.mxu0 %v14598_v36 }
 0xf0b   : > { %12832 = vmatpush3.bf16.msra.mxu0 %v14599_v28 }
 0xf0c   : > { %12833 = vmatprep.subr.bf16.mxu0 %v14600_v63 }
 0xf0f   : > { %12834 = vmatpush3.bf16.msra.mxu0 %v14601_v60 }
 0xf10   : > { %12863 = vmatprep.subr.bf16.mxu0 %v14602_v20 }
 0xf11   : > { %v10891_v53 = vpop.f32.mrf.mxu1 }
 0xf12   : > { %11185 = vmatmul.mubr.bf16.vlgmr.msra.gmra.mxu0 %v17715_v6  ;;  %v14610_v6 = vld [vmem:[%s15742_s4 + $0x890] ss:$12 sps:$4 sm:$0xff]   ;;  %v10892_v40 = vadd.f32 %v10891_v53, %v10849_v35 }
 0xf13   : > { %12864 = vmatpush3.bf16.msra.mxu0 %v14603_v16  ;;  %11266 = vmatprep.mubr.bf16.mxu0 %v17817_v23  ;;  %v14612_v23 = vld [vmem:[%s15742_s4 + $0x878] ss:$12 sps:$4 sm:$0xff]   ;;  %v10893_v62 = vpop.f32.mrf.mxu1  ;;  %s18050_s4 = sld [smem:[#allocation38_spill]] (!%p12592_p1) }
 0xf14   : > { %12865 = vmatprep.subr.bf16.mxu0 %v14604_v46  ;;  %v10894_v12 = vadd.f32 %v10893_v62, %v10851_v8 }
 0xf15   : > { %v10895_v42 = vpop.f32.mrf.mxu1 }
 0xf16   : > { %v10896_v55 = vadd.f32 %v10895_v42, %v10853_v30 }
 0xf17   : > { %12866 = vmatpush3.bf16.msra.mxu0 %v14605_v17  ;;  %v10897_v50 = vpop.f32.mrf.mxu1 }
 0xf18   : > { %12867 = vmatprep.subr.bf16.mxu0 %v14606_v10  ;;  %v10898_v63 = vadd.f32 %v10897_v50, %v10855_v37 }
 0xf1b   : > { %12868 = vmatpush3.bf16.msra.mxu0 %v14607_v25 }
 0xf1c   : > { %12869 = vmatprep.subr.bf16.mxu0 %v14608_v41 }
 0xf1f   : > { %12870 = vmatpush3.bf16.msra.mxu0 %v14609_v5 }
 0xf20   : > { %12871 = vmatprep.subr.bf16.mxu0 %v14610_v6 }
 0xf23   : > { %12872 = vmatpush3.bf16.msra.mxu0 %v14611_v14 }
 0xf24   : > { %12873 = vmatprep.subr.bf16.mxu0 %v14612_v23 }
 0xf27   : > { %12874 = vmatpush3.bf16.msra.mxu0 %v14613_v26 }
 0xf28   : > { %12875 = vmatprep.subr.bf16.mxu0 %v14614_v0 }
 0xf2b   : > { %12876 = vmatpush3.bf16.msra.mxu0 %v14615_v19 }
 0xf2c   : > { %12877 = vmatprep.subr.bf16.mxu0 %v14616_v13 }
 0xf2f   : > { %12878 = vmatpush3.bf16.msra.mxu0 %v14617_v7 }
 0xf32   : > { %11267 = vmatmul.mubr.bf16.vlgmr.msra.gmra.mxu0 %v17820_v11  ;;  %v10934_v9 = vpop.f32.mrf.mxu0 }
 0xf33   : > { %v10935_v33 = vadd.f32 %v10934_v9, %v10892_v40 }
 0xf34   : > { %v10936_v11 = vpop.f32.mrf.mxu0 }
 0xf35   : > { %v10937_v15 = vadd.f32 %v10936_v11, %v10894_v12 }
 0xf36   : > { %v10938_v58 = vpop.f32.mrf.mxu0 }
 0xf37   : > { %v10939_v60 = vadd.f32 %v10938_v58, %v10896_v55 }
 0xf38   : > { %v10940_v51 = vpop.f32.mrf.mxu0 }
 0xf39   : > { %v10941_v10 = vadd.f32 %v10940_v51, %v10898_v63 }
 0xf53   : > { %v10977_v54 = vpop.f32.mrf.mxu1 }
 0xf54   : > { %v10978_v36 = vadd.f32 %v10977_v54, %v10935_v33 }
 0xf55   : > { %v10979_v49 = vpop.f32.mrf.mxu1 }
 0xf56   : > { %v10980_v20 = vadd.f32 %v10979_v49, %v10937_v15 }
 0xf57   : > { %v10981_v52 = vpop.f32.mrf.mxu1 }
 0xf58   : > { %v10982_v25 = vadd.f32 %v10981_v52, %v10939_v60 }
 0xf59   : > { %v10983_v46 = vpop.f32.mrf.mxu1 }
 0xf5a   : > { %v10984_v14 = vadd.f32 %v10983_v46, %v10941_v10 }
 0xf73   : > { %v12769_v7 = vpop.f32.mrf.mxu1 }
 0xf75   : > { %v12770_v44 = vpop.f32.mrf.mxu1 }
 0xf76   : > { %v12771_v42 = vadd.f32 %v12770_v44, %v12769_v7 }
 0xf77   : > { %v12772_v3 = vpop.f32.mrf.mxu1 }
 0xf78   : > { %v11064_v2 = vadd.f32 %v12771_v42, %v9231_v38 }
 0xf79   : > { %v12773_v1 = vpop.f32.mrf.mxu1 }
 0xf7a   : > { %v12774_v11 = vadd.f32 %v12773_v1, %v12772_v3 }
 0xf7c   : > { %v11067_v58 = vadd.f32 %v12774_v11, %v9231_v38 }
 0xf92   : > { %v11020_v28 = vpop.f32.mrf.mxu0 }
 0xf93   : > { %v11021_v16 = vadd.f32 %v11020_v28, %v10978_v36  ;;  %v12813_v57 = vpop.f32.mrf.mxu1 }
 0xf94   : > { %v11022_v17 = vpop.f32.mrf.mxu0 }
 0xf95   : > { %v17899_v41 = vadd.f32 %v11021_v16, %v17076_v45  ;;  %v11023_v5 = vadd.f32 %v11022_v17, %v10980_v20  ;;  %v12814_v53 = vpop.f32.mrf.mxu1 }
 0xf96   : > { %v11024_v6 = vpop.f32.mrf.mxu0  ;;  %v12815_v49 = vadd.f32 %v12814_v53, %v12813_v57 }
 0xf97   : > { %11281 = vst [vmem:[#allocation2 + $0x28] sm:$0xff] %v17899_v41  ;;  %v17903_v23 = vadd.f32 %v11023_v5, %v17074_v22  ;;  %v11025_v26 = vadd.f32 %v11024_v6, %v10982_v25 }
 0xf98   : > { %v11026_v0 = vpop.f32.mrf.mxu0 }
 0xf99   : > { %11282 = vst [vmem:[#allocation2 + $0x10] sm:$0xff] %v17903_v23  ;;  %v17907_v19 = vadd.f32 %v11025_v26, %v17084_v29  ;;  %v11027_v13 = vadd.f32 %v11026_v0, %v10984_v14  ;;  %v12816_v29 = vpop.f32.mrf.mxu1 }
 0xf9b   : > { %11284 = vst [vmem:[#allocation2] sm:$0xff] %v17907_v19  ;;  %v17911_v45 = vadd.f32 %v11027_v13, %v17078_v48  ;;  %v12817_v9 = vpop.f32.mrf.mxu1 }
 0xf9c   : > { %v12818_v12 = vadd.f32 %v12817_v9, %v12816_v29 }
 0xf9d   : > { %11285 = vst [vmem:[#allocation2 + $0x18] sm:$0xff] %v17911_v45 }
 0xfb2   : > { %v12791_v22 = vpop.f32.mrf.mxu0 }
 0xfb4   : > { %v12792_v24 = vpop.f32.mrf.mxu0  ;;  %v12857_v50 = vpop.f32.mrf.mxu1 }
 0xfb5   : > { %v12793_v47 = vadd.f32 %v12792_v24, %v12791_v22 }
 0xfb6   : > { %v12794_v18 = vpop.f32.mrf.mxu0  ;;  %v12858_v35 = vpop.f32.mrf.mxu1 }
 0xfb7   : > { %v11105_v21 = vadd.f32 %v12793_v47, %v11064_v2  ;;  %v12859_v52 = vadd.f32 %v12858_v35, %v12857_v50 }
 0xfb8   : > { %v12795_v61 = vpop.f32.mrf.mxu0  ;;  %v12860_v30 = vpop.f32.mrf.mxu1 }
 0xfb9   : > { %v12796_v27 = vadd.f32 %v12795_v61, %v12794_v18  ;;  %v11146_v4 = vadd.f32 %v12815_v49, %v11105_v21 }
 0xfba   : > { %v12861_v55 = vpop.f32.mrf.mxu1 }
 0xfbb   : > { %v11108_v40 = vadd.f32 %v12796_v27, %v11067_v58  ;;  %v12862_v20 = vadd.f32 %v12861_v55, %v12860_v30 }
 0xfbd   : > { %v11149_v37 = vadd.f32 %v12818_v12, %v11108_v40 }
 0xfd2   : > { %v12835_v62 = vpop.f32.mrf.mxu0 }
 0xfd4   : > { %v12836_v48 = vpop.f32.mrf.mxu0 }
 0xfd5   : > { %v12837_v39 = vadd.f32 %v12836_v48, %v12835_v62 }
 0xfd6   : > { %v12838_v54 = vpop.f32.mrf.mxu0 }
 0xfd7   : > { %v11187_v56 = vadd.f32 %v12837_v39, %v11146_v4 }
 0xfd8   : > { %v12839_v8 = vpop.f32.mrf.mxu0 }
 0xfd9   : > { %v12840_v33 = vadd.f32 %v12839_v8, %v12838_v54  ;;  %v11228_v28 = vadd.f32 %v12859_v52, %v11187_v56 }
 0xfdb   : > { %v11190_v36 = vadd.f32 %v12840_v33, %v11149_v37 }
 0xfdd   : > { %v11231_v10 = vadd.f32 %v12862_v20, %v11190_v36 }
 0xff2   : > { %v12879_v51 = vpop.f32.mrf.mxu0 }
 0xff4   : > { %v12880_v15 = vpop.f32.mrf.mxu0 }
 0xff5   : > { %v12881_v63 = vadd.f32 %v12880_v15, %v12879_v51 }
 0xff6   : > { %v12882_v60 = vpop.f32.mrf.mxu0 }
 0xff7   : > { %v11269_v16 = vadd.f32 %v12881_v63, %v11228_v28 }
 0xff8   : > { %v12883_v46 = vpop.f32.mrf.mxu0 }
 0xff9   : > { %v11277_v17 = vadd.f32 %v11269_v16, %v17080_v43  ;;  %v12884_v25 = vadd.f32 %v12883_v46, %v12882_v60 }
 0xffb   : > { %11283 = vst [vmem:[#allocation2 + $0x8] sm:$0xff] %v11277_v17  ;;  %v11272_v5 = vadd.f32 %v12884_v25, %v11231_v10  ;;  %11290 = sbr.rel (%p12592_p1) target bundleno = 4416 (0x1140), region = 136 }
 0xffd   : > { %v11280_v6 = vadd.f32 %v11272_v5, %v17087_v59 }
 0xfff   : > { %11286 = vst [vmem:[#allocation2 + $0x20] sm:$0xff] %v11280_v6 }
0x1000   : > { %v11293_v14 = vadd.f32 %v17903_v23, %v17899_v41  ;;  %v11297_v26 = vadd.f32 %v17911_v45, %v17907_v19 }
0x1002   : > { %v11294_v0 = vadd.f32 %v11293_v14, %v11277_v17  ;;  %v11298_v13 = vadd.f32 %v11297_v26, %v11280_v6 }
0x1004   : > { %11295 = vadd.xlane.f32.xlu0 %v11294_v0 }
0x1008   : > { %11299 = vadd.xlane.f32.xlu0 %v11298_v13 }
0x108d   : > { %v11296_v43 = vpop.xlane.xlu0 %11295 }
0x108e   : > { %v11301_v7 = vmul.f32 0.0026041667, %v11296_v43 }
0x1090   : > { %v11303_v44 = vsub.f32 %v17899_v41, %v11301_v7  ;;  %v11304_v59 = vsub.f32 %v17903_v23, %v11301_v7  ;;  %v11305_v3 = vsub.f32 %v11277_v17, %v11301_v7 }
0x1091   : > { %v11300_v22 = vpop.xlane.xlu0 %11299 }
0x1092   : > { %v11302_v1 = vmul.f32 0.0026041667, %v11300_v22  ;;  %v11309_v24 = vmul.f32 %v11303_v44, %v11303_v44  ;;  %v11310_v57 = vmul.f32 %v11304_v59, %v11304_v59  ;;  %v11311_v18 = vmul.f32 %v11305_v3, %v11305_v3 }
0x1094   : > { %v11306_v53 = vsub.f32 %v17907_v19, %v11302_v1  ;;  %v11307_v61 = vsub.f32 %v17911_v45, %v11302_v1  ;;  %v11308_v29 = vsub.f32 %v11280_v6, %v11302_v1  ;;  %v11315_v62 = vadd.f32 %v11310_v57, %v11309_v24  ;;  %v11291_v19 = vld [vmem:[%s18049_s24] sm:$0x7] }
0x1095   : > { %v11292_v45 = vld [vmem:[%s18050_s4] sm:$0x7]  ;;  %v11339_v27 = vrot.slane %v11291_v19, %v15856_v34  ;;  %v11343_v35 = vrot.slane %v11291_v19, %v15848_v31  ;;  %v11347_v58 = vrot.slane %v11291_v19, %v15851_v32 }
0x1096   : > { %v11316_v38 = vadd.f32 %v11315_v62, %v11311_v18  ;;  %v11312_v42 = vmul.f32 %v11306_v53, %v11306_v53  ;;  %v11313_v9 = vmul.f32 %v11307_v61, %v11307_v61  ;;  %v11314_v48 = vmul.f32 %v11308_v29, %v11308_v29 }
0x1097   : > { %v11361_v39 = vrot.slane %v11292_v45, %v15856_v34  ;;  %v11365_v8 = vrot.slane %v11292_v45, %v15848_v31  ;;  %v11369_v12 = vrot.slane %v11292_v45, %v15851_v32 }
0x1098   : > { %11317 = vadd.xlane.f32.xlu1 %v11316_v38  ;;  %v11319_v41 = vadd.f32 %v11313_v9, %v11312_v42 }
0x109a   : > { %v11320_v47 = vadd.f32 %v11319_v41, %v11314_v48 }
0x109c   : > { %11321 = vadd.xlane.f32.xlu1 %v11320_v47 }
0x1121   : > { %v11318_v23 = vpop.xlane.xlu1 %11317 }
0x1122   : > { %v11323_v50 = vmul.f32 0.0026041667, %v11318_v23 }
0x1124   : > { %v11325_v2 = vadd.f32 1e-06, %v11323_v50 }
0x1125   : > { %v11322_v11 = vpop.xlane.xlu1 %11321 }
0x1126   : > { %14776 = vrsqrt.f32 %v11325_v2  ;;  %v11324_v54 = vmul.f32 0.0026041667, %v11322_v11 }
0x1128   : > { %v11326_v21 = vadd.f32 1e-06, %v11324_v54 }
0x112a   : > { %14778 = vrsqrt.f32 %v11326_v21 }
0x1133   : > { %v14777_v49 = vpop.eup %14776 }
0x1134   : > { %v11329_v40 = vmul.f32 %v14777_v49, %v11303_v44  ;;  %v11330_v4 = vmul.f32 %v14777_v49, %v11304_v59  ;;  %v11331_v30 = vmul.f32 %v14777_v49, %v11305_v3 }
0x1136   : > { %v11351_v56 = vmul.f32 %v11339_v27, %v11329_v40  ;;  %v11352_v33 = vmul.f32 %v11343_v35, %v11330_v4  ;;  %v11353_v51 = vmul.f32 %v11347_v58, %v11331_v30 }
0x1137   : > { %v14779_v52 = vpop.eup %14778 }
0x1138   : > { %v11373_v37 = vadd.f32 %v11361_v39, %v11351_v56  ;;  %v11374_v55 = vadd.f32 %v11365_v8, %v11352_v33  ;;  %v11375_v15 = vadd.f32 %v11369_v12, %v11353_v51  ;;  %v11332_v36 = vmul.f32 %v14779_v52, %v11306_v53 }
0x1139   : > { %v11333_v28 = vmul.f32 %v14779_v52, %v11307_v61  ;;  %v11334_v63 = vmul.f32 %v14779_v52, %v11308_v29 }
0x113a   : > { %11379 = vst [vmem:[%s18051_s20] sm:$0xff] %v11373_v37  ;;  %v11354_v31 = vmul.f32 %v11339_v27, %v11332_v36 }
0x113b   : > { %11380 = vst [vmem:[%s18052_s2 + $0x8] sm:$0xff] %v11374_v55  ;;  %11381 = vst [vmem:[%s18052_s2 + $0x10] sm:$0xff] %v11375_v15  ;;  %v11355_v32 = vmul.f32 %v11343_v35, %v11333_v28  ;;  %v11356_v34 = vmul.f32 %v11347_v58, %v11334_v63 }
0x113c   : > { %v11376_v60 = vadd.f32 %v11361_v39, %v11354_v31 }
0x113d   : > { %v11377_v20 = vadd.f32 %v11365_v8, %v11355_v32  ;;  %v11378_v16 = vadd.f32 %v11369_v12, %v11356_v34 }
0x113e   : > { %11382 = vst [vmem:[%s18052_s2 + $0x18] sm:$0xff] %v11376_v60 }
0x113f   : > { %11383 = vst [vmem:[%s18052_s2 + $0x20] sm:$0xff] %v11377_v20  ;;  %11384 = vst [vmem:[%s18052_s2 + $0x28] sm:$0xff] %v11378_v16 }
0x1140 PF: > { %s18053_s21 = sld [smem:[#allocation32_spill]] }
0x1141   : > { %s18054_s18 = sld [smem:[#allocation29_spill]] }
0x1142   : > { %s18055_s19 = sld [smem:[#allocation30_spill]] }
0x1143   : > { %s18056_s20 = sld [smem:[#allocation33_spill]] }
0x1146   : > { %p43_p7 = scmp.ge.s32.totalorder %s18053_s21, 14  }
0x1148   :  { %45 = sbr.rel (!%p43_p7) target bundleno = 24 (0x18), region = 257 }
0x114d   :  { %11396 = vsyncpa [#allocation4], 1 }
0x114e   :  { %11398 = vsyncpa [#allocation4 + $0x1], 1 }
0x114f   :  { %11399 = vsyncpa [#allocation6], 1 }
0x1150   :  { %11401 = vsyncpa [#allocation6 + $0x1], 1 }
0x1151   :  { %11402 = vsyncpa [#allocation9], 1 }
0x1152   :  { %11404 = vsyncpa [#allocation9 + $0x1], 1 }
0x1153   :  { %11405 = vsyncpa [#allocation12], 1 }
0x1154   :  { %11407 = vsyncpa [#allocation12 + $0x1], 1 }
0x1155   :  { %11408 = vsyncpa [#allocation15], 1 }
0x1156   :  { %11410 = vsyncpa [#allocation15 + $0x1], 1 }
0x1157   :  { %11411 = vsyncpa [#allocation18], 1 }
0x1158   :  { %11413 = vsyncpa [#allocation18 + $0x1], 1 }
0x1159   :  { %11414 = vsyncpa [#allocation21], 1 }
0x115a   :  { %11416 = vsyncpa [#allocation21 + $0x1], 1 }

</bundles_post_ra>
